<compile_context>
chip_gen: v5e
topology: v5e:2x2
jax: 0.10.0
libtpu: 0.0.40
codegen_flags: <defaults>
</compile_context>

<pallas_src>
import numpy as np
import jax
import jax.numpy as jnp
from jax.experimental import pallas as pl
from jax.experimental.pallas import tpu as pltpu

_EPS = 1e-5
# 32 MiB scoped VMEM: safe on v5e/v6e (128 MiB phys) and v7x (64 MiB phys);
# per-tile usage at TM=2048 stays well below this.
_VMEM_LIMIT = 32 * 1024 * 1024
_ROW_TILE_TARGET = 2048
_GEMM_DTYPE = jnp.bfloat16          # MXU-native operands; accumulation stays f32


def _compiler_params():
    return pltpu.CompilerParams(
        dimension_semantics=("parallel",),
        vmem_limit_bytes=_VMEM_LIMIT,
    )


def _pick_row_tile(M, target=_ROW_TILE_TARGET):
    """Largest multiple-of-8 divisor of M <= target, keeping the grid >= 2 when
    possible (v7x shards the 'parallel' axis across its 2 TensorCores)."""
    cands = [t for t in range(8, M + 1, 8) if M % t == 0]
    if not cands:
        return M
    capped = [t for t in cands if t <= target and 2 * t <= M]
    if capped:
        return max(capped)
    within = [t for t in cands if t <= target]
    return max(within) if within else min(cands)


def _gate(pre):
    """pixelcnn_gate on a (rows, 2h) pre-activation: tanh(a)*sigmoid(b).
    sigmoid(b) == 0.5*tanh(0.5*b)+0.5 -> one EUP tanh instead of exp+recip."""
    half = pre.shape[1] // 2
    return jnp.tanh(pre[:, :half]) * (0.5 * jnp.tanh(0.5 * pre[:, half:]) + 0.5)


# ----------------------------------------------------------------------------
# Pallas kernels
# ----------------------------------------------------------------------------
def _input_conv_kernel(t_ref, w_ref, b_ref, o_ref):
    # Gated 7x7 'a' conv: one GEMM (bf16 operands, f32 acc), split for the gate.
    acc = jnp.dot(t_ref[...], w_ref[...],
                  preferred_element_type=jnp.float32) + b_ref[...]
    o_ref[...] = _gate(acc)


def _res_layer_kernel(taps_ref, xh_ref,
                      sr_ref, fr_ref,
                      wvh_ref, bvh_ref, wv2h_ref, bv2h_ref, wh2h_ref, bh2h_ref,
                      ov_ref, oh_ref, sv_ref, qv_ref, sh_ref, qh_ref):
    # Fused GatedResidualLayer.  taps = [v-taps | h-taps] (mean-centred in the
    # wrapper), weight = blockdiag(Wv, Wh) with the previous BatchNorm istd
    # folded into the weight rows, so one lane-filling GEMM feeds both paths
    # and zero-padded border taps stay exactly zero (reference semantics).
    acc = jnp.dot(taps_ref[...], wvh_ref[...],
                  preferred_element_type=jnp.float32) + bvh_ref[...]
    two_h = acc.shape[1] // 2
    acc_v = acc[:, :two_h]                       # raw v(x_v), 2h channels
    # x_v2h = v2h(raw v output)  (1x1 conv).
    x_v2h = jnp.dot(acc_v.astype(_GEMM_DTYPE), wv2h_ref[...],
                    preferred_element_type=jnp.float32) + bv2h_ref[...]
    x_v_g = _gate(acc_v)                         # gated v output, h channels
    acc_h = acc[:, two_h:] + x_v2h               # h(x_h) + v2h(...)
    x_h_g = _gate(acc_h)
    # Residual add uses the *normalized* previous x_h (scale/shift folded here).
    xr = xh_ref[...] * sr_ref[...] + fr_ref[...]
    x_h_out = jnp.dot(x_h_g.astype(_GEMM_DTYPE), wh2h_ref[...],
                      preferred_element_type=jnp.float32) + bh2h_ref[...] + xr

    ov_ref[...] = x_v_g                          # pre-BatchNorm x_v
    oh_ref[...] = x_h_out                        # pre-BatchNorm x_h
    # TODO(synk): repack these (TM, n_ch) stores into lane-dense (TM/g, 128)
    # slabs once the minor-dim in-kernel reshape is validated on all targets.

    # Fused per-tile BatchNorm partial statistics (sum, sum of squares).  Each
    # (8, C) block holds 8 identical rows (layout-legal store); the wrapper
    # divides the factor of 8 back out.  Keeps the row axis 'parallel'.
    sv_ref[...] = jnp.broadcast_to(
        jnp.sum(x_v_g, axis=0, keepdims=True), sv_ref.shape)
    qv_ref[...] = jnp.broadcast_to(
        jnp.sum(x_v_g * x_v_g, axis=0, keepdims=True), qv_ref.shape)
    sh_ref[...] = jnp.broadcast_to(
        jnp.sum(x_h_out, axis=0, keepdims=True), sh_ref.shape)
    qh_ref[...] = jnp.broadcast_to(
        jnp.sum(x_h_out * x_h_out, axis=0, keepdims=True), qh_ref.shape)


def _head_kernel(x_ref, w1_ref, b1_ref, w2_ref, b2_ref, wo_ref, bo_ref, o_ref):
    # out1 -> gate -> out2 -> gate -> output.  The BatchNorm of the last x_h is
    # folded exactly into (w1, b1) in the wrapper (1x1 conv, no padding).
    x = x_ref[...].astype(_GEMM_DTYPE)
    a1 = jnp.dot(x, w1_ref[...], preferred_element_type=jnp.float32) + b1_ref[...]
    g1 = _gate(a1)
    a2 = jnp.dot(g1.astype(_GEMM_DTYPE), w2_ref[...],
                 preferred_element_type=jnp.float32) + b2_ref[...]
    g2 = _gate(a2)
    o_ref[...] = jnp.dot(g2.astype(_GEMM_DTYPE), wo_ref[...],
                         preferred_element_type=jnp.float32) + bo_ref[...]


# ----------------------------------------------------------------------------
# Pallas call wrapper
# ----------------------------------------------------------------------------
def _row_tiled_call(kernel, row_inputs, full_inputs, out_widths,
                    n_stat_outputs=0, stat_width=0):
    """Grid over row tiles of M.  row_inputs are tiled (TM, K); full_inputs are
    VMEM-resident; outputs are (M, w) f32 plus optional per-tile partial-stat
    slabs of shape (ntiles*8, stat_width)."""
    M = row_inputs[0].shape[0]
    TM = _pick_row_tile(M)
    ntiles = M // TM

    out_shapes = [jax.ShapeDtypeStruct((M, w), jnp.float32) for w in out_widths]
    out_specs = [pl.BlockSpec((TM, w), lambda i: (i, 0)) for w in out_widths]
    for _ in range(n_stat_outputs):
        out_shapes.append(jax.ShapeDtypeStruct((ntiles * 8, stat_width), jnp.float32))
        out_specs.append(pl.BlockSpec((8, stat_width), lambda i: (i, 0)))

    in_specs = ([pl.BlockSpec((TM, a.shape[1]), lambda i: (i, 0)) for a in row_inputs]
                + [pl.BlockSpec(a.shape, lambda i: (0, 0)) for a in full_inputs])

    return pl.pallas_call(
        kernel,
        out_shape=tuple(out_shapes),
        grid=(ntiles,),
        in_specs=in_specs,
        out_specs=tuple(out_specs),
        compiler_params=_compiler_params(),
    )(*row_inputs, *full_inputs)


# ----------------------------------------------------------------------------
# Mask / parameter construction (deterministic, glue)
# ----------------------------------------------------------------------------
def _build_mask(out_ch, in_ch, kh, kw, mask_type, mask_n_channels, gated):
    cr, cc = kh // 2, kw // 2
    mask = np.ones((out_ch, in_ch, kh, kw), np.float32)
    if cr == 0:
        mask[:, :, :, cc + 1:] = 0
    elif cc == 0:
        mask[:, :, cr + 1:, :] = 0
    else:
        mask[:, :, cr + 1:, :] = 0
        mask[:, :, cr, cc + 1:] = 0
    for i in range(mask_n_channels):
        for j in range(mask_n_channels):
            if (mask_type == 'a' and i >= j) or (mask_type == 'b' and i > j):
                mask[j::mask_n_channels, i::mask_n_channels, cr, cc] = 0
    if mask_type == 'vstack':
        mask[:, :, cr, :] = 0
    if gated:
        half = mask[:out_ch // 2]
        mask = np.concatenate([half, half], axis=0)
    return mask


def _masked_conv_weights(key, in_ch, out_ch, kh, kw, mask_type, mask_n_ch, gated):
    """Pre-masked conv weights packed as a (n_taps*in_ch, out_ch) GEMM matrix,
    keeping only taps that survive the causal mask.  Returns (wk, bias, taps)."""
    w = 0.05 * jax.random.normal(key, (out_ch, in_ch, kh, kw), jnp.float32)
    mask_np = _build_mask(out_ch, in_ch, kh, kw, mask_type, mask_n_ch, gated)
    w = w * jnp.asarray(mask_np)
    taps = tuple((di, dj) for di in range(kh) for dj in range(kw)
                 if mask_np[:, :, di, dj].any())
    wt = jnp.transpose(w, (2, 3, 1, 0))                              # (kh,kw,Cin,Cout)
    wk = jnp.concatenate([wt[di, dj] for (di, dj) in taps], axis=0)  # (n_taps*Cin,Cout)
    b = jnp.zeros((1, out_ch), jnp.float32)
    return wk, b, taps


def _ceil8(n):
    return -(-n // 8) * 8


def _pad_rows(w, rows):
    if w.shape[0] == rows:
        return w
    return jnp.concatenate(
        [w, jnp.zeros((rows - w.shape[0], w.shape[1]), w.dtype)], axis=0)


def init_pixelcnn(key, image_dims, n_bits, n_channels, n_out_conv_channels,
                  kernel_size, n_res_layers):
    C, _, _ = image_dims
    keys = iter(jax.random.split(key, 4 + 4 * n_res_layers))
    k2 = kernel_size // 2
    params, meta = {}, {"n_channels": n_channels}

    # Input conv: 7x7, mask 'a', gated.
    wk, b, taps = _masked_conv_weights(next(keys), C, 2 * n_channels, 7, 7, 'a', C, True)
    kp = _ceil8(wk.shape[0])
    params["input"] = {"wk": _pad_rows(wk, kp).astype(_GEMM_DTYPE), "b": b}
    meta["input"] = {"taps": taps, "pad": (3, 3), "Kp": kp}

    params["res"], meta["res"] = [], []
    two_h = 2 * n_channels
    for _ in range(n_res_layers):
        wv, bv, taps_v = _masked_conv_weights(
            next(keys), n_channels, two_h, kernel_size, kernel_size, 'vstack', C, True)
        wh, bh, taps_h = _masked_conv_weights(
            next(keys), n_channels, two_h, 1, kernel_size, 'b', C, True)
        wv2h, bv2h, _ = _masked_conv_weights(next(keys), two_h, two_h, 1, 1, 'b', C, True)
        wh2h, bh2h, _ = _masked_conv_weights(next(keys), n_channels, n_channels,
                                             1, 1, 'b', C, False)
        kv, kh_ = wv.shape[0], wh.shape[0]
        kp = _ceil8(kv + kh_)
        # Block-diagonal [Wv 0; 0 Wh]: one lane-filling (Kv+Kh, 4*n_ch) GEMM
        # replaces two half-lane-width gated-conv GEMMs.
        # TODO(synk): for n_channels >= 64 (2h >= 128) two separate GEMMs would
        # avoid the wasted zero-block flops; unnecessary at these widths.
        w_vh = jnp.zeros((kp, 2 * two_h), jnp.float32)
        w_vh = w_vh.at[:kv, :two_h].set(wv).at[kv:kv + kh_, two_h:].set(wh)
        b_vh = jnp.concatenate([bv, bh], axis=1)
        params["res"].append({
            "w_vh": w_vh, "b_vh": b_vh,
            "w_v2h": wv2h.astype(_GEMM_DTYPE), "b_v2h": bv2h,
            "w_h2h": wh2h.astype(_GEMM_DTYPE), "b_h2h": bh2h})
        meta["res"].append({
            "v": {"taps": taps_v, "pad": (k2, k2)},
            "h": {"taps": taps_h, "pad": (0, k2)},
            "Kv": kv, "Kh": kh_, "Kp": kp})

    n_out2 = 2 * n_out_conv_channels
    w1, b1, _ = _masked_conv_weights(next(keys), n_channels, n_out2, 1, 1, 'b', C, True)
    w2, b2, _ = _masked_conv_weights(next(keys), n_out_conv_channels, n_out2,
                                     1, 1, 'b', C, True)
    n_logits = C * 2 ** n_bits
    wo, bo, _ = _masked_conv_weights(next(keys), n_out_conv_channels, n_logits,
                                     1, 1, 'b', C, False)
    params["out1"] = {"wk": w1, "b": b1}                      # f32: BN folded at forward
    params["out2"] = {"wk": w2.astype(_GEMM_DTYPE), "b": b2}
    params["output"] = {"wk": wo.astype(_GEMM_DTYPE), "b": bo}
    meta["n_logits"] = n_logits
    return params, meta


# ----------------------------------------------------------------------------
# Glue: pruned im2col (mean-centred) and BatchNorm finalization
# ----------------------------------------------------------------------------
def _im2col_cols(x_2d, mean_c, B, H, W, conv_meta):
    """Pruned im2col of the *mean-centred* activation.  Centring before the
    zero-pad makes padded taps exactly 0 after the istd scale (folded into the
    weights), matching the reference's zero-padding of the normalized input."""
    M, Cin = x_2d.shape
    ph, pw = conv_meta["pad"]
    x = (x_2d - mean_c[None, :]).reshape(B, H, W, Cin)
    xp = jnp.pad(x, ((0, 0), (ph, ph), (pw, pw), (0, 0)))
    return [xp[:, di:di + H, dj:dj + W, :].reshape(M, Cin)
            for (di, dj) in conv_meta["taps"]]
    # TODO(synk): tap extraction is still materialized in HBM by XLA; a fully
    # in-kernel version needs halo DMAs (manual make_async_copy) and is left
    # out for robustness.


def _pack_taps(cols, k_pad):
    M = cols[0].shape[0]
    t = jnp.concatenate(cols, axis=1)
    if t.shape[1] < k_pad:
        t = jnp.concatenate(
            [t, jnp.zeros((M, k_pad - t.shape[1]), jnp.float32)], axis=1)
    return t.astype(_GEMM_DTYPE)


def _bn_from_stats(s_arr, q_arr, M):
    s = jnp.sum(s_arr, axis=0) / 8.0         # 8 identical rows per tile block
    q = jnp.sum(q_arr, axis=0) / 8.0
    mean = s / M
    # Biased variance via sum-of-squares (BatchNorm's normalization statistic);
    # adequate in f32 for post-gate activations.
    var = jnp.maximum(q / M - mean * mean, 0.0)
    return mean, jax.lax.rsqrt(var + _EPS)


# ----------------------------------------------------------------------------
# Full forward (h=None path: conditional projections are 0.0 as in the module)
# ----------------------------------------------------------------------------
def pixelcnn_forward(params, meta, x_nchw):
    B, C, H, W = x_nchw.shape
    M = B * H * W
    n_ch = meta["n_channels"]
    x2d = jnp.transpose(x_nchw, (0, 2, 3, 1)).astype(jnp.float32).reshape(M, C)

    # ---- x = gate(input_conv(x) + 0.0) ----
    m_in = meta["input"]
    taps = _pack_taps(
        _im2col_cols(x2d, jnp.zeros((C,), jnp.float32), B, H, W, m_in), m_in["Kp"])
    g0 = _row_tiled_call(_input_conv_kernel, [taps],
                         [params["input"]["wk"], params["input"]["b"]],
                         (n_ch,))[0]

    zero = jnp.zeros((n_ch,), jnp.float32)
    one = jnp.ones((n_ch,), jnp.float32)
    # Raw (pre-BatchNorm) activations + the (mean, istd) the consumer folds in.
    xv_raw, xv_mean, xv_istd = g0, zero, one
    xh_raw, xh_mean, xh_istd = g0, zero, one

    for lp, lm in zip(params["res"], meta["res"]):
        # Mean-centred pruned im2col; the istd scale is folded into the weights.
        cols = (_im2col_cols(xv_raw, xv_mean, B, H, W, lm["v"])
                + _im2col_cols(xh_raw, xh_mean, B, H, W, lm["h"]))
        taps = _pack_taps(cols, lm["Kp"])

        scale = jnp.concatenate([
            jnp.tile(xv_istd, len(lm["v"]["taps"])),
            jnp.tile(xh_istd, len(lm["h"]["taps"])),
            jnp.zeros((lm["Kp"] - lm["Kv"] - lm["Kh"],), jnp.float32)])
        w_vh = (lp["w_vh"] * scale[:, None]).astype(_GEMM_DTYPE)

        sr = xh_istd.reshape(1, n_ch)
        fr = (-xh_mean * xh_istd).reshape(1, n_ch)

        xv_new, xh_new, sv, qv, sh, qh = _row_tiled_call(
            _res_layer_kernel,
            [taps, xh_raw],
            [sr, fr, w_vh, lp["b_vh"], lp["w_v2h"], lp["b_v2h"],
             lp["w_h2h"], lp["b_h2h"]],
            (n_ch, n_ch), n_stat_outputs=4, stat_width=n_ch)

        xv_mean, xv_istd = _bn_from_stats(sv, qv, M)
        xh_mean, xh_istd = _bn_from_stats(sh, qh, M)
        xv_raw, xh_raw = xv_new, xh_new
    # TODO(synk): nn.BatchNorm2d running_mean/running_var in-place updates
    # (training-mode side effect) are not reproduced; forward output unaffected.

    # ---- output head: out1 -> gate -> out2 -> gate -> output ----
    p1, p2, po = params["out1"], params["out2"], params["output"]
    w1 = (p1["wk"] * xh_istd[:, None]).astype(_GEMM_DTYPE)
    b1 = p1["b"] + jnp.dot((-xh_mean * xh_istd)[None, :], p1["wk"])
    n_logits = meta["n_logits"]
    logits = _row_tiled_call(
        _head_kernel, [xh_raw],
        [w1, b1, p2["wk"], p2["b"], po["wk"], po["b"]],
        (n_logits,))[0]

    out = logits.reshape(B, H, W, n_logits)
    out = jnp.transpose(out, (0, 3, 1, 2))          # (B, C*2^n_bits, H, W)
    return out.reshape(B, -1, C, H, W)              # (B, 2^n_bits, C, H, W)


# ----------------------------------------------------------------------------
if __name__ == "__main__":
    key = jax.random.PRNGKey(0)
    pkey, xkey = jax.random.split(key)

    # Small config: image_dims=(3,16,16), n_bits=2, n_channels=32,
    # n_out_conv_channels=32, kernel_size=3, n_res_layers=2, n_cond_classes=0
    C, H, W = 3, 16, 16
    n_bits, n_channels, n_out_conv, kernel_size, n_res = 2, 32, 32, 3, 2

    params, meta = init_pixelcnn(pkey, (C, H, W), n_bits, n_channels,
                                 n_out_conv, kernel_size, n_res)
    x = jax.random.normal(xkey, (2, C, H, W), jnp.float32)

    fwd = jax.jit(lambda p, xx: pixelcnn_forward(p, meta, xx))
    out = fwd(params, x)
    jax.block_until_ready(out)

    assert out.shape == (2, 2 ** n_bits, C, H, W), out.shape
    assert out.dtype == jnp.float32
    print("KERNEL_OK")
</pallas_src>

<mosaic_0001>
module attributes {stable_mosaic.version = 11 : i64} {
  func.func @_input_conv_kernel(%arg0: i32, %arg1: memref<256x80xbf16, #tpu.memory_space<vmem>>, %arg2: memref<80x64xbf16, #tpu.memory_space<vmem>>, %arg3: memref<1x64xf32, #tpu.memory_space<vmem>>, %arg4: memref<256x32xf32, #tpu.memory_space<vmem>>) attributes {dimension_semantics = [#tpu.dimension_semantics<parallel>], iteration_bounds = array<i64: 2>, scalar_prefetch = 0 : i64, scratch_operands = 0 : i64, tpu.core_type = #tpu.core_type<tc>, window_params = [{transform_indices = @transform_0, window_bounds = array<i64: 256, 80>}, {pipeline_mode = #tpu.pipeline_mode<synchronous>, transform_indices = @transform_1, window_bounds = array<i64: 80, 64>}, {pipeline_mode = #tpu.pipeline_mode<synchronous>, transform_indices = @transform_2, window_bounds = array<i64: 1, 64>}, {transform_indices = @transform_3, window_bounds = array<i64: 256, 32>}]} {
    %c0 = arith.constant 0 : index
    %c0_0 = arith.constant 0 : index
    %0 = vector.load %arg1[%c0, %c0_0] : memref<256x80xbf16, #tpu.memory_space<vmem>>, vector<256x80xbf16>
    %c0_1 = arith.constant 0 : index
    %c0_2 = arith.constant 0 : index
    %1 = vector.load %arg2[%c0_1, %c0_2] : memref<80x64xbf16, #tpu.memory_space<vmem>>, vector<80x64xbf16>
    %cst = arith.constant dense<0.000000e+00> : vector<256x64xf32>
    %2 = tpu.matmul %0, %1, %cst {dimension_numbers = #tpu.dot_dimension_numbers<[1], [0], [0], [1], [0, 0, 1, 1], [], []>} : vector<256x80xbf16>, vector<80x64xbf16>, vector<256x64xf32> -> vector<256x64xf32>
    %c0_3 = arith.constant 0 : index
    %c0_4 = arith.constant 0 : index
    %3 = vector.load %arg3[%c0_3, %c0_4] : memref<1x64xf32, #tpu.memory_space<vmem>>, vector<1x64xf32>
    %4 = vector.broadcast %3 : vector<1x64xf32> to vector<256x64xf32>
    %5 = arith.addf %2, %4 : vector<256x64xf32>
    %6 = vector.extract_strided_slice %5 {offsets = [0, 0], sizes = [256, 32], strides = [1, 1]} : vector<256x64xf32> to vector<256x32xf32>
    %7 = math.tanh %6 : vector<256x32xf32>
    %8 = vector.extract_strided_slice %5 {offsets = [0, 32], sizes = [256, 32], strides = [1, 1]} : vector<256x64xf32> to vector<256x32xf32>
    %cst_5 = arith.constant 5.000000e-01 : f32
    %9 = vector.broadcast %cst_5 : f32 to vector<256x32xf32>
    %10 = arith.mulf %9, %8 : vector<256x32xf32>
    %11 = math.tanh %10 : vector<256x32xf32>
    %cst_6 = arith.constant 5.000000e-01 : f32
    %12 = vector.broadcast %cst_6 : f32 to vector<256x32xf32>
    %13 = arith.mulf %12, %11 : vector<256x32xf32>
    %cst_7 = arith.constant 5.000000e-01 : f32
    %14 = vector.broadcast %cst_7 : f32 to vector<256x32xf32>
    %15 = arith.addf %13, %14 : vector<256x32xf32>
    %16 = arith.mulf %7, %15 : vector<256x32xf32>
    %c0_8 = arith.constant 0 : index
    %c0_9 = arith.constant 0 : index
    %17 = vector.load %arg4[%c0_8, %c0_9] : memref<256x32xf32, #tpu.memory_space<vmem>>, vector<256x32xf32>
    tpu.vector_store %arg4[%c0_8, %c0_9], %16 {strides = array<i32>} : memref<256x32xf32, #tpu.memory_space<vmem>>, vector<256x32xf32>,
    return
  }
  func.func @transform_0(%arg0: i32) -> (i32, i32) {
    %c0_i32 = arith.constant 0 : i32
    %c0_i32_0 = arith.constant 0 : i32
    return %arg0, %c0_i32 : i32, i32
  }
  func.func @transform_1(%arg0: i32) -> (i32, i32) {
    %c0_i32 = arith.constant 0 : i32
    %c0_i32_0 = arith.constant 0 : i32
    %c0_i32_1 = arith.constant 0 : i32
    return %c0_i32, %c0_i32_0 : i32, i32
  }
  func.func @transform_2(%arg0: i32) -> (i32, i32) {
    %c0_i32 = arith.constant 0 : i32
    %c0_i32_0 = arith.constant 0 : i32
    %c0_i32_1 = arith.constant 0 : i32
    return %c0_i32, %c0_i32_0 : i32, i32
  }
  func.func @transform_3(%arg0: i32) -> (i32, i32) {
    %c0_i32 = arith.constant 0 : i32
    %c0_i32_0 = arith.constant 0 : i32
    return %arg0, %c0_i32 : i32, i32
  }
}

module attributes {stable_mosaic.version = 11 : i64} {
  func.func @_res_layer_kernel(%arg0: i32, %arg1: memref<256x160xbf16, #tpu.memory_space<vmem>>, %arg2: memref<256x32xf32, #tpu.memory_space<vmem>>, %arg3: memref<1x32xf32, #tpu.memory_space<vmem>>, %arg4: memref<1x32xf32, #tpu.memory_space<vmem>>, %arg5: memref<160x128xbf16, #tpu.memory_space<vmem>>, %arg6: memref<1x128xf32, #tpu.memory_space<vmem>>, %arg7: memref<64x64xbf16, #tpu.memory_space<vmem>>, %arg8: memref<1x64xf32, #tpu.memory_space<vmem>>, %arg9: memref<32x32xbf16, #tpu.memory_space<vmem>>, %arg10: memref<1x32xf32, #tpu.memory_space<vmem>>, %arg11: memref<256x32xf32, #tpu.memory_space<vmem>>, %arg12: memref<256x32xf32, #tpu.memory_space<vmem>>, %arg13: memref<8x32xf32, #tpu.memory_space<vmem>>, %arg14: memref<8x32xf32, #tpu.memory_space<vmem>>, %arg15: memref<8x32xf32, #tpu.memory_space<vmem>>, %arg16: memref<8x32xf32, #tpu.memory_space<vmem>>) attributes {dimension_semantics = [#tpu.dimension_semantics<parallel>], iteration_bounds = array<i64: 2>, scalar_prefetch = 0 : i64, scratch_operands = 0 : i64, tpu.core_type = #tpu.core_type<tc>, window_params = [{transform_indices = @transform_0, window_bounds = array<i64: 256, 160>}, {transform_indices = @transform_1, window_bounds = array<i64: 256, 32>}, {pipeline_mode = #tpu.pipeline_mode<synchronous>, transform_indices = @transform_2, window_bounds = array<i64: 1, 32>}, {pipeline_mode = #tpu.pipeline_mode<synchronous>, transform_indices = @transform_3, window_bounds = array<i64: 1, 32>}, {pipeline_mode = #tpu.pipeline_mode<synchronous>, transform_indices = @transform_4, window_bounds = array<i64: 160, 128>}, {pipeline_mode = #tpu.pipeline_mode<synchronous>, transform_indices = @transform_5, window_bounds = array<i64: 1, 128>}, {pipeline_mode = #tpu.pipeline_mode<synchronous>, transform_indices = @transform_6, window_bounds = array<i64: 64, 64>}, {pipeline_mode = #tpu.pipeline_mode<synchronous>, transform_indices = @transform_7, window_bounds = array<i64: 1, 64>}, {pipeline_mode = #tpu.pipeline_mode<synchronous>, transform_indices = @transform_8, window_bounds = array<i64: 32, 32>}, {pipeline_mode = #tpu.pipeline_mode<synchronous>, transform_indices = @transform_9, window_bounds = array<i64: 1, 32>}, {transform_indices = @transform_10, window_bounds = array<i64: 256, 32>}, {transform_indices = @transform_11, window_bounds = array<i64: 256, 32>}, {transform_indices = @transform_12, window_bounds = array<i64: 8, 32>}, {transform_indices = @transform_13, window_bounds = array<i64: 8, 32>}, {transform_indices = @transform_14, window_bounds = array<i64: 8, 32>}, {transform_indices = @transform_15, window_bounds = array<i64: 8, 32>}]} {
    %c0 = arith.constant 0 : index
    %c0_0 = arith.constant 0 : index
    %0 = vector.load %arg1[%c0, %c0_0] : memref<256x160xbf16, #tpu.memory_space<vmem>>, vector<256x160xbf16>
    %c0_1 = arith.constant 0 : index
    %c0_2 = arith.constant 0 : index
    %1 = vector.load %arg5[%c0_1, %c0_2] : memref<160x128xbf16, #tpu.memory_space<vmem>>, vector<160x128xbf16>
    %cst = arith.constant dense<0.000000e+00> : vector<256x128xf32>
    %2 = tpu.matmul %0, %1, %cst {dimension_numbers = #tpu.dot_dimension_numbers<[1], [0], [0], [1], [0, 0, 1, 1], [], []>} : vector<256x160xbf16>, vector<160x128xbf16>, vector<256x128xf32> -> vector<256x128xf32>
    %c0_3 = arith.constant 0 : index
    %c0_4 = arith.constant 0 : index
    %3 = vector.load %arg6[%c0_3, %c0_4] : memref<1x128xf32, #tpu.memory_space<vmem>>, vector<1x128xf32>
    %4 = vector.broadcast %3 : vector<1x128xf32> to vector<256x128xf32>
    %5 = arith.addf %2, %4 : vector<256x128xf32>
    %6 = vector.extract_strided_slice %5 {offsets = [0, 0], sizes = [256, 64], strides = [1, 1]} : vector<256x128xf32> to vector<256x64xf32>
    %7 = arith.truncf %6 : vector<256x64xf32> to vector<256x64xbf16>
    %c0_5 = arith.constant 0 : index
    %c0_6 = arith.constant 0 : index
    %8 = vector.load %arg7[%c0_5, %c0_6] : memref<64x64xbf16, #tpu.memory_space<vmem>>, vector<64x64xbf16>
    %cst_7 = arith.constant dense<0.000000e+00> : vector<256x64xf32>
    %9 = tpu.matmul %7, %8, %cst_7 {dimension_numbers = #tpu.dot_dimension_numbers<[1], [0], [0], [1], [0, 0, 1, 1], [], []>} : vector<256x64xbf16>, vector<64x64xbf16>, vector<256x64xf32> -> vector<256x64xf32>
    %c0_8 = arith.constant 0 : index
    %c0_9 = arith.constant 0 : index
    %10 = vector.load %arg8[%c0_8, %c0_9] : memref<1x64xf32, #tpu.memory_space<vmem>>, vector<1x64xf32>
    %11 = vector.broadcast %10 : vector<1x64xf32> to vector<256x64xf32>
    %12 = arith.addf %9, %11 : vector<256x64xf32>
    %13 = vector.extract_strided_slice %6 {offsets = [0, 0], sizes = [256, 32], strides = [1, 1]} : vector<256x64xf32> to vector<256x32xf32>
    %14 = math.tanh %13 : vector<256x32xf32>
    %15 = vector.extract_strided_slice %6 {offsets = [0, 32], sizes = [256, 32], strides = [1, 1]} : vector<256x64xf32> to vector<256x32xf32>
    %cst_10 = arith.constant 5.000000e-01 : f32
    %16 = vector.broadcast %cst_10 : f32 to vector<256x32xf32>
    %17 = arith.mulf %16, %15 : vector<256x32xf32>
    %18 = math.tanh %17 : vector<256x32xf32>
    %cst_11 = arith.constant 5.000000e-01 : f32
    %19 = vector.broadcast %cst_11 : f32 to vector<256x32xf32>
    %20 = arith.mulf %19, %18 : vector<256x32xf32>
    %cst_12 = arith.constant 5.000000e-01 : f32
    %21 = vector.broadcast %cst_12 : f32 to vector<256x32xf32>
    %22 = arith.addf %20, %21 : vector<256x32xf32>
    %23 = arith.mulf %14, %22 : vector<256x32xf32>
    %24 = vector.extract_strided_slice %5 {offsets = [0, 64], sizes = [256, 64], strides = [1, 1]} : vector<256x128xf32> to vector<256x64xf32>
    %25 = arith.addf %24, %12 : vector<256x64xf32>
    %26 = vector.extract_strided_slice %25 {offsets = [0, 0], sizes = [256, 32], strides = [1, 1]} : vector<256x64xf32> to vector<256x32xf32>
    %27 = math.tanh %26 : vector<256x32xf32>
    %28 = vector.extract_strided_slice %25 {offsets = [0, 32], sizes = [256, 32], strides = [1, 1]} : vector<256x64xf32> to vector<256x32xf32>
    %cst_13 = arith.constant 5.000000e-01 : f32
    %29 = vector.broadcast %cst_13 : f32 to vector<256x32xf32>
    %30 = arith.mulf %29, %28 : vector<256x32xf32>
    %31 = math.tanh %30 : vector<256x32xf32>
    %cst_14 = arith.constant 5.000000e-01 : f32
    %32 = vector.broadcast %cst_14 : f32 to vector<256x32xf32>
    %33 = arith.mulf %32, %31 : vector<256x32xf32>
    %cst_15 = arith.constant 5.000000e-01 : f32
    %34 = vector.broadcast %cst_15 : f32 to vector<256x32xf32>
    %35 = arith.addf %33, %34 : vector<256x32xf32>
    %36 = arith.mulf %27, %35 : vector<256x32xf32>
    %c0_16 = arith.constant 0 : index
    %c0_17 = arith.constant 0 : index
    %37 = vector.load %arg2[%c0_16, %c0_17] : memref<256x32xf32, #tpu.memory_space<vmem>>, vector<256x32xf32>
    %c0_18 = arith.constant 0 : index
    %c0_19 = arith.constant 0 : index
    %38 = vector.load %arg3[%c0_18, %c0_19] : memref<1x32xf32, #tpu.memory_space<vmem>>, vector<1x32xf32>
    %39 = vector.broadcast %38 : vector<1x32xf32> to vector<256x32xf32>
    %40 = arith.mulf %37, %39 : vector<256x32xf32>
    %c0_20 = arith.constant 0 : index
    %c0_21 = arith.constant 0 : index
    %41 = vector.load %arg4[%c0_20, %c0_21] : memref<1x32xf32, #tpu.memory_space<vmem>>, vector<1x32xf32>
    %42 = vector.broadcast %41 : vector<1x32xf32> to vector<256x32xf32>
    %43 = arith.addf %40, %42 : vector<256x32xf32>
    %44 = arith.truncf %36 : vector<256x32xf32> to vector<256x32xbf16>
    %c0_22 = arith.constant 0 : index
    %c0_23 = arith.constant 0 : index
    %45 = vector.load %arg9[%c0_22, %c0_23] : memref<32x32xbf16, #tpu.memory_space<vmem>>, vector<32x32xbf16>
    %cst_24 = arith.constant dense<0.000000e+00> : vector<256x32xf32>
    %46 = tpu.matmul %44, %45, %cst_24 {dimension_numbers = #tpu.dot_dimension_numbers<[1], [0], [0], [1], [0, 0, 1, 1], [], []>} : vector<256x32xbf16>, vector<32x32xbf16>, vector<256x32xf32> -> vector<256x32xf32>
    %c0_25 = arith.constant 0 : index
    %c0_26 = arith.constant 0 : index
    %47 = vector.load %arg10[%c0_25, %c0_26] : memref<1x32xf32, #tpu.memory_space<vmem>>, vector<1x32xf32>
    %48 = vector.broadcast %47 : vector<1x32xf32> to vector<256x32xf32>
    %49 = arith.addf %46, %48 : vector<256x32xf32>
    %50 = arith.addf %49, %43 : vector<256x32xf32>
    %c0_27 = arith.constant 0 : index
    %c0_28 = arith.constant 0 : index
    %51 = vector.load %arg11[%c0_27, %c0_28] : memref<256x32xf32, #tpu.memory_space<vmem>>, vector<256x32xf32>
    tpu.vector_store %arg11[%c0_27, %c0_28], %23 {strides = array<i32>} : memref<256x32xf32, #tpu.memory_space<vmem>>, vector<256x32xf32>,
    %c0_29 = arith.constant 0 : index
    %c0_30 = arith.constant 0 : index
    %52 = vector.load %arg12[%c0_29, %c0_30] : memref<256x32xf32, #tpu.memory_space<vmem>>, vector<256x32xf32>
    tpu.vector_store %arg12[%c0_29, %c0_30], %50 {strides = array<i32>} : memref<256x32xf32, #tpu.memory_space<vmem>>, vector<256x32xf32>,
    %cst_31 = arith.constant dense<0.000000e+00> : vector<32xf32>
    %53 = vector.multi_reduction <add>, %23, %cst_31 [0] : vector<256x32xf32> to vector<32xf32>
    %54 = vector.shape_cast %53 : vector<32xf32> to vector<1x32xf32>
    %55 = vector.shape_cast %54 : vector<1x32xf32> to vector<1x32xf32>
    %56 = vector.broadcast %55 : vector<1x32xf32> to vector<8x32xf32>
    %c0_32 = arith.constant 0 : index
    %c0_33 = arith.constant 0 : index
    %57 = vector.load %arg13[%c0_32, %c0_33] : memref<8x32xf32, #tpu.memory_space<vmem>>, vector<8x32xf32>
    tpu.vector_store %arg13[%c0_32, %c0_33], %56 {strides = array<i32>} : memref<8x32xf32, #tpu.memory_space<vmem>>, vector<8x32xf32>,
    %58 = arith.mulf %23, %23 : vector<256x32xf32>
    %cst_34 = arith.constant dense<0.000000e+00> : vector<32xf32>
    %59 = vector.multi_reduction <add>, %58, %cst_34 [0] : vector<256x32xf32> to vector<32xf32>
    %60 = vector.shape_cast %59 : vector<32xf32> to vector<1x32xf32>
    %61 = vector.shape_cast %60 : vector<1x32xf32> to vector<1x32xf32>
    %62 = vector.broadcast %61 : vector<1x32xf32> to vector<8x32xf32>
    %c0_35 = arith.constant 0 : index
    %c0_36 = arith.constant 0 : index
    %63 = vector.load %arg14[%c0_35, %c0_36] : memref<8x32xf32, #tpu.memory_space<vmem>>, vector<8x32xf32>
    tpu.vector_store %arg14[%c0_35, %c0_36], %62 {strides = array<i32>} : memref<8x32xf32, #tpu.memory_space<vmem>>, vector<8x32xf32>,
    %cst_37 = arith.constant dense<0.000000e+00> : vector<32xf32>
    %64 = vector.multi_reduction <add>, %50, %cst_37 [0] : vector<256x32xf32> to vector<32xf32>
    %65 = vector.shape_cast %64 : vector<32xf32> to vector<1x32xf32>
    %66 = vector.shape_cast %65 : vector<1x32xf32> to vector<1x32xf32>
    %67 = vector.broadcast %66 : vector<1x32xf32> to vector<8x32xf32>
    %c0_38 = arith.constant 0 : index
    %c0_39 = arith.constant 0 : index
    %68 = vector.load %arg15[%c0_38, %c0_39] : memref<8x32xf32, #tpu.memory_space<vmem>>, vector<8x32xf32>
    tpu.vector_store %arg15[%c0_38, %c0_39], %67 {strides = array<i32>} : memref<8x32xf32, #tpu.memory_space<vmem>>, vector<8x32xf32>,
    %69 = arith.mulf %50, %50 : vector<256x32xf32>
    %cst_40 = arith.constant dense<0.000000e+00> : vector<32xf32>
    %70 = vector.multi_reduction <add>, %69, %cst_40 [0] : vector<256x32xf32> to vector<32xf32>
    %71 = vector.shape_cast %70 : vector<32xf32> to vector<1x32xf32>
    %72 = vector.shape_cast %71 : vector<1x32xf32> to vector<1x32xf32>
    %73 = vector.broadcast %72 : vector<1x32xf32> to vector<8x32xf32>
    %c0_41 = arith.constant 0 : index
    %c0_42 = arith.constant 0 : index
    %74 = vector.load %arg16[%c0_41, %c0_42] : memref<8x32xf32, #tpu.memory_space<vmem>>, vector<8x32xf32>
    tpu.vector_store %arg16[%c0_41, %c0_42], %73 {strides = array<i32>} : memref<8x32xf32, #tpu.memory_space<vmem>>, vector<8x32xf32>,
    return
  }
  func.func @transform_0(%arg0: i32) -> (i32, i32) {
    %c0_i32 = arith.constant 0 : i32
    %c0_i32_0 = arith.constant 0 : i32
    return %arg0, %c0_i32 : i32, i32
  }
  func.func @transform_1(%arg0: i32) -> (i32, i32) {
    %c0_i32 = arith.constant 0 : i32
    %c0_i32_0 = arith.constant 0 : i32
    return %arg0, %c0_i32 : i32, i32
  }
  func.func @transform_2(%arg0: i32) -> (i32, i32) {
    %c0_i32 = arith.constant 0 : i32
    %c0_i32_0 = arith.constant 0 : i32
    %c0_i32_1 = arith.constant 0 : i32
    return %c0_i32, %c0_i32_0 : i32, i32
  }
  func.func @transform_3(%arg0: i32) -> (i32, i32) {
    %c0_i32 = arith.constant 0 : i32
    %c0_i32_0 = arith.constant 0 : i32
    %c0_i32_1 = arith.constant 0 : i32
    return %c0_i32, %c0_i32_0 : i32, i32
  }
  func.func @transform_4(%arg0: i32) -> (i32, i32) {
    %c0_i32 = arith.constant 0 : i32
    %c0_i32_0 = arith.constant 0 : i32
    %c0_i32_1 = arith.constant 0 : i32
    return %c0_i32, %c0_i32_0 : i32, i32
  }
  func.func @transform_5(%arg0: i32) -> (i32, i32) {
    %c0_i32 = arith.constant 0 : i32
    %c0_i32_0 = arith.constant 0 : i32
    %c0_i32_1 = arith.constant 0 : i32
    return %c0_i32, %c0_i32_0 : i32, i32
  }
  func.func @transform_6(%arg0: i32) -> (i32, i32) {
    %c0_i32 = arith.constant 0 : i32
    %c0_i32_0 = arith.constant 0 : i32
    %c0_i32_1 = arith.constant 0 : i32
    return %c0_i32, %c0_i32_0 : i32, i32
  }
  func.func @transform_7(%arg0: i32) -> (i32, i32) {
    %c0_i32 = arith.constant 0 : i32
    %c0_i32_0 = arith.constant 0 : i32
    %c0_i32_1 = arith.constant 0 : i32
    return %c0_i32, %c0_i32_0 : i32, i32
  }
  func.func @transform_8(%arg0: i32) -> (i32, i32) {
    %c0_i32 = arith.constant 0 : i32
    %c0_i32_0 = arith.constant 0 : i32
    %c0_i32_1 = arith.constant 0 : i32
    return %c0_i32, %c0_i32_0 : i32, i32
  }
  func.func @transform_9(%arg0: i32) -> (i32, i32) {
    %c0_i32 = arith.constant 0 : i32
    %c0_i32_0 = arith.constant 0 : i32
    %c0_i32_1 = arith.constant 0 : i32
    return %c0_i32, %c0_i32_0 : i32, i32
  }
  func.func @transform_10(%arg0: i32) -> (i32, i32) {
    %c0_i32 = arith.constant 0 : i32
    %c0_i32_0 = arith.constant 0 : i32
    return %arg0, %c0_i32 : i32, i32
  }
  func.func @transform_11(%arg0: i32) -> (i32, i32) {
    %c0_i32 = arith.constant 0 : i32
    %c0_i32_0 = arith.constant 0 : i32
    return %arg0, %c0_i32 : i32, i32
  }
  func.func @transform_12(%arg0: i32) -> (i32, i32) {
    %c0_i32 = arith.constant 0 : i32
    %c0_i32_0 = arith.constant 0 : i32
    return %arg0, %c0_i32 : i32, i32
  }
  func.func @transform_13(%arg0: i32) -> (i32, i32) {
    %c0_i32 = arith.constant 0 : i32
    %c0_i32_0 = arith.constant 0 : i32
    return %arg0, %c0_i32 : i32, i32
  }
  func.func @transform_14(%arg0: i32) -> (i32, i32) {
    %c0_i32 = arith.constant 0 : i32
    %c0_i32_0 = arith.constant 0 : i32
    return %arg0, %c0_i32 : i32, i32
  }
  func.func @transform_15(%arg0: i32) -> (i32, i32) {
    %c0_i32 = arith.constant 0 : i32
    %c0_i32_0 = arith.constant 0 : i32
    return %arg0, %c0_i32 : i32, i32
  }
}

module attributes {stable_mosaic.version = 11 : i64} {
  func.func @_res_layer_kernel(%arg0: i32, %arg1: memref<256x160xbf16, #tpu.memory_space<vmem>>, %arg2: memref<256x32xf32, #tpu.memory_space<vmem>>, %arg3: memref<1x32xf32, #tpu.memory_space<vmem>>, %arg4: memref<1x32xf32, #tpu.memory_space<vmem>>, %arg5: memref<160x128xbf16, #tpu.memory_space<vmem>>, %arg6: memref<1x128xf32, #tpu.memory_space<vmem>>, %arg7: memref<64x64xbf16, #tpu.memory_space<vmem>>, %arg8: memref<1x64xf32, #tpu.memory_space<vmem>>, %arg9: memref<32x32xbf16, #tpu.memory_space<vmem>>, %arg10: memref<1x32xf32, #tpu.memory_space<vmem>>, %arg11: memref<256x32xf32, #tpu.memory_space<vmem>>, %arg12: memref<256x32xf32, #tpu.memory_space<vmem>>, %arg13: memref<8x32xf32, #tpu.memory_space<vmem>>, %arg14: memref<8x32xf32, #tpu.memory_space<vmem>>, %arg15: memref<8x32xf32, #tpu.memory_space<vmem>>, %arg16: memref<8x32xf32, #tpu.memory_space<vmem>>) attributes {dimension_semantics = [#tpu.dimension_semantics<parallel>], iteration_bounds = array<i64: 2>, scalar_prefetch = 0 : i64, scratch_operands = 0 : i64, tpu.core_type = #tpu.core_type<tc>, window_params = [{transform_indices = @transform_0, window_bounds = array<i64: 256, 160>}, {transform_indices = @transform_1, window_bounds = array<i64: 256, 32>}, {pipeline_mode = #tpu.pipeline_mode<synchronous>, transform_indices = @transform_2, window_bounds = array<i64: 1, 32>}, {pipeline_mode = #tpu.pipeline_mode<synchronous>, transform_indices = @transform_3, window_bounds = array<i64: 1, 32>}, {pipeline_mode = #tpu.pipeline_mode<synchronous>, transform_indices = @transform_4, window_bounds = array<i64: 160, 128>}, {pipeline_mode = #tpu.pipeline_mode<synchronous>, transform_indices = @transform_5, window_bounds = array<i64: 1, 128>}, {pipeline_mode = #tpu.pipeline_mode<synchronous>, transform_indices = @transform_6, window_bounds = array<i64: 64, 64>}, {pipeline_mode = #tpu.pipeline_mode<synchronous>, transform_indices = @transform_7, window_bounds = array<i64: 1, 64>}, {pipeline_mode = #tpu.pipeline_mode<synchronous>, transform_indices = @transform_8, window_bounds = array<i64: 32, 32>}, {pipeline_mode = #tpu.pipeline_mode<synchronous>, transform_indices = @transform_9, window_bounds = array<i64: 1, 32>}, {transform_indices = @transform_10, window_bounds = array<i64: 256, 32>}, {transform_indices = @transform_11, window_bounds = array<i64: 256, 32>}, {transform_indices = @transform_12, window_bounds = array<i64: 8, 32>}, {transform_indices = @transform_13, window_bounds = array<i64: 8, 32>}, {transform_indices = @transform_14, window_bounds = array<i64: 8, 32>}, {transform_indices = @transform_15, window_bounds = array<i64: 8, 32>}]} {
    %c0 = arith.constant 0 : index
    %c0_0 = arith.constant 0 : index
    %0 = vector.load %arg1[%c0, %c0_0] : memref<256x160xbf16, #tpu.memory_space<vmem>>, vector<256x160xbf16>
    %c0_1 = arith.constant 0 : index
    %c0_2 = arith.constant 0 : index
    %1 = vector.load %arg5[%c0_1, %c0_2] : memref<160x128xbf16, #tpu.memory_space<vmem>>, vector<160x128xbf16>
    %cst = arith.constant dense<0.000000e+00> : vector<256x128xf32>
    %2 = tpu.matmul %0, %1, %cst {dimension_numbers = #tpu.dot_dimension_numbers<[1], [0], [0], [1], [0, 0, 1, 1], [], []>} : vector<256x160xbf16>, vector<160x128xbf16>, vector<256x128xf32> -> vector<256x128xf32>
    %c0_3 = arith.constant 0 : index
    %c0_4 = arith.constant 0 : index
    %3 = vector.load %arg6[%c0_3, %c0_4] : memref<1x128xf32, #tpu.memory_space<vmem>>, vector<1x128xf32>
    %4 = vector.broadcast %3 : vector<1x128xf32> to vector<256x128xf32>
    %5 = arith.addf %2, %4 : vector<256x128xf32>
    %6 = vector.extract_strided_slice %5 {offsets = [0, 0], sizes = [256, 64], strides = [1, 1]} : vector<256x128xf32> to vector<256x64xf32>
    %7 = arith.truncf %6 : vector<256x64xf32> to vector<256x64xbf16>
    %c0_5 = arith.constant 0 : index
    %c0_6 = arith.constant 0 : index
    %8 = vector.load %arg7[%c0_5, %c0_6] : memref<64x64xbf16, #tpu.memory_space<vmem>>, vector<64x64xbf16>
    %cst_7 = arith.constant dense<0.000000e+00> : vector<256x64xf32>
    %9 = tpu.matmul %7, %8, %cst_7 {dimension_numbers = #tpu.dot_dimension_numbers<[1], [0], [0], [1], [0, 0, 1, 1], [], []>} : vector<256x64xbf16>, vector<64x64xbf16>, vector<256x64xf32> -> vector<256x64xf32>
    %c0_8 = arith.constant 0 : index
    %c0_9 = arith.constant 0 : index
    %10 = vector.load %arg8[%c0_8, %c0_9] : memref<1x64xf32, #tpu.memory_space<vmem>>, vector<1x64xf32>
    %11 = vector.broadcast %10 : vector<1x64xf32> to vector<256x64xf32>
    %12 = arith.addf %9, %11 : vector<256x64xf32>
    %13 = vector.extract_strided_slice %6 {offsets = [0, 0], sizes = [256, 32], strides = [1, 1]} : vector<256x64xf32> to vector<256x32xf32>
    %14 = math.tanh %13 : vector<256x32xf32>
    %15 = vector.extract_strided_slice %6 {offsets = [0, 32], sizes = [256, 32], strides = [1, 1]} : vector<256x64xf32> to vector<256x32xf32>
    %cst_10 = arith.constant 5.000000e-01 : f32
    %16 = vector.broadcast %cst_10 : f32 to vector<256x32xf32>
    %17 = arith.mulf %16, %15 : vector<256x32xf32>
    %18 = math.tanh %17 : vector<256x32xf32>
    %cst_11 = arith.constant 5.000000e-01 : f32
    %19 = vector.broadcast %cst_11 : f32 to vector<256x32xf32>
    %20 = arith.mulf %19, %18 : vector<256x32xf32>
    %cst_12 = arith.constant 5.000000e-01 : f32
    %21 = vector.broadcast %cst_12 : f32 to vector<256x32xf32>
    %22 = arith.addf %20, %21 : vector<256x32xf32>
    %23 = arith.mulf %14, %22 : vector<256x32xf32>
    %24 = vector.extract_strided_slice %5 {offsets = [0, 64], sizes = [256, 64], strides = [1, 1]} : vector<256x128xf32> to vector<256x64xf32>
    %25 = arith.addf %24, %12 : vector<256x64xf32>
    %26 = vector.extract_strided_slice %25 {offsets = [0, 0], sizes = [256, 32], strides = [1, 1]} : vector<256x64xf32> to vector<256x32xf32>
    %27 = math.tanh %26 : vector<256x32xf32>
    %28 = vector.extract_strided_slice %25 {offsets = [0, 32], sizes = [256, 32], strides = [1, 1]} : vector<256x64xf32> to vector<256x32xf32>
    %cst_13 = arith.constant 5.000000e-01 : f32
    %29 = vector.broadcast %cst_13 : f32 to vector<256x32xf32>
    %30 = arith.mulf %29, %28 : vector<256x32xf32>
    %31 = math.tanh %30 : vector<256x32xf32>
    %cst_14 = arith.constant 5.000000e-01 : f32
    %32 = vector.broadcast %cst_14 : f32 to vector<256x32xf32>
    %33 = arith.mulf %32, %31 : vector<256x32xf32>
    %cst_15 = arith.constant 5.000000e-01 : f32
    %34 = vector.broadcast %cst_15 : f32 to vector<256x32xf32>
    %35 = arith.addf %33, %34 : vector<256x32xf32>
    %36 = arith.mulf %27, %35 : vector<256x32xf32>
    %c0_16 = arith.constant 0 : index
    %c0_17 = arith.constant 0 : index
    %37 = vector.load %arg2[%c0_16, %c0_17] : memref<256x32xf32, #tpu.memory_space<vmem>>, vector<256x32xf32>
    %c0_18 = arith.constant 0 : index
    %c0_19 = arith.constant 0 : index
    %38 = vector.load %arg3[%c0_18, %c0_19] : memref<1x32xf32, #tpu.memory_space<vmem>>, vector<1x32xf32>
    %39 = vector.broadcast %38 : vector<1x32xf32> to vector<256x32xf32>
    %40 = arith.mulf %37, %39 : vector<256x32xf32>
    %c0_20 = arith.constant 0 : index
    %c0_21 = arith.constant 0 : index
    %41 = vector.load %arg4[%c0_20, %c0_21] : memref<1x32xf32, #tpu.memory_space<vmem>>, vector<1x32xf32>
    %42 = vector.broadcast %41 : vector<1x32xf32> to vector<256x32xf32>
    %43 = arith.addf %40, %42 : vector<256x32xf32>
    %44 = arith.truncf %36 : vector<256x32xf32> to vector<256x32xbf16>
    %c0_22 = arith.constant 0 : index
    %c0_23 = arith.constant 0 : index
    %45 = vector.load %arg9[%c0_22, %c0_23] : memref<32x32xbf16, #tpu.memory_space<vmem>>, vector<32x32xbf16>
    %cst_24 = arith.constant dense<0.000000e+00> : vector<256x32xf32>
    %46 = tpu.matmul %44, %45, %cst_24 {dimension_numbers = #tpu.dot_dimension_numbers<[1], [0], [0], [1], [0, 0, 1, 1], [], []>} : vector<256x32xbf16>, vector<32x32xbf16>, vector<256x32xf32> -> vector<256x32xf32>
    %c0_25 = arith.constant 0 : index
    %c0_26 = arith.constant 0 : index
    %47 = vector.load %arg10[%c0_25, %c0_26] : memref<1x32xf32, #tpu.memory_space<vmem>>, vector<1x32xf32>
    %48 = vector.broadcast %47 : vector<1x32xf32> to vector<256x32xf32>
    %49 = arith.addf %46, %48 : vector<256x32xf32>
    %50 = arith.addf %49, %43 : vector<256x32xf32>
    %c0_27 = arith.constant 0 : index
    %c0_28 = arith.constant 0 : index
    %51 = vector.load %arg11[%c0_27, %c0_28] : memref<256x32xf32, #tpu.memory_space<vmem>>, vector<256x32xf32>
    tpu.vector_store %arg11[%c0_27, %c0_28], %23 {strides = array<i32>} : memref<256x32xf32, #tpu.memory_space<vmem>>, vector<256x32xf32>,
    %c0_29 = arith.constant 0 : index
    %c0_30 = arith.constant 0 : index
    %52 = vector.load %arg12[%c0_29, %c0_30] : memref<256x32xf32, #tpu.memory_space<vmem>>, vector<256x32xf32>
    tpu.vector_store %arg12[%c0_29, %c0_30], %50 {strides = array<i32>} : memref<256x32xf32, #tpu.memory_space<vmem>>, vector<256x32xf32>,
    %cst_31 = arith.constant dense<0.000000e+00> : vector<32xf32>
    %53 = vector.multi_reduction <add>, %23, %cst_31 [0] : vector<256x32xf32> to vector<32xf32>
    %54 = vector.shape_cast %53 : vector<32xf32> to vector<1x32xf32>
    %55 = vector.shape_cast %54 : vector<1x32xf32> to vector<1x32xf32>
    %56 = vector.broadcast %55 : vector<1x32xf32> to vector<8x32xf32>
    %c0_32 = arith.constant 0 : index
    %c0_33 = arith.constant 0 : index
    %57 = vector.load %arg13[%c0_32, %c0_33] : memref<8x32xf32, #tpu.memory_space<vmem>>, vector<8x32xf32>
    tpu.vector_store %arg13[%c0_32, %c0_33], %56 {strides = array<i32>} : memref<8x32xf32, #tpu.memory_space<vmem>>, vector<8x32xf32>,
    %58 = arith.mulf %23, %23 : vector<256x32xf32>
    %cst_34 = arith.constant dense<0.000000e+00> : vector<32xf32>
    %59 = vector.multi_reduction <add>, %58, %cst_34 [0] : vector<256x32xf32> to vector<32xf32>
    %60 = vector.shape_cast %59 : vector<32xf32> to vector<1x32xf32>
    %61 = vector.shape_cast %60 : vector<1x32xf32> to vector<1x32xf32>
    %62 = vector.broadcast %61 : vector<1x32xf32> to vector<8x32xf32>
    %c0_35 = arith.constant 0 : index
    %c0_36 = arith.constant 0 : index
    %63 = vector.load %arg14[%c0_35, %c0_36] : memref<8x32xf32, #tpu.memory_space<vmem>>, vector<8x32xf32>
    tpu.vector_store %arg14[%c0_35, %c0_36], %62 {strides = array<i32>} : memref<8x32xf32, #tpu.memory_space<vmem>>, vector<8x32xf32>,
    %cst_37 = arith.constant dense<0.000000e+00> : vector<32xf32>
    %64 = vector.multi_reduction <add>, %50, %cst_37 [0] : vector<256x32xf32> to vector<32xf32>
    %65 = vector.shape_cast %64 : vector<32xf32> to vector<1x32xf32>
    %66 = vector.shape_cast %65 : vector<1x32xf32> to vector<1x32xf32>
    %67 = vector.broadcast %66 : vector<1x32xf32> to vector<8x32xf32>
    %c0_38 = arith.constant 0 : index
    %c0_39 = arith.constant 0 : index
    %68 = vector.load %arg15[%c0_38, %c0_39] : memref<8x32xf32, #tpu.memory_space<vmem>>, vector<8x32xf32>
    tpu.vector_store %arg15[%c0_38, %c0_39], %67 {strides = array<i32>} : memref<8x32xf32, #tpu.memory_space<vmem>>, vector<8x32xf32>,
    %69 = arith.mulf %50, %50 : vector<256x32xf32>
    %cst_40 = arith.constant dense<0.000000e+00> : vector<32xf32>
    %70 = vector.multi_reduction <add>, %69, %cst_40 [0] : vector<256x32xf32> to vector<32xf32>
    %71 = vector.shape_cast %70 : vector<32xf32> to vector<1x32xf32>
    %72 = vector.shape_cast %71 : vector<1x32xf32> to vector<1x32xf32>
    %73 = vector.broadcast %72 : vector<1x32xf32> to vector<8x32xf32>
    %c0_41 = arith.constant 0 : index
    %c0_42 = arith.constant 0 : index
    %74 = vector.load %arg16[%c0_41, %c0_42] : memref<8x32xf32, #tpu.memory_space<vmem>>, vector<8x32xf32>
    tpu.vector_store %arg16[%c0_41, %c0_42], %73 {strides = array<i32>} : memref<8x32xf32, #tpu.memory_space<vmem>>, vector<8x32xf32>,
    return
  }
  func.func @transform_0(%arg0: i32) -> (i32, i32) {
    %c0_i32 = arith.constant 0 : i32
    %c0_i32_0 = arith.constant 0 : i32
    return %arg0, %c0_i32 : i32, i32
  }
  func.func @transform_1(%arg0: i32) -> (i32, i32) {
    %c0_i32 = arith.constant 0 : i32
    %c0_i32_0 = arith.constant 0 : i32
    return %arg0, %c0_i32 : i32, i32
  }
  func.func @transform_2(%arg0: i32) -> (i32, i32) {
    %c0_i32 = arith.constant 0 : i32
    %c0_i32_0 = arith.constant 0 : i32
    %c0_i32_1 = arith.constant 0 : i32
    return %c0_i32, %c0_i32_0 : i32, i32
  }
  func.func @transform_3(%arg0: i32) -> (i32, i32) {
    %c0_i32 = arith.constant 0 : i32
    %c0_i32_0 = arith.constant 0 : i32
    %c0_i32_1 = arith.constant 0 : i32
    return %c0_i32, %c0_i32_0 : i32, i32
  }
  func.func @transform_4(%arg0: i32) -> (i32, i32) {
    %c0_i32 = arith.constant 0 : i32
    %c0_i32_0 = arith.constant 0 : i32
    %c0_i32_1 = arith.constant 0 : i32
    return %c0_i32, %c0_i32_0 : i32, i32
  }
  func.func @transform_5(%arg0: i32) -> (i32, i32) {
    %c0_i32 = arith.constant 0 : i32
    %c0_i32_0 = arith.constant 0 : i32
    %c0_i32_1 = arith.constant 0 : i32
    return %c0_i32, %c0_i32_0 : i32, i32
  }
  func.func @transform_6(%arg0: i32) -> (i32, i32) {
    %c0_i32 = arith.constant 0 : i32
    %c0_i32_0 = arith.constant 0 : i32
    %c0_i32_1 = arith.constant 0 : i32
    return %c0_i32, %c0_i32_0 : i32, i32
  }
  func.func @transform_7(%arg0: i32) -> (i32, i32) {
    %c0_i32 = arith.constant 0 : i32
    %c0_i32_0 = arith.constant 0 : i32
    %c0_i32_1 = arith.constant 0 : i32
    return %c0_i32, %c0_i32_0 : i32, i32
  }
  func.func @transform_8(%arg0: i32) -> (i32, i32) {
    %c0_i32 = arith.constant 0 : i32
    %c0_i32_0 = arith.constant 0 : i32
    %c0_i32_1 = arith.constant 0 : i32
    return %c0_i32, %c0_i32_0 : i32, i32
  }
  func.func @transform_9(%arg0: i32) -> (i32, i32) {
    %c0_i32 = arith.constant 0 : i32
    %c0_i32_0 = arith.constant 0 : i32
    %c0_i32_1 = arith.constant 0 : i32
    return %c0_i32, %c0_i32_0 : i32, i32
  }
  func.func @transform_10(%arg0: i32) -> (i32, i32) {
    %c0_i32 = arith.constant 0 : i32
    %c0_i32_0 = arith.constant 0 : i32
    return %arg0, %c0_i32 : i32, i32
  }
  func.func @transform_11(%arg0: i32) -> (i32, i32) {
    %c0_i32 = arith.constant 0 : i32
    %c0_i32_0 = arith.constant 0 : i32
    return %arg0, %c0_i32 : i32, i32
  }
  func.func @transform_12(%arg0: i32) -> (i32, i32) {
    %c0_i32 = arith.constant 0 : i32
    %c0_i32_0 = arith.constant 0 : i32
    return %arg0, %c0_i32 : i32, i32
  }
  func.func @transform_13(%arg0: i32) -> (i32, i32) {
    %c0_i32 = arith.constant 0 : i32
    %c0_i32_0 = arith.constant 0 : i32
    return %arg0, %c0_i32 : i32, i32
  }
  func.func @transform_14(%arg0: i32) -> (i32, i32) {
    %c0_i32 = arith.constant 0 : i32
    %c0_i32_0 = arith.constant 0 : i32
    return %arg0, %c0_i32 : i32, i32
  }
  func.func @transform_15(%arg0: i32) -> (i32, i32) {
    %c0_i32 = arith.constant 0 : i32
    %c0_i32_0 = arith.constant 0 : i32
    return %arg0, %c0_i32 : i32, i32
  }
}

module attributes {stable_mosaic.version = 11 : i64} {
  func.func @_head_kernel(%arg0: i32, %arg1: memref<256x32xf32, #tpu.memory_space<vmem>>, %arg2: memref<32x64xbf16, #tpu.memory_space<vmem>>, %arg3: memref<1x64xf32, #tpu.memory_space<vmem>>, %arg4: memref<32x64xbf16, #tpu.memory_space<vmem>>, %arg5: memref<1x64xf32, #tpu.memory_space<vmem>>, %arg6: memref<32x12xbf16, #tpu.memory_space<vmem>>, %arg7: memref<1x12xf32, #tpu.memory_space<vmem>>, %arg8: memref<256x12xf32, #tpu.memory_space<vmem>>) attributes {dimension_semantics = [#tpu.dimension_semantics<parallel>], iteration_bounds = array<i64: 2>, scalar_prefetch = 0 : i64, scratch_operands = 0 : i64, tpu.core_type = #tpu.core_type<tc>, window_params = [{transform_indices = @transform_0, window_bounds = array<i64: 256, 32>}, {pipeline_mode = #tpu.pipeline_mode<synchronous>, transform_indices = @transform_1, window_bounds = array<i64: 32, 64>}, {pipeline_mode = #tpu.pipeline_mode<synchronous>, transform_indices = @transform_2, window_bounds = array<i64: 1, 64>}, {pipeline_mode = #tpu.pipeline_mode<synchronous>, transform_indices = @transform_3, window_bounds = array<i64: 32, 64>}, {pipeline_mode = #tpu.pipeline_mode<synchronous>, transform_indices = @transform_4, window_bounds = array<i64: 1, 64>}, {pipeline_mode = #tpu.pipeline_mode<synchronous>, transform_indices = @transform_5, window_bounds = array<i64: 32, 12>}, {pipeline_mode = #tpu.pipeline_mode<synchronous>, transform_indices = @transform_6, window_bounds = array<i64: 1, 12>}, {transform_indices = @transform_7, window_bounds = array<i64: 256, 12>}]} {
    %c0 = arith.constant 0 : index
    %c0_0 = arith.constant 0 : index
    %0 = vector.load %arg1[%c0, %c0_0] : memref<256x32xf32, #tpu.memory_space<vmem>>, vector<256x32xf32>
    %1 = arith.truncf %0 : vector<256x32xf32> to vector<256x32xbf16>
    %c0_1 = arith.constant 0 : index
    %c0_2 = arith.constant 0 : index
    %2 = vector.load %arg2[%c0_1, %c0_2] : memref<32x64xbf16, #tpu.memory_space<vmem>>, vector<32x64xbf16>
    %cst = arith.constant dense<0.000000e+00> : vector<256x64xf32>
    %3 = tpu.matmul %1, %2, %cst {dimension_numbers = #tpu.dot_dimension_numbers<[1], [0], [0], [1], [0, 0, 1, 1], [], []>} : vector<256x32xbf16>, vector<32x64xbf16>, vector<256x64xf32> -> vector<256x64xf32>
    %c0_3 = arith.constant 0 : index
    %c0_4 = arith.constant 0 : index
    %4 = vector.load %arg3[%c0_3, %c0_4] : memref<1x64xf32, #tpu.memory_space<vmem>>, vector<1x64xf32>
    %5 = vector.broadcast %4 : vector<1x64xf32> to vector<256x64xf32>
    %6 = arith.addf %3, %5 : vector<256x64xf32>
    %7 = vector.extract_strided_slice %6 {offsets = [0, 0], sizes = [256, 32], strides = [1, 1]} : vector<256x64xf32> to vector<256x32xf32>
    %8 = math.tanh %7 : vector<256x32xf32>
    %9 = vector.extract_strided_slice %6 {offsets = [0, 32], sizes = [256, 32], strides = [1, 1]} : vector<256x64xf32> to vector<256x32xf32>
    %cst_5 = arith.constant 5.000000e-01 : f32
    %10 = vector.broadcast %cst_5 : f32 to vector<256x32xf32>
    %11 = arith.mulf %10, %9 : vector<256x32xf32>
    %12 = math.tanh %11 : vector<256x32xf32>
    %cst_6 = arith.constant 5.000000e-01 : f32
    %13 = vector.broadcast %cst_6 : f32 to vector<256x32xf32>
    %14 = arith.mulf %13, %12 : vector<256x32xf32>
    %cst_7 = arith.constant 5.000000e-01 : f32
    %15 = vector.broadcast %cst_7 : f32 to vector<256x32xf32>
    %16 = arith.addf %14, %15 : vector<256x32xf32>
    %17 = arith.mulf %8, %16 : vector<256x32xf32>
    %18 = arith.truncf %17 : vector<256x32xf32> to vector<256x32xbf16>
    %c0_8 = arith.constant 0 : index
    %c0_9 = arith.constant 0 : index
    %19 = vector.load %arg4[%c0_8, %c0_9] : memref<32x64xbf16, #tpu.memory_space<vmem>>, vector<32x64xbf16>
    %cst_10 = arith.constant dense<0.000000e+00> : vector<256x64xf32>
    %20 = tpu.matmul %18, %19, %cst_10 {dimension_numbers = #tpu.dot_dimension_numbers<[1], [0], [0], [1], [0, 0, 1, 1], [], []>} : vector<256x32xbf16>, vector<32x64xbf16>, vector<256x64xf32> -> vector<256x64xf32>
    %c0_11 = arith.constant 0 : index
    %c0_12 = arith.constant 0 : index
    %21 = vector.load %arg5[%c0_11, %c0_12] : memref<1x64xf32, #tpu.memory_space<vmem>>, vector<1x64xf32>
    %22 = vector.broadcast %21 : vector<1x64xf32> to vector<256x64xf32>
    %23 = arith.addf %20, %22 : vector<256x64xf32>
    %24 = vector.extract_strided_slice %23 {offsets = [0, 0], sizes = [256, 32], strides = [1, 1]} : vector<256x64xf32> to vector<256x32xf32>
    %25 = math.tanh %24 : vector<256x32xf32>
    %26 = vector.extract_strided_slice %23 {offsets = [0, 32], sizes = [256, 32], strides = [1, 1]} : vector<256x64xf32> to vector<256x32xf32>
    %cst_13 = arith.constant 5.000000e-01 : f32
    %27 = vector.broadcast %cst_13 : f32 to vector<256x32xf32>
    %28 = arith.mulf %27, %26 : vector<256x32xf32>
    %29 = math.tanh %28 : vector<256x32xf32>
    %cst_14 = arith.constant 5.000000e-01 : f32
    %30 = vector.broadcast %cst_14 : f32 to vector<256x32xf32>
    %31 = arith.mulf %30, %29 : vector<256x32xf32>
    %cst_15 = arith.constant 5.000000e-01 : f32
    %32 = vector.broadcast %cst_15 : f32 to vector<256x32xf32>
    %33 = arith.addf %31, %32 : vector<256x32xf32>
    %34 = arith.mulf %25, %33 : vector<256x32xf32>
    %35 = arith.truncf %34 : vector<256x32xf32> to vector<256x32xbf16>
    %c0_16 = arith.constant 0 : index
    %c0_17 = arith.constant 0 : index
    %36 = vector.load %arg6[%c0_16, %c0_17] : memref<32x12xbf16, #tpu.memory_space<vmem>>, vector<32x12xbf16>
    %cst_18 = arith.constant dense<0.000000e+00> : vector<256x12xf32>
    %37 = tpu.matmul %35, %36, %cst_18 {dimension_numbers = #tpu.dot_dimension_numbers<[1], [0], [0], [1], [0, 0, 1, 1], [], []>} : vector<256x32xbf16>, vector<32x12xbf16>, vector<256x12xf32> -> vector<256x12xf32>
    %c0_19 = arith.constant 0 : index
    %c0_20 = arith.constant 0 : index
    %38 = vector.load %arg7[%c0_19, %c0_20] : memref<1x12xf32, #tpu.memory_space<vmem>>, vector<1x12xf32>
    %39 = vector.broadcast %38 : vector<1x12xf32> to vector<256x12xf32>
    %40 = arith.addf %37, %39 : vector<256x12xf32>
    %c0_21 = arith.constant 0 : index
    %c0_22 = arith.constant 0 : index
    %41 = vector.load %arg8[%c0_21, %c0_22] : memref<256x12xf32, #tpu.memory_space<vmem>>, vector<256x12xf32>
    tpu.vector_store %arg8[%c0_21, %c0_22], %40 {strides = array<i32>} : memref<256x12xf32, #tpu.memory_space<vmem>>, vector<256x12xf32>,
    return
  }
  func.func @transform_0(%arg0: i32) -> (i32, i32) {
    %c0_i32 = arith.constant 0 : i32
    %c0_i32_0 = arith.constant 0 : i32
    return %arg0, %c0_i32 : i32, i32
  }
  func.func @transform_1(%arg0: i32) -> (i32, i32) {
    %c0_i32 = arith.constant 0 : i32
    %c0_i32_0 = arith.constant 0 : i32
    %c0_i32_1 = arith.constant 0 : i32
    return %c0_i32, %c0_i32_0 : i32, i32
  }
  func.func @transform_2(%arg0: i32) -> (i32, i32) {
    %c0_i32 = arith.constant 0 : i32
    %c0_i32_0 = arith.constant 0 : i32
    %c0_i32_1 = arith.constant 0 : i32
    return %c0_i32, %c0_i32_0 : i32, i32
  }
  func.func @transform_3(%arg0: i32) -> (i32, i32) {
    %c0_i32 = arith.constant 0 : i32
    %c0_i32_0 = arith.constant 0 : i32
    %c0_i32_1 = arith.constant 0 : i32
    return %c0_i32, %c0_i32_0 : i32, i32
  }
  func.func @transform_4(%arg0: i32) -> (i32, i32) {
    %c0_i32 = arith.constant 0 : i32
    %c0_i32_0 = arith.constant 0 : i32
    %c0_i32_1 = arith.constant 0 : i32
    return %c0_i32, %c0_i32_0 : i32, i32
  }
  func.func @transform_5(%arg0: i32) -> (i32, i32) {
    %c0_i32 = arith.constant 0 : i32
    %c0_i32_0 = arith.constant 0 : i32
    %c0_i32_1 = arith.constant 0 : i32
    return %c0_i32, %c0_i32_0 : i32, i32
  }
  func.func @transform_6(%arg0: i32) -> (i32, i32) {
    %c0_i32 = arith.constant 0 : i32
    %c0_i32_0 = arith.constant 0 : i32
    %c0_i32_1 = arith.constant 0 : i32
    return %c0_i32, %c0_i32_0 : i32, i32
  }
  func.func @transform_7(%arg0: i32) -> (i32, i32) {
    %c0_i32 = arith.constant 0 : i32
    %c0_i32_0 = arith.constant 0 : i32
    return %arg0, %c0_i32 : i32, i32
  }
}

</mosaic_0001>

<bundles_post_ra>
// kernel: _lambda_.4
= control target key start
LH: loop header
LB: loop body
LE: loop exit
PB: predicated region body
PF: predicated region fallthrough
CT: control target
= control target key end

     0   :  { %s1192_s12 = smov 0   ;;  %s1525_s0 = inlined_call_operand.vmem [shape: bf16[512,80], index: 0, kind: input, shape index: {}]   ;;  %s1526_s1 = inlined_call_operand.vmem [shape: bf16[80,64], index: 1, kind: input, shape index: {}]   ;;  %s1527_s2 = inlined_call_operand.vmem [shape: f32[1,64], index: 2, kind: input, shape index: {}]   ;;  %s1528_s3 = inlined_call_operand.vmem [shape: f32[512,32], index: 3, kind: output, shape index: {}]  }
   0x1 LB: > { %s878_s13 = sadd.s32 4294967295, %s1169_s12   ;;  %p882_p0 = scmp.ge.s32.totalorder %s1169_s12, 1  ;;  %s1169_s12 = sphi %s1192_s12, %s13_s12  }
   0x2   : > { %p138_p1 = scmp.lt.s32.totalorder %s1169_s12, 3 }
   0x4   : > { %p139_p2 = pnand %p882_p0, %p138_p1 }
   0x5   : > { %s883_s16 = sshll.u32 (!%p139_p2), %s878_s13, 5  ;;  %s1171_s4 = smov (!%p139_p2), 96  }
   0x6   : > { %142 = sbr.rel (%p139_p2) target bundleno = 378 (0x17a), region = 32  ;;  %p163_p3 = scmp.lt.s32.totalorder (!%p139_p2), %s883_s16, 63 }
   0xb   : > { %v1009_v0 = vld [vmem:[%s1526_s1 + $0x20] sm:$0xff]  ;;  %v1008_v1 = vld [vmem:[%s1526_s1 + $0x18] sm:$0xff]  ;;  %v1007_v2 = vld [vmem:[%s1526_s1 + $0x10] sm:$0xff]  ;;  %s1530_s16 = smov (!%p163_p3, %s883_s16), 63  ;;  %vm331_vm0 = vcmask 654336   ;;  %vm789_vm1 = vcmask 261120  }
   0xc   : > { %383 = vmatpush.bf16.msra.mxu0 %v1009_v0  ;;  %1010 = vmatpush.bf16.msra.mxu1 %v1009_v0  ;;  %v1006_v3 = vld [vmem:[%s1526_s1 + $0x8] sm:$0xff]  ;;  %s884_s23 = sshll.u32 %s1530_s16, 2  ;;  %v1005_v4 = vld [vmem:[%s1526_s1] sm:$0xff]  ;;  %s886_s5 = sshll.u32 %s1530_s16, 3 }
   0xd   : > { %1011 = vmatpush.bf16.msra.mxu2 %v1009_v0  ;;  %1012 = vmatpush.bf16.msra.mxu3 %v1009_v0  ;;  %s1221_s28 = scalar_lea.vmem %s1525_s0, %s884_s23  ;;  %v1258_v21 = vld [vmem:[%s1527_s2] ss:$0 sm:$0xff]  ;;  %s1425_s8 = scalar_lea.vmem %s1528_s3, %s886_s5 }
   0xe   : > { %v989_v5 = vld [vmem:[%s1221_s28] sm:$0xff]  ;;  %v990_v9 = vld [vmem:[%s1221_s28 + $0x8] sm:$0xff]  ;;  %v991_v13 = vld [vmem:[%s1221_s28 + $0x10] sm:$0xff] }
   0xf   : > { %v993_v6 = vld [vmem:[%s1221_s28 + $0x20] sm:$0xff]  ;;  %v994_v10 = vld [vmem:[%s1221_s28 + $0x28] sm:$0xff]  ;;  %v995_v14 = vld [vmem:[%s1221_s28 + $0x30] sm:$0xff] }
  0x10   : > { %384 = vmatpush.bf16.msra.mxu0 %v1008_v1  ;;  %1013 = vmatpush.bf16.msra.mxu1 %v1008_v1  ;;  %v997_v7 = vld [vmem:[%s1221_s28 + $0x40] sm:$0xff]  ;;  %v1002_v11 = vld [vmem:[%s1221_s28 + $0x68] sm:$0xff]  ;;  %v999_v15 = vld [vmem:[%s1221_s28 + $0x50] sm:$0xff] }
  0x11   : > { %1014 = vmatpush.bf16.msra.mxu2 %v1008_v1  ;;  %1015 = vmatpush.bf16.msra.mxu3 %v1008_v1  ;;  %v1001_v8 = vld [vmem:[%s1221_s28 + $0x60] sm:$0xff]  ;;  %v998_v12 = vld [vmem:[%s1221_s28 + $0x48] sm:$0xff]  ;;  %v1003_v16 = vld [vmem:[%s1221_s28 + $0x70] sm:$0xff] }
  0x12   : > { %v992_v17 = vld [vmem:[%s1221_s28 + $0x18] sm:$0xff] }
  0x13   : > { %v996_v18 = vld [vmem:[%s1221_s28 + $0x38] sm:$0xff] }
  0x14   : > { %385 = vmatpush.bf16.msra.mxu0 %v1007_v2  ;;  %1016 = vmatpush.bf16.msra.mxu1 %v1007_v2  ;;  %v1000_v19 = vld [vmem:[%s1221_s28 + $0x58] sm:$0xff] }
  0x15   : > { %1017 = vmatpush.bf16.msra.mxu2 %v1007_v2  ;;  %1018 = vmatpush.bf16.msra.mxu3 %v1007_v2  ;;  %v1004_v20 = vld [vmem:[%s1221_s28 + $0x78] sm:$0xff] }
  0x18   : > { %386 = vmatpush.bf16.msra.mxu0 %v1006_v3  ;;  %1019 = vmatpush.bf16.msra.mxu1 %v1006_v3 }
  0x19   : > { %1020 = vmatpush.bf16.msra.mxu2 %v1006_v3  ;;  %1021 = vmatpush.bf16.msra.mxu3 %v1006_v3 }
  0x1c   : > { %387 = vmatpush.bf16.msra.mxu0 %v1005_v4  ;;  %1022 = vmatpush.bf16.msra.mxu1 %v1005_v4 }
  0x1d   : > { %1023 = vmatpush.bf16.msra.mxu2 %v1005_v4  ;;  %1024 = vmatpush.bf16.msra.mxu3 %v1005_v4 }
  0x1f   : > { %971 = vmatmul.msk.bf16.vlgmr.msra.gmra.mxu0 %vm331_vm0, %v989_v5  ;;  %975 = vmatmul.msk.bf16.vlgmr.msra.gmra.mxu1 %vm331_vm0, %v993_v6 }
  0x20   : > { %979 = vmatmul.msk.bf16.vlgmr.msra.gmra.mxu2 %vm331_vm0, %v997_v7  ;;  %983 = vmatmul.msk.bf16.vlgmr.msra.gmra.mxu3 %vm331_vm0, %v1001_v8 }
  0x2f   : > { %972 = vmatmul.msk.bf16.gmra.mxu0 %vm331_vm0, %v990_v9  ;;  %976 = vmatmul.msk.bf16.gmra.mxu1 %vm331_vm0, %v994_v10 }
  0x30   : > { %984 = vmatmul.msk.bf16.gmra.mxu3 %vm331_vm0, %v1002_v11  ;;  %980 = vmatmul.msk.bf16.gmra.mxu2 %vm331_vm0, %v998_v12 }
  0x3f   : > { %973 = vmatmul.msk.bf16.gmra.mxu0 %vm331_vm0, %v991_v13  ;;  %977 = vmatmul.msk.bf16.gmra.mxu1 %vm331_vm0, %v995_v14 }
  0x40   : > { %981 = vmatmul.msk.bf16.gmra.mxu2 %vm331_vm0, %v999_v15  ;;  %985 = vmatmul.msk.bf16.gmra.mxu3 %vm331_vm0, %v1003_v16 }
  0x4f   : > { %974 = vmatmul.msk.bf16.gmra.mxu0 %vm331_vm0, %v992_v17  ;;  %978 = vmatmul.msk.bf16.gmra.mxu1 %vm331_vm0, %v996_v18 }
  0x50   : > { %982 = vmatmul.msk.bf16.gmra.mxu2 %vm331_vm0, %v1000_v19  ;;  %986 = vmatmul.msk.bf16.gmra.mxu3 %vm331_vm0, %v1004_v20 }
  0x9c   : > { %v389_v22 = vpop.f32.mrf.mxu0  ;;  %v409_v23 = vpop.f32.mrf.mxu1 }
  0x9d   : > { %v1261_v24 = vadd.f32 %v1258_v21, %v389_v22  ;;  %v1264_v25 = vadd.f32 %v1258_v21, %v409_v23 }
  0x9f   : > { %v501_v26 = vmul.f32 0.5, %v1261_v24  ;;  %v509_v27 = vmul.f32 0.5, %v1264_v25 }
  0xa1   : > { %1035 = vtanh.f32 %v501_v26 }
  0xa2   : > { %1037 = vtanh.f32 %v509_v27 }
  0xa3   : > { %v429_v28 = vpop.f32.mrf.mxu2  ;;  %v449_v29 = vpop.f32.mrf.mxu3 }
  0xa4   : > { %v1269_v30 = vadd.f32 %v1258_v21, %v429_v28  ;;  %v1272_v31 = vadd.f32 %v1258_v21, %v449_v29  ;;  %v391_v32 = vpop.f32.mrf.mxu0  ;;  %v411_v33 = vpop.f32.mrf.mxu1 }
  0xa5   : > { %v1275_v34 = vadd.f32 %v1258_v21, %v391_v32  ;;  %v1288_v50 = vadd.f32 %v1258_v21, %v411_v33 }
  0xa6   : > { %v517_v35 = vmul.f32 0.5, %v1269_v30  ;;  %v525_v36 = vmul.f32 0.5, %v1272_v31 }
  0xa7   : > { %v1036_v37 = vpop.eup %1035  ;;  %v502_v40 = vmul.f32 0.5, %v1275_v34  ;;  %v510_v59 = vmul.f32 0.5, %v1288_v50 }
  0xa8   : > { %v1038_v38 = vpop.eup %1037  ;;  %1039 = vtanh.f32 %v517_v35  ;;  %v565_v39 = vmul.f32 0.5, %v1036_v37 }
  0xa9   : > { %1041 = vtanh.f32 %v525_v36  ;;  %v573_v41 = vmul.f32 0.5, %v1038_v38 }
  0xaa   : > { %v597_v42 = vadd.f32 0.5, %v565_v39  ;;  %1043 = vtanh.f32 %v502_v40 }
  0xab   : > { %v431_v43 = vpop.f32.mrf.mxu2  ;;  %v451_v44 = vpop.f32.mrf.mxu3  ;;  %v605_v45 = vadd.f32 0.5, %v573_v41 }
  0xac   : > { %v1281_v46 = vadd.f32 %v1258_v21, %v431_v43  ;;  %v1284_v47 = vadd.f32 %v1258_v21, %v451_v44  ;;  %v394_v48 = vpop.f32.mrf.mxu0  ;;  %661 = vrot.lane.b32.xlu0 %v597_v42, %s1171_s4  ;;  %v414_v49 = vpop.f32.mrf.mxu1 }
  0xad   : > { %677 = vrot.lane.b32.xlu2 %v605_v45, %s1171_s4  ;;  %v1292_v51 = vadd.f32 %v1258_v21, %v394_v48  ;;  %v1299_v61 = vadd.f32 %v1258_v21, %v414_v49 }
  0xae   : > { %v1040_v52 = vpop.eup %1039  ;;  %v518_v53 = vmul.f32 0.5, %v1281_v46  ;;  %v526_v54 = vmul.f32 0.5, %v1284_v47 }
  0xaf   : > { %v1042_v55 = vpop.eup %1041  ;;  %v503_v56 = vmul.f32 0.5, %v1292_v51  ;;  %v581_v57 = vmul.f32 0.5, %v1040_v52  ;;  %v511_v9 = vmul.f32 0.5, %v1299_v61 }
  0xb0   : > { %1045 = vtanh.f32 %v518_v53  ;;  %v589_v58 = vmul.f32 0.5, %v1042_v55  ;;  %v1044_v63 = vpop.eup %1043 }
  0xb1   : > { %1047 = vtanh.f32 %v526_v54  ;;  %v613_v60 = vadd.f32 0.5, %v581_v57  ;;  %v566_v10 = vmul.f32 0.5, %v1044_v63 }
  0xb2   : > { %v621_v62 = vadd.f32 0.5, %v589_v58  ;;  %1049 = vtanh.f32 %v503_v56 }
  0xb3   : > { %v454_v0 = vpop.f32.mrf.mxu3  ;;  %693 = vrot.lane.b32.xlu1 %v613_v60, %s1171_s4  ;;  %v434_v1 = vpop.f32.mrf.mxu2  ;;  %1051 = vtanh.f32 %v510_v59  ;;  %v598_v20 = vadd.f32 0.5, %v566_v10 }
  0xb4   : > { %v1303_v2 = vadd.f32 %v1258_v21, %v454_v0  ;;  %v396_v3 = vpop.f32.mrf.mxu0  ;;  %709 = vrot.lane.b32.xlu0 %v621_v62, %s1171_s4  ;;  %v1307_v4 = vadd.f32 %v1258_v21, %v434_v1  ;;  %v416_v5 = vpop.f32.mrf.mxu1 }
  0xb5   : > { %v1310_v6 = vadd.f32 %v1258_v21, %v416_v5  ;;  %v1317_v18 = vadd.f32 %v1258_v21, %v396_v3 }
  0xb6   : > { %v1046_v7 = vpop.eup %1045  ;;  %v527_v8 = vmul.f32 0.5, %v1303_v2  ;;  %v519_v12 = vmul.f32 0.5, %v1307_v4 }
  0xb7   : > { %v1048_v11 = vpop.eup %1047  ;;  %v582_v13 = vmul.f32 0.5, %v1046_v7  ;;  %v512_v16 = vmul.f32 0.5, %v1310_v6  ;;  %v504_v36 = vmul.f32 0.5, %v1317_v18 }
  0xb8   : > { %1053 = vtanh.f32 %v527_v8  ;;  %v590_v14 = vmul.f32 0.5, %v1048_v11  ;;  %v1050_v15 = vpop.eup %1049 }
  0xb9   : > { %v614_v17 = vadd.f32 0.5, %v582_v13  ;;  %1055 = vtanh.f32 %v511_v9  ;;  %v1052_v22 = vpop.eup %1051  ;;  %v567_v28 = vmul.f32 0.5, %v1050_v15 }
  0xba   : > { %v622_v19 = vadd.f32 0.5, %v590_v14  ;;  %1057 = vtanh.f32 %v519_v12  ;;  %v574_v37 = vmul.f32 0.5, %v1052_v22 }
  0xbb   : > { %695 = vrot.lane.b32.xlu2 %v614_v17, %s1171_s4  ;;  %v436_v23 = vpop.f32.mrf.mxu2  ;;  %v456_v26 = vpop.f32.mrf.mxu3  ;;  %1059 = vtanh.f32 %v512_v16  ;;  %v599_v41 = vadd.f32 0.5, %v567_v28 }
  0xbc   : > { %711 = vrot.lane.b32.xlu1 %v622_v19, %s1171_s4  ;;  %663 = vrot.lane.b32.xlu0 %v598_v20, %s1171_s4  ;;  %v399_v27 = vpop.f32.mrf.mxu0  ;;  %v419_v29 = vpop.f32.mrf.mxu1  ;;  %v1323_v32 = vadd.f32 %v1258_v21, %v456_v26  ;;  %1061 = vtanh.f32 %v504_v36  ;;  %v606_v45 = vadd.f32 0.5, %v574_v37  ;;  %v1341_v57 = vadd.f32 %v1258_v21, %v436_v23 }
  0xbd   : > { %v1326_v33 = vadd.f32 %v1258_v21, %v399_v27  ;;  %v1333_v49 = vadd.f32 %v1258_v21, %v419_v29 }
  0xbe   : > { %v1054_v35 = vpop.eup %1053  ;;  %v528_v43 = vmul.f32 0.5, %v1323_v32  ;;  %v520_v7 = vmul.f32 0.5, %v1341_v57 }
  0xbf   : > { %v591_v38 = vmul.f32 0.5, %v1054_v35  ;;  %v505_v39 = vmul.f32 0.5, %v1326_v33  ;;  %v1056_v40 = vpop.eup %1055  ;;  %v513_v60 = vmul.f32 0.5, %v1333_v49 }
  0xc0   : > { %v1058_v42 = vpop.eup %1057  ;;  %v575_v55 = vmul.f32 0.5, %v1056_v40 }
  0xc1   : > { %v623_v44 = vadd.f32 0.5, %v591_v38  ;;  %v1060_v48 = vpop.eup %1059  ;;  %1063 = vtanh.f32 %v505_v39  ;;  %v583_v56 = vmul.f32 0.5, %v1058_v42 }
  0xc2   : > { %v576_v54 = vmul.f32 0.5, %v1060_v48  ;;  %1065 = vtanh.f32 %v528_v43  ;;  %v1062_v0 = vpop.eup %1061  ;;  %v607_v1 = vadd.f32 0.5, %v575_v55 }
  0xc3   : > { %713 = vrot.lane.b32.xlu2 %v623_v44, %s1171_s4  ;;  %v439_v52 = vpop.f32.mrf.mxu2  ;;  %v615_v3 = vadd.f32 0.5, %v583_v56  ;;  %v459_v8 = vpop.f32.mrf.mxu3  ;;  %v568_v16 = vmul.f32 0.5, %v1062_v0 }
  0xc4   : > { %665 = vrot.lane.b32.xlu1 %v599_v41, %s1171_s4  ;;  %679 = vrot.lane.b32.xlu0 %v606_v45, %s1171_s4  ;;  %v1338_v53 = vadd.f32 %v1258_v21, %v439_v52  ;;  %v421_v58 = vpop.f32.mrf.mxu1  ;;  %v608_v62 = vadd.f32 0.5, %v576_v54  ;;  %v401_v63 = vpop.f32.mrf.mxu0  ;;  %v1350_v11 = vadd.f32 %v1258_v21, %v459_v8 }
  0xc5   : > { %v1347_v9 = vadd.f32 %v1258_v21, %v401_v63  ;;  %v600_v28 = vadd.f32 0.5, %v568_v16  ;;  %v1371_v42 = vadd.f32 %v1258_v21, %v421_v58 }
  0xc6   : > { %v521_v59 = vmul.f32 0.5, %v1338_v53  ;;  %v529_v19 = vmul.f32 0.5, %v1350_v11 }
  0xc7   : > { %v1064_v5 = vpop.eup %1063  ;;  %v506_v15 = vmul.f32 0.5, %v1347_v9 }
  0xc8   : > { %1067 = vtanh.f32 %v521_v59  ;;  %v1066_v10 = vpop.eup %1065  ;;  %v569_v13 = vmul.f32 0.5, %v1064_v5  ;;  %v514_v59 = vmul.f32 0.5, %v1371_v42 }
  0xc9   : > { %1069 = vtanh.f32 %v513_v60  ;;  %v592_v17 = vmul.f32 0.5, %v1066_v10 }
  0xca   : > { %1071 = vtanh.f32 %v520_v7  ;;  %v601_v20 = vadd.f32 0.5, %v569_v13 }
  0xcb   : > { %683 = vrot.lane.b32.xlu2 %v608_v62, %s1171_s4  ;;  %v441_v12 = vpop.f32.mrf.mxu2  ;;  %1073 = vtanh.f32 %v506_v15  ;;  %v624_v29 = vadd.f32 0.5, %v592_v17  ;;  %v461_v54 = vpop.f32.mrf.mxu3 }
  0xcc   : > { %681 = vrot.lane.b32.xlu1 %v607_v1, %s1171_s4  ;;  %697 = vrot.lane.b32.xlu0 %v615_v3, %s1171_s4  ;;  %v1356_v14 = vadd.f32 %v1258_v21, %v441_v12  ;;  %v424_v22 = vpop.f32.mrf.mxu1  ;;  %v404_v35 = vpop.f32.mrf.mxu0  ;;  %1075 = vtanh.f32 %v529_v19 }
  0xcd   : > { %v1362_v36 = vadd.f32 %v1258_v21, %v424_v22  ;;  %v1366_v38 = vadd.f32 %v1258_v21, %v404_v35 }
  0xce   : > { %v1068_v23 = vpop.eup %1067  ;;  %v522_v27 = vmul.f32 0.5, %v1356_v14 }
  0xcf   : > { %v1070_v26 = vpop.eup %1069  ;;  %v585_v40 = vmul.f32 0.5, %v1068_v23  ;;  %v515_v43 = vmul.f32 0.5, %v1362_v36  ;;  %v507_v45 = vmul.f32 0.5, %v1366_v38 }
  0xd0   : > { %v1072_v37 = vpop.eup %1071  ;;  %v577_v41 = vmul.f32 0.5, %v1070_v26  ;;  %1077 = vtanh.f32 %v522_v27  ;;  %v1392_v27 = vadd.f32 %v1258_v21, %v461_v54 }
  0xd1   : > { %v584_v44 = vmul.f32 0.5, %v1072_v37  ;;  %v617_v48 = vadd.f32 0.5, %v585_v40  ;;  %v1074_v52 = vpop.eup %1073  ;;  %1079 = vtanh.f32 %v515_v43 }
  0xd2   : > { %v609_v55 = vadd.f32 0.5, %v577_v41  ;;  %v1076_v56 = vpop.eup %1075  ;;  %1081 = vtanh.f32 %v507_v45  ;;  %v570_v1 = vmul.f32 0.5, %v1074_v52  ;;  %v530_v40 = vmul.f32 0.5, %v1392_v27 }
  0xd3   : > { %669 = vrot.lane.b32.xlu2 %v601_v20, %s1171_s4  ;;  %v444_v39 = vpop.f32.mrf.mxu2  ;;  %v616_v60 = vadd.f32 0.5, %v584_v44  ;;  %v593_v5 = vmul.f32 0.5, %v1076_v56  ;;  %1083 = vtanh.f32 %v514_v59  ;;  %v464_v16 = vpop.f32.mrf.mxu3 }
  0xd4   : > { %667 = vrot.lane.b32.xlu1 %v600_v28, %s1171_s4  ;;  %715 = vrot.lane.b32.xlu0 %v624_v29, %s1171_s4  ;;  %v426_v62 = vpop.f32.mrf.mxu1  ;;  %v1377_v58 = vadd.f32 %v1258_v21, %v444_v39  ;;  %v602_v13 = vadd.f32 0.5, %v570_v1  ;;  %v406_v20 = vpop.f32.mrf.mxu0  ;;  %v1401_v37 = vadd.f32 %v1258_v21, %v464_v16 }
  0xd5   : > { %v1386_v7 = vadd.f32 %v1258_v21, %v426_v62  ;;  %v625_v17 = vadd.f32 0.5, %v593_v5  ;;  %v1396_v29 = vadd.f32 %v1258_v21, %v406_v20 }
  0xd6   : > { %v1078_v63 = vpop.eup %1077  ;;  %v523_v12 = vmul.f32 0.5, %v1377_v58  ;;  %v531_v52 = vmul.f32 0.5, %v1401_v37 }
  0xd7   : > { %v586_v10 = vmul.f32 0.5, %v1078_v63  ;;  %v1080_v15 = vpop.eup %1079  ;;  %v516_v22 = vmul.f32 0.5, %v1386_v7  ;;  %v508_v44 = vmul.f32 0.5, %v1396_v29 }
  0xd8   : > { %v1082_v19 = vpop.eup %1081  ;;  %v579_v28 = vmul.f32 0.5, %v1080_v15 }
  0xd9   : > { %v618_v23 = vadd.f32 0.5, %v586_v10  ;;  %v1084_v26 = vpop.eup %1083  ;;  %v571_v35 = vmul.f32 0.5, %v1082_v19 }
  0xda   : > { %v578_v39 = vmul.f32 0.5, %v1084_v26  ;;  %v611_v41 = vadd.f32 0.5, %v579_v28 }
  0xdb   : > { %701 = vrot.lane.b32.xlu2 %v617_v48, %s1171_s4  ;;  %v446_v0 = vpop.f32.mrf.mxu2  ;;  %v603_v45 = vadd.f32 0.5, %v571_v35  ;;  %v466_v54 = vpop.f32.mrf.mxu3 }
  0xdc   : > { %699 = vrot.lane.b32.xlu1 %v616_v60, %s1171_s4  ;;  %685 = vrot.lane.b32.xlu0 %v609_v55, %s1171_s4  ;;  %v1383_v3 = vadd.f32 %v1258_v21, %v446_v0  ;;  %v610_v55 = vadd.f32 0.5, %v578_v39  ;;  %v1410_v62 = vadd.f32 %v1258_v21, %v466_v54 }
  0xde   : > { %v524_v8 = vmul.f32 0.5, %v1383_v3 }
  0xe0   : > { %1085 = vtanh.f32 %v524_v8  ;;  %v532_v8 = vmul.f32 0.5, %v1410_v62 }
  0xe1   : > { %1087 = vtanh.f32 %v523_v12 }
  0xe2   : > { %1089 = vtanh.f32 %v516_v22 }
  0xe3   : > { %671 = vrot.lane.b32.xlu2 %v602_v13, %s1171_s4  ;;  %1091 = vtanh.f32 %v530_v40 }
  0xe4   : > { %717 = vrot.lane.b32.xlu1 %v625_v17, %s1171_s4  ;;  %703 = vrot.lane.b32.xlu0 %v618_v23, %s1171_s4  ;;  %1093 = vtanh.f32 %v508_v44 }
  0xe5   : > { %1095 = vtanh.f32 %v531_v52 }
  0xe6   : > { %v1086_v43 = vpop.eup %1085  ;;  %1097 = vtanh.f32 %v532_v8 }
  0xe7   : > { %v1088_v48 = vpop.eup %1087  ;;  %v588_v59 = vmul.f32 0.5, %v1086_v43  ;;  %1099 = vtanh.f32 %v1264_v25 }
  0xe8   : > { %v1090_v56 = vpop.eup %1089  ;;  %v587_v60 = vmul.f32 0.5, %v1088_v48  ;;  %1101 = vtanh.f32 %v1281_v46 }
  0xe9   : > { %v580_v63 = vmul.f32 0.5, %v1090_v56  ;;  %v620_v0 = vadd.f32 0.5, %v588_v59  ;;  %v1092_v5 = vpop.eup %1091  ;;  %1103 = vtanh.f32 %v1303_v2 }
  0xea   : > { %v619_v1 = vadd.f32 0.5, %v587_v60  ;;  %v1094_v10 = vpop.eup %1093  ;;  %v594_v15 = vmul.f32 0.5, %v1092_v5  ;;  %1105 = vtanh.f32 %v1261_v24 }
  0xeb   : > { %689 = vrot.lane.b32.xlu2 %v611_v41, %s1171_s4  ;;  %v612_v12 = vadd.f32 0.5, %v580_v63  ;;  %v1096_v13 = vpop.eup %1095  ;;  %v572_v21 = vmul.f32 0.5, %v1094_v10  ;;  %1107 = vtanh.f32 %v1269_v30 }
  0xec   : > { %687 = vrot.lane.b32.xlu1 %v610_v55, %s1171_s4  ;;  %673 = vrot.lane.b32.xlu0 %v603_v45, %s1171_s4  ;;  %v595_v16 = vmul.f32 0.5, %v1096_v13  ;;  %v626_v17 = vadd.f32 0.5, %v594_v15  ;;  %v1098_v22 = vpop.eup %1097  ;;  %1109 = vtanh.f32 %v1310_v6 }
  0xed   : > { %v604_v19 = vadd.f32 0.5, %v572_v21  ;;  %v596_v23 = vmul.f32 0.5, %v1098_v22  ;;  %v1100_v28 = vpop.eup %1099  ;;  %1111 = vtanh.f32 %v1272_v31 }
  0xee   : > { %v627_v20 = vadd.f32 0.5, %v595_v16  ;;  %v1102_v25 = vpop.eup %1101  ;;  %1113 = vtanh.f32 %v1275_v34 }
  0xef   : > { %v628_v26 = vadd.f32 0.5, %v596_v23  ;;  %v1104_v43 = vpop.eup %1103  ;;  %1115 = vtanh.f32 %v1326_v33 }
  0xf0   : > { %v1106_v45 = vpop.eup %1105  ;;  %1117 = vtanh.f32 %v1284_v47 }
  0xf1   : > { %v1108_v24 = vpop.eup %1107  ;;  %1119 = vtanh.f32 %v1288_v50 }
  0xf2   : > { %v1110_v2 = vpop.eup %1109  ;;  %1121 = vtanh.f32 %v1338_v53 }
  0xf3   : > { %707 = vrot.lane.b32.xlu2 %v620_v0, %s1171_s4  ;;  %v1112_v56 = vpop.eup %1111  ;;  %1123 = vtanh.f32 %v1292_v51 }
  0xf4   : > { %705 = vrot.lane.b32.xlu1 %v619_v1, %s1171_s4  ;;  %691 = vrot.lane.b32.xlu0 %v612_v12, %s1171_s4  ;;  %v1114_v31 = vpop.eup %1113  ;;  %1125 = vtanh.f32 %v1299_v61 }
  0xf5   : > { %v1116_v63 = vpop.eup %1115  ;;  %1127 = vtanh.f32 %v1347_v9 }
  0xf6   : > { %v1118_v0 = vpop.eup %1117  ;;  %1129 = vtanh.f32 %v1307_v4 }
  0xf7   : > { %v1120_v10 = vpop.eup %1119  ;;  %1131 = vtanh.f32 %v1317_v18 }
  0xf8   : > { %v1122_v50 = vpop.eup %1121  ;;  %1133 = vtanh.f32 %v1362_v36 }
  0xf9   : > { %v1124_v13 = vpop.eup %1123  ;;  %1135 = vtanh.f32 %v1323_v32 }
  0xfa   : > { %1137 = vtanh.f32 %v1341_v57 }
  0xfb   : > { %719 = vrot.lane.b32.xlu2 %v626_v17, %s1171_s4  ;;  %v1126_v17 = vpop.eup %1125  ;;  %1139 = vtanh.f32 %v1383_v3 }
  0xfc   : > { %675 = vrot.lane.b32.xlu1 %v604_v19, %s1171_s4  ;;  %721 = vrot.lane.b32.xlu0 %v627_v20, %s1171_s4  ;;  %v1128_v61 = vpop.eup %1127  ;;  %1141 = vtanh.f32 %v1333_v49 }
  0xfd   : > { %v1130_v20 = vpop.eup %1129  ;;  %1143 = vtanh.f32 %v1350_v11 }
  0xfe   : > { %1145 = vtanh.f32 %v1392_v27 }
  0xff   : > { %1147 = vtanh.f32 %v1356_v14 }
 0x100   : > { %1149 = vtanh.f32 %v1371_v42 }
 0x101   : > { %1151 = vtanh.f32 %v1366_v38 }
 0x102   : > { %1153 = vtanh.f32 %v1377_v58 }
 0x103   : > { %1155 = vtanh.f32 %v1386_v7 }
 0x104   : > { %723 = vrot.lane.b32.xlu1 %v628_v26, %s1171_s4  ;;  %1157 = vtanh.f32 %v1396_v29 }
 0x105   : > { %1159 = vtanh.f32 %v1401_v37 }
 0x106   : > { %1161 = vtanh.f32 %v1410_v62 }
 0x107   : > { %v678_v35 = vpop.permute.xlu2 %677 }
 0x108   : > { %v765_v39 = vmul.f32 %v1100_v28, %v678_v35  ;;  %v1132_v28 = vpop.eup %1131 }
 0x109   : > { %v1134_v18 = vpop.eup %1133 }
 0x10a   : > { %798 = vst.msk [vmem:[%s1425_s8 + $0x40] sm:$0xff] %vm789_vm1, %v765_v39  ;;  %v1136_v39 = vpop.eup %1135 }
 0x115   : > { %v696_v40 = vpop.permute.xlu2 %695 }
 0x116   : > { %v774_v41 = vmul.f32 %v1102_v25, %v696_v40 }
 0x118   : > { %807 = vst.msk [vmem:[%s1425_s8 + $0x88] sm:$0xff] %vm789_vm1, %v774_v41 }
 0x11d   : > { %v714_v44 = vpop.permute.xlu2 %713 }
 0x11e   : > { %v783_v48 = vmul.f32 %v1104_v43, %v714_v44  ;;  %v662_v52 = vpop.permute.xlu0 %661  ;;  %v1138_v43 = vpop.eup %1137 }
 0x11f   : > { %v757_v46 = vmul.f32 %v1106_v45, %v662_v52  ;;  %v1140_v57 = vpop.eup %1139 }
 0x120   : > { %816 = vst.msk [vmem:[%s1425_s8 + $0xd0] sm:$0xff] %vm789_vm1, %v783_v48  ;;  %v1142_v45 = vpop.eup %1141 }
 0x121   : > { %790 = vst.msk [vmem:[%s1425_s8] sm:$0xff] %vm789_vm1, %v757_v46 }
 0x125   : > { %v694_v54 = vpop.permute.xlu1 %693  ;;  %v684_v55 = vpop.permute.xlu2 %683 }
 0x126   : > { %v773_v30 = vmul.f32 %v1108_v24, %v694_v54  ;;  %v768_v59 = vmul.f32 %v1110_v2, %v684_v55  ;;  %v710_v6 = vpop.permute.xlu0 %709  ;;  %v1144_v24 = vpop.eup %1143 }
 0x127   : > { %v781_v60 = vmul.f32 %v1112_v56, %v710_v6  ;;  %v1146_v11 = vpop.eup %1145 }
 0x128   : > { %806 = vst.msk [vmem:[%s1425_s8 + $0x80] sm:$0xff] %vm789_vm1, %v773_v30  ;;  %v1148_v54 = vpop.eup %1147 }
 0x129   : > { %801 = vst.msk [vmem:[%s1425_s8 + $0x58] sm:$0xff] %vm789_vm1, %v768_v59  ;;  %v1150_v59 = vpop.eup %1149 }
 0x12a   : > { %814 = vst.msk [vmem:[%s1425_s8 + $0xc0] sm:$0xff] %vm789_vm1, %v781_v60  ;;  %v1152_v6 = vpop.eup %1151 }
 0x12b   : > { %v1154_v38 = vpop.eup %1153 }
 0x12d   : > { %v670_v34 = vpop.permute.xlu2 %669 }
 0x12e   : > { %v712_v1 = vpop.permute.xlu1 %711  ;;  %v761_v33 = vmul.f32 %v1116_v63, %v670_v34  ;;  %v664_v5 = vpop.permute.xlu0 %663 }
 0x12f   : > { %v782_v47 = vmul.f32 %v1118_v0, %v712_v1  ;;  %v758_v8 = vmul.f32 %v1114_v31, %v664_v5  ;;  %v1156_v34 = vpop.eup %1155 }
 0x130   : > { %794 = vst.msk [vmem:[%s1425_s8 + $0x20] sm:$0xff] %vm789_vm1, %v761_v33  ;;  %v1158_v58 = vpop.eup %1157 }
 0x131   : > { %815 = vst.msk [vmem:[%s1425_s8 + $0xc8] sm:$0xff] %vm789_vm1, %v782_v47  ;;  %v1160_v7 = vpop.eup %1159 }
 0x132   : > { %791 = vst.msk [vmem:[%s1425_s8 + $0x8] sm:$0xff] %vm789_vm1, %v758_v8  ;;  %v1162_v29 = vpop.eup %1161 }
 0x135   : > { %v702_v12 = vpop.permute.xlu2 %701 }
 0x136   : > { %v777_v53 = vmul.f32 %v1122_v50, %v702_v12  ;;  %v666_v15 = vpop.permute.xlu1 %665  ;;  %v680_v21 = vpop.permute.xlu0 %679 }
 0x137   : > { %v759_v51 = vmul.f32 %v1124_v13, %v666_v15  ;;  %v766_v16 = vmul.f32 %v1120_v10, %v680_v21 }
 0x138   : > { %810 = vst.msk [vmem:[%s1425_s8 + $0xa0] sm:$0xff] %vm789_vm1, %v777_v53 }
 0x139   : > { %792 = vst.msk [vmem:[%s1425_s8 + $0x10] sm:$0xff] %vm789_vm1, %v759_v51 }
 0x13a   : > { %799 = vst.msk [vmem:[%s1425_s8 + $0x48] sm:$0xff] %vm789_vm1, %v766_v16 }
 0x13d   : > { %v672_v19 = vpop.permute.xlu2 %671 }
 0x13e   : > { %v762_v9 = vmul.f32 %v1128_v61, %v672_v19  ;;  %v682_v22 = vpop.permute.xlu1 %681  ;;  %v698_v23 = vpop.permute.xlu0 %697 }
 0x13f   : > { %v767_v4 = vmul.f32 %v1126_v17, %v682_v22  ;;  %v775_v26 = vmul.f32 %v1130_v20, %v698_v23 }
 0x140   : > { %795 = vst.msk [vmem:[%s1425_s8 + $0x28] sm:$0xff] %vm789_vm1, %v762_v9 }
 0x141   : > { %800 = vst.msk [vmem:[%s1425_s8 + $0x50] sm:$0xff] %vm789_vm1, %v767_v4 }
 0x142   : > { %808 = vst.msk [vmem:[%s1425_s8 + $0x90] sm:$0xff] %vm789_vm1, %v775_v26 }
 0x145   : > { %v690_v35 = vpop.permute.xlu2 %689 }
 0x146   : > { %v771_v36 = vmul.f32 %v1134_v18, %v690_v35  ;;  %v668_v25 = vpop.permute.xlu1 %667  ;;  %v716_v40 = vpop.permute.xlu0 %715 }
 0x147   : > { %v760_v32 = vmul.f32 %v1132_v28, %v668_v25  ;;  %v784_v41 = vmul.f32 %v1136_v39, %v716_v40 }
 0x148   : > { %804 = vst.msk [vmem:[%s1425_s8 + $0x70] sm:$0xff] %vm789_vm1, %v771_v36 }
 0x149   : > { %793 = vst.msk [vmem:[%s1425_s8 + $0x18] sm:$0xff] %vm789_vm1, %v760_v32 }
 0x14a   : > { %817 = vst.msk [vmem:[%s1425_s8 + $0xd8] sm:$0xff] %vm789_vm1, %v784_v41 }
 0x14d   : > { %v708_v44 = vpop.permute.xlu2 %707 }
 0x14e   : > { %v780_v3 = vmul.f32 %v1140_v57, %v708_v44  ;;  %v700_v48 = vpop.permute.xlu1 %699  ;;  %v686_v52 = vpop.permute.xlu0 %685 }
 0x14f   : > { %v776_v49 = vmul.f32 %v1138_v43, %v700_v48  ;;  %v769_v46 = vmul.f32 %v1142_v45, %v686_v52 }
 0x150   : > { %813 = vst.msk [vmem:[%s1425_s8 + $0xb8] sm:$0xff] %vm789_vm1, %v780_v3 }
 0x151   : > { %809 = vst.msk [vmem:[%s1425_s8 + $0x98] sm:$0xff] %vm789_vm1, %v776_v49 }
 0x152   : > { %802 = vst.msk [vmem:[%s1425_s8 + $0x60] sm:$0xff] %vm789_vm1, %v769_v46 }
 0x155   : > { %v720_v2 = vpop.permute.xlu2 %719 }
 0x156   : > { %v786_v55 = vmul.f32 %v1146_v11, %v720_v2  ;;  %v718_v56 = vpop.permute.xlu1 %717  ;;  %v704_v27 = vpop.permute.xlu0 %703 }
 0x157   : > { %v785_v14 = vmul.f32 %v1144_v24, %v718_v56  ;;  %v778_v30 = vmul.f32 %v1148_v54, %v704_v27 }
 0x158   : > { %819 = vst.msk [vmem:[%s1425_s8 + $0xe8] sm:$0xff] %vm789_vm1, %v786_v55 }
 0x159   : > { %818 = vst.msk [vmem:[%s1425_s8 + $0xe0] sm:$0xff] %vm789_vm1, %v785_v14 }
 0x15a   : > { %811 = vst.msk [vmem:[%s1425_s8 + $0xa8] sm:$0xff] %vm789_vm1, %v778_v30 }
 0x15e   : > { %v688_v60 = vpop.permute.xlu1 %687  ;;  %v674_v31 = vpop.permute.xlu0 %673 }
 0x15f   : > { %v770_v42 = vmul.f32 %v1150_v59, %v688_v60  ;;  %v763_v63 = vmul.f32 %v1152_v6, %v674_v31 }
 0x161   : > { %803 = vst.msk [vmem:[%s1425_s8 + $0x68] sm:$0xff] %vm789_vm1, %v770_v42 }
 0x162   : > { %796 = vst.msk [vmem:[%s1425_s8 + $0x30] sm:$0xff] %vm789_vm1, %v763_v63 }
 0x166   : > { %v706_v0 = vpop.permute.xlu1 %705  ;;  %v692_v1 = vpop.permute.xlu0 %691 }
 0x167   : > { %v779_v33 = vmul.f32 %v1154_v38, %v706_v0  ;;  %v772_v5 = vmul.f32 %v1156_v34, %v692_v1 }
 0x169   : > { %812 = vst.msk [vmem:[%s1425_s8 + $0xb0] sm:$0xff] %vm789_vm1, %v779_v33 }
 0x16a   : > { %805 = vst.msk [vmem:[%s1425_s8 + $0x78] sm:$0xff] %vm789_vm1, %v772_v5 }
 0x16e   : > { %v676_v47 = vpop.permute.xlu1 %675  ;;  %v722_v8 = vpop.permute.xlu0 %721 }
 0x16f   : > { %v764_v10 = vmul.f32 %v1158_v58, %v676_v47  ;;  %v787_v50 = vmul.f32 %v1160_v7, %v722_v8 }
 0x171   : > { %797 = vst.msk [vmem:[%s1425_s8 + $0x38] sm:$0xff] %vm789_vm1, %v764_v10 }
 0x172   : > { %820 = vst.msk [vmem:[%s1425_s8 + $0xf0] sm:$0xff] %vm789_vm1, %v787_v50 }
 0x176   : > { %v724_v12 = vpop.permute.xlu1 %723 }
 0x177   : > { %v788_v13 = vmul.f32 %v1162_v29, %v724_v12 }
 0x179   : > { %821 = vst.msk [vmem:[%s1425_s8 + $0xf8] sm:$0xff] %vm789_vm1, %v788_v13 }
 0x17a PF: > { %s13_s12 = sadd.s32 1, %s1169_s12  }
 0x17b   : > { %p10_p4 = scmp.ge.s32.totalorder %s13_s12, 4  }
 0x17d   :  { %12 = sbr.rel (!%p10_p4) target bundleno = 1 (0x1), region = 62 }

// kernel: tile.18
= control target key start
LH: loop header
LB: loop body
LE: loop exit
PB: predicated region body
PF: predicated region fallthrough
CT: control target
= control target key end

     0   :  { %s22_s0 = inlined_call_operand.vmem [shape: f32[32], index: 0, kind: input, shape index: {}]   ;;  %s23_s1 = inlined_call_operand.vmem [shape: f32[2,32], index: 1, kind: output, shape index: {}]  }
   0x1   :  { %v4_v0 = vld [vmem:[%s22_s0] ss:$0 sm:$0xff] }
   0x2   :  { %5 = vst [vmem:[%s23_s1] sm:$0x3] %v4_v0 }

// kernel: tile.19
= control target key start
LH: loop header
LB: loop body
LE: loop exit
PB: predicated region body
PF: predicated region fallthrough
CT: control target
= control target key end

     0   :  { %vm7_vm0 = vcmask 261120   ;;  %vm13_vm1 = vcmask 523520   ;;  %s39_s0 = inlined_call_operand.vmem [shape: f32[2,32], index: 0, kind: input, shape index: {}]   ;;  %s40_s1 = inlined_call_operand.vmem [shape: f32[64], index: 1, kind: output, shape index: {}]  }
   0x1   :  { %v4_v0 = vld [vmem:[%s39_s0] sm:$0x3]  ;;  %s22_s0 = smov 32  }
   0x2   :  { %5 = vst [vmem:[#allocation1] sm:$0x3] %v4_v0 }
   0x9   :  { %v10_v1 = vld [vmem:[#allocation1 + $0x1] sm:$0x1]   ;;  %v6_v2 = vld [vmem:[#allocation1] sm:$0x1]  }
   0xa   :  { %11 = vrot.lane.b32.xlu0 %v10_v1, %s22_s0  ;;  %8 = vst.msk [vmem:[#allocation0] sm:$0x1] %vm7_vm0, %v6_v2  }
  0x7c   :  { %v12_v3 = vpop.permute.xlu0 %11  }
  0x7d   :  { %14 = vst.msk [vmem:[#allocation0] sm:$0x1] %vm13_vm1, %v12_v3  }
  0x84   :  { %v17_v4 = vld [vmem:[#allocation0] sm:$0x1] }
  0x85   :  { %20 = vst [vmem:[%s40_s1] sm:$0x1] %v17_v4 }

// kernel: tile.13
= control target key start
LH: loop header
LB: loop body
LE: loop exit
PB: predicated region body
PF: predicated region fallthrough
CT: control target
= control target key end

     0   :  { %s22_s0 = inlined_call_operand.vmem [shape: f32[32], index: 0, kind: input, shape index: {}]   ;;  %s23_s1 = inlined_call_operand.vmem [shape: f32[3,32], index: 1, kind: output, shape index: {}]  }
   0x1   :  { %v4_v0 = vld [vmem:[%s22_s0] ss:$0 sm:$0xff] }
   0x2   :  { %5 = vst [vmem:[%s23_s1] sm:$0xf] %v4_v0 }

// kernel: tile.14
= control target key start
LH: loop header
LB: loop body
LE: loop exit
PB: predicated region body
PF: predicated region fallthrough
CT: control target
= control target key end

     0   :  { %s30_s8 = smov 32   ;;  %vm7_vm0 = vcmask 261120   ;;  %vm13_vm1 = vcmask 785920   ;;  %vm19_vm2 = vcmask 523520   ;;  %s47_s0 = inlined_call_operand.vmem [shape: f32[3,32], index: 0, kind: input, shape index: {}]   ;;  %s48_s1 = inlined_call_operand.vmem [shape: f32[96], index: 1, kind: output, shape index: {}]  }
   0x1   :  { %v4_v0 = vld [vmem:[%s47_s0] sm:$0xf]  ;;  %s29_s0 = smov 64  }
   0x2   :  { %5 = vst [vmem:[#allocation1] sm:$0xf] %v4_v0 }
   0x9   :  { %v10_v1 = vld [vmem:[#allocation1 + $0x2] sm:$0x1]   ;;  %v16_v2 = vld [vmem:[#allocation1 + $0x1] sm:$0x1]   ;;  %v6_v3 = vld [vmem:[#allocation1] sm:$0x1]  }
   0xa   :  { %11 = vrot.lane.b32.xlu0 %v10_v1, %s29_s0  ;;  %8 = vst.msk [vmem:[#allocation0] sm:$0x1] %vm7_vm0, %v6_v3  }
  0x12   :  { %17 = vrot.lane.b32.xlu0 %v16_v2, %s30_s8 }
  0x7c   :  { %v12_v4 = vpop.permute.xlu0 %11  }
  0x7d   :  { %14 = vst.msk [vmem:[#allocation0] sm:$0x1] %vm13_vm1, %v12_v4  }
  0x84   :  { %v18_v5 = vpop.permute.xlu0 %17  }
  0x85   :  { %20 = vst.msk [vmem:[#allocation0] sm:$0x1] %vm19_vm2, %v18_v5  }
  0x8c   :  { %v23_v6 = vld [vmem:[#allocation0] sm:$0x1] }
  0x8d   :  { %26 = vst [vmem:[%s48_s1] sm:$0x1] %v23_v6 }

// kernel: _lambda_.5
= control target key start
LH: loop header
LB: loop body
LE: loop exit
PB: predicated region body
PF: predicated region fallthrough
CT: control target
= control target key end

     0   :  { %s3723_s18 = smov 0   ;;  %s5042_s0 = inlined_call_operand.vmem [shape: bf16[512,160], index: 0, kind: input, shape index: {}]   ;;  %s5043_s1 = inlined_call_operand.vmem [shape: f32[512,32], index: 1, kind: input, shape index: {}]   ;;  %s5044_s2 = inlined_call_operand.vmem [shape: f32[1,32], index: 2, kind: input, shape index: {}]   ;;  %s5045_s3 = inlined_call_operand.vmem [shape: f32[1,32], index: 3, kind: input, shape index: {}]   ;;  %s5046_s4 = inlined_call_operand.vmem [shape: bf16[160,128], index: 4, kind: input, shape index: {}]   ;;  %s5047_s5 = inlined_call_operand.vmem [shape: f32[1,128], index: 5, kind: input, shape index: {}]   ;;  %s5048_s6 = inlined_call_operand.vmem [shape: bf16[64,64], index: 6, kind: input, shape index: {}]   ;;  %s5049_s7 = inlined_call_operand.vmem [shape: f32[1,64], index: 7, kind: input, shape index: {}]   ;;  %s5050_s8 = inlined_call_operand.vmem [shape: bf16[32,32], index: 8, kind: input, shape index: {}]   ;;  %s5051_s9 = inlined_call_operand.vmem [shape: f32[1,32], index: 9, kind: input, shape index: {}]   ;;  %s5052_s10 = inlined_call_operand.vmem [shape: f32[512,32], index: 10, kind: output, shape index: {0}]   ;;  %s5053_s11 = inlined_call_operand.vmem [shape: f32[512,32], index: 11, kind: output, shape index: {1}]   ;;  %s5054_s12 = inlined_call_operand.vmem [shape: f32[16,32], index: 12, kind: output, shape index: {2}]   ;;  %s5055_s13 = inlined_call_operand.vmem [shape: f32[16,32], index: 13, kind: output, shape index: {3}]   ;;  %s5056_s14 = inlined_call_operand.vmem [shape: f32[16,32], index: 14, kind: output, shape index: {4}]   ;;  %s5057_s15 = inlined_call_operand.vmem [shape: f32[16,32], index: 15, kind: output, shape index: {5}]  }
   0x1 LB: > { %s3729_s19 = sadd.s32 4294967295, %s3639_s18   ;;  %p3050_p0 = scmp.ge.s32.totalorder %s3639_s18, 1  ;;  %s3639_s18 = sphi %s3723_s18, %s26_s18  }
   0x2   : > { %p461_p1 = scmp.lt.s32.totalorder %s3639_s18, 3 }
   0x4   : > { %p462_p2 = pnand %p3050_p0, %p461_p1 }
   0x6   : > { %465 = sbr.rel (%p462_p2) target bundleno = 1381 (0x565), region = 60 }
   0xb   : > { %v3346_v0 = vld [vmem:[%s5046_s4 + $0x38] sm:$0xff]  ;;  %s3051_s22 = sshll.u32 %s3729_s19, 5  ;;  %v3348_v1 = vld [vmem:[%s5046_s4 + $0x48] sm:$0xff]  ;;  %v3345_v2 = vld [vmem:[%s5046_s4 + $0x30] sm:$0xff]  ;;  %vm838_vm0 = vcmask 261120   ;;  %vm1117_vm1 = vcmask 523264  }
   0xc   : > { %p537_p3 = scmp.lt.s32.totalorder %s3051_s22, 63  ;;  %887 = vmatpush.bf16.msra.mxu0 %v3346_v0  ;;  %982 = vmatpush.bf16.msra.mxu1 %v3348_v1  ;;  %v3347_v3 = vld [vmem:[%s5046_s4 + $0x40] sm:$0xff]  ;;  %v3344_v4 = vld [vmem:[%s5046_s4 + $0x28] sm:$0xff]  ;;  %v3342_v9 = vld [vmem:[%s5046_s4 + $0x18] sm:$0xff]  ;;  %s3642_s23 = smov 96  }
   0xd   : > { %v3343_v8 = vld [vmem:[%s5046_s4 + $0x20] sm:$0xff]  ;;  %v3341_v10 = vld [vmem:[%s5046_s4 + $0x10] sm:$0xff]  ;;  %v3340_v13 = vld [vmem:[%s5046_s4 + $0x8] sm:$0xff]  ;;  %p561_p4 = scmp.lt.s32.totalorder %s3729_s19, 1 }
   0xe   : > { %s5075_s22 = smov (!%p537_p3, %s3051_s22), 63  ;;  %v3339_v15 = vld [vmem:[%s5046_s4] sm:$0xff]  ;;  %v3352_v40 = vld [vmem:[%s5048_s6 + $0x18] sm:$0xff]  ;;  %v3351_v41 = vld [vmem:[%s5048_s6 + $0x10] sm:$0xff] }
   0xf   : > { %s3746_s29 = sshll.u32 %s5075_s22, 3  ;;  %1170 = vmatpush.bf16.msra.mxu2 %v3352_v40  ;;  %v3350_v42 = vld [vmem:[%s5048_s6 + $0x8] sm:$0xff]  ;;  %v3349_v43 = vld [vmem:[%s5048_s6] sm:$0xff]  ;;  %s3641_s22 = smov 64  }
  0x10   : > { %888 = vmatpush.bf16.msra.mxu0 %v3345_v2  ;;  %s3755_s21 = scalar_lea.vmem %s5042_s0, %s3746_s29  ;;  %983 = vmatpush.bf16.msra.mxu1 %v3347_v3  ;;  %v3819_v55 = vld [vmem:[%s5047_s5] ss:$0 sm:$0xff]  ;;  %s4230_s30 = scalar_lea.vmem %s5043_s1, %s3746_s29 }
  0x11   : > { %v3307_v5 = vld [vmem:[%s3755_s21 + $0x4] sm:$0xf]  ;;  %v3068_v6 = vld [vmem:[%s3755_s21 + $0x8] sm:$0xf0]  ;;  %v3309_v11 = vld [vmem:[%s3755_s21 + $0x14] sm:$0xf]  ;;  %s4262_s28 = scalar_lea.vmem %s5053_s11, %s3746_s29  ;;  %s4532_s24 = scalar_lea.vmem %s5052_s10, %s3746_s29 }
  0x12   : > { %v3071_v7 = vor.u32 %v3307_v5, %v3068_v6  ;;  %v3076_v12 = vld [vmem:[%s3755_s21 + $0x18] sm:$0xf0]  ;;  %v3066_v16 = vld [vmem:[%s3755_s21] sm:$0xf]  ;;  %v3308_v17 = vld [vmem:[%s3755_s21 + $0x4] sm:$0xf0] }
  0x13   : > { %v3079_v14 = vor.u32 %v3309_v11, %v3076_v12  ;;  %v3067_v18 = vor.u32 %v3308_v17, %v3066_v16  ;;  %v3311_v19 = vld [vmem:[%s3755_s21 + $0x24] sm:$0xf]  ;;  %v3084_v20 = vld [vmem:[%s3755_s21 + $0x28] sm:$0xf0]  ;;  %v3074_v22 = vld [vmem:[%s3755_s21 + $0x10] sm:$0xf]  ;;  %1171 = vmatpush.bf16.msra.mxu2 %v3351_v41 }
  0x14   : > { %889 = vmatpush.bf16.msra.mxu0 %v3344_v4  ;;  %3232 = vmatmul.msk.bf16.vlgmr.msra.gmra.mxu1 %vm838_vm0, %v3071_v7  ;;  %v3087_v21 = vor.u32 %v3311_v19, %v3084_v20  ;;  %v3310_v23 = vld [vmem:[%s3755_s21 + $0x14] sm:$0xf0]  ;;  %v3313_v25 = vld [vmem:[%s3755_s21 + $0x34] sm:$0xf]  ;;  %v3092_v26 = vld [vmem:[%s3755_s21 + $0x38] sm:$0xf0] }
  0x15   : > { %v3075_v24 = vor.u32 %v3310_v23, %v3074_v22  ;;  %v3095_v27 = vor.u32 %v3313_v25, %v3092_v26  ;;  %v3082_v28 = vld [vmem:[%s3755_s21 + $0x20] sm:$0xf]  ;;  %v3312_v29 = vld [vmem:[%s3755_s21 + $0x24] sm:$0xf0]  ;;  %v3315_v31 = vld [vmem:[%s3755_s21 + $0x44] sm:$0xf] }
  0x16   : > { %v3083_v30 = vor.u32 %v3312_v29, %v3082_v28  ;;  %v3100_v32 = vld [vmem:[%s3755_s21 + $0x48] sm:$0xf0]  ;;  %v3090_v34 = vld [vmem:[%s3755_s21 + $0x30] sm:$0xf]  ;;  %v3314_v35 = vld [vmem:[%s3755_s21 + $0x34] sm:$0xf0] }
  0x17   : > { %v3103_v33 = vor.u32 %v3315_v31, %v3100_v32  ;;  %v3091_v36 = vor.u32 %v3314_v35, %v3090_v34  ;;  %v3098_v37 = vld [vmem:[%s3755_s21 + $0x40] sm:$0xf]  ;;  %v3316_v38 = vld [vmem:[%s3755_s21 + $0x44] sm:$0xf0]  ;;  %1172 = vmatpush.bf16.msra.mxu2 %v3350_v42  ;;  %v3106_v45 = vld [vmem:[%s3755_s21 + $0x50] sm:$0xf] }
  0x18   : > { %890 = vmatpush.bf16.msra.mxu0 %v3343_v8  ;;  %v3099_v39 = vor.u32 %v3316_v38, %v3098_v37  ;;  %v3318_v46 = vld [vmem:[%s3755_s21 + $0x54] sm:$0xf0]  ;;  %v3317_v48 = vld [vmem:[%s3755_s21 + $0x54] sm:$0xf]  ;;  %v3108_v49 = vld [vmem:[%s3755_s21 + $0x58] sm:$0xf0] }
  0x19   : > { %v3107_v47 = vor.u32 %v3318_v46, %v3106_v45  ;;  %v3111_v50 = vor.u32 %v3317_v48, %v3108_v49  ;;  %v3114_v53 = vld [vmem:[%s3755_s21 + $0x60] sm:$0xf]  ;;  %v3320_v54 = vld [vmem:[%s3755_s21 + $0x64] sm:$0xf0]  ;;  %v3319_v57 = vld [vmem:[%s3755_s21 + $0x64] sm:$0xf] }
  0x1a   : > { %v3115_v56 = vor.u32 %v3320_v54, %v3114_v53  ;;  %v3116_v58 = vld [vmem:[%s3755_s21 + $0x68] sm:$0xf0]  ;;  %v3122_v5 = vld [vmem:[%s3755_s21 + $0x70] sm:$0xf]  ;;  %v3322_v6 = vld [vmem:[%s3755_s21 + $0x74] sm:$0xf0] }
  0x1b   : > { %1173 = vmatpush.bf16.msra.mxu2 %v3349_v43  ;;  %v3119_v60 = vor.u32 %v3319_v57, %v3116_v58  ;;  %v3123_v7 = vor.u32 %v3322_v6, %v3122_v5  ;;  %v3321_v8 = vld [vmem:[%s3755_s21 + $0x74] sm:$0xf]  ;;  %v3324_v28 = vld [vmem:[%s3755_s21 + $0x84] sm:$0xf0]  ;;  %v3323_v29 = vld [vmem:[%s3755_s21 + $0x84] sm:$0xf] }
  0x1c   : > { %891 = vmatpush.bf16.msra.mxu0 %v3342_v9  ;;  %v3124_v9 = vld [vmem:[%s3755_s21 + $0x78] sm:$0xf0]  ;;  %v3132_v32 = vld [vmem:[%s3755_s21 + $0x88] sm:$0xf0]  ;;  %v3138_v53 = vld [vmem:[%s3755_s21 + $0x90] sm:$0xf] }
  0x1d   : > { %v3326_v54 = vld [vmem:[%s3755_s21 + $0x94] sm:$0xf0]  ;;  %s5077_s19 = smov (!%p561_p4, %s3729_s19), 1 }
  0x1e   : > { %v3139_v57 = vor.u32 %v3326_v54, %v3138_v53 }
  0x20   : > { %892 = vmatpush.bf16.msra.mxu0 %v3341_v10  ;;  %v3127_v10 = vor.u32 %v3321_v8, %v3124_v9  ;;  %v3328_v8 = vld [vmem:[%s3755_s21 + $0xa4] sm:$0xf0] }
  0x24   : > { %893 = vmatpush.bf16.msra.mxu0 %v3340_v13  ;;  %3233 = vmatmul.msk.bf16.gmra.mxu1 %vm838_vm0, %v3079_v14 }
  0x28   : > { %894 = vmatpush.bf16.msra.mxu0 %v3339_v15 }
  0x2b   : > { %895 = vmatmul.bf16.vlgmr.msra.gmra.mxu0 %v3067_v18 }
  0x34   : > { %3234 = vmatmul.msk.bf16.gmra.mxu1 %vm838_vm0, %v3087_v21 }
  0x3b   : > { %900 = vmatmul.bf16.gmra.mxu0 %v3075_v24 }
  0x44   : > { %3235 = vmatmul.msk.bf16.gmra.mxu1 %vm838_vm0, %v3095_v27  ;;  %v3130_v27 = vld [vmem:[%s3755_s21 + $0x80] sm:$0xf] }
  0x45   : > { %v3131_v31 = vor.u32 %v3324_v28, %v3130_v27 }
  0x4b   : > { %905 = vmatmul.bf16.gmra.mxu0 %v3083_v30 }
  0x54   : > { %3236 = vmatmul.msk.bf16.gmra.mxu1 %vm838_vm0, %v3103_v33  ;;  %v3135_v33 = vor.u32 %v3323_v29, %v3132_v32 }
  0x5b   : > { %910 = vmatmul.bf16.gmra.mxu0 %v3091_v36 }
  0x64   : > { %3237 = vmatmul.msk.bf16.gmra.mxu1 %vm838_vm0, %v3111_v50 }
  0x6b   : > { %915 = vmatmul.bf16.gmra.mxu0 %v3099_v39 }
  0x74   : > { %3238 = vmatmul.msk.bf16.gmra.mxu1 %vm838_vm0, %v3119_v60 }
  0x7b   : > { %920 = vmatmul.bf16.gmra.mxu0 %v3107_v47 }
  0x84   : > { %3239 = vmatmul.msk.bf16.gmra.mxu1 %vm838_vm0, %v3127_v10 }
  0x8b   : > { %925 = vmatmul.bf16.gmra.mxu0 %v3115_v56 }
  0x91   : > { %v985_v44 = vpop.f32.mrf.mxu1 }
  0x94   : > { %3240 = vmatmul.msk.bf16.gmra.mxu1 %vm838_vm0, %v3135_v33 }
  0x99   : > { %v987_v51 = vpop.f32.mrf.mxu1 }
  0x9b   : > { %930 = vmatmul.bf16.gmra.mxu0 %v3123_v7  ;;  %v3146_v7 = vld [vmem:[%s3755_s21 + $0xa0] sm:$0xf] }
  0x9c   : > { %v3147_v10 = vor.u32 %v3328_v8, %v3146_v7 }
  0xa1   : > { %v990_v59 = vpop.f32.mrf.mxu1 }
  0xa8   : > { %v896_v52 = vpop.f32.mrf.mxu0 }
  0xa9   : > { %v897_v61 = vadd.f32 %v3819_v55, %v896_v52  ;;  %v992_v3 = vpop.f32.mrf.mxu1 }
  0xab   : > { %v3826_v0 = vadd.f32 %v985_v44, %v897_v61  ;;  %935 = vmatmul.bf16.gmra.mxu0 %v3131_v31  ;;  %v3325_v61 = vld [vmem:[%s3755_s21 + $0x94] sm:$0xf] }
  0xb0   : > { %v898_v62 = vpop.f32.mrf.mxu0 }
  0xb1   : > { %v899_v63 = vadd.f32 %v3819_v55, %v898_v62  ;;  %v995_v11 = vpop.f32.mrf.mxu1  ;;  %v3140_v62 = vld [vmem:[%s3755_s21 + $0x98] sm:$0xf0] }
  0xb3   : > { %v3828_v1 = vadd.f32 %v987_v51, %v899_v63  ;;  %v3143_v63 = vor.u32 %v3325_v61, %v3140_v62 }
  0xb5   : > { %v1065_v2 = vpack.c.bf16 %v3828_v1, %v3826_v0  ;;  %3241 = vmatmul.msk.bf16.gmra.mxu1 %vm838_vm0, %v3143_v63 }
  0xb7   : > { %3264 = vmatmul.msk.bf16.vlgmr.msra.gmra.mxu2 %vm1117_vm1, %v1065_v2 }
  0xb8   : > { %v901_v4 = vpop.f32.mrf.mxu0 }
  0xb9   : > { %v902_v12 = vadd.f32 %v3819_v55, %v901_v4  ;;  %v997_v19 = vpop.f32.mrf.mxu1 }
  0xbb   : > { %v3840_v15 = vadd.f32 %v990_v59, %v902_v12  ;;  %940 = vmatmul.bf16.gmra.mxu0 %v3139_v57 }
  0xc0   : > { %v903_v13 = vpop.f32.mrf.mxu0 }
  0xc1   : > { %v904_v14 = vadd.f32 %v3819_v55, %v903_v13  ;;  %v1000_v24 = vpop.f32.mrf.mxu1 }
  0xc3   : > { %v3842_v16 = vadd.f32 %v992_v3, %v904_v14  ;;  %v3327_v14 = vld [vmem:[%s3755_s21 + $0xa4] sm:$0xf] }
  0xc5   : > { %v1066_v17 = vpack.c.bf16 %v3842_v16, %v3840_v15 }
  0xc7   : > { %3265 = vmatmul.msk.bf16.gmra.mxu2 %vm1117_vm1, %v1066_v17  ;;  %v3148_v17 = vld [vmem:[%s3755_s21 + $0xa8] sm:$0xf0] }
  0xc8   : > { %v906_v18 = vpop.f32.mrf.mxu0 }
  0xc9   : > { %v907_v20 = vadd.f32 %v3819_v55, %v906_v18  ;;  %v1002_v34 = vpop.f32.mrf.mxu1  ;;  %v3151_v18 = vor.u32 %v3327_v14, %v3148_v17 }
  0xcb   : > { %v3848_v22 = vadd.f32 %v995_v11, %v907_v20  ;;  %945 = vmatmul.bf16.gmra.mxu0 %v3147_v10  ;;  %3242 = vmatmul.msk.bf16.gmra.mxu1 %vm838_vm0, %v3151_v18  ;;  %v3907_v20 = vld [vmem:[%s5049_s7] ss:$0 sm:$0xff]  ;;  %v3331_v18 = vld [vmem:[%s3755_s21 + $0xc4] sm:$0xf] }
  0xd0   : > { %v908_v21 = vpop.f32.mrf.mxu0 }
  0xd1   : > { %v909_v23 = vadd.f32 %v3819_v55, %v908_v21  ;;  %v1005_v41 = vpop.f32.mrf.mxu1 }
  0xd3   : > { %v3851_v25 = vadd.f32 %v997_v19, %v909_v23 }
  0xd5   : > { %v1067_v26 = vpack.c.bf16 %v3851_v25, %v3848_v22 }
  0xd7   : > { %3266 = vmatmul.msk.bf16.gmra.mxu2 %vm1117_vm1, %v1067_v26 }
  0xd8   : > { %v911_v30 = vpop.f32.mrf.mxu0 }
  0xd9   : > { %v912_v35 = vadd.f32 %v3819_v55, %v911_v30  ;;  %v1007_v45 = vpop.f32.mrf.mxu1 }
  0xdb   : > { %v3862_v37 = vadd.f32 %v1000_v24, %v912_v35 }
  0xe0   : > { %v913_v36 = vpop.f32.mrf.mxu0 }
  0xe1   : > { %v914_v38 = vadd.f32 %v3819_v55, %v913_v36  ;;  %v1010_v51 = vpop.f32.mrf.mxu1 }
  0xe3   : > { %v3865_v39 = vadd.f32 %v1002_v34, %v914_v38 }
  0xe5   : > { %v1068_v40 = vpack.c.bf16 %v3865_v39, %v3862_v37 }
  0xe7   : > { %3267 = vmatmul.msk.bf16.gmra.mxu2 %vm1117_vm1, %v1068_v40 }
  0xe8   : > { %v916_v42 = vpop.f32.mrf.mxu0 }
  0xe9   : > { %v917_v43 = vadd.f32 %v3819_v55, %v916_v42  ;;  %v1012_v60 = vpop.f32.mrf.mxu1 }
  0xeb   : > { %v3871_v46 = vadd.f32 %v1005_v41, %v917_v43 }
  0xf0   : > { %v918_v44 = vpop.f32.mrf.mxu0 }
  0xf1   : > { %v919_v47 = vadd.f32 %v3819_v55, %v918_v44  ;;  %v1015_v5 = vpop.f32.mrf.mxu1 }
  0xf3   : > { %v3874_v48 = vadd.f32 %v1007_v45, %v919_v47  ;;  %v3154_v45 = vld [vmem:[%s3755_s21 + $0xb0] sm:$0xf]  ;;  %v3330_v47 = vld [vmem:[%s3755_s21 + $0xb4] sm:$0xf0] }
  0xf5   : > { %v1069_v49 = vpack.c.bf16 %v3874_v48, %v3871_v46 }
  0xf7   : > { %3268 = vmatmul.msk.bf16.gmra.mxu2 %vm1117_vm1, %v1069_v49  ;;  %v3329_v49 = vld [vmem:[%s3755_s21 + $0xb4] sm:$0xf] }
  0xf8   : > { %v921_v50 = vpop.f32.mrf.mxu0 }
  0xf9   : > { %v922_v52 = vadd.f32 %v3819_v55, %v921_v50  ;;  %v1017_v13 = vpop.f32.mrf.mxu1  ;;  %v3155_v50 = vor.u32 %v3330_v47, %v3154_v45 }
  0xfb   : > { %v3882_v58 = vadd.f32 %v1010_v51, %v922_v52  ;;  %v3156_v51 = vld [vmem:[%s3755_s21 + $0xb8] sm:$0xf0]  ;;  %950 = vmatmul.bf16.gmra.mxu0 %v3155_v50 }
  0xfc   : > { %v3159_v52 = vor.u32 %v3329_v49, %v3156_v51 }
  0xfe   : > { %3243 = vmatmul.msk.bf16.gmra.mxu1 %vm838_vm0, %v3159_v52 }
 0x100   : > { %v923_v56 = vpop.f32.mrf.mxu0 }
 0x101   : > { %v924_v59 = vadd.f32 %v3819_v55, %v923_v56  ;;  %v1020_v27 = vpop.f32.mrf.mxu1 }
 0x103   : > { %v3887_v2 = vadd.f32 %v1012_v60, %v924_v59 }
 0x105   : > { %v1070_v3 = vpack.c.bf16 %v3887_v2, %v3882_v58 }
 0x107   : > { %3269 = vmatmul.msk.bf16.gmra.mxu2 %vm1117_vm1, %v1070_v3 }
 0x108   : > { %v926_v4 = vpop.f32.mrf.mxu0 }
 0x109   : > { %v927_v6 = vadd.f32 %v3819_v55, %v926_v4  ;;  %v1022_v34 = vpop.f32.mrf.mxu1 }
 0x10b   : > { %v3896_v11 = vadd.f32 %v1015_v5, %v927_v6 }
 0x110   : > { %v928_v9 = vpop.f32.mrf.mxu0 }
 0x111   : > { %v929_v12 = vadd.f32 %v3819_v55, %v928_v9  ;;  %v1025_v3 = vpop.f32.mrf.mxu1 }
 0x113   : > { %v3901_v19 = vadd.f32 %v1017_v13, %v929_v12  ;;  %v3162_v12 = vld [vmem:[%s3755_s21 + $0xc0] sm:$0xf]  ;;  %v3332_v13 = vld [vmem:[%s3755_s21 + $0xc4] sm:$0xf0] }
 0x114   : > { %v3163_v17 = vor.u32 %v3332_v13, %v3162_v12 }
 0x115   : > { %v1071_v21 = vpack.c.bf16 %v3901_v19, %v3896_v11 }
 0x116   : > { %955 = vmatmul.bf16.gmra.mxu0 %v3163_v17  ;;  %v3336_v17 = vld [vmem:[%s3755_s21 + $0xe4] sm:$0xf0] }
 0x117   : > { %3270 = vmatmul.msk.bf16.gmra.mxu2 %vm1117_vm1, %v1071_v21  ;;  %v3164_v21 = vld [vmem:[%s3755_s21 + $0xc8] sm:$0xf0] }
 0x118   : > { %v931_v24 = vpop.f32.mrf.mxu0 }
 0x119   : > { %v932_v28 = vadd.f32 %v3819_v55, %v931_v24  ;;  %v1027_v8 = vpop.f32.mrf.mxu1  ;;  %v3167_v24 = vor.u32 %v3331_v18, %v3164_v21 }
 0x11b   : > { %v3916_v32 = vadd.f32 %v1020_v27, %v932_v28  ;;  %3244 = vmatmul.msk.bf16.gmra.mxu1 %vm838_vm0, %v3167_v24 }
 0x120   : > { %v933_v30 = vpop.f32.mrf.mxu0 }
 0x121   : > { %v934_v33 = vadd.f32 %v3819_v55, %v933_v30 }
 0x123   : > { %v3920_v35 = vadd.f32 %v1022_v34, %v934_v33 }
 0x125   : > { %v1072_v36 = vpack.c.bf16 %v3920_v35, %v3916_v32 }
 0x127   : > { %3271 = vmatmul.msk.bf16.gmra.mxu2 %vm1117_vm1, %v1072_v36 }
 0x128   : > { %v936_v63 = vpop.f32.mrf.mxu0 }
 0x129   : > { %v937_v4 = vadd.f32 %v3819_v55, %v936_v63 }
 0x12b   : > { %v3945_v6 = vadd.f32 %v1025_v3, %v937_v4 }
 0x130   : > { %v938_v5 = vpop.f32.mrf.mxu0 }
 0x131   : > { %v939_v7 = vadd.f32 %v3819_v55, %v938_v5 }
 0x133   : > { %v3948_v9 = vadd.f32 %v1027_v8, %v939_v7 }
 0x135   : > { %5066 = vst [vmem:[#allocation2_spill] sm:$0xff] %v3948_v9  ;;  %v1073_v10 = vpack.c.bf16 %v3948_v9, %v3945_v6 }
 0x137   : > { %3272 = vmatmul.msk.bf16.gmra.mxu2 %vm1117_vm1, %v1073_v10 }
 0x138   : > { %v941_v14 = vpop.f32.mrf.mxu0 }
 0x13a   : > { %v1175_v23 = vpop.f32.mrf.mxu2 }
 0x13b   : > { %v1176_v26 = vadd.f32 %v3907_v20, %v1175_v23  ;;  %v1030_v23 = vpop.f32.mrf.mxu1 }
 0x13d   : > { %1607 = vrot.lane.b32.xlu0 %v1176_v26, %s3641_s22  ;;  %v942_v26 = vadd.f32 %v3819_v55, %v941_v14  ;;  %v3178_v14 = vld [vmem:[%s3755_s21 + $0xe0] sm:$0xf] }
 0x13e   : > { %v3179_v21 = vor.u32 %v3336_v17, %v3178_v14 }
 0x13f   : > { %v3959_v28 = vadd.f32 %v1030_v23, %v942_v26  ;;  %v3335_v26 = vld [vmem:[%s3755_s21 + $0xe4] sm:$0xf] }
 0x140   : > { %v943_v27 = vpop.f32.mrf.mxu0 }
 0x142   : > { %v1177_v29 = vpop.f32.mrf.mxu2 }
 0x143   : > { %v1178_v31 = vadd.f32 %v3907_v20, %v1177_v29  ;;  %v944_v29 = vadd.f32 %v3819_v55, %v943_v27  ;;  %v1032_v30 = vpop.f32.mrf.mxu1  ;;  %v3180_v27 = vld [vmem:[%s3755_s21 + $0xe8] sm:$0xf0] }
 0x145   : > { %1609 = vrot.lane.b32.xlu0 %v1178_v31, %s3641_s22  ;;  %v3962_v31 = vadd.f32 %v1032_v30, %v944_v29 }
 0x147   : > { %v1074_v34 = vpack.c.bf16 %v3962_v31, %v3959_v28 }
 0x148   : > { %v946_v45 = vpop.f32.mrf.mxu0 }
 0x149   : > { %3273 = vmatmul.msk.bf16.gmra.mxu2 %vm1117_vm1, %v1074_v34 }
 0x14a   : > { %v1180_v38 = vpop.f32.mrf.mxu2 }
 0x14b   : > { %v1181_v40 = vadd.f32 %v3907_v20, %v1180_v38  ;;  %v3170_v38 = vld [vmem:[%s3755_s21 + $0xd0] sm:$0xf]  ;;  %v1035_v50 = vpop.f32.mrf.mxu1 }
 0x14d   : > { %1611 = vrot.lane.b32.xlu1 %v1181_v40, %s3641_s22  ;;  %v3334_v40 = vld [vmem:[%s3755_s21 + $0xd4] sm:$0xf0] }
 0x152   : > { %v1182_v41 = vpop.f32.mrf.mxu2 }
 0x153   : > { %v1183_v42 = vadd.f32 %v3907_v20, %v1182_v41  ;;  %v3333_v41 = vld [vmem:[%s3755_s21 + $0xd4] sm:$0xf]  ;;  %v1037_v63 = vpop.f32.mrf.mxu1 }
 0x155   : > { %1613 = vrot.lane.b32.xlu1 %v1183_v42, %s3641_s22  ;;  %v3171_v42 = vor.u32 %v3334_v40, %v3170_v38 }
 0x157   : > { %960 = vmatmul.bf16.gmra.mxu0 %v3171_v42 }
 0x15a   : > { %v1185_v43 = vpop.f32.mrf.mxu2 }
 0x15b   : > { %v1186_v44 = vadd.f32 %v3907_v20, %v1185_v43  ;;  %v3172_v43 = vld [vmem:[%s3755_s21 + $0xd8] sm:$0xf0] }
 0x15c   : > { %v3175_v47 = vor.u32 %v3333_v41, %v3172_v43 }
 0x15d   : > { %1615 = vrot.lane.b32.xlu2 %v1186_v44, %s3641_s22 }
 0x15e   : > { %3245 = vmatmul.msk.bf16.gmra.mxu1 %vm838_vm0, %v3175_v47 }
 0x162   : > { %v1187_v53 = vpop.f32.mrf.mxu2 }
 0x163   : > { %v1188_v54 = vadd.f32 %v3907_v20, %v1187_v53  ;;  %v947_v53 = vadd.f32 %v3819_v55, %v946_v45 }
 0x165   : > { %1617 = vrot.lane.b32.xlu2 %v1188_v54, %s3641_s22 }
 0x167   : > { %965 = vmatmul.bf16.gmra.mxu0 %v3179_v21 }
 0x16a   : > { %v1190_v56 = vpop.f32.mrf.mxu2 }
 0x16b   : > { %v1191_v57 = vadd.f32 %v3907_v20, %v1190_v56 }
 0x16d   : > { %1619 = vrot.lane.b32.xlu0 %v1191_v57, %s3641_s22 }
 0x172   : > { %v1192_v59 = vpop.f32.mrf.mxu2 }
 0x173   : > { %v1193_v60 = vadd.f32 %v3907_v20, %v1192_v59  ;;  %v948_v59 = vpop.f32.mrf.mxu0 }
 0x175   : > { %1621 = vrot.lane.b32.xlu1 %v1193_v60, %s3641_s22 }
 0x17a   : > { %v1195_v61 = vpop.f32.mrf.mxu2 }
 0x17b   : > { %v1196_v62 = vadd.f32 %v3907_v20, %v1195_v61  ;;  %v3981_v61 = vadd.f32 %v1035_v50, %v947_v53 }
 0x17d   : > { %1623 = vrot.lane.b32.xlu1 %v1196_v62, %s3641_s22  ;;  %5067 = vst [vmem:[#allocation3_spill] sm:$0xff] %v3981_v61  ;;  %v949_v62 = vadd.f32 %v3819_v55, %v948_v59 }
 0x17f   : > { %v3984_v4 = vadd.f32 %v1037_v63, %v949_v62 }
 0x181   : > { %v1075_v10 = vpack.c.bf16 %v3984_v4, %v3981_v61 }
 0x182   : > { %v1197_v49 = vpop.f32.mrf.mxu2 }
 0x183   : > { %3274 = vmatmul.msk.bf16.gmra.mxu2 %vm1117_vm1, %v1075_v10  ;;  %v1198_v24 = vadd.f32 %v3907_v20, %v1197_v49 }
 0x18a   : > { %v1200_v5 = vpop.f32.mrf.mxu2 }
 0x18b   : > { %v1201_v45 = vadd.f32 %v3907_v20, %v1200_v5 }
 0x192   : > { %v1202_v42 = vpop.f32.mrf.mxu2 }
 0x193   : > { %v1203_v59 = vadd.f32 %v3907_v20, %v1202_v42 }
 0x1af   : > { %v1608_v33 = vpop.permute.xlu0 %1607 }
 0x1b0   : > { %v3967_v36 = vadd.f32 %v1608_v33, %v3826_v0  ;;  %v3183_v33 = vor.u32 %v3335_v26, %v3180_v27 }
 0x1b2   : > { %v1767_v44 = vmul.f32 0.5, %v3967_v36  ;;  %3246 = vmatmul.msk.bf16.gmra.mxu1 %vm838_vm0, %v3183_v33 }
 0x1b4   : > { %3370 = vtanh.f32 %v1767_v44 }
 0x1b7   : > { %v1616_v51 = vpop.permute.xlu2 %1615  ;;  %v1610_v52 = vpop.permute.xlu0 %1609 }
 0x1b8   : > { %v3978_v54 = vadd.f32 %v1610_v52, %v3828_v1  ;;  %v4006_v40 = vadd.f32 %v1616_v51, %v3848_v22 }
 0x1ba   : > { %v3371_v56 = vpop.eup %3370  ;;  %v1768_v57 = vmul.f32 0.5, %v3978_v54  ;;  %v1771_v47 = vmul.f32 0.5, %v4006_v40 }
 0x1bb   : > { %v1831_v60 = vmul.f32 0.5, %v3371_v56  ;;  %v1205_v56 = vpop.f32.mrf.mxu2 }
 0x1bc   : > { %3372 = vtanh.f32 %v1768_v57  ;;  %v1206_v5 = vadd.f32 %v3907_v20, %v1205_v56 }
 0x1bd   : > { %v1863_v3 = vadd.f32 0.5, %v1831_v60 }
 0x1bf   : > { %v1618_v7 = vpop.permute.xlu2 %1617  ;;  %v1612_v8 = vpop.permute.xlu1 %1611  ;;  %1927 = vrot.lane.b32.xlu2 %v1863_v3, %s3642_s23 }
 0x1c0   : > { %v3990_v12 = vadd.f32 %v1618_v7, %v3851_v25  ;;  %v3993_v13 = vadd.f32 %v1612_v8, %v3840_v15 }
 0x1c2   : > { %v1769_v18 = vmul.f32 0.5, %v3993_v13  ;;  %v3373_v23 = vpop.eup %3372  ;;  %v1772_v29 = vmul.f32 0.5, %v3990_v12 }
 0x1c3   : > { %v1832_v30 = vmul.f32 0.5, %v3373_v23  ;;  %v1207_v7 = vpop.f32.mrf.mxu2 }
 0x1c4   : > { %3374 = vtanh.f32 %v1769_v18  ;;  %v1208_v18 = vadd.f32 %v3907_v20, %v1207_v7 }
 0x1c5   : > { %v1864_v34 = vadd.f32 0.5, %v1832_v30  ;;  %3376 = vtanh.f32 %v1772_v29 }
 0x1c7   : > { %v1614_v38 = vpop.permute.xlu1 %1613  ;;  %1625 = vrot.lane.b32.xlu2 %v1198_v24, %s3641_s22  ;;  %1929 = vrot.lane.b32.xlu0 %v1864_v34, %s3642_s23 }
 0x1c8   : > { %v4009_v41 = vadd.f32 %v1614_v38, %v3842_v16 }
 0x1ca   : > { %v1770_v43 = vmul.f32 0.5, %v4009_v41  ;;  %v3375_v44 = vpop.eup %3374 }
 0x1cb   : > { %v1833_v49 = vmul.f32 0.5, %v3375_v44  ;;  %v3377_v50 = vpop.eup %3376  ;;  %v4029_v21 = vpop.f32.mrf.mxu2 }
 0x1cc   : > { %3378 = vtanh.f32 %v1770_v43  ;;  %v1836_v51 = vmul.f32 0.5, %v3377_v50  ;;  %v951_v44 = vpop.f32.mrf.mxu0  ;;  %v3338_v50 = vld [vmem:[%s3755_s21 + $0xf4] sm:$0xf0] }
 0x1cd   : > { %v1865_v52 = vadd.f32 0.5, %v1833_v49  ;;  %3380 = vtanh.f32 %v1771_v47  ;;  %v952_v47 = vadd.f32 %v3819_v55, %v951_v44  ;;  %v3186_v49 = vld [vmem:[%s3755_s21 + $0xf0] sm:$0xf] }
 0x1ce   : > { %v1868_v62 = vadd.f32 0.5, %v1836_v51  ;;  %v3187_v51 = vor.u32 %v3338_v50, %v3186_v49 }
 0x1cf   : > { %1627 = vrot.lane.b32.xlu2 %v1201_v45, %s3641_s22  ;;  %1931 = vrot.lane.b32.xlu0 %v1865_v52, %s3642_s23  ;;  %v1040_v45 = vpop.f32.mrf.mxu1 }
 0x1d0   : > { %970 = vmatmul.bf16.gmra.mxu0 %v3187_v51 }
 0x1d2   : > { %v3379_v53 = vpop.eup %3378 }
 0x1d3   : > { %v1834_v57 = vmul.f32 0.5, %v3379_v53  ;;  %v3381_v63 = vpop.eup %3380  ;;  %v1212_v33 = vpop.f32.mrf.mxu2  ;;  %v4043_v53 = vadd.f32 %v1040_v45, %v952_v47 }
 0x1d4   : > { %v1835_v3 = vmul.f32 0.5, %v3381_v63  ;;  %v1213_v38 = vadd.f32 %v3907_v20, %v1212_v33  ;;  %v953_v52 = vpop.f32.mrf.mxu0 }
 0x1d5   : > { %v1866_v60 = vadd.f32 0.5, %v1834_v57  ;;  %v954_v56 = vadd.f32 %v3819_v55, %v953_v52  ;;  %v3337_v57 = vld [vmem:[%s3755_s21 + $0xf4] sm:$0xf] }
 0x1d6   : > { %v1867_v8 = vadd.f32 0.5, %v1835_v3 }
 0x1d7   : > { %1933 = vrot.lane.b32.xlu1 %v1866_v60, %s3642_s23  ;;  %1937 = vrot.lane.b32.xlu2 %v1868_v62, %s3642_s23  ;;  %v1042_v60 = vpop.f32.mrf.mxu1 }
 0x1d8   : > { %1629 = vrot.lane.b32.xlu0 %v1203_v59, %s3641_s22  ;;  %v3188_v59 = vld [vmem:[%s3755_s21 + $0xf8] sm:$0xf0]  ;;  %v4048_v63 = vadd.f32 %v1042_v60, %v954_v56 }
 0x1d9   : > { %v3191_v62 = vor.u32 %v3337_v57, %v3188_v59 }
 0x1da   : > { %5068 = vst [vmem:[#allocation4_spill] sm:$0xff] %v4048_v63  ;;  %v1076_v3 = vpack.c.bf16 %v4048_v63, %v4043_v53 }
 0x1db   : > { %3247 = vmatmul.msk.bf16.gmra.mxu1 %vm838_vm0, %v3191_v62  ;;  %v4070_v47 = vpop.f32.mrf.mxu2 }
 0x1dc   : > { %3275 = vmatmul.msk.bf16.gmra.mxu2 %vm1117_vm1, %v1076_v3 }
 0x1df   : > { %1935 = vrot.lane.b32.xlu1 %v1867_v8, %s3642_s23  ;;  %v1620_v10 = vpop.permute.xlu0 %1619  ;;  %v956_v8 = vpop.f32.mrf.mxu0 }
 0x1e0   : > { %1631 = vrot.lane.b32.xlu0 %v1206_v5, %s3641_s22  ;;  %v4025_v14 = vadd.f32 %v1620_v10, %v3862_v37 }
 0x1e2   : > { %v1773_v17 = vmul.f32 0.5, %v4025_v14 }
 0x1e4   : > { %3382 = vtanh.f32 %v1773_v17  ;;  %v1045_v17 = vpop.f32.mrf.mxu1 }
 0x1e7   : > { %1633 = vrot.lane.b32.xlu1 %v1208_v18, %s3641_s22  ;;  %v1622_v23 = vpop.permute.xlu1 %1621 }
 0x1e8   : > { %v4033_v24 = vadd.f32 %v1622_v23, %v3865_v39  ;;  %v957_v23 = vadd.f32 %v3819_v55, %v956_v8 }
 0x1ea   : > { %v3383_v26 = vpop.eup %3382  ;;  %v1774_v27 = vmul.f32 0.5, %v4033_v24 }
 0x1eb   : > { %v1837_v29 = vmul.f32 0.5, %v3383_v26  ;;  %v958_v26 = vpop.f32.mrf.mxu0 }
 0x1ec   : > { %3384 = vtanh.f32 %v1774_v27  ;;  %v4059_v27 = vadd.f32 %v1045_v17, %v957_v23 }
 0x1ed   : > { %v1869_v30 = vadd.f32 0.5, %v1837_v29  ;;  %v959_v29 = vadd.f32 %v3819_v55, %v958_v26 }
 0x1ef   : > { %1939 = vrot.lane.b32.xlu0 %v1869_v30, %s3642_s23  ;;  %v1047_v30 = vpop.f32.mrf.mxu1  ;;  %v1624_v49 = vpop.permute.xlu1 %1623 }
 0x1f0   : > { %v4074_v52 = vadd.f32 %v1624_v49, %v3871_v46 }
 0x1f2   : > { %v3385_v34 = vpop.eup %3384 }
 0x1f3   : > { %v1838_v42 = vmul.f32 0.5, %v3385_v34  ;;  %v4062_v34 = vadd.f32 %v1047_v30, %v959_v29  ;;  %v961_v44 = vpop.f32.mrf.mxu0 }
 0x1f4   : > { %v962_v50 = vadd.f32 %v3819_v55, %v961_v44 }
 0x1f5   : > { %v1870_v43 = vadd.f32 0.5, %v1838_v42  ;;  %v1077_v42 = vpack.c.bf16 %v4062_v34, %v4059_v27 }
 0x1f7   : > { %1941 = vrot.lane.b32.xlu1 %v1870_v43, %s3642_s23  ;;  %1637 = vrot.lane.b32.xlu0 %v1213_v38, %s3641_s22  ;;  %v1050_v45 = vpop.f32.mrf.mxu1 }
 0x1f8   : > { %3276 = vmatmul.msk.bf16.gmra.mxu2 %vm1117_vm1, %v1077_v42  ;;  %v4076_v60 = vadd.f32 %v1050_v45, %v962_v50 }
 0x1fa   : > { %5069 = vst [vmem:[#allocation5_spill] sm:$0xff] %v4076_v60 }
 0x1fb   : > { %v963_v56 = vpop.f32.mrf.mxu0 }
 0x1fc   : > { %v964_v62 = vadd.f32 %v3819_v55, %v963_v56 }
 0x203   : > { %v966_v26 = vpop.f32.mrf.mxu0 }
 0x204   : > { %v967_v42 = vadd.f32 %v3819_v55, %v966_v26 }
 0x20b   : > { %v968_v50 = vpop.f32.mrf.mxu0 }
 0x219   : > { %v1928_v5 = vpop.permute.xlu2 %1927 }
 0x221   : > { %v1626_v7 = vpop.permute.xlu2 %1625 }
 0x222   : > { %v4055_v10 = vadd.f32 %v1626_v7, %v3874_v48  ;;  %v1052_v7 = vpop.f32.mrf.mxu1 }
 0x223   : > { %v4080_v8 = vadd.f32 %v1052_v7, %v964_v62 }
 0x224   : > { %v1776_v18 = vmul.f32 0.5, %v4055_v10 }
 0x225   : > { %v1078_v23 = vpack.c.bf16 %v4080_v8, %v4076_v60 }
 0x226   : > { %3386 = vtanh.f32 %v1776_v18  ;;  %v1217_v18 = vpop.f32.mrf.mxu2 }
 0x227   : > { %3388 = vtanh.f32 %v3967_v36  ;;  %3277 = vmatmul.msk.bf16.gmra.mxu2 %vm1117_vm1, %v1078_v23 }
 0x228   : > { %3390 = vtanh.f32 %v3978_v54  ;;  %v1775_v54 = vmul.f32 0.5, %v4074_v52 }
 0x229   : > { %v1628_v30 = vpop.permute.xlu2 %1627 }
 0x22a   : > { %3392 = vtanh.f32 %v1775_v54 }
 0x22b   : > { %3394 = vtanh.f32 %v3993_v13 }
 0x22c   : > { %v3387_v33 = vpop.eup %3386  ;;  %3396 = vtanh.f32 %v4009_v41 }
 0x22d   : > { %v1840_v38 = vmul.f32 0.5, %v3387_v33  ;;  %v3389_v51 = vpop.eup %3388  ;;  %v1211_v33 = vadd.f32 %v3907_v20, %v4029_v21  ;;  %3398 = vtanh.f32 %v4006_v40 }
 0x22e   : > { %v3391_v57 = vpop.eup %3390  ;;  %v2023_v36 = vmul.f32 %v3389_v51, %v1928_v5  ;;  %v1220_v45 = vpop.f32.mrf.mxu2  ;;  %3400 = vtanh.f32 %v3990_v12 }
 0x22f   : > { %v1872_v43 = vadd.f32 0.5, %v1840_v38  ;;  %v1055_v29 = vpop.f32.mrf.mxu1 }
 0x230   : > { %v3393_v38 = vpop.eup %3392  ;;  %v4096_v21 = vadd.f32 %v1055_v29, %v967_v42 }
 0x231   : > { %1945 = vrot.lane.b32.xlu0 %v1872_v43, %s3642_s23  ;;  %v4092_v43 = vadd.f32 %v1628_v30, %v3882_v58  ;;  %v3395_v44 = vpop.eup %3394  ;;  %v1839_v41 = vmul.f32 0.5, %v3393_v38  ;;  %v1938_v12 = vpop.permute.xlu2 %1937 }
 0x232   : > { %v3397_v49 = vpop.eup %3396 }
 0x233   : > { %v1777_v62 = vmul.f32 0.5, %v4092_v43  ;;  %v3399_v26 = vpop.eup %3398 }
 0x235   : > { %3402 = vtanh.f32 %v1777_v62 }
 0x239   : > { %v1930_v59 = vpop.permute.xlu0 %1929 }
 0x23a   : > { %v2024_v3 = vmul.f32 %v3391_v57, %v1930_v59  ;;  %v969_v59 = vadd.f32 %v3819_v55, %v968_v50  ;;  %v1218_v50 = vadd.f32 %v3907_v20, %v1217_v18 }
 0x23c   : > { %v2159_v17 = vpack.c.bf16 %v2024_v3, %v2023_v36  ;;  %v1057_v3 = vpop.f32.mrf.mxu1 }
 0x23d   : > { %v4104_v40 = vadd.f32 %v1057_v3, %v969_v59  ;;  %v1221_v3 = vadd.f32 %v3907_v20, %v1220_v45 }
 0x23e   : > { %2199 = vrot.lane.b32.xlu2 %v2159_v17, %s3641_s22  ;;  %v1871_v17 = vadd.f32 0.5, %v1839_v41 }
 0x23f   : > { %v1079_v23 = vpack.c.bf16 %v4104_v40, %v4096_v21 }
 0x241   : > { %v1932_v5 = vpop.permute.xlu0 %1931  ;;  %3278 = vmatmul.msk.bf16.gmra.mxu2 %vm1117_vm1, %v1079_v23 }
 0x242   : > { %v2025_v51 = vmul.f32 %v3395_v44, %v1932_v5  ;;  %v3401_v5 = vpop.eup %3400  ;;  %v1222_v44 = vpop.f32.mrf.mxu2 }
 0x243   : > { %v2028_v30 = vmul.f32 %v3401_v5, %v1938_v12  ;;  %v3403_v41 = vpop.eup %3402 }
 0x246   : > { %1635 = vrot.lane.b32.xlu2 %v1211_v33, %s3641_s22 }
 0x249   : > { %v1934_v13 = vpop.permute.xlu1 %1933 }
 0x24a   : > { %v2026_v56 = vmul.f32 %v3397_v49, %v1934_v13  ;;  %v1630_v57 = vpop.permute.xlu0 %1629  ;;  %v1216_v49 = vadd.f32 %v3907_v20, %v4070_v47  ;;  %v3354_v47 = vld [vmem:[%s5050_s8 + $0x8] sm:$0xff]  ;;  %v1225_v12 = vpop.f32.mrf.mxu2 }
 0x24b   : > { %v4102_v36 = vadd.f32 %v1630_v57, %v3887_v2  ;;  %v1841_v57 = vmul.f32 0.5, %v3403_v41  ;;  %2297 = vmatpush.bf16.msra.mxu3 %v3354_v47  ;;  %v1226_v47 = vadd.f32 %v3907_v20, %v1225_v12 }
 0x24c   : > { %v2160_v7 = vpack.c.bf16 %v2026_v56, %v2025_v51 }
 0x24d   : > { %v1778_v54 = vmul.f32 0.5, %v4102_v36 }
 0x24e   : > { %2201 = vrot.lane.b32.xlu1 %v2160_v7, %s3641_s22  ;;  %1943 = vrot.lane.b32.xlu2 %v1871_v17, %s3642_s23  ;;  %v3353_v7 = vld [vmem:[%s5050_s8] sm:$0xff]  ;;  %v1873_v17 = vadd.f32 0.5, %v1841_v57 }
 0x24f   : > { %3404 = vtanh.f32 %v1778_v54  ;;  %2298 = vmatpush.bf16.msra.mxu3 %v3353_v7 }
 0x251   : > { %v1936_v29 = vpop.permute.xlu1 %1935 }
 0x252   : > { %v2027_v33 = vmul.f32 %v3399_v26, %v1936_v29  ;;  %v1632_v38 = vpop.permute.xlu0 %1631  ;;  %v1223_v29 = vadd.f32 %v3907_v20, %v1222_v44 }
 0x253   : > { %v4113_v42 = vadd.f32 %v1632_v38, %v3896_v11  ;;  %v1227_v38 = vpop.f32.mrf.mxu2 }
 0x254   : > { %v2161_v13 = vpack.c.bf16 %v2028_v30, %v2027_v33  ;;  %v1228_v44 = vadd.f32 %v3907_v20, %v1227_v38 }
 0x255   : > { %v1779_v51 = vmul.f32 0.5, %v4113_v42  ;;  %v3405_v56 = vpop.eup %3404 }
 0x256   : > { %2203 = vrot.lane.b32.xlu0 %v2161_v13, %s3641_s22  ;;  %1639 = vrot.lane.b32.xlu1 %v1216_v49, %s3641_s22  ;;  %v1842_v62 = vmul.f32 0.5, %v3405_v56 }
 0x257   : > { %3406 = vtanh.f32 %v1779_v51  ;;  %1641 = vrot.lane.b32.xlu2 %v1218_v50, %s3641_s22 }
 0x258   : > { %v1874_v26 = vadd.f32 0.5, %v1842_v62 }
 0x259   : > { %v1634_v59 = vpop.permute.xlu1 %1633 }
 0x25a   : > { %v4127_v18 = vadd.f32 %v1634_v59, %v3901_v19 }
 0x25c   : > { %v1780_v54 = vmul.f32 0.5, %v4127_v18 }
 0x25d   : > { %v3407_v23 = vpop.eup %3406 }
 0x25e   : > { %1643 = vrot.lane.b32.xlu0 %v1221_v3, %s3641_s22  ;;  %1947 = vrot.lane.b32.xlu1 %v1873_v17, %s3642_s23  ;;  %3408 = vtanh.f32 %v1780_v54  ;;  %v1843_v45 = vmul.f32 0.5, %v3407_v23  ;;  %v971_v17 = vpop.f32.mrf.mxu0  ;;  %v1060_v23 = vpop.f32.mrf.mxu1 }
 0x25f   : > { %1949 = vrot.lane.b32.xlu2 %v1874_v26, %s3642_s23  ;;  %3410 = vtanh.f32 %v4025_v14  ;;  %v972_v26 = vadd.f32 %v3819_v55, %v971_v17 }
 0x260   : > { %3412 = vtanh.f32 %v4033_v24  ;;  %v1875_v30 = vadd.f32 0.5, %v1843_v45 }
 0x261   : > { %v1940_v5 = vpop.permute.xlu0 %1939 }
 0x264   : > { %v3409_v33 = vpop.eup %3408 }
 0x265   : > { %v3411_v49 = vpop.eup %3410  ;;  %v1844_v13 = vmul.f32 0.5, %v3409_v33 }
 0x266   : > { %1645 = vrot.lane.b32.xlu1 %v1223_v29, %s3641_s22  ;;  %1951 = vrot.lane.b32.xlu0 %v1875_v30, %s3642_s23  ;;  %v3413_v41 = vpop.eup %3412  ;;  %v2029_v56 = vmul.f32 %v3411_v49, %v1940_v5  ;;  %v973_v45 = vpop.f32.mrf.mxu0  ;;  %v4153_v5 = vadd.f32 %v1060_v23, %v972_v26 }
 0x267   : > { %v1876_v62 = vadd.f32 0.5, %v1844_v13  ;;  %v974_v29 = vadd.f32 %v3819_v55, %v973_v45  ;;  %v1062_v30 = vpop.f32.mrf.mxu1 }
 0x269   : > { %v1942_v50 = vpop.permute.xlu1 %1941  ;;  %v1638_v51 = vpop.permute.xlu0 %1637  ;;  %v4156_v33 = vadd.f32 %v1062_v30, %v974_v29 }
 0x26a   : > { %v2030_v57 = vmul.f32 %v3413_v41, %v1942_v50  ;;  %v4142_v14 = vadd.f32 %v1638_v51, %v3920_v35  ;;  %v1230_v51 = vpop.f32.mrf.mxu2 }
 0x26b   : > { %v1080_v12 = vpack.c.bf16 %v4156_v33, %v4153_v5 }
 0x26c   : > { %v2162_v24 = vpack.c.bf16 %v2030_v57, %v2029_v56  ;;  %v1782_v59 = vmul.f32 0.5, %v4142_v14 }
 0x26d   : > { %3279 = vmatmul.msk.bf16.gmra.mxu2 %vm1117_vm1, %v1080_v12 }
 0x26e   : > { %3414 = vtanh.f32 %v1782_v59  ;;  %1953 = vrot.lane.b32.xlu1 %v1876_v62, %s3642_s23  ;;  %1649 = vrot.lane.b32.xlu0 %v1228_v44, %s3641_s22 }
 0x26f   : > { %2205 = vrot.lane.b32.xlu2 %v2162_v24, %s3641_s22  ;;  %3416 = vtanh.f32 %v4074_v52 }
 0x270   : > { %3418 = vtanh.f32 %v4055_v10  ;;  %v1231_v10 = vadd.f32 %v3907_v20, %v1230_v51 }
 0x274   : > { %v3415_v3 = vpop.eup %3414 }
 0x275   : > { %v1846_v7 = vmul.f32 0.5, %v3415_v3  ;;  %v3417_v50 = vpop.eup %3416 }
 0x276   : > { %v3419_v56 = vpop.eup %3418 }
 0x277   : > { %1647 = vrot.lane.b32.xlu2 %v1226_v47, %s3641_s22  ;;  %v1878_v54 = vadd.f32 0.5, %v1846_v7 }
 0x279   : > { %1957 = vrot.lane.b32.xlu0 %v1878_v54, %s3642_s23  ;;  %v1232_v54 = vpop.f32.mrf.mxu2 }
 0x27a   : > { %v1233_v23 = vadd.f32 %v3907_v20, %v1232_v54 }
 0x281   : > { %v1235_v12 = vpop.f32.mrf.mxu2 }
 0x289   : > { %v1237_v51 = vpop.f32.mrf.mxu2 }
 0x298   : > { %v2200_v38 = vpop.permute.xlu2 %2199 }
 0x299   : > { %3288 = vmatmul.msk.bf16.vlgmr.msra.gmra.mxu3 %vm838_vm0, %v2200_v38 }
 0x2a0   : > { %v1636_v49 = vpop.permute.xlu2 %1635 }
 0x2a1   : > { %v4164_v13 = vadd.f32 %v1636_v49, %v3916_v32 }
 0x2a3   : > { %v1781_v55 = vmul.f32 0.5, %v4164_v13  ;;  %v1946_v41 = vpop.permute.xlu0 %1945 }
 0x2a4   : > { %v2032_v44 = vmul.f32 %v3419_v56, %v1946_v41 }
 0x2a5   : > { %3420 = vtanh.f32 %v1781_v55 }
 0x2a8   : > { %v1944_v57 = vpop.permute.xlu2 %1943 }
 0x2a9   : > { %v2031_v24 = vmul.f32 %v3417_v50, %v1944_v57 }
 0x2ab   : > { %v3421_v59 = vpop.eup %3420  ;;  %v2163_v62 = vpack.c.bf16 %v2032_v44, %v2031_v24 }
 0x2ac   : > { %v1845_v47 = vmul.f32 0.5, %v3421_v59 }
 0x2ad   : > { %2207 = vrot.lane.b32.xlu1 %v2163_v62, %s3641_s22 }
 0x2ae   : > { %v1877_v52 = vadd.f32 0.5, %v1845_v47 }
 0x2b0   : > { %1955 = vrot.lane.b32.xlu2 %v1877_v52, %s3642_s23 }
 0x2b1   : > { %v1642_v3 = vpop.permute.xlu2 %1641 }
 0x2b2   : > { %v4172_v7 = vadd.f32 %v1642_v3, %v3948_v9 }
 0x2b4   : > { %v1784_v17 = vmul.f32 0.5, %v4172_v7 }
 0x2b5   : > { %1651 = vrot.lane.b32.xlu1 %v1231_v10, %s3641_s22 }
 0x2b6   : > { %3422 = vtanh.f32 %v1784_v17  ;;  %v1240_v17 = vpop.f32.mrf.mxu2 }
 0x2b7   : > { %3424 = vtanh.f32 %v4092_v43 }
 0x2b8   : > { %1653 = vrot.lane.b32.xlu2 %v1233_v23, %s3641_s22  ;;  %3426 = vtanh.f32 %v4102_v36 }
 0x2b9   : > { %v1950_v38 = vpop.permute.xlu2 %1949 }
 0x2bc   : > { %v3423_v26 = vpop.eup %3422 }
 0x2bd   : > { %v1848_v45 = vmul.f32 0.5, %v3423_v26  ;;  %v3425_v56 = vpop.eup %3424 }
 0x2be   : > { %v3427_v44 = vpop.eup %3426 }
 0x2bf   : > { %v1880_v29 = vadd.f32 0.5, %v1848_v45  ;;  %v2034_v62 = vmul.f32 %v3427_v44, %v1950_v38  ;;  %v1236_v45 = vadd.f32 %v3907_v20, %v1235_v12 }
 0x2c0   : > { %v2202_v30 = vpop.permute.xlu1 %2201 }
 0x2c1   : > { %1961 = vrot.lane.b32.xlu2 %v1880_v29, %s3642_s23  ;;  %3289 = vmatmul.msk.bf16.gmra.mxu3 %vm838_vm0, %v2202_v30 }
 0x2c8   : > { %v1640_v49 = vpop.permute.xlu1 %1639  ;;  %v2204_v55 = vpop.permute.xlu0 %2203 }
 0x2c9   : > { %v4182_v41 = vadd.f32 %v1640_v49, %v3945_v6  ;;  %v2206_v57 = vpop.permute.xlu2 %2205 }
 0x2cb   : > { %v1783_v50 = vmul.f32 0.5, %v4182_v41 }
 0x2cd   : > { %3428 = vtanh.f32 %v1783_v50 }
 0x2d0   : > { %v1948_v24 = vpop.permute.xlu1 %1947  ;;  %v1644_v59 = vpop.permute.xlu0 %1643 }
 0x2d1   : > { %v2033_v47 = vmul.f32 %v3425_v56, %v1948_v24  ;;  %v4187_v52 = vadd.f32 %v1644_v59, %v3959_v28  ;;  %3290 = vmatmul.msk.bf16.gmra.mxu3 %vm838_vm0, %v2204_v55  ;;  %v1648_v30 = vpop.permute.xlu2 %1647  ;;  %v1238_v55 = vadd.f32 %v3907_v20, %v1237_v51  ;;  %v1242_v51 = vpop.f32.mrf.mxu2 }
 0x2d2   : > { %v4202_v50 = vadd.f32 %v1648_v30, %v3981_v61 }
 0x2d3   : > { %v3429_v43 = vpop.eup %3428  ;;  %v2164_v3 = vpack.c.bf16 %v2034_v62, %v2033_v47  ;;  %v1785_v36 = vmul.f32 0.5, %v4187_v52 }
 0x2d4   : > { %v1847_v10 = vmul.f32 0.5, %v3429_v43 }
 0x2d5   : > { %2209 = vrot.lane.b32.xlu0 %v2164_v3, %s3641_s22  ;;  %3430 = vtanh.f32 %v1785_v36 }
 0x2d6   : > { %v1879_v54 = vadd.f32 0.5, %v1847_v10  ;;  %3432 = vtanh.f32 %v4113_v42 }
 0x2d7   : > { %3434 = vtanh.f32 %v4127_v18  ;;  %v1787_v18 = vmul.f32 0.5, %v4202_v50 }
 0x2d8   : > { %v1646_v23 = vpop.permute.xlu1 %1645  ;;  %1959 = vrot.lane.b32.xlu1 %v1879_v54, %s3642_s23  ;;  %v1952_v26 = vpop.permute.xlu0 %1951 }
 0x2d9   : > { %v4196_v29 = vadd.f32 %v1646_v23, %v3962_v31 }
 0x2db   : > { %v1786_v38 = vmul.f32 0.5, %v4196_v29  ;;  %v3431_v49 = vpop.eup %3430 }
 0x2dc   : > { %v3433_v42 = vpop.eup %3432  ;;  %v1849_v56 = vmul.f32 0.5, %v3431_v49 }
 0x2dd   : > { %3436 = vtanh.f32 %v1786_v38  ;;  %1655 = vrot.lane.b32.xlu0 %v1236_v45, %s3641_s22  ;;  %v3435_v12 = vpop.eup %3434  ;;  %v2035_v59 = vmul.f32 %v3433_v42, %v1952_v26  ;;  %v1241_v26 = vadd.f32 %v3907_v20, %v1240_v17  ;;  %v1245_v38 = vpop.f32.mrf.mxu2 }
 0x2de   : > { %v1881_v10 = vadd.f32 0.5, %v1849_v56  ;;  %3438 = vtanh.f32 %v1787_v18 }
 0x2e0   : > { %v1954_v44 = vpop.permute.xlu1 %1953  ;;  %1657 = vrot.lane.b32.xlu1 %v1238_v55, %s3641_s22  ;;  %v1650_v24 = vpop.permute.xlu0 %1649 }
 0x2e1   : > { %v2036_v62 = vmul.f32 %v3435_v12, %v1954_v44  ;;  %v4208_v47 = vadd.f32 %v1650_v24, %v3984_v4  ;;  %3291 = vmatmul.msk.bf16.gmra.mxu3 %vm838_vm0, %v2206_v57  ;;  %v1243_v57 = vadd.f32 %v3907_v20, %v1242_v51 }
 0x2e3   : > { %v3437_v43 = vpop.eup %3436  ;;  %v2165_v3 = vpack.c.bf16 %v2036_v62, %v2035_v59  ;;  %v1788_v36 = vmul.f32 0.5, %v4208_v47 }
 0x2e4   : > { %v1850_v54 = vmul.f32 0.5, %v3437_v43  ;;  %v3439_v45 = vpop.eup %3438 }
 0x2e5   : > { %1963 = vrot.lane.b32.xlu0 %v1881_v10, %s3642_s23  ;;  %2211 = vrot.lane.b32.xlu2 %v2165_v3, %s3641_s22  ;;  %3440 = vtanh.f32 %v1788_v36  ;;  %v1851_v49 = vmul.f32 0.5, %v3439_v45  ;;  %v1247_v12 = vpop.f32.mrf.mxu2  ;;  %v4239_v36 = vld [vmem:[%s5044_s2] ss:$0 sm:$0xff] }
 0x2e6   : > { %v1882_v23 = vadd.f32 0.5, %v1850_v54  ;;  %v1248_v17 = vadd.f32 %v3907_v20, %v1247_v12  ;;  %3442 = vtanh.f32 %v4142_v14  ;;  %v1246_v14 = vadd.f32 %v3907_v20, %v1245_v38  ;;  %v2055_v10 = vld [vmem:[%s4230_s30] sm:$0xff] }
 0x2e7   : > { %v1883_v42 = vadd.f32 0.5, %v1851_v49  ;;  %3444 = vtanh.f32 %v4164_v13  ;;  %v4248_v20 = vld [vmem:[%s5045_s3] ss:$0 sm:$0xff] }
 0x2e8   : > { %1965 = vrot.lane.b32.xlu1 %v1882_v23, %s3642_s23  ;;  %v2091_v23 = vmul.f32 %v4239_v36, %v2055_v10 }
 0x2eb   : > { %v3441_v30 = vpop.eup %3440  ;;  %v1958_v44 = vpop.permute.xlu0 %1957 }
 0x2ec   : > { %v1852_v55 = vmul.f32 0.5, %v3441_v30  ;;  %v3443_v24 = vpop.eup %3442  ;;  %v2056_v30 = vld [vmem:[%s4230_s30 + $0x8] sm:$0xff] }
 0x2ed   : > { %1661 = vrot.lane.b32.xlu0 %v1243_v57, %s3641_s22  ;;  %1659 = vrot.lane.b32.xlu2 %v1241_v26, %s3641_s22  ;;  %v3445_v18 = vpop.eup %3444  ;;  %v2038_v62 = vmul.f32 %v3443_v24, %v1958_v44  ;;  %v4253_v26 = vld [vmem:[%s5051_s9] ss:$0 sm:$0xff]  ;;  %v2127_v57 = vadd.f32 %v4248_v20, %v2091_v23  ;;  %v2092_v12 = vmul.f32 %v4239_v36, %v2056_v30 }
 0x2ee   : > { %v1884_v56 = vadd.f32 0.5, %v1852_v55 }
 0x2ef   : > { %v2128_v44 = vadd.f32 %v4248_v20, %v2092_v12 }
 0x2f5   : > { %1967 = vrot.lane.b32.xlu2 %v1883_v42, %s3642_s23  ;;  %1969 = vrot.lane.b32.xlu0 %v1884_v56, %s3642_s23 }
 0x2fd   : > { %1665 = vrot.lane.b32.xlu2 %v1248_v17, %s3641_s22 }
 0x30a   : > { %v1956_v59 = vpop.permute.xlu2 %1955 }
 0x30b   : > { %v2037_v51 = vmul.f32 %v3445_v18, %v1956_v59 }
 0x30d   : > { %v2166_v43 = vpack.c.bf16 %v2038_v62, %v2037_v51 }
 0x30f   : > { %2213 = vrot.lane.b32.xlu1 %v2166_v43, %s3641_s22 }
 0x312   : > { %v1654_v3 = vpop.permute.xlu2 %1653 }
 0x313   : > { %v4234_v13 = vadd.f32 %v1654_v3, %v4048_v63 }
 0x315   : > { %v1790_v54 = vmul.f32 0.5, %v4234_v13 }
 0x317   : > { %3446 = vtanh.f32 %v1790_v54  ;;  %1663 = vrot.lane.b32.xlu1 %v1246_v14, %s3641_s22 }
 0x31c   : > { %v2300_v45 = vpop.f32.mrf.mxu3 }
 0x31d   : > { %v3447_v38 = vpop.eup %3446  ;;  %v2301_v49 = vadd.f32 %v4253_v26, %v2300_v45 }
 0x31e   : > { %v1854_v55 = vmul.f32 0.5, %v3447_v38  ;;  %v4281_v38 = vpop.f32.mrf.mxu2 }
 0x31f   : > { %v2380_v42 = vadd.f32 %v2301_v49, %v2127_v57  ;;  %v2208_v56 = vpop.permute.xlu1 %2207 }
 0x320   : > { %3292 = vmatmul.msk.bf16.gmra.mxu3 %vm838_vm0, %v2208_v56  ;;  %v1886_v17 = vadd.f32 0.5, %v1854_v55  ;;  %v1962_v56 = vpop.permute.xlu2 %1961 }
 0x321   : > { %2444 = vst.msk [vmem:[%s4262_s28] sm:$0xff] %vm838_vm0, %v2380_v42  ;;  %v2718_v59 = vmul.f32 %v2380_v42, %v2380_v42  ;;  %v2648_v3 = vsel %vm838_vm0, %v2380_v42, 0.0 }
 0x322   : > { %1973 = vrot.lane.b32.xlu2 %v1886_v17, %s3642_s23  ;;  %v3626_v17 = vld [vmem:[%s5049_s7] ss:$0 sm:$0xff] }
 0x323   : > { %v2750_v57 = vsel %vm838_vm0, %v2718_v59, 0.0 }
 0x324   : > { %v2302_v24 = vpop.f32.mrf.mxu3 }
 0x325   : > { %v2303_v18 = vadd.f32 %v4253_v26, %v2302_v24  ;;  %v2057_v24 = vld [vmem:[%s4230_s30 + $0x10] sm:$0xff] }
 0x326   : > { %v1252_v12 = vpop.f32.mrf.mxu2  ;;  %v2093_v59 = vmul.f32 %v4239_v36, %v2057_v24 }
 0x327   : > { %v2381_v62 = vadd.f32 %v2303_v18, %v2128_v44  ;;  %v1652_v51 = vpop.permute.xlu1 %1651  ;;  %v1253_v44 = vadd.f32 %v3626_v17, %v1252_v12 }
 0x328   : > { %v4272_v43 = vadd.f32 %v1652_v51, %v4043_v53 }
 0x329   : > { %2445 = vst.msk [vmem:[%s4262_s28 + $0x8] sm:$0xff] %vm838_vm0, %v2381_v62  ;;  %v2649_v14 = vsel %vm838_vm0, %v2381_v62, 0.0  ;;  %v2719_v10 = vmul.f32 %v2381_v62, %v2381_v62  ;;  %v2129_v62 = vadd.f32 %v4248_v20, %v2093_v59 }
 0x32a   : > { %v2650_v54 = vadd.f32 %v2649_v14, %v2648_v3  ;;  %v1789_v23 = vmul.f32 0.5, %v4272_v43  ;;  %v2058_v3 = vld [vmem:[%s4230_s30 + $0x18] sm:$0xff] }
 0x32b   : > { %v2751_v45 = vsel %vm838_vm0, %v2719_v10, 0.0 }
 0x32c   : > { %v2752_v30 = vadd.f32 %v2751_v45, %v2750_v57  ;;  %3448 = vtanh.f32 %v1789_v23  ;;  %v2094_v57 = vmul.f32 %v4239_v36, %v2058_v3 }
 0x32d   : > { %3450 = vtanh.f32 %v4172_v7 }
 0x32e   : > { %3452 = vtanh.f32 %v4182_v41 }
 0x32f   : > { %3454 = vtanh.f32 %v4187_v52 }
 0x330   : > { %3456 = vtanh.f32 %v4196_v29 }
 0x332   : > { %v3449_v49 = vpop.eup %3448 }
 0x333   : > { %v1853_v55 = vmul.f32 0.5, %v3449_v49  ;;  %v3451_v45 = vpop.eup %3450 }
 0x335   : > { %v1885_v42 = vadd.f32 0.5, %v1853_v55 }
 0x337   : > { %1971 = vrot.lane.b32.xlu1 %v1885_v42, %s3642_s23  ;;  %v3453_v42 = vpop.eup %3452 }
 0x33f   : > { %v4288_v18 = vpop.permute.xlu2 %2211  ;;  %1669 = vrot.lane.b32.xlu1 %v1253_v44, %s3641_s22  ;;  %v2040_v44 = vmul.f32 %v3451_v45, %v1962_v56 }
 0x344   : > { %v2305_v51 = vpop.f32.mrf.mxu3 }
 0x345   : > { %v2306_v14 = vadd.f32 %v4253_v26, %v2305_v51 }
 0x347   : > { %v2382_v10 = vadd.f32 %v2306_v14, %v2129_v62  ;;  %v2210_v23 = vpop.permute.xlu0 %2209  ;;  %v1660_v55 = vpop.permute.xlu2 %1659  ;;  %v2130_v62 = vadd.f32 %v4248_v20, %v2094_v57  ;;  %v2059_v14 = vld [vmem:[%s4230_s30 + $0x20] sm:$0xff] }
 0x348   : > { %3293 = vmatmul.msk.bf16.gmra.mxu3 %vm838_vm0, %v2210_v23  ;;  %v4309_v56 = vadd.f32 %v1660_v55, %v4076_v60 }
 0x349   : > { %2446 = vst.msk [vmem:[%s4262_s28 + $0x10] sm:$0xff] %vm838_vm0, %v2382_v10  ;;  %v2651_v7 = vsel %vm838_vm0, %v2382_v10, 0.0  ;;  %v2720_v49 = vmul.f32 %v2382_v10, %v2382_v10 }
 0x34a   : > { %v2652_v41 = vadd.f32 %v2651_v7, %v2650_v54  ;;  %v1960_v12 = vpop.permute.xlu1 %1959  ;;  %v2095_v54 = vmul.f32 %v4239_v36, %v2059_v14 }
 0x34b   : > { %v2753_v24 = vsel %vm838_vm0, %v2720_v49, 0.0  ;;  %v2039_v59 = vmul.f32 %v3453_v42, %v1960_v12 }
 0x34c   : > { %v2754_v51 = vadd.f32 %v2753_v24, %v2752_v30  ;;  %v2307_v3 = vpop.f32.mrf.mxu3  ;;  %v2060_v24 = vld [vmem:[%s4230_s30 + $0x28] sm:$0xff] }
 0x34d   : > { %v2167_v23 = vpack.c.bf16 %v2040_v44, %v2039_v59  ;;  %v2308_v63 = vadd.f32 %v4253_v26, %v2307_v3  ;;  %v2131_v44 = vadd.f32 %v4248_v20, %v2095_v54  ;;  %v1251_v59 = vadd.f32 %v3626_v17, %v4281_v38 }
 0x34e   : > { %v2096_v3 = vmul.f32 %v4239_v36, %v2060_v24 }
 0x34f   : > { %v2383_v61 = vadd.f32 %v2308_v63, %v2130_v62  ;;  %2215 = vrot.lane.b32.xlu0 %v2167_v23, %s3641_s22  ;;  %v1656_v10 = vpop.permute.xlu0 %1655  ;;  %v4321_v55 = vpop.permute.xlu2 %1967 }
 0x350   : > { %v4312_v45 = vadd.f32 %v1656_v10, %v4059_v27  ;;  %v3455_v10 = vpop.eup %3454 }
 0x351   : > { %2447 = vst.msk [vmem:[%s4262_s28 + $0x18] sm:$0xff] %vm838_vm0, %v2383_v61  ;;  %v2653_v30 = vsel %vm838_vm0, %v2383_v61, 0.0  ;;  %v2721_v57 = vmul.f32 %v2383_v61, %v2383_v61  ;;  %v1793_v61 = vmul.f32 0.5, %v4309_v56 }
 0x352   : > { %v2654_v63 = vadd.f32 %v2653_v30, %v2652_v41  ;;  %v1791_v7 = vmul.f32 0.5, %v4312_v45  ;;  %v1658_v49 = vpop.permute.xlu1 %1657 }
 0x353   : > { %v2755_v42 = vsel %vm838_vm0, %v2721_v57, 0.0  ;;  %v4324_v12 = vadd.f32 %v1658_v49, %v4062_v34 }
 0x354   : > { %v2756_v52 = vadd.f32 %v2755_v42, %v2754_v51  ;;  %3458 = vtanh.f32 %v1791_v7  ;;  %v2310_v41 = vpop.f32.mrf.mxu3  ;;  %v3457_v51 = vpop.eup %3456  ;;  %v2132_v7 = vadd.f32 %v4248_v20, %v2096_v3 }
 0x355   : > { %v1792_v29 = vmul.f32 0.5, %v4324_v12  ;;  %v2311_v62 = vadd.f32 %v4253_v26, %v2310_v41 }
 0x357   : > { %3460 = vtanh.f32 %v1792_v29  ;;  %v2384_v14 = vadd.f32 %v2311_v62, %v2131_v44  ;;  %1667 = vrot.lane.b32.xlu0 %v1251_v59, %s3641_s22  ;;  %v1964_v23 = vpop.permute.xlu0 %1963  ;;  %v2061_v59 = vld [vmem:[%s4230_s30 + $0x30] sm:$0xff]  ;;  %v1666_v29 = vpop.permute.xlu2 %1665 }
 0x358   : > { %3462 = vtanh.f32 %v1793_v61  ;;  %3294 = vmatmul.msk.bf16.gmra.mxu3 %vm838_vm0, %v4288_v18  ;;  %v2041_v42 = vmul.f32 %v3455_v10, %v1964_v23  ;;  %v2097_v23 = vmul.f32 %v4239_v36, %v2061_v59 }
 0x359   : > { %2448 = vst.msk [vmem:[%s4262_s28 + $0x20] sm:$0xff] %vm838_vm0, %v2384_v14  ;;  %v2655_v38 = vsel %vm838_vm0, %v2384_v14, 0.0  ;;  %v2722_v17 = vmul.f32 %v2384_v14, %v2384_v14  ;;  %3464 = vtanh.f32 %v4202_v50 }
 0x35a   : > { %v3459_v54 = vpop.eup %3458  ;;  %v2656_v30 = vadd.f32 %v2655_v38, %v2654_v63  ;;  %v1966_v57 = vpop.permute.xlu1 %1965  ;;  %3466 = vtanh.f32 %v4208_v47 }
 0x35b   : > { %v2757_v49 = vsel %vm838_vm0, %v2722_v17, 0.0  ;;  %v2042_v44 = vmul.f32 %v3457_v51, %v1966_v57  ;;  %v1855_v24 = vmul.f32 0.5, %v3459_v54 }
 0x35c   : > { %v2758_v61 = vadd.f32 %v2757_v49, %v2756_v52  ;;  %v2312_v41 = vpop.f32.mrf.mxu3  ;;  %v4348_v52 = vadd.f32 %v1666_v29, %v4104_v40  ;;  %v2133_v49 = vadd.f32 %v4248_v20, %v2097_v23 }
 0x35d   : > { %v3461_v18 = vpop.eup %3460  ;;  %v2168_v62 = vpack.c.bf16 %v2042_v44, %v2041_v42  ;;  %v2313_v60 = vadd.f32 %v4253_v26, %v2312_v41  ;;  %v1887_v14 = vadd.f32 0.5, %v1855_v24  ;;  %v2062_v24 = vld [vmem:[%s4230_s30 + $0x38] sm:$0xff] }
 0x35e   : > { %v3463_v9 = vpop.eup %3462  ;;  %v1856_v63 = vmul.f32 0.5, %v3461_v18  ;;  %v1796_v42 = vmul.f32 0.5, %v4348_v52 }
 0x35f   : > { %v2385_v38 = vadd.f32 %v2313_v60, %v2132_v7  ;;  %1975 = vrot.lane.b32.xlu0 %v1887_v14, %s3642_s23  ;;  %2217 = vrot.lane.b32.xlu2 %v2168_v62, %s3641_s22  ;;  %v1662_v3 = vpop.permute.xlu0 %1661  ;;  %v1857_v54 = vmul.f32 0.5, %v3463_v9  ;;  %v3465_v9 = vpop.eup %3464  ;;  %v2098_v62 = vmul.f32 %v4239_v36, %v2062_v24 }
 0x360   : > { %v4351_v10 = vadd.f32 %v1662_v3, %v4080_v8  ;;  %v1888_v51 = vadd.f32 0.5, %v1856_v63  ;;  %v2043_v14 = vmul.f32 %v3465_v9, %v4321_v55 }
 0x361   : > { %2449 = vst.msk [vmem:[%s4262_s28 + $0x28] sm:$0xff] %vm838_vm0, %v2385_v38  ;;  %v2657_v60 = vsel %vm838_vm0, %v2385_v38, 0.0  ;;  %v2723_v17 = vmul.f32 %v2385_v38, %v2385_v38  ;;  %v1889_v59 = vadd.f32 0.5, %v1857_v54 }
 0x362   : > { %v2658_v57 = vadd.f32 %v2657_v60, %v2656_v30  ;;  %v1794_v7 = vmul.f32 0.5, %v4351_v10  ;;  %1977 = vrot.lane.b32.xlu1 %v1888_v51, %s3642_s23  ;;  %v3467_v30 = vpop.eup %3466 }
 0x363   : > { %v2759_v50 = vsel %vm838_vm0, %v2723_v17, 0.0  ;;  %v2134_v17 = vadd.f32 %v4248_v20, %v2098_v62 }
 0x364   : > { %v2760_v44 = vadd.f32 %v2759_v50, %v2758_v61  ;;  %3468 = vtanh.f32 %v1794_v7  ;;  %v2315_v47 = vpop.f32.mrf.mxu3 }
 0x365   : > { %v2316_v41 = vadd.f32 %v4253_v26, %v2315_v47  ;;  %3470 = vtanh.f32 %v1796_v42 }
 0x367   : > { %v2386_v18 = vadd.f32 %v2316_v41, %v2133_v49  ;;  %1979 = vrot.lane.b32.xlu0 %v1889_v59, %s3642_s23  ;;  %v1970_v29 = vpop.permute.xlu0 %1969 }
 0x368   : > { %v2044_v63 = vmul.f32 %v3467_v30, %v1970_v29 }
 0x369   : > { %2450 = vst.msk [vmem:[%s4262_s28 + $0x30] sm:$0xff] %vm838_vm0, %v2386_v18  ;;  %v2659_v61 = vsel %vm838_vm0, %v2386_v18, 0.0  ;;  %v2724_v38 = vmul.f32 %v2386_v18, %v2386_v18 }
 0x36a   : > { %v3469_v3 = vpop.eup %3468  ;;  %v2660_v23 = vadd.f32 %v2659_v61, %v2658_v57  ;;  %v2169_v51 = vpack.c.bf16 %v2044_v63, %v2043_v14 }
 0x36b   : > { %v2761_v60 = vsel %vm838_vm0, %v2724_v38, 0.0  ;;  %v1858_v54 = vmul.f32 0.5, %v3469_v3  ;;  %v3471_v42 = vpop.eup %3470  ;;  %v2063_v3 = vld [vmem:[%s4230_s30 + $0x40] sm:$0xff] }
 0x36c   : > { %v2762_v7 = vadd.f32 %v2761_v60, %v2760_v44  ;;  %v2317_v50 = vpop.f32.mrf.mxu3  ;;  %2219 = vrot.lane.b32.xlu2 %v2169_v51, %s3641_s22  ;;  %v1860_v41 = vmul.f32 0.5, %v3471_v42 }
 0x36d   : > { %v2318_v55 = vadd.f32 %v4253_v26, %v2317_v50  ;;  %v1890_v49 = vadd.f32 0.5, %v1858_v54 }
 0x36e   : > { %v1892_v30 = vadd.f32 0.5, %v1860_v41 }
 0x36f   : > { %v2387_v47 = vadd.f32 %v2318_v55, %v2134_v17  ;;  %1981 = vrot.lane.b32.xlu1 %v1890_v49, %s3642_s23  ;;  %v2064_v17 = vld [vmem:[%s4230_s30 + $0x48] sm:$0xff] }
 0x370   : > { %v2100_v50 = vmul.f32 %v4239_v36, %v2064_v17 }
 0x371   : > { %2451 = vst.msk [vmem:[%s4262_s28 + $0x38] sm:$0xff] %vm838_vm0, %v2387_v47  ;;  %v2661_v57 = vsel %vm838_vm0, %v2387_v47, 0.0  ;;  %v2725_v24 = vmul.f32 %v2387_v47, %v2387_v47 }
 0x372   : > { %v2662_v59 = vadd.f32 %v2661_v57, %v2660_v23  ;;  %v2099_v23 = vmul.f32 %v4239_v36, %v2063_v3 }
 0x373   : > { %v2763_v44 = vsel %vm838_vm0, %v2725_v24, 0.0 }
 0x374   : > { %v2764_v9 = vadd.f32 %v2763_v44, %v2762_v7  ;;  %v2135_v51 = vadd.f32 %v4248_v20, %v2099_v23 }
 0x377   : > { %1985 = vrot.lane.b32.xlu1 %v1892_v30, %s3642_s23  ;;  %v2136_v30 = vadd.f32 %v4248_v20, %v2100_v50 }
 0x37c   : > { %v1974_v55 = vpop.permute.xlu2 %1973 }
 0x381   : > { %v2214_v18 = vpop.permute.xlu1 %2213 }
 0x382   : > { %3295 = vmatmul.msk.bf16.gmra.mxu3 %vm838_vm0, %v2214_v18 }
 0x389   : > { %v1664_v29 = vpop.permute.xlu1 %1663 }
 0x38a   : > { %v4382_v62 = vadd.f32 %v1664_v29, %v4096_v21 }
 0x38c   : > { %v1795_v14 = vmul.f32 0.5, %v4382_v62 }
 0x38e   : > { %3472 = vtanh.f32 %v1795_v14 }
 0x38f   : > { %3474 = vtanh.f32 %v4234_v13 }
 0x390   : > { %3476 = vtanh.f32 %v4272_v43 }
 0x394   : > { %v3473_v63 = vpop.eup %3472 }
 0x395   : > { %v1859_v61 = vmul.f32 0.5, %v3473_v63  ;;  %v3475_v49 = vpop.eup %3474 }
 0x396   : > { %v3477_v13 = vpop.eup %3476  ;;  %v2046_v41 = vmul.f32 %v3475_v49, %v1974_v55  ;;  %v2065_v49 = vld [vmem:[%s4230_s30 + $0x50] sm:$0xff] }
 0x397   : > { %v1891_v38 = vadd.f32 0.5, %v1859_v61 }
 0x399   : > { %1983 = vrot.lane.b32.xlu0 %v1891_v38, %s3642_s23 }
 0x3a3   : > { %v2320_v60 = vpop.f32.mrf.mxu3 }
 0x3a4   : > { %v2321_v54 = vadd.f32 %v4253_v26, %v2320_v60 }
 0x3a6   : > { %v2388_v7 = vadd.f32 %v2321_v54, %v2135_v51 }
 0x3a8   : > { %2452 = vst.msk [vmem:[%s4262_s28 + $0x40] sm:$0xff] %vm838_vm0, %v2388_v7  ;;  %v2663_v42 = vsel %vm838_vm0, %v2388_v7, 0.0  ;;  %v2726_v47 = vmul.f32 %v2388_v7, %v2388_v7 }
 0x3a9   : > { %v2664_v57 = vadd.f32 %v2663_v42, %v2662_v59  ;;  %v1972_v24 = vpop.permute.xlu1 %1971  ;;  %v2101_v42 = vmul.f32 %v4239_v36, %v2065_v49 }
 0x3aa   : > { %v2765_v43 = vsel %vm838_vm0, %v2726_v47, 0.0  ;;  %v2045_v44 = vmul.f32 %v3477_v13, %v1972_v24 }
 0x3ab   : > { %v2766_v18 = vadd.f32 %v2765_v43, %v2764_v9  ;;  %v2322_v29 = vpop.f32.mrf.mxu3 }
 0x3ac   : > { %v2170_v14 = vpack.c.bf16 %v2046_v41, %v2045_v44  ;;  %v2323_v63 = vadd.f32 %v4253_v26, %v2322_v29  ;;  %v2066_v41 = vld [vmem:[%s4230_s30 + $0x58] sm:$0xff] }
 0x3ae   : > { %v2389_v61 = vadd.f32 %v2323_v63, %v2136_v30  ;;  %2221 = vrot.lane.b32.xlu2 %v2170_v14, %s3641_s22 }
 0x3b0   : > { %2453 = vst.msk [vmem:[%s4262_s28 + $0x48] sm:$0xff] %vm838_vm0, %v2389_v61  ;;  %v2665_v59 = vsel %vm838_vm0, %v2389_v61, 0.0  ;;  %v2727_v38 = vmul.f32 %v2389_v61, %v2389_v61 }
 0x3b1   : > { %v2666_v3 = vadd.f32 %v2665_v59, %v2664_v57  ;;  %v1670_v23 = vpop.permute.xlu1 %1669  ;;  %v2137_v57 = vadd.f32 %v4248_v20, %v2101_v42 }
 0x3b2   : > { %v2767_v51 = vsel %vm838_vm0, %v2727_v38, 0.0  ;;  %v4406_v60 = vadd.f32 %v1670_v23, %v4156_v33 }
 0x3b3   : > { %v2768_v9 = vadd.f32 %v2767_v51, %v2766_v18  ;;  %v2102_v18 = vmul.f32 %v4239_v36, %v2066_v41 }
 0x3b4   : > { %v1798_v17 = vmul.f32 0.5, %v4406_v60 }
 0x3b6   : > { %3478 = vtanh.f32 %v1798_v17 }
 0x3b7   : > { %3480 = vtanh.f32 %v4312_v45 }
 0x3b8   : > { %3482 = vtanh.f32 %v4324_v12  ;;  %v2138_v12 = vadd.f32 %v4248_v20, %v2102_v18 }
 0x3b9   : > { %v2218_v63 = vpop.permute.xlu2 %2217 }
 0x3bc   : > { %v3479_v54 = vpop.eup %3478 }
 0x3bd   : > { %v1862_v7 = vmul.f32 0.5, %v3479_v54  ;;  %v3481_v59 = vpop.eup %3480  ;;  %v2067_v54 = vld [vmem:[%s4230_s30 + $0x60] sm:$0xff] }
 0x3be   : > { %v3483_v23 = vpop.eup %3482 }
 0x3bf   : > { %v1894_v50 = vadd.f32 0.5, %v1862_v7 }
 0x3c1   : > { %v2216_v55 = vpop.permute.xlu0 %2215  ;;  %1989 = vrot.lane.b32.xlu1 %v1894_v50, %s3642_s23 }
 0x3c2   : > { %3296 = vmatmul.msk.bf16.gmra.mxu3 %vm838_vm0, %v2216_v55 }
 0x3c9   : > { %v1668_v47 = vpop.permute.xlu0 %1667 }
 0x3ca   : > { %v4414_v13 = vadd.f32 %v1668_v47, %v4153_v5 }
 0x3cb   : > { %v2325_v24 = vpop.f32.mrf.mxu3 }
 0x3cc   : > { %v1797_v43 = vmul.f32 0.5, %v4414_v13  ;;  %v2326_v44 = vadd.f32 %v4253_v26, %v2325_v24 }
 0x3ce   : > { %3484 = vtanh.f32 %v1797_v43  ;;  %v2390_v30 = vadd.f32 %v2326_v44, %v2137_v57  ;;  %v2103_v57 = vmul.f32 %v4239_v36, %v2067_v54 }
 0x3cf   : > { %3486 = vtanh.f32 %v4309_v56 }
 0x3d0   : > { %2454 = vst.msk [vmem:[%s4262_s28 + $0x50] sm:$0xff] %vm838_vm0, %v2390_v30  ;;  %v2667_v29 = vsel %vm838_vm0, %v2390_v30, 0.0  ;;  %v2728_v14 = vmul.f32 %v2390_v30, %v2390_v30  ;;  %v2139_v18 = vadd.f32 %v4248_v20, %v2103_v57  ;;  %3488 = vtanh.f32 %v4351_v10  ;;  %v2220_v10 = vpop.permute.xlu2 %2219 }
 0x3d1   : > { %v2668_v61 = vadd.f32 %v2667_v29, %v2666_v3  ;;  %v1976_v38 = vpop.permute.xlu0 %1975  ;;  %v1290_v57 = vmul.f32 0.5, %v3842_v16 }
 0x3d2   : > { %v2769_v45 = vsel %vm838_vm0, %v2728_v14, 0.0  ;;  %3297 = vmatmul.msk.bf16.gmra.mxu3 %vm838_vm0, %v2218_v63  ;;  %v2047_v49 = vmul.f32 %v3481_v59, %v1976_v38  ;;  %v2068_v63 = vld [vmem:[%s4230_s30 + $0x68] sm:$0xff]  ;;  %v1287_v59 = vmul.f32 0.5, %v3826_v0 }
 0x3d3   : > { %v2770_v51 = vadd.f32 %v2769_v45, %v2768_v9  ;;  %v2327_v17 = vpop.f32.mrf.mxu3  ;;  %v2104_v38 = vmul.f32 %v4239_v36, %v2068_v63 }
 0x3d4   : > { %v3485_v7 = vpop.eup %3484  ;;  %v2328_v50 = vadd.f32 %v4253_v26, %v2327_v17  ;;  %v1978_v55 = vpop.permute.xlu1 %1977  ;;  %3490 = vtanh.f32 %v1287_v59  ;;  %v1293_v59 = vmul.f32 0.5, %v3862_v37 }
 0x3d5   : > { %v2048_v42 = vmul.f32 %v3483_v23, %v1978_v55  ;;  %v1861_v3 = vmul.f32 0.5, %v3485_v7  ;;  %v3487_v23 = vpop.eup %3486  ;;  %3492 = vtanh.f32 %v1290_v57 }
 0x3d6   : > { %v2391_v47 = vadd.f32 %v2328_v50, %v2138_v12  ;;  %v3489_v54 = vpop.eup %3488  ;;  %3494 = vtanh.f32 %v1293_v59 }
 0x3d7   : > { %v2171_v24 = vpack.c.bf16 %v2048_v42, %v2047_v49  ;;  %v1893_v41 = vadd.f32 0.5, %v1861_v3  ;;  %v2140_v42 = vadd.f32 %v4248_v20, %v2104_v38 }
 0x3d8   : > { %2455 = vst.msk [vmem:[%s4262_s28 + $0x58] sm:$0xff] %vm838_vm0, %v2391_v47  ;;  %v2669_v43 = vsel %vm838_vm0, %v2391_v47, 0.0  ;;  %v2729_v9 = vmul.f32 %v2391_v47, %v2391_v47 }
 0x3d9   : > { %v2670_v44 = vadd.f32 %v2669_v43, %v2668_v61  ;;  %1987 = vrot.lane.b32.xlu0 %v1893_v41, %s3642_s23  ;;  %2223 = vrot.lane.b32.xlu2 %v2171_v24, %s3641_s22  ;;  %v1980_v12 = vpop.permute.xlu0 %1979 }
 0x3da   : > { %v2771_v30 = vsel %vm838_vm0, %v2729_v9, 0.0  ;;  %v2049_v50 = vmul.f32 %v3487_v23, %v1980_v12  ;;  %v3491_v43 = vpop.eup %3490  ;;  %v1296_v12 = vmul.f32 0.5, %v3874_v48 }
 0x3db   : > { %v2772_v29 = vadd.f32 %v2771_v30, %v2770_v51  ;;  %v2330_v14 = vpop.f32.mrf.mxu3 }
 0x3dc   : > { %v2331_v61 = vadd.f32 %v4253_v26, %v2330_v14  ;;  %3496 = vtanh.f32 %v1296_v12 }
 0x3de   : > { %v2392_v45 = vadd.f32 %v2331_v61, %v2139_v18  ;;  %v1351_v18 = vmul.f32 0.5, %v3491_v43 }
 0x3e0   : > { %2456 = vst.msk [vmem:[%s4262_s28 + $0x60] sm:$0xff] %vm838_vm0, %v2392_v45  ;;  %v2671_v56 = vsel %vm838_vm0, %v2392_v45, 0.0  ;;  %v2730_v17 = vmul.f32 %v2392_v45, %v2392_v45  ;;  %v1383_v61 = vadd.f32 0.5, %v1351_v18  ;;  %v3493_v45 = vpop.eup %3492 }
 0x3e1   : > { %v2672_v51 = vadd.f32 %v2671_v56, %v2670_v44  ;;  %v1982_v7 = vpop.permute.xlu1 %1981  ;;  %v1354_v38 = vmul.f32 0.5, %v3493_v45  ;;  %v3495_v56 = vpop.eup %3494 }
 0x3e2   : > { %v2773_v55 = vsel %vm838_vm0, %v2730_v17, 0.0  ;;  %v2050_v49 = vmul.f32 %v3489_v54, %v1982_v7  ;;  %3298 = vmatmul.msk.bf16.gmra.mxu3 %vm838_vm0, %v2220_v10  ;;  %v1357_v17 = vmul.f32 0.5, %v3495_v56  ;;  %v1299_v54 = vmul.f32 0.5, %v3896_v11  ;;  %v2069_v7 = vld [vmem:[%s4230_s30 + $0x70] sm:$0xff] }
 0x3e3   : > { %v2774_v3 = vadd.f32 %v2773_v55, %v2772_v29  ;;  %v2332_v47 = vpop.f32.mrf.mxu3  ;;  %v1386_v23 = vadd.f32 0.5, %v1354_v38  ;;  %v2105_v55 = vmul.f32 %v4239_v36, %v2069_v7 }
 0x3e4   : > { %v2172_v24 = vpack.c.bf16 %v2050_v49, %v2049_v50  ;;  %v2333_v41 = vadd.f32 %v4253_v26, %v2332_v47  ;;  %v1389_v10 = vadd.f32 0.5, %v1357_v17  ;;  %3498 = vtanh.f32 %v1299_v54 }
 0x3e5   : > { %v1302_v49 = vmul.f32 0.5, %v3920_v35  ;;  %3500 = vtanh.f32 %v4348_v52  ;;  %v2141_v47 = vadd.f32 %v4248_v20, %v2105_v55  ;;  %v1291_v55 = vmul.f32 0.5, %v3848_v22 }
 0x3e6   : > { %v2393_v9 = vadd.f32 %v2333_v41, %v2140_v42  ;;  %2225 = vrot.lane.b32.xlu2 %v2172_v24, %s3641_s22  ;;  %3502 = vtanh.f32 %v4382_v62  ;;  %v2070_v24 = vld [vmem:[%s4230_s30 + $0x78] sm:$0xff]  ;;  %v1288_v41 = vmul.f32 0.5, %v3828_v1 }
 0x3e7   : > { %3504 = vtanh.f32 %v1302_v49  ;;  %v2106_v18 = vmul.f32 %v4239_v36, %v2070_v24 }
 0x3e8   : > { %2457 = vst.msk [vmem:[%s4262_s28 + $0x68] sm:$0xff] %vm838_vm0, %v2393_v9  ;;  %v2673_v44 = vsel %vm838_vm0, %v2393_v9, 0.0  ;;  %v2731_v30 = vmul.f32 %v2393_v9, %v2393_v9  ;;  %3506 = vtanh.f32 %v1288_v41  ;;  %v1308_v41 = vmul.f32 0.5, %v3984_v4 }
 0x3e9   : > { %v2674_v14 = vadd.f32 %v2673_v44, %v2672_v51  ;;  %v3497_v51 = vpop.eup %3496  ;;  %v1986_v52 = vpop.permute.xlu1 %1985 }
 0x3ea   : > { %v2775_v29 = vsel %vm838_vm0, %v2731_v30, 0.0  ;;  %v1360_v50 = vmul.f32 0.5, %v3497_v51  ;;  %v2142_v51 = vadd.f32 %v4248_v20, %v2106_v18 }
 0x3eb   : > { %v2776_v63 = vadd.f32 %v2775_v29, %v2774_v3  ;;  %v3499_v3 = vpop.eup %3498 }
 0x3ec   : > { %v1392_v42 = vadd.f32 0.5, %v1360_v50  ;;  %v1363_v9 = vmul.f32 0.5, %v3499_v3  ;;  %v3501_v29 = vpop.eup %3500 }
 0x3ed   : > { %v3503_v45 = vpop.eup %3502  ;;  %v2052_v17 = vmul.f32 %v3501_v29, %v1986_v52  ;;  %v1294_v52 = vmul.f32 0.5, %v3865_v39 }
 0x3ee   : > { %1447 = vrot.lane.b32.xlu2 %v1383_v61, %s3642_s23  ;;  %v1305_v61 = vmul.f32 0.5, %v3959_v28  ;;  %v3505_v56 = vpop.eup %3504 }
 0x3ef   : > { %v1366_v3 = vmul.f32 0.5, %v3505_v56 }
 0x3f0   : > { %3508 = vtanh.f32 %v1305_v61 }
 0x3f1   : > { %3510 = vtanh.f32 %v1291_v55  ;;  %v1300_v55 = vmul.f32 0.5, %v3901_v19 }
 0x3f2   : > { %3512 = vtanh.f32 %v1308_v41 }
 0x3f3   : > { %3514 = vtanh.f32 %v1294_v52 }
 0x3f6   : > { %1453 = vrot.lane.b32.xlu2 %v1386_v23, %s3642_s23  ;;  %v1395_v23 = vadd.f32 0.5, %v1363_v9  ;;  %v1398_v9 = vadd.f32 0.5, %v1366_v3 }
 0x3fe   : > { %1459 = vrot.lane.b32.xlu2 %v1389_v10, %s3642_s23 }
 0x405   : > { %v2335_v57 = vpop.f32.mrf.mxu3 }
 0x406   : > { %1465 = vrot.lane.b32.xlu2 %v1392_v42, %s3642_s23  ;;  %v2336_v43 = vadd.f32 %v4253_v26, %v2335_v57 }
 0x408   : > { %v2394_v44 = vadd.f32 %v2336_v43, %v2141_v47  ;;  %v2222_v30 = vpop.permute.xlu2 %2221 }
 0x409   : > { %3299 = vmatmul.msk.bf16.gmra.mxu3 %vm838_vm0, %v2222_v30 }
 0x40a   : > { %2458 = vst.msk [vmem:[%s4262_s28 + $0x70] sm:$0xff] %vm838_vm0, %v2394_v44  ;;  %v2675_v62 = vsel %vm838_vm0, %v2394_v44, 0.0  ;;  %v2732_v59 = vmul.f32 %v2394_v44, %v2394_v44 }
 0x40b   : > { %v2676_v38 = vadd.f32 %v2675_v62, %v2674_v14  ;;  %v1984_v12 = vpop.permute.xlu0 %1983  ;;  %v3507_v14 = vpop.eup %3506 }
 0x40c   : > { %v2777_v54 = vsel %vm838_vm0, %v2732_v59, 0.0  ;;  %v2051_v10 = vmul.f32 %v3503_v45, %v1984_v12  ;;  %v1352_v24 = vmul.f32 0.5, %v3507_v14  ;;  %v3509_v44 = vpop.eup %3508  ;;  %v1311_v45 = vmul.f32 0.5, %v4059_v27 }
 0x40d   : > { %v2778_v7 = vadd.f32 %v2777_v54, %v2776_v63  ;;  %v2337_v50 = vpop.f32.mrf.mxu3  ;;  %v3511_v62 = vpop.eup %3510  ;;  %v1369_v59 = vmul.f32 0.5, %v3509_v44 }
 0x40e   : > { %1471 = vrot.lane.b32.xlu2 %v1395_v23, %s3642_s23  ;;  %v2173_v49 = vpack.c.bf16 %v2052_v17, %v2051_v10  ;;  %v2338_v42 = vadd.f32 %v4253_v26, %v2337_v50  ;;  %v1384_v29 = vadd.f32 0.5, %v1352_v24  ;;  %v1355_v61 = vmul.f32 0.5, %v3511_v62  ;;  %v3513_v12 = vpop.eup %3512 }
 0x40f   : > { %v1297_v23 = vmul.f32 0.5, %v3882_v58  ;;  %3516 = vtanh.f32 %v1311_v45  ;;  %v3515_v17 = vpop.eup %3514  ;;  %v1372_v54 = vmul.f32 0.5, %v3513_v12  ;;  %v1303_v24 = vmul.f32 0.5, %v3945_v6 }
 0x410   : > { %v2395_v47 = vadd.f32 %v2338_v42, %v2142_v51  ;;  %2227 = vrot.lane.b32.xlu0 %v2173_v49, %s3641_s22  ;;  %v1387_v56 = vadd.f32 0.5, %v1355_v61  ;;  %v1358_v10 = vmul.f32 0.5, %v3515_v17  ;;  %v1314_v51 = vmul.f32 0.5, %v4080_v8 }
 0x411   : > { %3518 = vtanh.f32 %v1297_v23  ;;  %v1309_v17 = vmul.f32 0.5, %v4043_v53 }
 0x412   : > { %2459 = vst.msk [vmem:[%s4262_s28 + $0x78] sm:$0xff] %vm838_vm0, %v2395_v47  ;;  %v2677_v57 = vsel %vm838_vm0, %v2395_v47, 0.0  ;;  %v2733_v63 = vmul.f32 %v2395_v47, %v2395_v47  ;;  %v1390_v49 = vadd.f32 0.5, %v1358_v10  ;;  %3520 = vtanh.f32 %v1314_v51 }
 0x413   : > { %v4490_v43 = vadd.f32 %v2677_v57, %v2676_v38  ;;  %v1401_v38 = vadd.f32 0.5, %v1369_v59  ;;  %3522 = vtanh.f32 %v1300_v55  ;;  %v1317_v47 = vmul.f32 0.5, %v4153_v5 }
 0x414   : > { %v2779_v30 = vsel %vm838_vm0, %v2733_v63, 0.0  ;;  %v1306_v59 = vmul.f32 0.5, %v3962_v31 }
 0x415   : > { %v4493_v18 = vadd.f32 %v2779_v30, %v2778_v7  ;;  %v1404_v7 = vadd.f32 0.5, %v1372_v54  ;;  %v3517_v50 = vpop.eup %3516  ;;  %3524 = vtanh.f32 %v1317_v47 }
 0x416   : > { %1477 = vrot.lane.b32.xlu2 %v1398_v9, %s3642_s23  ;;  %v1375_v14 = vmul.f32 0.5, %v3517_v50  ;;  %3526 = vtanh.f32 %v1303_v24 }
 0x417   : > { %v3519_v42 = vpop.eup %3518  ;;  %3528 = vtanh.f32 %v1306_v59  ;;  %v1292_v59 = vmul.f32 0.5, %v3851_v25 }
 0x418   : > { %1449 = vrot.lane.b32.xlu0 %v1384_v29, %s3642_s23  ;;  %v1361_v3 = vmul.f32 0.5, %v3519_v42  ;;  %v1407_v57 = vadd.f32 0.5, %v1375_v14  ;;  %v3521_v63 = vpop.eup %3520  ;;  %3530 = vtanh.f32 %v3826_v0  ;;  %v2072_v14 = vld [vmem:[%s4230_s30 + $0x88] sm:$0xff]  ;;  %v1312_v0 = vmul.f32 0.5, %v4062_v34 }
 0x419   : > { %v3523_v9 = vpop.eup %3522  ;;  %v1378_v44 = vmul.f32 0.5, %v3521_v63  ;;  %3532 = vtanh.f32 %v1309_v17 }
 0x41a   : > { %v1393_v41 = vadd.f32 0.5, %v1361_v3  ;;  %v1364_v52 = vmul.f32 0.5, %v3523_v9  ;;  %3534 = vtanh.f32 %v4406_v60 }
 0x41b   : > { %v1410_v29 = vadd.f32 0.5, %v1378_v44  ;;  %v3525_v62 = vpop.eup %3524  ;;  %3536 = vtanh.f32 %v4414_v13  ;;  %v2108_v13 = vmul.f32 %v4239_v36, %v2072_v14 }
 0x41c   : > { %v1396_v61 = vadd.f32 0.5, %v1364_v52  ;;  %v3527_v45 = vpop.eup %3526 }
 0x41d   : > { %v1367_v12 = vmul.f32 0.5, %v3527_v45  ;;  %v3529_v10 = vpop.eup %3528 }
 0x41e   : > { %1483 = vrot.lane.b32.xlu2 %v1401_v38, %s3642_s23  ;;  %v1381_v38 = vmul.f32 0.5, %v3525_v62  ;;  %v1370_v50 = vmul.f32 0.5, %v3529_v10  ;;  %v3531_v47 = vpop.eup %3530 }
 0x41f   : > { %v1399_v54 = vadd.f32 0.5, %v1367_v12  ;;  %v3533_v63 = vpop.eup %3532 }
 0x420   : > { %1455 = vrot.lane.b32.xlu0 %v1387_v56, %s3642_s23  ;;  %v1413_v23 = vadd.f32 0.5, %v1381_v38  ;;  %v2071_v56 = vld [vmem:[%s4230_s30 + $0x80] sm:$0xff]  ;;  %v1373_v62 = vmul.f32 0.5, %v3533_v63  ;;  %v2144_v38 = vadd.f32 %v4248_v20, %v2108_v13 }
 0x426   : > { %1489 = vrot.lane.b32.xlu2 %v1404_v7, %s3642_s23  ;;  %v2107_v7 = vmul.f32 %v4239_v36, %v2071_v56  ;;  %v2073_v56 = vld [vmem:[%s4230_s30 + $0x90] sm:$0xff] }
 0x428   : > { %1461 = vrot.lane.b32.xlu0 %v1390_v49, %s3642_s23  ;;  %v2143_v55 = vadd.f32 %v4248_v20, %v2107_v7  ;;  %v1289_v49 = vmul.f32 0.5, %v3840_v15 }
 0x42a   : > { %3538 = vtanh.f32 %v1289_v49  ;;  %v4562_v49 = vld [vmem:[%s5044_s2] ss:$0 sm:$0xff] }
 0x42b   : > { %3540 = vtanh.f32 %v3842_v16 }
 0x42c   : > { %3542 = vtanh.f32 %v1312_v0 }
 0x42d   : > { %3544 = vtanh.f32 %v1292_v59 }
 0x42e   : > { %1495 = vrot.lane.b32.xlu2 %v1407_v57, %s3642_s23  ;;  %v1402_v57 = vadd.f32 0.5, %v1370_v50  ;;  %v1405_v50 = vadd.f32 0.5, %v1373_v62  ;;  %3546 = vtanh.f32 %v3862_v37 }
 0x430   : > { %1467 = vrot.lane.b32.xlu0 %v1393_v41, %s3642_s23 }
 0x433   : > { %v2224_v30 = vpop.permute.xlu2 %2223  ;;  %v1990_v41 = vpop.permute.xlu1 %1989 }
 0x434   : > { %3300 = vmatmul.msk.bf16.gmra.mxu3 %vm838_vm0, %v2224_v30 }
 0x436   : > { %1501 = vrot.lane.b32.xlu2 %v1410_v29, %s3642_s23 }
 0x438   : > { %1473 = vrot.lane.b32.xlu0 %v1396_v61, %s3642_s23 }
 0x43e   : > { %1507 = vrot.lane.b32.xlu2 %v1413_v23, %s3642_s23 }
 0x440   : > { %v2226_v51 = vpop.permute.xlu2 %2225  ;;  %1479 = vrot.lane.b32.xlu0 %v1399_v54, %s3642_s23 }
 0x444   : > { %3301 = vmatmul.msk.bf16.gmra.mxu3 %vm838_vm0, %v2226_v51  ;;  %v1315_v51 = vmul.f32 0.5, %v4096_v21 }
 0x445   : > { %v2340_v42 = vpop.f32.mrf.mxu3 }
 0x446   : > { %v2341_v3 = vadd.f32 %v4253_v26, %v2340_v42  ;;  %v3535_v26 = vpop.eup %3534  ;;  %v2109_v42 = vmul.f32 %v4562_v49, %v2073_v56  ;;  %3548 = vtanh.f32 %v1315_v51 }
 0x447   : > { %v3537_v52 = vpop.eup %3536  ;;  %v2054_v61 = vmul.f32 %v3535_v26, %v1990_v41  ;;  %v2074_v26 = vld [vmem:[%s4230_s30 + $0x98] sm:$0xff]  ;;  %3550 = vtanh.f32 %v3874_v48 }
 0x448   : > { %v2396_v24 = vadd.f32 %v2341_v3, %v2143_v55  ;;  %v1448_v60 = vpop.permute.xlu2 %1447  ;;  %1485 = vrot.lane.b32.xlu0 %v1402_v57, %s3642_s23  ;;  %v3539_v17 = vpop.eup %3538 }
 0x449   : > { %v4535_v9 = vmul.f32 %v3531_v47, %v1448_v60  ;;  %v3541_v7 = vpop.eup %3540  ;;  %v1353_v47 = vmul.f32 0.5, %v3539_v17  ;;  %v4579_v60 = vld [vmem:[%s5045_s3] ss:$0 sm:$0xff] }
 0x44a   : > { %2460 = vst.msk [vmem:[%s4262_s28 + $0x80] sm:$0xff] %vm838_vm0, %v2396_v24  ;;  %v2679_v44 = vsel %vm838_vm0, %v2396_v24, 0.0  ;;  %v2734_v30 = vmul.f32 %v2396_v24, %v2396_v24  ;;  %v3543_v55 = vpop.eup %3542  ;;  %v2145_v37 = vadd.f32 %v4579_v60, %v2109_v42 }
 0x44b   : > { %v2680_v29 = vadd.f32 %v2679_v44, %v4490_v43  ;;  %2412 = vst.msk [vmem:[%s4532_s24] sm:$0xff] %vm838_vm0, %v4535_v9  ;;  %v1988_v36 = vpop.permute.xlu0 %1987  ;;  %v4554_v43 = vld [vmem:[%s5051_s9] ss:$0 sm:$0xff]  ;;  %v1376_v63 = vmul.f32 0.5, %v3543_v55  ;;  %v1295_v44 = vmul.f32 0.5, %v3871_v46 }
 0x44c   : > { %v2781_v16 = vsel %vm838_vm0, %v2734_v30, 0.0  ;;  %v2053_v45 = vmul.f32 %v3537_v52, %v1988_v36  ;;  %v3545_v30 = vpop.eup %3544  ;;  %v1318_v36 = vmul.f32 0.5, %v4156_v33  ;;  %v2075_v55 = vld [vmem:[%s4230_s30 + $0xa0] sm:$0xff] }
 0x44d   : > { %v2782_v12 = vadd.f32 %v2781_v16, %v4493_v18  ;;  %v2342_v23 = vpop.f32.mrf.mxu3  ;;  %v3547_v62 = vpop.eup %3546  ;;  %v1408_v59 = vadd.f32 0.5, %v1376_v63  ;;  %3552 = vtanh.f32 %v1295_v44  ;;  %v1356_v17 = vmul.f32 0.5, %v3545_v30 }
 0x44e   : > { %v2174_v54 = vpack.c.bf16 %v2054_v61, %v2053_v45  ;;  %v2343_v10 = vadd.f32 %v4554_v43, %v2342_v23  ;;  %v3549_v61 = vpop.eup %3548  ;;  %3554 = vtanh.f32 %v1318_v36 }
 0x450   : > { %v2397_v20 = vadd.f32 %v2343_v10, %v2144_v38  ;;  %v1454_v18 = vpop.permute.xlu2 %1453  ;;  %2229 = vrot.lane.b32.xlu1 %v2174_v54, %s3641_s22  ;;  %1491 = vrot.lane.b32.xlu0 %v1405_v50, %s3642_s23  ;;  %v2110_v38 = vmul.f32 %v4562_v49, %v2074_v26  ;;  %v1379_v10 = vmul.f32 0.5, %v3549_v61  ;;  %v2076_v61 = vld [vmem:[%s4230_s30 + $0xa8] sm:$0xff] }
 0x451   : > { %v4565_v14 = vmul.f32 %v3541_v7, %v1454_v18  ;;  %v3551_v18 = vpop.eup %3550 }
 0x452   : > { %2461 = vst.msk [vmem:[%s4262_s28 + $0x88] sm:$0xff] %vm838_vm0, %v2397_v20  ;;  %v2681_v3 = vsel %vm838_vm0, %v2397_v20, 0.0  ;;  %v2735_v0 = vmul.f32 %v2397_v20, %v2397_v20  ;;  %v2146_v51 = vadd.f32 %v4579_v60, %v2110_v38  ;;  %v1298_v20 = vmul.f32 0.5, %v3887_v2 }
 0x453   : > { %v2682_v57 = vadd.f32 %v2681_v3, %v2680_v29  ;;  %2415 = vst.msk [vmem:[%s4532_s24 + $0x18] sm:$0xff] %vm838_vm0, %v4565_v14  ;;  %v1385_v29 = vadd.f32 0.5, %v1353_v47  ;;  %v1388_v3 = vadd.f32 0.5, %v1356_v17  ;;  %v1411_v47 = vadd.f32 0.5, %v1379_v10 }
 0x454   : > { %v2783_v24 = vsel %vm838_vm0, %v2735_v0, 0.0  ;;  %v3553_v0 = vpop.eup %3552  ;;  %3556 = vtanh.f32 %v1298_v20  ;;  %v2112_v10 = vmul.f32 %v4562_v49, %v2076_v61 }
 0x455   : > { %v2784_v13 = vadd.f32 %v2783_v24, %v2782_v12  ;;  %v2345_v41 = vpop.f32.mrf.mxu3  ;;  %3558 = vtanh.f32 %v3896_v11  ;;  %v1359_v44 = vmul.f32 0.5, %v3553_v0  ;;  %v5070_v0 = vld [vmem:[#allocation2_spill] sm:$0xff] }
 0x456   : > { %v2346_v52 = vadd.f32 %v4554_v43, %v2345_v41 }
 0x457   : > { %v1391_v38 = vadd.f32 0.5, %v1359_v44 }
 0x458   : > { %v2398_v16 = vadd.f32 %v2346_v52, %v2145_v37  ;;  %v1460_v45 = vpop.permute.xlu2 %1459  ;;  %1451 = vrot.lane.b32.xlu1 %v1385_v29, %s3642_s23  ;;  %1497 = vrot.lane.b32.xlu0 %v1408_v59, %s3642_s23  ;;  %v2111_v37 = vmul.f32 %v4562_v49, %v2075_v55 }
 0x459   : > { %v4589_v12 = vmul.f32 %v3547_v62, %v1460_v45 }
 0x45a   : > { %2462 = vst.msk [vmem:[%s4262_s28 + $0x90] sm:$0xff] %vm838_vm0, %v2398_v16  ;;  %v2683_v23 = vsel %vm838_vm0, %v2398_v16, 0.0  ;;  %v2736_v56 = vmul.f32 %v2398_v16, %v2398_v16  ;;  %v2147_v36 = vadd.f32 %v4579_v60, %v2111_v37  ;;  %v1301_v16 = vmul.f32 0.5, %v3916_v32 }
 0x45b   : > { %v2684_v54 = vadd.f32 %v2683_v23, %v2682_v57  ;;  %2418 = vst.msk [vmem:[%s4532_s24 + $0x30] sm:$0xff] %vm838_vm0, %v4589_v12  ;;  %v3555_v57 = vpop.eup %3554 }
 0x45c   : > { %v2785_v48 = vsel %vm838_vm0, %v2736_v56, 0.0  ;;  %v1382_v52 = vmul.f32 0.5, %v3555_v57  ;;  %v3557_v11 = vpop.eup %3556  ;;  %3560 = vtanh.f32 %v1301_v16 }
 0x45d   : > { %v2786_v7 = vadd.f32 %v2785_v48, %v2784_v13  ;;  %v2347_v50 = vpop.f32.mrf.mxu3  ;;  %v3559_v56 = vpop.eup %3558  ;;  %3562 = vtanh.f32 %v3920_v35 }
 0x45e   : > { %v2348_v42 = vadd.f32 %v4554_v43, %v2347_v50  ;;  %v1414_v23 = vadd.f32 0.5, %v1382_v52  ;;  %v1362_v50 = vmul.f32 0.5, %v3557_v11 }
 0x460   : > { %v2399_v63 = vadd.f32 %v2348_v42, %v2146_v51  ;;  %v1466_v24 = vpop.permute.xlu2 %1465  ;;  %1457 = vrot.lane.b32.xlu1 %v1388_v3, %s3642_s23  ;;  %1503 = vrot.lane.b32.xlu0 %v1411_v47, %s3642_s23  ;;  %v1304_v47 = vmul.f32 0.5, %v5070_v0 }
 0x461   : > { %v4605_v13 = vmul.f32 %v3551_v18, %v1466_v24  ;;  %v2148_v18 = vadd.f32 %v4579_v60, %v2112_v10 }
 0x462   : > { %2463 = vst.msk [vmem:[%s4262_s28 + $0x98] sm:$0xff] %vm838_vm0, %v2399_v63  ;;  %v2685_v41 = vsel %vm838_vm0, %v2399_v63, 0.0  ;;  %v2737_v26 = vmul.f32 %v2399_v63, %v2399_v63  ;;  %v1394_v63 = vadd.f32 0.5, %v1362_v50  ;;  %v3561_v24 = vpop.eup %3560  ;;  %3564 = vtanh.f32 %v1304_v47 }
 0x463   : > { %v2686_v30 = vadd.f32 %v2685_v41, %v2684_v54  ;;  %2421 = vst.msk [vmem:[%s4532_s24 + $0x48] sm:$0xff] %vm838_vm0, %v4605_v13  ;;  %v3563_v35 = vpop.eup %3562  ;;  %3566 = vtanh.f32 %v3959_v28  ;;  %v1365_v52 = vmul.f32 0.5, %v3561_v24 }
 0x464   : > { %v2787_v29 = vsel %vm838_vm0, %v2737_v26, 0.0 }
 0x465   : > { %v2788_v62 = vadd.f32 %v2787_v29, %v2786_v7  ;;  %v2350_v59 = vpop.f32.mrf.mxu3  ;;  %v1397_v16 = vadd.f32 0.5, %v1365_v52 }
 0x466   : > { %v2351_v45 = vadd.f32 %v4554_v43, %v2350_v59  ;;  %v5071_v59 = vld [vmem:[#allocation3_spill] sm:$0xff] }
 0x467   : > { %v1307_v61 = vmul.f32 0.5, %v5071_v59 }
 0x468   : > { %v2400_v17 = vadd.f32 %v2351_v45, %v2147_v36  ;;  %v1472_v54 = vpop.permute.xlu2 %1471  ;;  %1463 = vrot.lane.b32.xlu1 %v1391_v38, %s3642_s23  ;;  %1509 = vrot.lane.b32.xlu0 %v1414_v23, %s3642_s23  ;;  %v3565_v45 = vpop.eup %3564 }
 0x469   : > { %v4622_v48 = vmul.f32 %v3559_v56, %v1472_v54  ;;  %v3567_v38 = vpop.eup %3566  ;;  %3568 = vtanh.f32 %v1307_v61  ;;  %v1368_v23 = vmul.f32 0.5, %v3565_v45  ;;  %v5072_v56 = vld [vmem:[#allocation4_spill] sm:$0xff]  ;;  %v2078_v61 = vld [vmem:[%s4230_s30 + $0xb8] sm:$0xff] }
 0x46a   : > { %2464 = vst.msk [vmem:[%s4262_s28 + $0xa0] sm:$0xff] %vm838_vm0, %v2400_v17  ;;  %v2687_v51 = vsel %vm838_vm0, %v2400_v17, 0.0  ;;  %v2738_v7 = vmul.f32 %v2400_v17, %v2400_v17  ;;  %3570 = vtanh.f32 %v3984_v4  ;;  %v1310_v17 = vmul.f32 0.5, %v5072_v56 }
 0x46b   : > { %v2688_v55 = vadd.f32 %v2687_v51, %v2686_v30  ;;  %2424 = vst.msk [vmem:[%s4532_s24 + $0x60] sm:$0xff] %vm838_vm0, %v4622_v48  ;;  %v1400_v54 = vadd.f32 0.5, %v1368_v23 }
 0x46c   : > { %v2789_v20 = vsel %vm838_vm0, %v2738_v7, 0.0  ;;  %3572 = vtanh.f32 %v1310_v17 }
 0x46d   : > { %v2790_v42 = vadd.f32 %v2789_v20, %v2788_v62  ;;  %v2352_v3 = vpop.f32.mrf.mxu3  ;;  %3574 = vtanh.f32 %v4059_v27  ;;  %v2077_v20 = vld [vmem:[%s4230_s30 + $0xb0] sm:$0xff] }
 0x46e   : > { %v2353_v57 = vadd.f32 %v4554_v43, %v2352_v3  ;;  %3576 = vtanh.f32 %v3828_v1  ;;  %v2113_v27 = vmul.f32 %v4562_v49, %v2077_v20 }
 0x46f   : > { %v3569_v10 = vpop.eup %3568 }
 0x470   : > { %v2401_v37 = vadd.f32 %v2353_v57, %v2148_v18  ;;  %v1478_v41 = vpop.permute.xlu2 %1477  ;;  %1469 = vrot.lane.b32.xlu1 %v1394_v63, %s3642_s23  ;;  %v3571_v51 = vpop.eup %3570  ;;  %v5073_v18 = vld [vmem:[#allocation5_spill] sm:$0xff] }
 0x471   : > { %v4637_v26 = vmul.f32 %v3563_v35, %v1478_v41  ;;  %v2546_v41 = vmul.f32 %v4535_v9, %v4535_v9 }
 0x472   : > { %2465 = vst.msk [vmem:[%s4262_s28 + $0xa8] sm:$0xff] %vm838_vm0, %v2401_v37  ;;  %v2689_v44 = vsel %vm838_vm0, %v2401_v37, 0.0  ;;  %v2739_v30 = vmul.f32 %v2401_v37, %v2401_v37  ;;  %v3573_v3 = vpop.eup %3572 }
 0x473   : > { %v4643_v29 = vadd.f32 %v2689_v44, %v2688_v55  ;;  %2427 = vst.msk [vmem:[%s4532_s24 + $0x78] sm:$0xff] %vm838_vm0, %v4637_v26  ;;  %v1371_v55 = vmul.f32 0.5, %v3569_v10  ;;  %v3575_v57 = vpop.eup %3574  ;;  %v1374_v35 = vmul.f32 0.5, %v3573_v3 }
 0x474   : > { %v2791_v36 = vsel %vm838_vm0, %v2739_v30, 0.0  ;;  %v3577_v1 = vpop.eup %3576  ;;  %v2149_v30 = vadd.f32 %v4579_v60, %v2113_v27 }
 0x475   : > { %v4649_v62 = vadd.f32 %v2791_v36, %v2790_v42  ;;  %v1313_v42 = vmul.f32 0.5, %v5073_v18  ;;  %v1403_v47 = vadd.f32 0.5, %v1371_v55  ;;  %v1406_v36 = vadd.f32 0.5, %v1374_v35 }
 0x477   : > { %3578 = vtanh.f32 %v1313_v42 }
 0x478   : > { %v1484_v11 = vpop.permute.xlu2 %1483  ;;  %1475 = vrot.lane.b32.xlu1 %v1397_v16, %s3642_s23  ;;  %3580 = vtanh.f32 %v4080_v8  ;;  %v1316_v16 = vmul.f32 0.5, %v4104_v40  ;;  %v2476_v8 = vsel %vm838_vm0, %v4535_v9, 0.0  ;;  %v2114_v9 = vmul.f32 %v4562_v49, %v2078_v61 }
 0x479   : > { %v4653_v28 = vmul.f32 %v3567_v38, %v1484_v11  ;;  %3582 = vtanh.f32 %v3848_v22  ;;  %v2578_v22 = vsel %vm838_vm0, %v2546_v41, 0.0 }
 0x47a   : > { %3584 = vtanh.f32 %v1316_v16 }
 0x47b   : > { %2430 = vst.msk [vmem:[%s4532_s24 + $0x90] sm:$0xff] %vm838_vm0, %v4653_v28  ;;  %3586 = vtanh.f32 %v4153_v5 }
 0x47c   : > { %3588 = vtanh.f32 %v3865_v39 }
 0x47d   : > { %v3579_v23 = vpop.eup %3578  ;;  %3590 = vtanh.f32 %v3882_v58 }
 0x47e   : > { %v1377_v3 = vmul.f32 0.5, %v3579_v23  ;;  %3592 = vtanh.f32 %v3901_v19 }
 0x47f   : > { %3594 = vtanh.f32 %v3945_v6 }
 0x480   : > { %v1490_v7 = vpop.permute.xlu2 %1489  ;;  %1481 = vrot.lane.b32.xlu1 %v1400_v54, %s3642_s23  ;;  %v3581_v54 = vpop.eup %3580  ;;  %3596 = vtanh.f32 %v3962_v31 }
 0x481   : > { %v4661_v50 = vmul.f32 %v3571_v51, %v1490_v7  ;;  %3598 = vtanh.f32 %v4043_v53 }
 0x482   : > { %v2228_v4 = vpop.permute.xlu0 %2227  ;;  %3600 = vtanh.f32 %v3840_v15 }
 0x483   : > { %2433 = vst.msk [vmem:[%s4532_s24 + $0xa8] sm:$0xff] %vm838_vm0, %v4661_v50  ;;  %3302 = vmatmul.msk.bf16.gmra.mxu3 %vm838_vm0, %v2228_v4  ;;  %3602 = vtanh.f32 %v4062_v34 }
 0x484   : > { %3604 = vtanh.f32 %v3851_v25 }
 0x485   : > { %3606 = vtanh.f32 %v4096_v21  ;;  %v2481_v21 = vsel %vm838_vm0, %v4565_v14, 0.0 }
 0x486   : > { %3608 = vtanh.f32 %v3871_v46 }
 0x487   : > { %3610 = vtanh.f32 %v4156_v33 }
 0x488   : > { %v1496_v63 = vpop.permute.xlu2 %1495  ;;  %1487 = vrot.lane.b32.xlu1 %v1403_v47, %s3642_s23  ;;  %v3583_v47 = vpop.eup %3582  ;;  %3612 = vtanh.f32 %v3887_v2 }
 0x489   : > { %v4673_v24 = vmul.f32 %v3575_v57, %v1496_v63  ;;  %3614 = vtanh.f32 %v3916_v32 }
 0x48a   : > { %v1450_v37 = vpop.permute.xlu0 %1449 }
 0x48b   : > { %2436 = vst.msk [vmem:[%s4532_s24 + $0xc0] sm:$0xff] %vm838_vm0, %v4673_v24  ;;  %v1544_v44 = vmul.f32 %v3577_v1, %v1450_v37  ;;  %v2150_v1 = vadd.f32 %v4579_v60, %v2114_v9 }
 0x48c   : > { %v2355_v52 = vpop.f32.mrf.mxu3 }
 0x48d   : > { %2413 = vst.msk [vmem:[%s4532_s24 + $0x8] sm:$0xff] %vm838_vm0, %v1544_v44  ;;  %v2477_v45 = vsel %vm838_vm0, %v1544_v44, 0.0  ;;  %v2547_v38 = vmul.f32 %v1544_v44, %v1544_v44  ;;  %v2356_v11 = vadd.f32 %v4554_v43, %v2355_v52  ;;  %v3585_v44 = vpop.eup %3584  ;;  %3616 = vtanh.f32 %v5070_v0 }
 0x48e   : > { %v4691_v17 = vadd.f32 %v2477_v45, %v2476_v8  ;;  %v1380_v16 = vmul.f32 0.5, %v3585_v44 }
 0x48f   : > { %v2579_v10 = vsel %vm838_vm0, %v2547_v38, 0.0  ;;  %v2402_v51 = vadd.f32 %v2356_v11, %v2149_v30  ;;  %v3587_v30 = vpop.eup %3586  ;;  %3618 = vtanh.f32 %v5071_v59 }
 0x490   : > { %v1502_v7 = vpop.permute.xlu2 %1501  ;;  %1493 = vrot.lane.b32.xlu1 %v1406_v36, %s3642_s23  ;;  %v4697_v55 = vadd.f32 %v2579_v10, %v2578_v22  ;;  %v3589_v8 = vpop.eup %3588  ;;  %v1412_v22 = vadd.f32 0.5, %v1380_v16  ;;  %3620 = vtanh.f32 %v5072_v56 }
 0x491   : > { %v4699_v4 = vmul.f32 %v3581_v54, %v1502_v7  ;;  %2466 = vst.msk [vmem:[%s4262_s28 + $0xb0] sm:$0xff] %vm838_vm0, %v2402_v51  ;;  %v2691_v20 = vsel %vm838_vm0, %v2402_v51, 0.0  ;;  %v2740_v42 = vmul.f32 %v2402_v51, %v2402_v51  ;;  %v3591_v10 = vpop.eup %3590  ;;  %3622 = vtanh.f32 %v5073_v18 }
 0x492   : > { %v2692_v57 = vadd.f32 %v2691_v20, %v4643_v29  ;;  %v1456_v63 = vpop.permute.xlu0 %1455  ;;  %v1409_v29 = vadd.f32 0.5, %v1377_v3  ;;  %v3593_v9 = vpop.eup %3592  ;;  %3624 = vtanh.f32 %v4104_v40 }
 0x493   : > { %2439 = vst.msk [vmem:[%s4532_s24 + $0xd8] sm:$0xff] %vm838_vm0, %v4699_v4  ;;  %v2793_v27 = vsel %vm838_vm0, %v2740_v42, 0.0  ;;  %v4710_v35 = vmul.f32 %v3583_v47, %v1456_v63  ;;  %v2079_v42 = vld [vmem:[%s4230_s30 + $0xc0] sm:$0xff]  ;;  %v3595_v47 = vpop.eup %3594  ;;  %v2529_v40 = vsel %vm838_vm0, %v4699_v4, 0.0 }
 0x494   : > { %v2794_v37 = vadd.f32 %v2793_v27, %v4649_v62  ;;  %v2357_v41 = vpop.f32.mrf.mxu3  ;;  %v2115_v3 = vmul.f32 %v4562_v49, %v2079_v42  ;;  %v2080_v27 = vld [vmem:[%s4230_s30 + $0xc8] sm:$0xff] }
 0x495   : > { %2416 = vst.msk [vmem:[%s4532_s24 + $0x20] sm:$0xff] %vm838_vm0, %v4710_v35  ;;  %v2358_v5 = vadd.f32 %v4554_v43, %v2357_v41  ;;  %v2116_v41 = vmul.f32 %v4562_v49, %v2080_v27 }
 0x496   : > { %v2151_v63 = vadd.f32 %v4579_v60, %v2115_v3 }
 0x497   : > { %v2403_v52 = vadd.f32 %v2358_v5, %v2150_v1  ;;  %v3597_v5 = vpop.eup %3596 }
 0x498   : > { %v1508_v36 = vpop.permute.xlu2 %1507  ;;  %1499 = vrot.lane.b32.xlu1 %v1409_v29, %s3642_s23 }
 0x499   : > { %v4720_v61 = vmul.f32 %v3587_v30, %v1508_v36  ;;  %2467 = vst.msk [vmem:[%s4262_s28 + $0xb8] sm:$0xff] %vm838_vm0, %v2403_v52  ;;  %v2693_v39 = vsel %vm838_vm0, %v2403_v52, 0.0  ;;  %v2741_v62 = vmul.f32 %v2403_v52, %v2403_v52 }
 0x49a   : > { %v2694_v45 = vadd.f32 %v2693_v39, %v2692_v57  ;;  %v1462_v38 = vpop.permute.xlu0 %1461  ;;  %v2152_v39 = vadd.f32 %v4579_v60, %v2116_v41 }
 0x49b   : > { %2442 = vst.msk [vmem:[%s4532_s24 + $0xf0] sm:$0xff] %vm838_vm0, %v4720_v61  ;;  %v2795_v11 = vsel %vm838_vm0, %v2741_v62, 0.0  ;;  %v4729_v23 = vmul.f32 %v3589_v8, %v1462_v38  ;;  %v2081_v8 = vld [vmem:[%s4230_s30 + $0xd0] sm:$0xff] }
 0x49c   : > { %v2796_v54 = vadd.f32 %v2795_v11, %v2794_v37 }
 0x49d   : > { %2419 = vst.msk [vmem:[%s4532_s24 + $0x38] sm:$0xff] %vm838_vm0, %v4729_v23 }
 0x4a0   : > { %1505 = vrot.lane.b32.xlu1 %v1412_v22, %s3642_s23  ;;  %s4994_s23 = sshll.u32 %s5077_s19, 3 }
 0x4a1   : > { %s564_s21 = scalar_lea.vmem %s5054_s12, %s4994_s23  ;;  %s568_s25 = scalar_lea.vmem %s5055_s13, %s4994_s23 }
 0x4a2   : > { %v1468_v51 = vpop.permute.xlu0 %1467  ;;  %s572_s20 = scalar_lea.vmem %s5056_s14, %s4994_s23  ;;  %s576_s29 = scalar_lea.vmem %s5057_s15, %s4994_s23 }
 0x4a3   : > { %v4736_v7 = vmul.f32 %v3591_v10, %v1468_v51  ;;  %v2117_v10 = vmul.f32 %v4562_v49, %v2081_v8 }
 0x4a5   : > { %2422 = vst.msk [vmem:[%s4532_s24 + $0x50] sm:$0xff] %vm838_vm0, %v4736_v7  ;;  %v2153_v3 = vadd.f32 %v4579_v60, %v2117_v10 }
 0x4aa   : > { %v1474_v20 = vpop.permute.xlu0 %1473 }
 0x4ab   : > { %v4742_v58 = vmul.f32 %v3593_v9, %v1474_v20 }
 0x4ad   : > { %2425 = vst.msk [vmem:[%s4532_s24 + $0x68] sm:$0xff] %vm838_vm0, %v4742_v58 }
 0x4b2   : > { %v1480_v57 = vpop.permute.xlu0 %1479 }
 0x4b3   : > { %v4750_v19 = vmul.f32 %v3595_v47, %v1480_v57 }
 0x4b5   : > { %2428 = vst.msk [vmem:[%s4532_s24 + $0x80] sm:$0xff] %vm838_vm0, %v4750_v19 }
 0x4b7   : > { %v2360_v6 = vpop.f32.mrf.mxu3 }
 0x4b8   : > { %v2361_v1 = vadd.f32 %v4554_v43, %v2360_v6 }
 0x4ba   : > { %v2404_v37 = vadd.f32 %v2361_v1, %v2151_v63  ;;  %v1486_v29 = vpop.permute.xlu0 %1485  ;;  %v2082_v63 = vld [vmem:[%s4230_s30 + $0xd8] sm:$0xff] }
 0x4bb   : > { %v4763_v30 = vmul.f32 %v3597_v5, %v1486_v29 }
 0x4bc   : > { %2468 = vst.msk [vmem:[%s4262_s28 + $0xc0] sm:$0xff] %vm838_vm0, %v2404_v37  ;;  %v2695_v31 = vsel %vm838_vm0, %v2404_v37, 0.0  ;;  %v2742_v44 = vmul.f32 %v2404_v37, %v2404_v37  ;;  %v2118_v37 = vmul.f32 %v4562_v49, %v2082_v63 }
 0x4bd   : > { %v2696_v52 = vadd.f32 %v2695_v31, %v2694_v45  ;;  %2431 = vst.msk [vmem:[%s4532_s24 + $0x98] sm:$0xff] %vm838_vm0, %v4763_v30  ;;  %v3599_v45 = vpop.eup %3598 }
 0x4be   : > { %v2797_v36 = vsel %vm838_vm0, %v2742_v44, 0.0  ;;  %v3601_v27 = vpop.eup %3600  ;;  %v2154_v8 = vadd.f32 %v4579_v60, %v2118_v37  ;;  %v2552_v37 = vmul.f32 %v4589_v12, %v4589_v12 }
 0x4bf   : > { %v2798_v62 = vadd.f32 %v2797_v36, %v2796_v54  ;;  %v2362_v16 = vpop.f32.mrf.mxu3  ;;  %v3603_v34 = vpop.eup %3602 }
 0x4c0   : > { %v2363_v38 = vadd.f32 %v4554_v43, %v2362_v16 }
 0x4c2   : > { %v2405_v11 = vadd.f32 %v2363_v38, %v2152_v39  ;;  %v2230_v22 = vpop.permute.xlu1 %2229  ;;  %v1492_v53 = vpop.permute.xlu0 %1491  ;;  %v2550_v38 = vmul.f32 %v4710_v35, %v4710_v35 }
 0x4c3   : > { %3303 = vmatmul.msk.bf16.gmra.mxu3 %vm838_vm0, %v2230_v22  ;;  %v4778_v54 = vmul.f32 %v3599_v45, %v1492_v53 }
 0x4c4   : > { %2469 = vst.msk [vmem:[%s4262_s28 + $0xc8] sm:$0xff] %vm838_vm0, %v2405_v11  ;;  %v2697_v51 = vsel %vm838_vm0, %v2405_v11, 0.0  ;;  %v2743_v9 = vmul.f32 %v2405_v11, %v2405_v11  ;;  %v2585_v63 = vsel %vm838_vm0, %v2550_v38, 0.0 }
 0x4c5   : > { %v2698_v20 = vadd.f32 %v2697_v51, %v2696_v52  ;;  %2434 = vst.msk [vmem:[%s4532_s24 + $0xb0] sm:$0xff] %vm838_vm0, %v4778_v54  ;;  %v2549_v52 = vmul.f32 %v4565_v14, %v4565_v14  ;;  %v3605_v51 = vpop.eup %3604 }
 0x4c6   : > { %v2799_v42 = vsel %vm838_vm0, %v2743_v9, 0.0  ;;  %v3607_v14 = vpop.eup %3606 }
 0x4c7   : > { %v2800_v47 = vadd.f32 %v2799_v42, %v2798_v62  ;;  %v2365_v57 = vpop.f32.mrf.mxu3  ;;  %v2583_v9 = vsel %vm838_vm0, %v2549_v52, 0.0 }
 0x4c8   : > { %v2366_v6 = vadd.f32 %v4554_v43, %v2365_v57 }
 0x4ca   : > { %v2406_v1 = vadd.f32 %v2366_v6, %v2153_v3  ;;  %v1452_v15 = vpop.permute.xlu1 %1451  ;;  %v1498_v5 = vpop.permute.xlu0 %1497 }
 0x4cb   : > { %v1545_v41 = vmul.f32 %v3601_v27, %v1452_v15  ;;  %v4794_v44 = vmul.f32 %v3603_v34, %v1498_v5 }
 0x4cc   : > { %2470 = vst.msk [vmem:[%s4262_s28 + $0xd0] sm:$0xff] %vm838_vm0, %v2406_v1  ;;  %v2699_v29 = vsel %vm838_vm0, %v2406_v1, 0.0  ;;  %v2744_v31 = vmul.f32 %v2406_v1, %v2406_v1 }
 0x4cd   : > { %v2700_v36 = vadd.f32 %v2699_v29, %v2698_v20  ;;  %2414 = vst.msk [vmem:[%s4532_s24 + $0x10] sm:$0xff] %vm838_vm0, %v1545_v41  ;;  %v2479_v39 = vsel %vm838_vm0, %v1545_v41, 0.0  ;;  %v2548_v62 = vmul.f32 %v1545_v41, %v1545_v41  ;;  %v2483_v20 = vsel %vm838_vm0, %v4710_v35, 0.0 }
 0x4ce   : > { %v2801_v25 = vsel %vm838_vm0, %v2744_v31, 0.0  ;;  %v2480_v16 = vadd.f32 %v2479_v39, %v4691_v17  ;;  %2437 = vst.msk [vmem:[%s4532_s24 + $0xc8] sm:$0xff] %vm838_vm0, %v4794_v44  ;;  %v2487_v29 = vsel %vm838_vm0, %v4589_v12, 0.0  ;;  %v2553_v31 = vmul.f32 %v4729_v23, %v4729_v23  ;;  %v3609_v39 = vpop.eup %3608 }
 0x4cf   : > { %v2802_v11 = vadd.f32 %v2801_v25, %v2800_v47  ;;  %v2581_v22 = vsel %vm838_vm0, %v2548_v62, 0.0  ;;  %v2367_v10 = vpop.f32.mrf.mxu3 }
 0x4d0   : > { %v2482_v45 = vadd.f32 %v2481_v21, %v2480_v16  ;;  %v2582_v53 = vadd.f32 %v2581_v22, %v4697_v55  ;;  %v2368_v17 = vadd.f32 %v4554_v43, %v2367_v10  ;;  %v3611_v16 = vpop.eup %3610  ;;  %v2489_v21 = vsel %vm838_vm0, %v4729_v23, 0.0 }
 0x4d1   : > { %v2591_v10 = vsel %vm838_vm0, %v2553_v31, 0.0 }
 0x4d2   : > { %v2584_v42 = vadd.f32 %v2583_v9, %v2582_v53  ;;  %v2407_v3 = vadd.f32 %v2368_v17, %v2154_v8  ;;  %v1458_v47 = vpop.permute.xlu1 %1457  ;;  %v2484_v57 = vadd.f32 %v2483_v20, %v2482_v45  ;;  %v1504_v6 = vpop.permute.xlu0 %1503  ;;  %v2589_v8 = vsel %vm838_vm0, %v2552_v37, 0.0 }
 0x4d3   : > { %v1548_v55 = vmul.f32 %v3605_v51, %v1458_v47  ;;  %v4824_v15 = vmul.f32 %v3607_v14, %v1504_v6  ;;  %v2555_v51 = vmul.f32 %v4605_v13, %v4605_v13  ;;  %v2493_v14 = vsel %vm838_vm0, %v4605_v13, 0.0 }
 0x4d4   : > { %2471 = vst.msk [vmem:[%s4262_s28 + $0xd8] sm:$0xff] %vm838_vm0, %v2407_v3  ;;  %v2701_v27 = vsel %vm838_vm0, %v2407_v3, 0.0  ;;  %v2745_v35 = vmul.f32 %v2407_v3, %v2407_v3  ;;  %v2586_v1 = vadd.f32 %v2585_v63, %v2584_v42  ;;  %v2556_v42 = vmul.f32 %v4736_v7, %v4736_v7 }
 0x4d5   : > { %v4828_v34 = vadd.f32 %v2701_v27, %v2700_v36  ;;  %2417 = vst.msk [vmem:[%s4532_s24 + $0x28] sm:$0xff] %vm838_vm0, %v1548_v55  ;;  %v2485_v46 = vsel %vm838_vm0, %v1548_v55, 0.0  ;;  %v2551_v41 = vmul.f32 %v1548_v55, %v1548_v55  ;;  %v2495_v63 = vsel %vm838_vm0, %v4736_v7, 0.0  ;;  %v3613_v55 = vpop.eup %3612 }
 0x4d6   : > { %v2803_v33 = vsel %vm838_vm0, %v2745_v35, 0.0  ;;  %v2486_v5 = vadd.f32 %v2485_v46, %v2484_v57  ;;  %2440 = vst.msk [vmem:[%s4532_s24 + $0xe0] sm:$0xff] %vm838_vm0, %v4824_v15  ;;  %v2595_v57 = vsel %vm838_vm0, %v2555_v51, 0.0  ;;  %v2558_v46 = vmul.f32 %v4622_v48, %v4622_v48 }
 0x4d7   : > { %v4841_v52 = vadd.f32 %v2803_v33, %v2802_v11  ;;  %v2587_v36 = vsel %vm838_vm0, %v2551_v41, 0.0  ;;  %v2499_v7 = vsel %vm838_vm0, %v4622_v48, 0.0 }
 0x4d8   : > { %v2488_v62 = vadd.f32 %v2487_v29, %v2486_v5  ;;  %v2588_v25 = vadd.f32 %v2587_v36, %v2586_v1  ;;  %v2597_v1 = vsel %vm838_vm0, %v2556_v42, 0.0  ;;  %v2559_v29 = vmul.f32 %v4742_v58, %v4742_v58 }
 0x4da   : > { %v2590_v38 = vadd.f32 %v2589_v8, %v2588_v25  ;;  %v1464_v12 = vpop.permute.xlu1 %1463  ;;  %v2490_v22 = vadd.f32 %v2489_v21, %v2488_v62  ;;  %v1510_v45 = vpop.permute.xlu0 %1509  ;;  %v2501_v62 = vsel %vm838_vm0, %v4742_v58, 0.0  ;;  %v2505_v58 = vsel %vm838_vm0, %v4637_v26, 0.0 }
 0x4db   : > { %v1551_v11 = vmul.f32 %v3609_v39, %v1464_v12  ;;  %v4848_v17 = vmul.f32 %v3611_v16, %v1510_v45  ;;  %v2601_v39 = vsel %vm838_vm0, %v2558_v46, 0.0  ;;  %v3615_v25 = vpop.eup %3614  ;;  %v2513_v46 = vsel %vm838_vm0, %v4763_v30, 0.0 }
 0x4dc   : > { %v2592_v53 = vadd.f32 %v2591_v10, %v2590_v38  ;;  %v2603_v38 = vsel %vm838_vm0, %v2559_v29, 0.0 }
 0x4dd   : > { %2420 = vst.msk [vmem:[%s4532_s24 + $0x40] sm:$0xff] %vm838_vm0, %v1551_v11  ;;  %v2491_v9 = vsel %vm838_vm0, %v1551_v11, 0.0  ;;  %v2554_v23 = vmul.f32 %v1551_v11, %v1551_v11 }
 0x4de   : > { %v2492_v20 = vadd.f32 %v2491_v9, %v2490_v22  ;;  %2443 = vst.msk [vmem:[%s4532_s24 + $0xf8] sm:$0xff] %vm838_vm0, %v4848_v17  ;;  %v2561_v22 = vmul.f32 %v4637_v26, %v4637_v26 }
 0x4df   : > { %v2593_v2 = vsel %vm838_vm0, %v2554_v23, 0.0 }
 0x4e0   : > { %v2494_v3 = vadd.f32 %v2493_v14, %v2492_v20  ;;  %v2594_v47 = vadd.f32 %v2593_v2, %v2592_v53  ;;  %v2562_v53 = vmul.f32 %v4750_v19, %v4750_v19  ;;  %v2607_v23 = vsel %vm838_vm0, %v2561_v22, 0.0  ;;  %v3617_v14 = vpop.eup %3616 }
 0x4e1   : > { %v2507_v20 = vsel %vm838_vm0, %v4750_v19, 0.0  ;;  %v2511_v19 = vsel %vm838_vm0, %v4653_v28, 0.0 }
 0x4e2   : > { %v2596_v6 = vadd.f32 %v2595_v57, %v2594_v47  ;;  %v1470_v27 = vpop.permute.xlu1 %1469  ;;  %v2496_v35 = vadd.f32 %v2495_v63, %v2494_v3  ;;  %v2609_v47 = vsel %vm838_vm0, %v2562_v53, 0.0  ;;  %v2564_v63 = vmul.f32 %v4653_v28, %v4653_v28 }
 0x4e3   : > { %v1554_v13 = vmul.f32 %v3613_v55, %v1470_v27 }
 0x4e4   : > { %v2598_v37 = vadd.f32 %v2597_v1, %v2596_v6 }
 0x4e5   : > { %2423 = vst.msk [vmem:[%s4532_s24 + $0x58] sm:$0xff] %vm838_vm0, %v1554_v13  ;;  %v2497_v41 = vsel %vm838_vm0, %v1554_v13, 0.0  ;;  %v2557_v33 = vmul.f32 %v1554_v13, %v1554_v13 }
 0x4e6   : > { %v2498_v5 = vadd.f32 %v2497_v41, %v2496_v35  ;;  %v2565_v35 = vmul.f32 %v4763_v30, %v4763_v30  ;;  %v3619_v41 = vpop.eup %3618 }
 0x4e7   : > { %v2599_v31 = vsel %vm838_vm0, %v2557_v33, 0.0 }
 0x4e8   : > { %v2500_v36 = vadd.f32 %v2499_v7, %v2498_v5  ;;  %v2600_v32 = vadd.f32 %v2599_v31, %v2598_v37  ;;  %v2613_v37 = vsel %vm838_vm0, %v2564_v63, 0.0  ;;  %v2615_v28 = vsel %vm838_vm0, %v2565_v35, 0.0 }
 0x4e9   : > { %v2525_v63 = vsel %vm838_vm0, %v4794_v44, 0.0 }
 0x4ea   : > { %v2602_v16 = vadd.f32 %v2601_v39, %v2600_v32  ;;  %v1476_v8 = vpop.permute.xlu1 %1475  ;;  %v2502_v21 = vadd.f32 %v2501_v62, %v2500_v36  ;;  %v2567_v36 = vmul.f32 %v4661_v50, %v4661_v50  ;;  %v2517_v62 = vsel %vm838_vm0, %v4661_v50, 0.0 }
 0x4eb   : > { %v1557_v48 = vmul.f32 %v3615_v25, %v1476_v8  ;;  %v2568_v25 = vmul.f32 %v4778_v54, %v4778_v54  ;;  %v2083_v8 = vld [vmem:[%s4230_s30 + $0xe0] sm:$0xff] }
 0x4ec   : > { %v2604_v12 = vadd.f32 %v2603_v38, %v2602_v16  ;;  %v2619_v38 = vsel %vm838_vm0, %v2567_v36, 0.0  ;;  %v2119_v50 = vmul.f32 %v4562_v49, %v2083_v8 }
 0x4ed   : > { %2426 = vst.msk [vmem:[%s4532_s24 + $0x70] sm:$0xff] %vm838_vm0, %v1557_v48  ;;  %v2503_v10 = vsel %vm838_vm0, %v1557_v48, 0.0  ;;  %v2560_v11 = vmul.f32 %v1557_v48, %v1557_v48  ;;  %v2519_v48 = vsel %vm838_vm0, %v4778_v54, 0.0 }
 0x4ee   : > { %v2504_v45 = vadd.f32 %v2503_v10, %v2502_v21 }
 0x4ef   : > { %v2605_v51 = vsel %vm838_vm0, %v2560_v11, 0.0 }
 0x4f0   : > { %v2506_v9 = vadd.f32 %v2505_v58, %v2504_v45  ;;  %v2606_v0 = vadd.f32 %v2605_v51, %v2604_v12  ;;  %v3621_v12 = vpop.eup %3620  ;;  %v2621_v45 = vsel %vm838_vm0, %v2568_v25, 0.0  ;;  %v2570_v51 = vmul.f32 %v4673_v24, %v4673_v24 }
 0x4f2   : > { %v2608_v42 = vadd.f32 %v2607_v23, %v2606_v0  ;;  %v1482_v2 = vpop.permute.xlu1 %1481  ;;  %v2508_v3 = vadd.f32 %v2507_v20, %v2506_v9  ;;  %v2155_v23 = vadd.f32 %v4579_v60, %v2119_v50  ;;  %v2523_v20 = vsel %vm838_vm0, %v4673_v24, 0.0 }
 0x4f3   : > { %v1560_v26 = vmul.f32 %v3617_v14, %v1482_v2  ;;  %v2571_v14 = vmul.f32 %v4794_v44, %v4794_v44  ;;  %v2084_v2 = vld [vmem:[%s4230_s30 + $0xe8] sm:$0xff]  ;;  %v2573_v44 = vmul.f32 %v4699_v4, %v4699_v4 }
 0x4f4   : > { %v2610_v57 = vadd.f32 %v2609_v47, %v2608_v42  ;;  %v2120_v35 = vmul.f32 %v4562_v49, %v2084_v2 }
 0x4f5   : > { %2429 = vst.msk [vmem:[%s4532_s24 + $0x88] sm:$0xff] %vm838_vm0, %v1560_v26  ;;  %v2509_v55 = vsel %vm838_vm0, %v1560_v26, 0.0  ;;  %v2563_v6 = vmul.f32 %v1560_v26, %v1560_v26 }
 0x4f6   : > { %v2510_v27 = vadd.f32 %v2509_v55, %v2508_v3  ;;  %v3623_v55 = vpop.eup %3622 }
 0x4f7   : > { %v2611_v1 = vsel %vm838_vm0, %v2563_v6, 0.0 }
 0x4f8   : > { %v2512_v13 = vadd.f32 %v2511_v19, %v2510_v27  ;;  %v2612_v59 = vadd.f32 %v2611_v1, %v2610_v57  ;;  %v2625_v57 = vsel %vm838_vm0, %v2570_v51, 0.0  ;;  %v2627_v1 = vsel %vm838_vm0, %v2571_v14, 0.0 }
 0x4fa   : > { %v2614_v33 = vadd.f32 %v2613_v37, %v2612_v59  ;;  %v1488_v5 = vpop.permute.xlu1 %1487  ;;  %v2514_v7 = vadd.f32 %v2513_v46, %v2512_v13 }
 0x4fb   : > { %v1563_v29 = vmul.f32 %v3619_v41, %v1488_v5 }
 0x4fc   : > { %v2616_v31 = vadd.f32 %v2615_v28, %v2614_v33  ;;  %v2156_v28 = vadd.f32 %v4579_v60, %v2120_v35  ;;  %v2574_v60 = vmul.f32 %v4824_v15, %v4824_v15  ;;  %v2086_v35 = vld [vmem:[%s4230_s30 + $0xf8] sm:$0xff] }
 0x4fd   : > { %2432 = vst.msk [vmem:[%s4532_s24 + $0xa0] sm:$0xff] %vm838_vm0, %v1563_v29  ;;  %v2515_v32 = vsel %vm838_vm0, %v1563_v29, 0.0  ;;  %v2566_v39 = vmul.f32 %v1563_v29, %v1563_v29 }
 0x4fe   : > { %v2516_v30 = vadd.f32 %v2515_v32, %v2514_v7 }
 0x4ff   : > { %v2617_v16 = vsel %vm838_vm0, %v2566_v39, 0.0 }
 0x500   : > { %v2518_v56 = vadd.f32 %v2517_v62, %v2516_v30  ;;  %v2618_v21 = vadd.f32 %v2617_v16, %v2616_v31  ;;  %v2631_v30 = vsel %vm838_vm0, %v2573_v44, 0.0  ;;  %v3625_v62 = vpop.eup %3624 }
 0x502   : > { %v2620_v22 = vadd.f32 %v2619_v38, %v2618_v21  ;;  %v1494_v10 = vpop.permute.xlu1 %1493  ;;  %v2520_v11 = vadd.f32 %v2519_v48, %v2518_v56  ;;  %v2633_v21 = vsel %vm838_vm0, %v2574_v60, 0.0 }
 0x503   : > { %v1566_v58 = vmul.f32 %v3621_v12, %v1494_v10  ;;  %v2577_v10 = vmul.f32 %v4848_v17, %v4848_v17 }
 0x504   : > { %v2622_v53 = vadd.f32 %v2621_v45, %v2620_v22 }
 0x505   : > { %2435 = vst.msk [vmem:[%s4532_s24 + $0xb8] sm:$0xff] %vm838_vm0, %v1566_v58  ;;  %v2521_v54 = vsel %vm838_vm0, %v1566_v58, 0.0  ;;  %v2569_v9 = vmul.f32 %v1566_v58, %v1566_v58 }
 0x506   : > { %v2522_v0 = vadd.f32 %v2521_v54, %v2520_v11  ;;  %v2370_v18 = vpop.f32.mrf.mxu3 }
 0x507   : > { %v2623_v42 = vsel %vm838_vm0, %v2569_v9, 0.0  ;;  %v2371_v26 = vadd.f32 %v4554_v43, %v2370_v18  ;;  %v2639_v9 = vsel %vm838_vm0, %v2577_v10, 0.0 }
 0x508   : > { %v2524_v3 = vadd.f32 %v2523_v20, %v2522_v0  ;;  %v2624_v47 = vadd.f32 %v2623_v42, %v2622_v53  ;;  %v2537_v53 = vsel %vm838_vm0, %v4848_v17, 0.0 }
 0x509   : > { %v2408_v6 = vadd.f32 %v2371_v26, %v2155_v23 }
 0x50a   : > { %v2626_v24 = vadd.f32 %v2625_v57, %v2624_v47  ;;  %v1500_v27 = vpop.permute.xlu1 %1499  ;;  %v2526_v19 = vadd.f32 %v2525_v63, %v2524_v3  ;;  %v2085_v63 = vld [vmem:[%s4230_s30 + $0xf0] sm:$0xff] }
 0x50b   : > { %v1569_v13 = vmul.f32 %v3623_v55, %v1500_v27  ;;  %2472 = vst.msk [vmem:[%s4262_s28 + $0xe0] sm:$0xff] %vm838_vm0, %v2408_v6  ;;  %v2703_v59 = vsel %vm838_vm0, %v2408_v6, 0.0  ;;  %v2746_v37 = vmul.f32 %v2408_v6, %v2408_v6  ;;  %v3630_v55 = vld [vmem:[%s5044_s2] ss:$0 sm:$0xff] }
 0x50c   : > { %v2628_v46 = vadd.f32 %v2627_v1, %v2626_v24  ;;  %v4956_v41 = vadd.f32 %v2703_v59, %v4828_v34  ;;  %v2121_v24 = vmul.f32 %v3630_v55, %v2085_v63  ;;  %v3631_v6 = vld [vmem:[%s5045_s3] ss:$0 sm:$0xff] }
 0x50d   : > { %2438 = vst.msk [vmem:[%s4532_s24 + $0xd0] sm:$0xff] %vm838_vm0, %v1569_v13  ;;  %v2527_v49 = vsel %vm838_vm0, %v1569_v13, 0.0  ;;  %v2572_v33 = vmul.f32 %v1569_v13, %v1569_v13  ;;  %v2805_v5 = vsel %vm838_vm0, %v2746_v37, 0.0  ;;  %v3632_v1 = vld [vmem:[%s5051_s9] ss:$0 sm:$0xff]  ;;  %v2122_v37 = vmul.f32 %v3630_v55, %v2086_v35 }
 0x50e   : > { %v2528_v7 = vadd.f32 %v2527_v49, %v2526_v19  ;;  %v4966_v29 = vadd.f32 %v2805_v5, %v4841_v52  ;;  %v2372_v31 = vpop.f32.mrf.mxu3  ;;  %v2531_v52 = vsel %vm838_vm0, %v4824_v15, 0.0  ;;  %v2535_v15 = vsel %vm838_vm0, %v4720_v61, 0.0 }
 0x50f   : > { %v2629_v34 = vsel %vm838_vm0, %v2572_v33, 0.0  ;;  %v2373_v39 = vadd.f32 %v4554_v43, %v2372_v31  ;;  %v2576_v43 = vmul.f32 %v4720_v61, %v4720_v61  ;;  %v2157_v27 = vadd.f32 %v3631_v6, %v2121_v24 }
 0x510   : > { %v2530_v36 = vadd.f32 %v2529_v40, %v2528_v7  ;;  %v2630_v32 = vadd.f32 %v2629_v34, %v2628_v46  ;;  %v2158_v33 = vadd.f32 %v3631_v6, %v2122_v37 }
 0x511   : > { %v2409_v16 = vadd.f32 %v2373_v39, %v2156_v28  ;;  %v2637_v58 = vsel %vm838_vm0, %v2576_v43, 0.0 }
 0x512   : > { %v2632_v25 = vadd.f32 %v2631_v30, %v2630_v32  ;;  %v1506_v4 = vpop.permute.xlu1 %1505  ;;  %v2532_v56 = vadd.f32 %v2531_v52, %v2530_v36 }
 0x513   : > { %v1572_v8 = vmul.f32 %v3625_v62, %v1506_v4  ;;  %2473 = vst.msk [vmem:[%s4262_s28 + $0xe8] sm:$0xff] %vm838_vm0, %v2409_v16  ;;  %v2747_v46 = vmul.f32 %v2409_v16, %v2409_v16  ;;  %v2705_v44 = vsel %vm838_vm0, %v2409_v16, 0.0 }
 0x514   : > { %v2634_v22 = vadd.f32 %v2633_v21, %v2632_v25  ;;  %v2706_v34 = vadd.f32 %v2705_v44, %v4956_v41 }
 0x515   : > { %2441 = vst.msk [vmem:[%s4532_s24 + $0xe8] sm:$0xff] %vm838_vm0, %v1572_v8  ;;  %v2533_v38 = vsel %vm838_vm0, %v1572_v8, 0.0  ;;  %v2575_v48 = vmul.f32 %v1572_v8, %v1572_v8  ;;  %v2807_v7 = vsel %vm838_vm0, %v2747_v46, 0.0 }
 0x516   : > { %v2534_v12 = vadd.f32 %v2533_v38, %v2532_v56  ;;  %v2808_v32 = vadd.f32 %v2807_v7, %v4966_v29 }
 0x517   : > { %v2635_v11 = vsel %vm838_vm0, %v2575_v48, 0.0 }
 0x518   : > { %v2536_v50 = vadd.f32 %v2535_v15, %v2534_v12  ;;  %v2636_v45 = vadd.f32 %v2635_v11, %v2634_v22 }
 0x51a   : > { %v2538_v51 = vadd.f32 %v2537_v53, %v2536_v50  ;;  %v2638_v54 = vadd.f32 %v2637_v58, %v2636_v45 }
 0x51c   : > { %v2539_v0 = vrot.slane %v2538_v51, 4  ;;  %v2640_v23 = vadd.f32 %v2639_v9, %v2638_v54 }
 0x51e   : > { %v2540_v61 = vadd.f32 %v2539_v0, %v2538_v51  ;;  %v2641_v20 = vrot.slane %v2640_v23, 4 }
 0x520   : > { %v2541_v14 = vrot.slane %v2540_v61, 2  ;;  %v2642_v42 = vadd.f32 %v2641_v20, %v2640_v23 }
 0x522   : > { %v2542_v18 = vadd.f32 %v2541_v14, %v2540_v61  ;;  %v2643_v2 = vrot.slane %v2642_v42, 2 }
 0x524   : > { %v2543_v17 = vrot.slane %v2542_v18, 1  ;;  %v2644_v3 = vadd.f32 %v2643_v2, %v2642_v42 }
 0x526   : > { %v2544_v47 = vadd.f32 %v2543_v17, %v2542_v18  ;;  %v2645_v26 = vrot.slane %v2644_v3, 1 }
 0x528   : > { %2545 = vst.msk [vmem:[%s564_s21] sm:$0xff] %vm838_vm0, %v2544_v47  ;;  %v2646_v57 = vadd.f32 %v2645_v26, %v2644_v3 }
 0x52a   : > { %2647 = vst.msk [vmem:[%s568_s25] sm:$0xff] %vm838_vm0, %v2646_v57 }
 0x546   : > { %v2375_v19 = vpop.f32.mrf.mxu3 }
 0x547   : > { %v2376_v13 = vadd.f32 %v3632_v1, %v2375_v19 }
 0x549   : > { %v2410_v59 = vadd.f32 %v2376_v13, %v2157_v27 }
 0x54b   : > { %2474 = vst.msk [vmem:[%s4262_s28 + $0xf0] sm:$0xff] %vm838_vm0, %v2410_v59  ;;  %v2748_v49 = vmul.f32 %v2410_v59, %v2410_v59  ;;  %v2707_v28 = vsel %vm838_vm0, %v2410_v59, 0.0 }
 0x54c   : > { %v2708_v39 = vadd.f32 %v2707_v28, %v2706_v34 }
 0x54d   : > { %v2809_v31 = vsel %vm838_vm0, %v2748_v49, 0.0 }
 0x54e   : > { %v2377_v5 = vpop.f32.mrf.mxu3  ;;  %v2810_v62 = vadd.f32 %v2809_v31, %v2808_v32 }
 0x54f   : > { %v2378_v40 = vadd.f32 %v3632_v1, %v2377_v5 }
 0x551   : > { %v2411_v36 = vadd.f32 %v2378_v40, %v2158_v33 }
 0x553   : > { %2475 = vst.msk [vmem:[%s4262_s28 + $0xf8] sm:$0xff] %vm838_vm0, %v2411_v36  ;;  %v2709_v30 = vsel %vm838_vm0, %v2411_v36, 0.0  ;;  %v2749_v60 = vmul.f32 %v2411_v36, %v2411_v36 }
 0x554   : > { %v2710_v25 = vadd.f32 %v2709_v30, %v2708_v39 }
 0x555   : > { %v2811_v16 = vsel %vm838_vm0, %v2749_v60, 0.0 }
 0x556   : > { %v2711_v4 = vrot.slane %v2710_v25, 4  ;;  %v2812_v52 = vadd.f32 %v2811_v16, %v2810_v62 }
 0x558   : > { %v2712_v41 = vadd.f32 %v2711_v4, %v2710_v25  ;;  %v2813_v8 = vrot.slane %v2812_v52, 4 }
 0x55a   : > { %v2713_v56 = vrot.slane %v2712_v41, 2  ;;  %v2814_v43 = vadd.f32 %v2813_v8, %v2812_v52 }
 0x55c   : > { %v2714_v21 = vadd.f32 %v2713_v56, %v2712_v41  ;;  %v2815_v29 = vrot.slane %v2814_v43, 2 }
 0x55e   : > { %v2715_v38 = vrot.slane %v2714_v21, 1  ;;  %v2816_v48 = vadd.f32 %v2815_v29, %v2814_v43 }
 0x560   : > { %v2716_v12 = vadd.f32 %v2715_v38, %v2714_v21  ;;  %v2817_v22 = vrot.slane %v2816_v48, 1 }
 0x562   : > { %2717 = vst.msk [vmem:[%s572_s20] sm:$0xff] %vm838_vm0, %v2716_v12  ;;  %v2818_v15 = vadd.f32 %v2817_v22, %v2816_v48 }
 0x564   : > { %2819 = vst.msk [vmem:[%s576_s29] sm:$0xff] %vm838_vm0, %v2818_v15 }
 0x565 PF: > { %s26_s18 = sadd.s32 1, %s3639_s18  }
 0x566   : > { %p23_p5 = scmp.ge.s32.totalorder %s26_s18, 4  }
 0x568   :  { %25 = sbr.rel (!%p23_p5) target bundleno = 1 (0x1), region = 153 }

// kernel: _lambda_.7
= control target key start
LH: loop header
LB: loop body
LE: loop exit
PB: predicated region body
PF: predicated region fallthrough
CT: control target
= control target key end

     0   :  { %s1976_s24 = smov 0   ;;  %s2600_s0 = inlined_call_operand.vmem [shape: f32[512,32], index: 0, kind: input, shape index: {}]   ;;  %s2601_s1 = inlined_call_operand.vmem [shape: bf16[32,64], index: 1, kind: input, shape index: {}]   ;;  %s2602_s2 = inlined_call_operand.vmem [shape: f32[1,64], index: 2, kind: input, shape index: {}]   ;;  %s2603_s3 = inlined_call_operand.vmem [shape: bf16[32,64], index: 3, kind: input, shape index: {}]   ;;  %s2604_s4 = inlined_call_operand.vmem [shape: f32[1,64], index: 4, kind: input, shape index: {}]   ;;  %s2605_s5 = inlined_call_operand.vmem [shape: bf16[32,12], index: 5, kind: input, shape index: {}]   ;;  %s2606_s6 = inlined_call_operand.vmem [shape: f32[1,12], index: 6, kind: input, shape index: {}]   ;;  %s2607_s7 = inlined_call_operand.vmem [shape: f32[512,12], index: 7, kind: output, shape index: {}]  }
   0x1 LB: > { %s1564_s25 = sadd.s32 4294967295, %s1933_s24   ;;  %p1568_p0 = scmp.ge.s32.totalorder %s1933_s24, 1  ;;  %s1933_s24 = sphi %s1976_s24, %s17_s24  }
   0x2   : > { %p238_p1 = scmp.lt.s32.totalorder %s1933_s24, 3 }
   0x4   : > { %p239_p2 = pnand %p1568_p0, %p238_p1 }
   0x5   : > { %s1569_s28 = sshll.u32 (!%p239_p2), %s1564_s25, 5  ;;  %s1935_s14 = smov (!%p239_p2), 96  }
   0x6   : > { %242 = sbr.rel (%p239_p2) target bundleno = 875 (0x36b), region = 48  ;;  %p271_p3 = scmp.lt.s32.totalorder (!%p239_p2), %s1569_s28, 63 }
   0xb   : > { %v1648_v0 = vld [vmem:[%s2601_s1 + $0x8] sm:$0xff]  ;;  %v1647_v1 = vld [vmem:[%s2601_s1] sm:$0xff]  ;;  %s2609_s28 = smov (!%p271_p3, %s1569_s28), 63  ;;  %vm351_vm0 = vcmask 261120   ;;  %vm1475_vm1 = vcmask 97280  }
   0xc   : > { %406 = vmatpush.bf16.msra.mxu0 %v1648_v0  ;;  %1653 = vmatpush.bf16.msra.mxu3 %v1648_v0  ;;  %s1570_s8 = sshll.u32 %s2609_s28, 3  ;;  %v2040_v40 = vld [vmem:[%s2602_s2] ss:$0 sm:$0xff] }
   0xd   : > { %s1998_s11 = scalar_lea.vmem %s2600_s0, %s1570_s8  ;;  %s2484_s9 = scalar_lea.vmem %s2607_s7, %s1570_s8 }
   0xe   : > { %v283_v2 = vld [vmem:[%s1998_s11] sm:$0xff]  ;;  %v284_v3 = vld [vmem:[%s1998_s11 + $0x8] sm:$0xff]  ;;  %v285_v5 = vld [vmem:[%s1998_s11 + $0x10] sm:$0xff] }
   0xf   : > { %v315_v4 = vpack.c.bf16 %v284_v3, %v283_v2  ;;  %v286_v6 = vld [vmem:[%s1998_s11 + $0x18] sm:$0xff]  ;;  %v287_v8 = vld [vmem:[%s1998_s11 + $0x20] sm:$0xff]  ;;  %v288_v9 = vld [vmem:[%s1998_s11 + $0x28] sm:$0xff] }
  0x10   : > { %407 = vmatpush.bf16.msra.mxu0 %v1647_v1  ;;  %1654 = vmatpush.bf16.msra.mxu3 %v1647_v1  ;;  %v316_v7 = vpack.c.bf16 %v286_v6, %v285_v5  ;;  %v317_v10 = vpack.c.bf16 %v288_v9, %v287_v8  ;;  %v289_v11 = vld [vmem:[%s1998_s11 + $0x30] sm:$0xff]  ;;  %v290_v12 = vld [vmem:[%s1998_s11 + $0x38] sm:$0xff]  ;;  %v291_v14 = vld [vmem:[%s1998_s11 + $0x40] sm:$0xff] }
  0x11   : > { %v318_v13 = vpack.c.bf16 %v290_v12, %v289_v11  ;;  %v292_v15 = vld [vmem:[%s1998_s11 + $0x48] sm:$0xff]  ;;  %v307_v17 = vld [vmem:[%s1998_s11 + $0xc0] sm:$0xff]  ;;  %v293_v20 = vld [vmem:[%s1998_s11 + $0x50] sm:$0xff] }
  0x12   : > { %v319_v16 = vpack.c.bf16 %v292_v15, %v291_v14  ;;  %v308_v18 = vld [vmem:[%s1998_s11 + $0xc8] sm:$0xff]  ;;  %v294_v21 = vld [vmem:[%s1998_s11 + $0x58] sm:$0xff]  ;;  %v309_v23 = vld [vmem:[%s1998_s11 + $0xd0] sm:$0xff] }
  0x13   : > { %1581 = vmatmul.msk.bf16.vlgmr.msra.gmra.mxu0 %vm351_vm0, %v315_v4  ;;  %v327_v19 = vpack.c.bf16 %v308_v18, %v307_v17  ;;  %v320_v22 = vpack.c.bf16 %v294_v21, %v293_v20  ;;  %v310_v24 = vld [vmem:[%s1998_s11 + $0xd8] sm:$0xff]  ;;  %v295_v26 = vld [vmem:[%s1998_s11 + $0x60] sm:$0xff]  ;;  %v296_v27 = vld [vmem:[%s1998_s11 + $0x68] sm:$0xff] }
  0x14   : > { %v328_v25 = vpack.c.bf16 %v310_v24, %v309_v23  ;;  %v321_v28 = vpack.c.bf16 %v296_v27, %v295_v26  ;;  %v311_v29 = vld [vmem:[%s1998_s11 + $0xe0] sm:$0xff]  ;;  %v312_v30 = vld [vmem:[%s1998_s11 + $0xe8] sm:$0xff]  ;;  %v297_v32 = vld [vmem:[%s1998_s11 + $0x70] sm:$0xff] }
  0x15   : > { %1593 = vmatmul.msk.bf16.vlgmr.msra.gmra.mxu3 %vm351_vm0, %v327_v19  ;;  %v329_v31 = vpack.c.bf16 %v312_v30, %v311_v29  ;;  %v298_v33 = vld [vmem:[%s1998_s11 + $0x78] sm:$0xff]  ;;  %v313_v35 = vld [vmem:[%s1998_s11 + $0xf0] sm:$0xff]  ;;  %v299_v38 = vld [vmem:[%s1998_s11 + $0x80] sm:$0xff] }
  0x16   : > { %v322_v34 = vpack.c.bf16 %v298_v33, %v297_v32  ;;  %v314_v36 = vld [vmem:[%s1998_s11 + $0xf8] sm:$0xff]  ;;  %v300_v39 = vld [vmem:[%s1998_s11 + $0x88] sm:$0xff]  ;;  %v301_v50 = vld [vmem:[%s1998_s11 + $0x90] sm:$0xff] }
  0x17   : > { %v330_v37 = vpack.c.bf16 %v314_v36, %v313_v35  ;;  %v323_v41 = vpack.c.bf16 %v300_v39, %v299_v38  ;;  %v302_v51 = vld [vmem:[%s1998_s11 + $0x98] sm:$0xff]  ;;  %v303_v1 = vld [vmem:[%s1998_s11 + $0xa0] sm:$0xff]  ;;  %v304_v2 = vld [vmem:[%s1998_s11 + $0xa8] sm:$0xff] }
  0x18   : > { %v324_v53 = vpack.c.bf16 %v302_v51, %v301_v50  ;;  %v325_v4 = vpack.c.bf16 %v304_v2, %v303_v1  ;;  %v306_v17 = vld [vmem:[%s1998_s11 + $0xb8] sm:$0xff] }
  0x23   : > { %1582 = vmatmul.msk.bf16.gmra.mxu0 %vm351_vm0, %v316_v7 }
  0x25   : > { %1594 = vmatmul.msk.bf16.gmra.mxu3 %vm351_vm0, %v328_v25 }
  0x33   : > { %1583 = vmatmul.msk.bf16.gmra.mxu0 %vm351_vm0, %v317_v10 }
  0x35   : > { %1595 = vmatmul.msk.bf16.gmra.mxu3 %vm351_vm0, %v329_v31 }
  0x43   : > { %1584 = vmatmul.msk.bf16.gmra.mxu0 %vm351_vm0, %v318_v13 }
  0x45   : > { %1596 = vmatmul.msk.bf16.gmra.mxu3 %vm351_vm0, %v330_v37 }
  0x53   : > { %1585 = vmatmul.msk.bf16.gmra.mxu0 %vm351_vm0, %v319_v16  ;;  %v305_v16 = vld [vmem:[%s1998_s11 + $0xb0] sm:$0xff] }
  0x54   : > { %v326_v19 = vpack.c.bf16 %v306_v17, %v305_v16 }
  0x63   : > { %1586 = vmatmul.msk.bf16.gmra.mxu0 %vm351_vm0, %v320_v22 }
  0x73   : > { %1587 = vmatmul.msk.bf16.gmra.mxu0 %vm351_vm0, %v321_v28 }
  0x83   : > { %1588 = vmatmul.msk.bf16.gmra.mxu0 %vm351_vm0, %v322_v34 }
  0x90   : > { %v409_v42 = vpop.f32.mrf.mxu0 }
  0x91   : > { %v2044_v43 = vadd.f32 %v2040_v40, %v409_v42 }
  0x93   : > { %v521_v44 = vmul.f32 0.5, %v2044_v43  ;;  %1589 = vmatmul.msk.bf16.gmra.mxu0 %vm351_vm0, %v323_v41 }
  0x95   : > { %1671 = vtanh.f32 %v521_v44 }
  0x98   : > { %v411_v45 = vpop.f32.mrf.mxu0 }
  0x99   : > { %v2049_v46 = vadd.f32 %v2040_v40, %v411_v45 }
  0x9b   : > { %v1672_v47 = vpop.eup %1671  ;;  %v522_v48 = vmul.f32 0.5, %v2049_v46 }
  0x9c   : > { %v585_v49 = vmul.f32 0.5, %v1672_v47 }
  0x9d   : > { %1673 = vtanh.f32 %v522_v48 }
  0x9e   : > { %v617_v52 = vadd.f32 0.5, %v585_v49 }
  0xa0   : > { %v414_v54 = vpop.f32.mrf.mxu0  ;;  %681 = vrot.lane.b32.xlu0 %v617_v52, %s1935_s14  ;;  %v469_v52 = vpop.f32.mrf.mxu3 }
  0xa1   : > { %v2056_v55 = vadd.f32 %v2040_v40, %v414_v54 }
  0xa3   : > { %v1674_v56 = vpop.eup %1673  ;;  %v523_v57 = vmul.f32 0.5, %v2056_v55  ;;  %1590 = vmatmul.msk.bf16.gmra.mxu0 %vm351_vm0, %v324_v53 }
  0xa4   : > { %v586_v58 = vmul.f32 0.5, %v1674_v56 }
  0xa5   : > { %1675 = vtanh.f32 %v523_v57 }
  0xa6   : > { %v618_v59 = vadd.f32 0.5, %v586_v58 }
  0xa8   : > { %v416_v60 = vpop.f32.mrf.mxu0  ;;  %683 = vrot.lane.b32.xlu0 %v618_v59, %s1935_s14 }
  0xa9   : > { %v2062_v61 = vadd.f32 %v2040_v40, %v416_v60 }
  0xab   : > { %v1676_v62 = vpop.eup %1675  ;;  %v524_v63 = vmul.f32 0.5, %v2062_v61 }
  0xac   : > { %v587_v0 = vmul.f32 0.5, %v1676_v62  ;;  %v471_v62 = vpop.f32.mrf.mxu3 }
  0xad   : > { %1677 = vtanh.f32 %v524_v63 }
  0xae   : > { %v619_v3 = vadd.f32 0.5, %v587_v0 }
  0xb0   : > { %v419_v5 = vpop.f32.mrf.mxu0  ;;  %685 = vrot.lane.b32.xlu1 %v619_v3, %s1935_s14 }
  0xb1   : > { %v2069_v6 = vadd.f32 %v2040_v40, %v419_v5  ;;  %v1650_v5 = vld [vmem:[%s2603_s3 + $0x8] sm:$0xff] }
  0xb2   : > { %899 = vmatpush.bf16.msra.mxu1 %v1650_v5  ;;  %1655 = vmatpush.bf16.msrb.mxu3 %v1650_v5 }
  0xb3   : > { %v1678_v7 = vpop.eup %1677  ;;  %v525_v8 = vmul.f32 0.5, %v2069_v6  ;;  %1591 = vmatmul.msk.bf16.gmra.mxu0 %vm351_vm0, %v325_v4 }
  0xb4   : > { %v588_v9 = vmul.f32 0.5, %v1678_v7  ;;  %v2120_v7 = vadd.f32 %v2040_v40, %v469_v52 }
  0xb5   : > { %1679 = vtanh.f32 %v525_v8 }
  0xb6   : > { %v620_v10 = vadd.f32 0.5, %v588_v9 }
  0xb8   : > { %v421_v11 = vpop.f32.mrf.mxu0  ;;  %687 = vrot.lane.b32.xlu1 %v620_v10, %s1935_s14  ;;  %v474_v10 = vpop.f32.mrf.mxu3 }
  0xb9   : > { %v2075_v12 = vadd.f32 %v2040_v40, %v421_v11  ;;  %v1649_v11 = vld [vmem:[%s2603_s3] sm:$0xff] }
  0xba   : > { %900 = vmatpush.bf16.msra.mxu1 %v1649_v11  ;;  %1656 = vmatpush.bf16.msrb.mxu3 %v1649_v11 }
  0xbb   : > { %v1680_v13 = vpop.eup %1679  ;;  %v526_v14 = vmul.f32 0.5, %v2075_v12 }
  0xbc   : > { %v589_v15 = vmul.f32 0.5, %v1680_v13 }
  0xbd   : > { %1681 = vtanh.f32 %v526_v14 }
  0xbe   : > { %v621_v18 = vadd.f32 0.5, %v589_v15  ;;  %v545_v15 = vmul.f32 0.5, %v2120_v7 }
  0xc0   : > { %v424_v20 = vpop.f32.mrf.mxu0  ;;  %689 = vrot.lane.b32.xlu2 %v621_v18, %s1935_s14  ;;  %v2132_v18 = vadd.f32 %v2040_v40, %v471_v62 }
  0xc1   : > { %v2082_v21 = vadd.f32 %v2040_v40, %v424_v20 }
  0xc3   : > { %v1682_v22 = vpop.eup %1681  ;;  %v527_v23 = vmul.f32 0.5, %v2082_v21  ;;  %1592 = vmatmul.msk.bf16.gmra.mxu0 %vm351_vm0, %v326_v19 }
  0xc4   : > { %v590_v24 = vmul.f32 0.5, %v1682_v22 }
  0xc5   : > { %1683 = vtanh.f32 %v527_v23 }
  0xc6   : > { %v622_v25 = vadd.f32 0.5, %v590_v24  ;;  %v546_v24 = vmul.f32 0.5, %v2132_v18 }
  0xc8   : > { %v426_v26 = vpop.f32.mrf.mxu0  ;;  %691 = vrot.lane.b32.xlu2 %v622_v25, %s1935_s14  ;;  %v476_v25 = vpop.f32.mrf.mxu3 }
  0xc9   : > { %v2088_v27 = vadd.f32 %v2040_v40, %v426_v26 }
  0xcb   : > { %v1684_v28 = vpop.eup %1683  ;;  %v528_v29 = vmul.f32 0.5, %v2088_v27 }
  0xcc   : > { %v591_v30 = vmul.f32 0.5, %v1684_v28 }
  0xcd   : > { %1685 = vtanh.f32 %v528_v29 }
  0xce   : > { %v623_v31 = vadd.f32 0.5, %v591_v30  ;;  %v2141_v30 = vadd.f32 %v2040_v40, %v474_v10 }
  0xd0   : > { %v429_v32 = vpop.f32.mrf.mxu0  ;;  %693 = vrot.lane.b32.xlu0 %v623_v31, %s1935_s14 }
  0xd1   : > { %v2093_v33 = vadd.f32 %v2040_v40, %v429_v32 }
  0xd3   : > { %v1686_v34 = vpop.eup %1685  ;;  %v529_v35 = vmul.f32 0.5, %v2093_v33 }
  0xd4   : > { %v592_v36 = vmul.f32 0.5, %v1686_v34 }
  0xd5   : > { %1687 = vtanh.f32 %v529_v35 }
  0xd6   : > { %v624_v37 = vadd.f32 0.5, %v592_v36 }
  0xd8   : > { %v431_v38 = vpop.f32.mrf.mxu0  ;;  %695 = vrot.lane.b32.xlu1 %v624_v37, %s1935_s14  ;;  %v547_v37 = vmul.f32 0.5, %v2141_v30 }
  0xd9   : > { %v2098_v39 = vadd.f32 %v2040_v40, %v431_v38 }
  0xdb   : > { %v1688_v41 = vpop.eup %1687  ;;  %v530_v42 = vmul.f32 0.5, %v2098_v39 }
  0xdc   : > { %v593_v44 = vmul.f32 0.5, %v1688_v41 }
  0xdd   : > { %1689 = vtanh.f32 %v530_v42 }
  0xde   : > { %v625_v45 = vadd.f32 0.5, %v593_v44  ;;  %v479_v44 = vpop.f32.mrf.mxu3 }
  0xe0   : > { %v434_v47 = vpop.f32.mrf.mxu0  ;;  %697 = vrot.lane.b32.xlu2 %v625_v45, %s1935_s14 }
  0xe1   : > { %v2103_v48 = vadd.f32 %v2040_v40, %v434_v47  ;;  %v2150_v47 = vadd.f32 %v2040_v40, %v476_v25 }
  0xe3   : > { %v1690_v49 = vpop.eup %1689  ;;  %v531_v50 = vmul.f32 0.5, %v2103_v48 }
  0xe4   : > { %v594_v51 = vmul.f32 0.5, %v1690_v49 }
  0xe5   : > { %1691 = vtanh.f32 %v531_v50 }
  0xe6   : > { %v626_v53 = vadd.f32 0.5, %v594_v51 }
  0xe8   : > { %v436_v54 = vpop.f32.mrf.mxu0  ;;  %699 = vrot.lane.b32.xlu0 %v626_v53, %s1935_s14 }
  0xe9   : > { %v2108_v56 = vadd.f32 %v2040_v40, %v436_v54 }
  0xeb   : > { %v1692_v57 = vpop.eup %1691  ;;  %v532_v58 = vmul.f32 0.5, %v2108_v56 }
  0xec   : > { %v595_v59 = vmul.f32 0.5, %v1692_v57  ;;  %v548_v57 = vmul.f32 0.5, %v2150_v47 }
  0xed   : > { %1693 = vtanh.f32 %v532_v58 }
  0xee   : > { %v627_v60 = vadd.f32 0.5, %v595_v59 }
  0xf0   : > { %v439_v63 = vpop.f32.mrf.mxu0  ;;  %701 = vrot.lane.b32.xlu1 %v627_v60, %s1935_s14 }
  0xf1   : > { %v2113_v0 = vadd.f32 %v2040_v40, %v439_v63  ;;  %v2162_v63 = vadd.f32 %v2040_v40, %v479_v44 }
  0xf3   : > { %v1694_v1 = vpop.eup %1693  ;;  %v533_v2 = vmul.f32 0.5, %v2113_v0 }
  0xf4   : > { %v596_v3 = vmul.f32 0.5, %v1694_v1  ;;  %v481_v1 = vpop.f32.mrf.mxu3 }
  0xf5   : > { %1695 = vtanh.f32 %v533_v2 }
  0xf6   : > { %v628_v4 = vadd.f32 0.5, %v596_v3 }
  0xf8   : > { %v441_v8 = vpop.f32.mrf.mxu0  ;;  %703 = vrot.lane.b32.xlu2 %v628_v4, %s1935_s14 }
  0xf9   : > { %v2124_v9 = vadd.f32 %v2040_v40, %v441_v8 }
  0xfb   : > { %v1696_v13 = vpop.eup %1695  ;;  %v534_v14 = vmul.f32 0.5, %v2124_v9 }
  0xfc   : > { %v597_v16 = vmul.f32 0.5, %v1696_v13 }
  0xfd   : > { %1697 = vtanh.f32 %v534_v14 }
  0xfe   : > { %v629_v17 = vadd.f32 0.5, %v597_v16  ;;  %1699 = vtanh.f32 %v545_v15  ;;  %v549_v15 = vmul.f32 0.5, %v2162_v63 }
 0x100   : > { %v444_v19 = vpop.f32.mrf.mxu0  ;;  %705 = vrot.lane.b32.xlu0 %v629_v17, %s1935_s14 }
 0x101   : > { %v2136_v20 = vadd.f32 %v2040_v40, %v444_v19 }
 0x103   : > { %v1698_v22 = vpop.eup %1697  ;;  %v535_v23 = vmul.f32 0.5, %v2136_v20 }
 0x104   : > { %v598_v26 = vmul.f32 0.5, %v1698_v22  ;;  %v1700_v28 = vpop.eup %1699 }
 0x105   : > { %1701 = vtanh.f32 %v535_v23  ;;  %v609_v32 = vmul.f32 0.5, %v1700_v28  ;;  %v484_v28 = vpop.f32.mrf.mxu3 }
 0x106   : > { %v630_v29 = vadd.f32 0.5, %v598_v26  ;;  %1703 = vtanh.f32 %v546_v24 }
 0x107   : > { %v641_v41 = vadd.f32 0.5, %v609_v32 }
 0x108   : > { %v446_v31 = vpop.f32.mrf.mxu0  ;;  %707 = vrot.lane.b32.xlu1 %v630_v29, %s1935_s14 }
 0x109   : > { %v2145_v34 = vadd.f32 %v2040_v40, %v446_v31 }
 0x10b   : > { %v1702_v35 = vpop.eup %1701  ;;  %v536_v36 = vmul.f32 0.5, %v2145_v34 }
 0x10c   : > { %v599_v38 = vmul.f32 0.5, %v1702_v35  ;;  %v1704_v42 = vpop.eup %1703 }
 0x10d   : > { %1705 = vtanh.f32 %v536_v36  ;;  %v610_v50 = vmul.f32 0.5, %v1704_v42 }
 0x10e   : > { %v631_v45 = vadd.f32 0.5, %v599_v38  ;;  %1707 = vtanh.f32 %v547_v37 }
 0x10f   : > { %1709 = vtanh.f32 %v2044_v43  ;;  %v642_v58 = vadd.f32 0.5, %v610_v50 }
 0x110   : > { %v449_v49 = vpop.f32.mrf.mxu0  ;;  %709 = vrot.lane.b32.xlu2 %v631_v45, %s1935_s14  ;;  %729 = vrot.lane.b32.xlu1 %v641_v41, %s1935_s14  ;;  %1711 = vtanh.f32 %v2049_v46 }
 0x111   : > { %v2155_v51 = vadd.f32 %v2040_v40, %v449_v49 }
 0x112   : > { %v682_v52 = vpop.permute.xlu0 %681 }
 0x113   : > { %v1706_v53 = vpop.eup %1705  ;;  %v537_v54 = vmul.f32 0.5, %v2155_v51 }
 0x114   : > { %v600_v59 = vmul.f32 0.5, %v1706_v53  ;;  %v1708_v60 = vpop.eup %1707 }
 0x115   : > { %1713 = vtanh.f32 %v537_v54  ;;  %v611_v43 = vmul.f32 0.5, %v1708_v60  ;;  %v1710_v3 = vpop.eup %1709 }
 0x116   : > { %v632_v62 = vadd.f32 0.5, %v600_v59  ;;  %1715 = vtanh.f32 %v548_v57  ;;  %v1712_v46 = vpop.eup %1711  ;;  %v777_v11 = vmul.f32 %v1710_v3, %v682_v52 }
 0x117   : > { %1717 = vtanh.f32 %v2069_v6  ;;  %v643_v16 = vadd.f32 0.5, %v611_v43  ;;  %v2175_v6 = vadd.f32 %v2040_v40, %v481_v1 }
 0x118   : > { %v451_v2 = vpop.f32.mrf.mxu0  ;;  %731 = vrot.lane.b32.xlu2 %v642_v58, %s1935_s14  ;;  %711 = vrot.lane.b32.xlu0 %v632_v62, %s1935_s14  ;;  %1719 = vtanh.f32 %v2075_v12 }
 0x119   : > { %v2167_v4 = vadd.f32 %v2040_v40, %v451_v2  ;;  %v550_v41 = vmul.f32 0.5, %v2175_v6 }
 0x11a   : > { %v690_v5 = vpop.permute.xlu2 %689  ;;  %v684_v8 = vpop.permute.xlu0 %683 }
 0x11b   : > { %v1714_v10 = vpop.eup %1713  ;;  %v538_v13 = vmul.f32 0.5, %v2167_v4  ;;  %v778_v14 = vmul.f32 %v1712_v46, %v684_v8  ;;  %v486_v46 = vpop.f32.mrf.mxu3 }
 0x11c   : > { %v601_v17 = vmul.f32 0.5, %v1714_v10  ;;  %v1716_v19 = vpop.eup %1715 }
 0x11d   : > { %1721 = vtanh.f32 %v538_v13  ;;  %v809_v22 = vpack.c.bf16 %v778_v14, %v777_v11  ;;  %v1718_v24 = vpop.eup %1717  ;;  %v612_v26 = vmul.f32 0.5, %v1716_v19  ;;  %v2201_v11 = vadd.f32 %v2040_v40, %v486_v46 }
 0x11e   : > { %v633_v23 = vadd.f32 0.5, %v601_v17  ;;  %1723 = vtanh.f32 %v549_v15  ;;  %v1720_v29 = vpop.eup %1719  ;;  %v2183_v36 = vmul.f32 %v1718_v24, %v690_v5 }
 0x11f   : > { %1605 = vmatmul.msk.bf16.vlgmr.msra.gmra.mxu1 %vm351_vm0, %v809_v22  ;;  %1725 = vtanh.f32 %v2056_v55  ;;  %v644_v44 = vadd.f32 0.5, %v612_v26  ;;  %v2190_v55 = vadd.f32 %v2040_v40, %v484_v28  ;;  %v552_v19 = vmul.f32 0.5, %v2201_v11 }
 0x120   : > { %v454_v25 = vpop.f32.mrf.mxu0  ;;  %733 = vrot.lane.b32.xlu2 %v643_v16, %s1935_s14  ;;  %713 = vrot.lane.b32.xlu0 %v633_v23, %s1935_s14  ;;  %1727 = vtanh.f32 %v2062_v61 }
 0x121   : > { %v2180_v12 = vadd.f32 %v2040_v40, %v454_v25  ;;  %v551_v2 = vmul.f32 0.5, %v2190_v55 }
 0x122   : > { %v692_v31 = vpop.permute.xlu2 %691  ;;  %v686_v32 = vpop.permute.xlu1 %685 }
 0x123   : > { %v1722_v35 = vpop.eup %1721  ;;  %v539_v37 = vmul.f32 0.5, %v2180_v12  ;;  %v782_v38 = vmul.f32 %v1720_v29, %v692_v31 }
 0x124   : > { %v602_v42 = vmul.f32 0.5, %v1722_v35  ;;  %v1724_v45 = vpop.eup %1723 }
 0x125   : > { %1729 = vtanh.f32 %v539_v37  ;;  %v811_v49 = vpack.c.bf16 %v782_v38, %v2183_v36  ;;  %v1726_v52 = vpop.eup %1725  ;;  %v613_v54 = vmul.f32 0.5, %v1724_v45 }
 0x126   : > { %v634_v50 = vadd.f32 0.5, %v602_v42  ;;  %1731 = vtanh.f32 %v550_v41  ;;  %v1728_v57 = vpop.eup %1727  ;;  %v779_v60 = vmul.f32 %v1726_v52, %v686_v32 }
 0x127   : > { %v645_v3 = vadd.f32 0.5, %v613_v54 }
 0x128   : > { %v456_v53 = vpop.f32.mrf.mxu0  ;;  %715 = vrot.lane.b32.xlu1 %v634_v50, %s1935_s14  ;;  %735 = vrot.lane.b32.xlu0 %v644_v44, %s1935_s14 }
 0x129   : > { %v2195_v61 = vadd.f32 %v2040_v40, %v456_v53 }
 0x12a   : > { %v688_v58 = vpop.permute.xlu1 %687 }
 0x12b   : > { %v1730_v59 = vpop.eup %1729  ;;  %v540_v62 = vmul.f32 0.5, %v2195_v61  ;;  %v780_v1 = vmul.f32 %v1728_v57, %v688_v58 }
 0x12c   : > { %v603_v43 = vmul.f32 0.5, %v1730_v59  ;;  %v1732_v5 = vpop.eup %1731 }
 0x12d   : > { %1733 = vtanh.f32 %v540_v62  ;;  %v810_v8 = vpack.c.bf16 %v780_v1, %v779_v60  ;;  %v614_v14 = vmul.f32 0.5, %v1732_v5 }
 0x12e   : > { %v635_v10 = vadd.f32 0.5, %v603_v43  ;;  %1735 = vtanh.f32 %v551_v2 }
 0x12f   : > { %1606 = vmatmul.msk.bf16.gmra.mxu1 %vm351_vm0, %v810_v8  ;;  %v646_v23 = vadd.f32 0.5, %v614_v14 }
 0x130   : > { %v459_v13 = vpop.f32.mrf.mxu0  ;;  %717 = vrot.lane.b32.xlu1 %v635_v10, %s1935_s14  ;;  %737 = vrot.lane.b32.xlu0 %v645_v3, %s1935_s14 }
 0x131   : > { %v2206_v15 = vadd.f32 %v2040_v40, %v459_v13 }
 0x133   : > { %v1734_v16 = vpop.eup %1733  ;;  %v541_v17 = vmul.f32 0.5, %v2206_v15 }
 0x134   : > { %v604_v22 = vmul.f32 0.5, %v1734_v16  ;;  %v1736_v24 = vpop.eup %1735 }
 0x135   : > { %1737 = vtanh.f32 %v541_v17  ;;  %v615_v28 = vmul.f32 0.5, %v1736_v24 }
 0x136   : > { %v636_v25 = vadd.f32 0.5, %v604_v22  ;;  %1739 = vtanh.f32 %v552_v19 }
 0x137   : > { %v647_v36 = vadd.f32 0.5, %v615_v28 }
 0x138   : > { %v461_v26 = vpop.f32.mrf.mxu0  ;;  %719 = vrot.lane.b32.xlu2 %v636_v25, %s1935_s14  ;;  %739 = vrot.lane.b32.xlu1 %v646_v23, %s1935_s14 }
 0x139   : > { %v2213_v29 = vadd.f32 %v2040_v40, %v461_v26 }
 0x13a   : > { %v698_v10 = vpop.permute.xlu2 %697 }
 0x13b   : > { %v1738_v31 = vpop.eup %1737  ;;  %v542_v32 = vmul.f32 0.5, %v2213_v29 }
 0x13c   : > { %v605_v35 = vmul.f32 0.5, %v1738_v31  ;;  %v1740_v37 = vpop.eup %1739 }
 0x13d   : > { %1741 = vtanh.f32 %v542_v32  ;;  %v616_v42 = vmul.f32 0.5, %v1740_v37 }
 0x13e   : > { %v637_v38 = vadd.f32 0.5, %v605_v35  ;;  %1743 = vtanh.f32 %v2082_v21 }
 0x13f   : > { %1607 = vmatmul.msk.bf16.gmra.mxu1 %vm351_vm0, %v811_v49  ;;  %1745 = vtanh.f32 %v2088_v27  ;;  %v648_v52 = vadd.f32 0.5, %v616_v42 }
 0x140   : > { %v464_v41 = vpop.f32.mrf.mxu0  ;;  %721 = vrot.lane.b32.xlu2 %v637_v38, %s1935_s14  ;;  %741 = vrot.lane.b32.xlu1 %v647_v36, %s1935_s14 }
 0x141   : > { %v2220_v44 = vadd.f32 %v2040_v40, %v464_v41 }
 0x142   : > { %v694_v54 = vpop.permute.xlu0 %693 }
 0x143   : > { %v1742_v45 = vpop.eup %1741  ;;  %v543_v50 = vmul.f32 0.5, %v2220_v44 }
 0x144   : > { %v606_v53 = vmul.f32 0.5, %v1742_v45  ;;  %v1744_v58 = vpop.eup %1743 }
 0x145   : > { %1747 = vtanh.f32 %v543_v50  ;;  %v1746_v60 = vpop.eup %1745  ;;  %v783_v1 = vmul.f32 %v1744_v58, %v694_v54 }
 0x146   : > { %v638_v49 = vadd.f32 0.5, %v606_v53 }
 0x148   : > { %v466_v57 = vpop.f32.mrf.mxu0  ;;  %743 = vrot.lane.b32.xlu2 %v648_v52, %s1935_s14  ;;  %723 = vrot.lane.b32.xlu0 %v638_v49, %s1935_s14 }
 0x149   : > { %v2228_v59 = vadd.f32 %v2040_v40, %v466_v57 }
 0x14a   : > { %v696_v21 = vpop.permute.xlu1 %695 }
 0x14b   : > { %v1748_v62 = vpop.eup %1747  ;;  %v544_v27 = vmul.f32 0.5, %v2228_v59  ;;  %v784_v2 = vmul.f32 %v1746_v60, %v696_v21  ;;  %v2256_v21 = vld [vmem:[%s2604_s4] ss:$0 sm:$0xff] }
 0x14c   : > { %v607_v43 = vmul.f32 0.5, %v1748_v62 }
 0x14d   : > { %1749 = vtanh.f32 %v544_v27  ;;  %v812_v3 = vpack.c.bf16 %v784_v2, %v783_v1 }
 0x14e   : > { %v639_v46 = vadd.f32 0.5, %v607_v43  ;;  %1751 = vtanh.f32 %v2093_v33 }
 0x14f   : > { %1608 = vmatmul.msk.bf16.gmra.mxu1 %vm351_vm0, %v812_v3  ;;  %1753 = vtanh.f32 %v2098_v39 }
 0x150   : > { %725 = vrot.lane.b32.xlu0 %v639_v46, %s1935_s14  ;;  %1755 = vtanh.f32 %v2103_v48 }
 0x151   : > { %1757 = vtanh.f32 %v2108_v56 }
 0x152   : > { %v704_v33 = vpop.permute.xlu2 %703  ;;  %1759 = vtanh.f32 %v2113_v0 }
 0x153   : > { %v1750_v5 = vpop.eup %1749  ;;  %1761 = vtanh.f32 %v2124_v9 }
 0x154   : > { %v608_v40 = vmul.f32 0.5, %v1750_v5  ;;  %v1752_v13 = vpop.eup %1751  ;;  %1763 = vtanh.f32 %v2120_v7 }
 0x155   : > { %v1754_v14 = vpop.eup %1753  ;;  %v785_v17 = vmul.f32 %v1752_v13, %v698_v10  ;;  %1765 = vtanh.f32 %v2132_v18 }
 0x156   : > { %v640_v8 = vadd.f32 0.5, %v608_v40  ;;  %v1756_v23 = vpop.eup %1755  ;;  %1767 = vtanh.f32 %v2136_v20 }
 0x157   : > { %v1758_v39 = vpop.eup %1757  ;;  %1769 = vtanh.f32 %v2145_v34 }
 0x158   : > { %727 = vrot.lane.b32.xlu1 %v640_v8, %s1935_s14  ;;  %v788_v25 = vmul.f32 %v1758_v39, %v704_v33  ;;  %v1760_v32 = vpop.eup %1759  ;;  %1771 = vtanh.f32 %v2141_v30 }
 0x159   : > { %v1762_v56 = vpop.eup %1761  ;;  %1773 = vtanh.f32 %v2155_v51 }
 0x15a   : > { %v700_v16 = vpop.permute.xlu0 %699  ;;  %v1764_v42 = vpop.eup %1763  ;;  %1775 = vtanh.f32 %v2167_v4 }
 0x15b   : > { %v786_v19 = vmul.f32 %v1754_v14, %v700_v16  ;;  %v1766_v45 = vpop.eup %1765  ;;  %1777 = vtanh.f32 %v2150_v47 }
 0x15c   : > { %v1768_v7 = vpop.eup %1767  ;;  %1779 = vtanh.f32 %v2180_v12 }
 0x15d   : > { %v813_v22 = vpack.c.bf16 %v786_v19, %v785_v17  ;;  %v1770_v53 = vpop.eup %1769  ;;  %1781 = vtanh.f32 %v2195_v61 }
 0x15e   : > { %v1772_v34 = vpop.eup %1771 }
 0x15f   : > { %1609 = vmatmul.msk.bf16.gmra.mxu1 %vm351_vm0, %v813_v22  ;;  %v1774_v60 = vpop.eup %1773 }
 0x160   : > { %v1776_v62 = vpop.eup %1775 }
 0x161   : > { %v1778_v27 = vpop.eup %1777 }
 0x162   : > { %v702_v24 = vpop.permute.xlu1 %701  ;;  %v1780_v12 = vpop.eup %1779 }
 0x163   : > { %v787_v26 = vmul.f32 %v1756_v23, %v702_v24  ;;  %v1782_v10 = vpop.eup %1781 }
 0x165   : > { %v814_v28 = vpack.c.bf16 %v788_v25, %v787_v26 }
 0x16a   : > { %v710_v48 = vpop.permute.xlu2 %709 }
 0x16b   : > { %v791_v18 = vmul.f32 %v1768_v7, %v710_v48 }
 0x16f   : > { %1610 = vmatmul.msk.bf16.gmra.mxu1 %vm351_vm0, %v814_v28 }
 0x172   : > { %v706_v31 = vpop.permute.xlu0 %705  ;;  %v732_v41 = vpop.permute.xlu2 %731 }
 0x173   : > { %v789_v36 = vmul.f32 %v1760_v32, %v706_v31  ;;  %v802_v9 = vmul.f32 %v1766_v45, %v732_v41 }
 0x17a   : > { %v708_v35 = vpop.permute.xlu1 %707  ;;  %v734_v20 = vpop.permute.xlu2 %733 }
 0x17b   : > { %v790_v37 = vmul.f32 %v1762_v56, %v708_v35  ;;  %v803_v4 = vmul.f32 %v1772_v34, %v734_v20 }
 0x17d   : > { %v815_v38 = vpack.c.bf16 %v790_v37, %v789_v36 }
 0x17f   : > { %1611 = vmatmul.msk.bf16.gmra.mxu1 %vm351_vm0, %v815_v38 }
 0x182   : > { %v730_v0 = vpop.permute.xlu1 %729 }
 0x183   : > { %v801_v50 = vmul.f32 %v1764_v42, %v730_v0 }
 0x185   : > { %v821_v52 = vpack.c.bf16 %v802_v9, %v801_v50 }
 0x187   : > { %1617 = vmatmul.msk.bf16.vlgmr.msrb.gmra.mxu3 %vm351_vm0, %v821_v52 }
 0x18a   : > { %v712_v49 = vpop.permute.xlu0 %711 }
 0x18b   : > { %v792_v54 = vmul.f32 %v1770_v53, %v712_v49 }
 0x18d   : > { %v816_v57 = vpack.c.bf16 %v792_v54, %v791_v18 }
 0x18f   : > { %1612 = vmatmul.msk.bf16.gmra.mxu1 %vm351_vm0, %v816_v57 }
 0x192   : > { %v714_v58 = vpop.permute.xlu0 %713  ;;  %v720_v43 = vpop.permute.xlu2 %719 }
 0x193   : > { %v793_v30 = vmul.f32 %v1774_v60, %v714_v58  ;;  %v796_v61 = vmul.f32 %v1782_v10, %v720_v43 }
 0x19a   : > { %v716_v1 = vpop.permute.xlu1 %715  ;;  %v736_v51 = vpop.permute.xlu0 %735 }
 0x19b   : > { %v794_v2 = vmul.f32 %v1776_v62, %v716_v1  ;;  %v804_v47 = vmul.f32 %v1778_v27, %v736_v51  ;;  %v722_v22 = vpop.permute.xlu2 %721 }
 0x19c   : > { %v902_v3 = vpop.f32.mrf.mxu1 }
 0x19d   : > { %v817_v46 = vpack.c.bf16 %v794_v2, %v793_v30  ;;  %v2261_v5 = vadd.f32 %v2256_v21, %v902_v3  ;;  %v822_v40 = vpack.c.bf16 %v804_v47, %v803_v4 }
 0x19f   : > { %v1014_v8 = vmul.f32 0.5, %v2261_v5  ;;  %1613 = vmatmul.msk.bf16.gmra.mxu1 %vm351_vm0, %v817_v46  ;;  %1618 = vmatmul.msk.bf16.gmra.mxu3 %vm351_vm0, %v822_v40 }
 0x1a1   : > { %1783 = vtanh.f32 %v1014_v8 }
 0x1a2   : > { %v718_v13 = vpop.permute.xlu1 %717  ;;  %1785 = vtanh.f32 %v2162_v63  ;;  %v738_v39 = vpop.permute.xlu0 %737 }
 0x1a3   : > { %v795_v14 = vmul.f32 %v1780_v12, %v718_v13  ;;  %1787 = vtanh.f32 %v2175_v6  ;;  %v744_v37 = vpop.permute.xlu2 %743 }
 0x1a4   : > { %v904_v16 = vpop.f32.mrf.mxu1 }
 0x1a5   : > { %v818_v17 = vpack.c.bf16 %v796_v61, %v795_v14  ;;  %v2269_v19 = vadd.f32 %v2256_v21, %v904_v16 }
 0x1a7   : > { %v1784_v33 = vpop.eup %1783  ;;  %v1015_v23 = vmul.f32 0.5, %v2269_v19 }
 0x1a8   : > { %v1078_v24 = vmul.f32 0.5, %v1784_v33  ;;  %v1786_v25 = vpop.eup %1785 }
 0x1a9   : > { %1789 = vtanh.f32 %v1015_v23  ;;  %v1788_v26 = vpop.eup %1787  ;;  %v805_v48 = vmul.f32 %v1786_v25, %v738_v39 }
 0x1aa   : > { %v740_v28 = vpop.permute.xlu1 %739  ;;  %v1110_v63 = vadd.f32 0.5, %v1078_v24  ;;  %1791 = vtanh.f32 %v2190_v55 }
 0x1ab   : > { %v806_v6 = vmul.f32 %v1788_v26, %v740_v28  ;;  %1793 = vtanh.f32 %v2201_v11 }
 0x1ac   : > { %v907_v31 = vpop.f32.mrf.mxu1  ;;  %1174 = vrot.lane.b32.xlu2 %v1110_v63, %s1935_s14 }
 0x1ad   : > { %v823_v32 = vpack.c.bf16 %v806_v6, %v805_v48  ;;  %v2276_v56 = vadd.f32 %v2256_v21, %v907_v31 }
 0x1af   : > { %v1790_v35 = vpop.eup %1789  ;;  %v1016_v36 = vmul.f32 0.5, %v2276_v56  ;;  %1614 = vmatmul.msk.bf16.gmra.mxu1 %vm351_vm0, %v818_v17  ;;  %1619 = vmatmul.msk.bf16.gmra.mxu3 %vm351_vm0, %v823_v32 }
 0x1b0   : > { %v1079_v55 = vmul.f32 0.5, %v1790_v35  ;;  %v1792_v38 = vpop.eup %1791 }
 0x1b1   : > { %1795 = vtanh.f32 %v1016_v36  ;;  %v1794_v41 = vpop.eup %1793 }
 0x1b2   : > { %v742_v11 = vpop.permute.xlu1 %741  ;;  %v1111_v42 = vadd.f32 0.5, %v1079_v55  ;;  %1797 = vtanh.f32 %v2206_v15  ;;  %v808_v45 = vmul.f32 %v1794_v41, %v744_v37 }
 0x1b3   : > { %v807_v0 = vmul.f32 %v1792_v38, %v742_v11  ;;  %1799 = vtanh.f32 %v2213_v29 }
 0x1b4   : > { %v909_v9 = vpop.f32.mrf.mxu1  ;;  %1176 = vrot.lane.b32.xlu0 %v1111_v42, %s1935_s14 }
 0x1b5   : > { %v824_v50 = vpack.c.bf16 %v808_v45, %v807_v0  ;;  %v2285_v52 = vadd.f32 %v2256_v21, %v909_v9 }
 0x1b7   : > { %v1796_v7 = vpop.eup %1795  ;;  %v1017_v53 = vmul.f32 0.5, %v2285_v52 }
 0x1b8   : > { %v1080_v49 = vmul.f32 0.5, %v1796_v7  ;;  %v1798_v18 = vpop.eup %1797 }
 0x1b9   : > { %1801 = vtanh.f32 %v1017_v53  ;;  %v1800_v54 = vpop.eup %1799  ;;  %v797_v58 = vmul.f32 %v1798_v18, %v722_v22 }
 0x1ba   : > { %v724_v57 = vpop.permute.xlu0 %723  ;;  %v1112_v15 = vadd.f32 0.5, %v1080_v49 }
 0x1bb   : > { %v798_v20 = vmul.f32 %v1800_v54, %v724_v57 }
 0x1bc   : > { %v912_v34 = vpop.f32.mrf.mxu1  ;;  %1178 = vrot.lane.b32.xlu1 %v1112_v15, %s1935_s14 }
 0x1bd   : > { %v819_v29 = vpack.c.bf16 %v798_v20, %v797_v58  ;;  %v2290_v60 = vadd.f32 %v2256_v21, %v912_v34 }
 0x1bf   : > { %v1802_v62 = vpop.eup %1801  ;;  %v1018_v1 = vmul.f32 0.5, %v2290_v60  ;;  %1615 = vmatmul.msk.bf16.gmra.mxu1 %vm351_vm0, %v819_v29  ;;  %1620 = vmatmul.msk.bf16.gmra.mxu3 %vm351_vm0, %v824_v50 }
 0x1c0   : > { %v1081_v27 = vmul.f32 0.5, %v1802_v62 }
 0x1c1   : > { %1803 = vtanh.f32 %v1018_v1  ;;  %v1652_v1 = vld [vmem:[%s2605_s5 + $0x8] sm:$0xff] }
 0x1c2   : > { %v1113_v30 = vadd.f32 0.5, %v1081_v27  ;;  %1805 = vtanh.f32 %v2220_v44  ;;  %v726_v47 = vpop.permute.xlu0 %725  ;;  %1392 = vmatpush.bf16.msra.mxu2 %v1652_v1  ;;  %1657 = vmatpush.bf16.msra.mxu3 %v1652_v1 }
 0x1c3   : > { %1807 = vtanh.f32 %v2228_v59 }
 0x1c4   : > { %v914_v2 = vpop.f32.mrf.mxu1  ;;  %1180 = vrot.lane.b32.xlu2 %v1113_v30, %s1935_s14 }
 0x1c5   : > { %v2299_v51 = vadd.f32 %v2256_v21, %v914_v2 }
 0x1c7   : > { %v1804_v4 = vpop.eup %1803  ;;  %v1019_v43 = vmul.f32 0.5, %v2299_v51 }
 0x1c8   : > { %v1082_v3 = vmul.f32 0.5, %v1804_v4  ;;  %v1806_v46 = vpop.eup %1805 }
 0x1c9   : > { %1809 = vtanh.f32 %v1019_v43  ;;  %v1808_v40 = vpop.eup %1807  ;;  %v799_v10 = vmul.f32 %v1806_v46, %v726_v47  ;;  %v1651_v43 = vld [vmem:[%s2605_s5] sm:$0xff] }
 0x1ca   : > { %v728_v8 = vpop.permute.xlu1 %727  ;;  %v1114_v12 = vadd.f32 0.5, %v1082_v3  ;;  %1393 = vmatpush.bf16.msra.mxu2 %v1651_v43  ;;  %1658 = vmatpush.bf16.msra.mxu3 %v1651_v43 }
 0x1cb   : > { %v800_v44 = vmul.f32 %v1808_v40, %v728_v8 }
 0x1cc   : > { %v917_v13 = vpop.f32.mrf.mxu1  ;;  %1182 = vrot.lane.b32.xlu0 %v1114_v12, %s1935_s14 }
 0x1cd   : > { %v820_v59 = vpack.c.bf16 %v800_v44, %v799_v10  ;;  %v2304_v61 = vadd.f32 %v2256_v21, %v917_v13 }
 0x1cf   : > { %v1810_v14 = vpop.eup %1809  ;;  %v1020_v16 = vmul.f32 0.5, %v2304_v61  ;;  %1616 = vmatmul.msk.bf16.gmra.mxu1 %vm351_vm0, %v820_v59 }
 0x1d0   : > { %v1083_v17 = vmul.f32 0.5, %v1810_v14 }
 0x1d1   : > { %1811 = vtanh.f32 %v1020_v16 }
 0x1d2   : > { %v1115_v22 = vadd.f32 0.5, %v1083_v17 }
 0x1d4   : > { %v919_v33 = vpop.f32.mrf.mxu1  ;;  %1184 = vrot.lane.b32.xlu1 %v1115_v22, %s1935_s14 }
 0x1d5   : > { %v2310_v23 = vadd.f32 %v2256_v21, %v919_v33 }
 0x1d7   : > { %v1812_v39 = vpop.eup %1811  ;;  %v1021_v24 = vmul.f32 0.5, %v2310_v23 }
 0x1d8   : > { %v1084_v25 = vmul.f32 0.5, %v1812_v39 }
 0x1d9   : > { %1813 = vtanh.f32 %v1021_v24 }
 0x1da   : > { %v1116_v26 = vadd.f32 0.5, %v1084_v25 }
 0x1dc   : > { %v922_v28 = vpop.f32.mrf.mxu1  ;;  %1186 = vrot.lane.b32.xlu2 %v1116_v26, %s1935_s14 }
 0x1dd   : > { %v2315_v63 = vadd.f32 %v2256_v21, %v922_v28 }
 0x1df   : > { %v1814_v48 = vpop.eup %1813  ;;  %v1022_v6 = vmul.f32 0.5, %v2315_v63 }
 0x1e0   : > { %v1085_v31 = vmul.f32 0.5, %v1814_v48 }
 0x1e1   : > { %1815 = vtanh.f32 %v1022_v6 }
 0x1e2   : > { %v1117_v32 = vadd.f32 0.5, %v1085_v31 }
 0x1e4   : > { %v924_v35 = vpop.f32.mrf.mxu1  ;;  %1188 = vrot.lane.b32.xlu0 %v1117_v32, %s1935_s14 }
 0x1e5   : > { %v2320_v36 = vadd.f32 %v2256_v21, %v924_v35 }
 0x1e7   : > { %v1816_v37 = vpop.eup %1815  ;;  %v1023_v55 = vmul.f32 0.5, %v2320_v36 }
 0x1e8   : > { %v1086_v38 = vmul.f32 0.5, %v1816_v37 }
 0x1e9   : > { %1817 = vtanh.f32 %v1023_v55 }
 0x1ea   : > { %v1118_v41 = vadd.f32 0.5, %v1086_v38 }
 0x1ec   : > { %v927_v11 = vpop.f32.mrf.mxu1  ;;  %1190 = vrot.lane.b32.xlu1 %v1118_v41, %s1935_s14 }
 0x1ed   : > { %v2325_v42 = vadd.f32 %v2256_v21, %v927_v11 }
 0x1ef   : > { %v1818_v45 = vpop.eup %1817  ;;  %v1024_v0 = vmul.f32 0.5, %v2325_v42 }
 0x1f0   : > { %v1087_v9 = vmul.f32 0.5, %v1818_v45 }
 0x1f1   : > { %1819 = vtanh.f32 %v1024_v0 }
 0x1f2   : > { %v1119_v50 = vadd.f32 0.5, %v1087_v9 }
 0x1f4   : > { %v929_v7 = vpop.f32.mrf.mxu1  ;;  %1192 = vrot.lane.b32.xlu2 %v1119_v50, %s1935_s14 }
 0x1f5   : > { %v2330_v53 = vadd.f32 %v2256_v21, %v929_v7 }
 0x1f7   : > { %v1820_v49 = vpop.eup %1819  ;;  %v1025_v18 = vmul.f32 0.5, %v2330_v53 }
 0x1f8   : > { %v1088_v54 = vmul.f32 0.5, %v1820_v49 }
 0x1f9   : > { %1821 = vtanh.f32 %v1025_v18 }
 0x1fa   : > { %v1120_v57 = vadd.f32 0.5, %v1088_v54 }
 0x1fc   : > { %v932_v15 = vpop.f32.mrf.mxu1  ;;  %1194 = vrot.lane.b32.xlu0 %v1120_v57, %s1935_s14 }
 0x1fd   : > { %v2335_v58 = vadd.f32 %v2256_v21, %v932_v15 }
 0x1ff   : > { %v1822_v20 = vpop.eup %1821  ;;  %v1026_v34 = vmul.f32 0.5, %v2335_v58 }
 0x200   : > { %v1089_v29 = vmul.f32 0.5, %v1822_v20 }
 0x201   : > { %1823 = vtanh.f32 %v1026_v34 }
 0x202   : > { %v1121_v62 = vadd.f32 0.5, %v1089_v29 }
 0x204   : > { %v934_v27 = vpop.f32.mrf.mxu1  ;;  %1196 = vrot.lane.b32.xlu1 %v1121_v62, %s1935_s14 }
 0x205   : > { %v2343_v30 = vadd.f32 %v2256_v21, %v934_v27 }
 0x206   : > { %v1175_v41 = vpop.permute.xlu2 %1174 }
 0x207   : > { %v1824_v2 = vpop.eup %1823  ;;  %v1027_v4 = vmul.f32 0.5, %v2343_v30 }
 0x208   : > { %v1090_v47 = vmul.f32 0.5, %v1824_v2 }
 0x209   : > { %1825 = vtanh.f32 %v1027_v4 }
 0x20a   : > { %v1122_v3 = vadd.f32 0.5, %v1090_v47  ;;  %v962_v10 = vpop.f32.mrf.mxu3 }
 0x20b   : > { %v2356_v14 = vadd.f32 %v2256_v21, %v962_v10 }
 0x20c   : > { %v937_v46 = vpop.f32.mrf.mxu1  ;;  %1198 = vrot.lane.b32.xlu2 %v1122_v3, %s1935_s14 }
 0x20d   : > { %v2351_v40 = vadd.f32 %v2256_v21, %v937_v46  ;;  %v1038_v39 = vmul.f32 0.5, %v2356_v14 }
 0x20f   : > { %v1826_v8 = vpop.eup %1825  ;;  %v1028_v12 = vmul.f32 0.5, %v2351_v40 }
 0x210   : > { %v1091_v44 = vmul.f32 0.5, %v1826_v8 }
 0x211   : > { %1827 = vtanh.f32 %v1028_v12 }
 0x212   : > { %v1123_v13 = vadd.f32 0.5, %v1091_v44  ;;  %v964_v24 = vpop.f32.mrf.mxu3 }
 0x213   : > { %v2365_v28 = vadd.f32 %v2256_v21, %v964_v24 }
 0x214   : > { %v939_v59 = vpop.f32.mrf.mxu1  ;;  %1200 = vrot.lane.b32.xlu0 %v1123_v13, %s1935_s14 }
 0x215   : > { %v2359_v16 = vadd.f32 %v2256_v21, %v939_v59  ;;  %v1039_v35 = vmul.f32 0.5, %v2365_v28 }
 0x217   : > { %v1828_v17 = vpop.eup %1827  ;;  %v1029_v22 = vmul.f32 0.5, %v2359_v16 }
 0x218   : > { %v1092_v33 = vmul.f32 0.5, %v1828_v17 }
 0x219   : > { %1829 = vtanh.f32 %v1029_v22 }
 0x21a   : > { %v1124_v25 = vadd.f32 0.5, %v1092_v33  ;;  %1831 = vtanh.f32 %v1038_v39 }
 0x21b   : > { %1833 = vtanh.f32 %v2261_v5 }
 0x21c   : > { %v942_v26 = vpop.f32.mrf.mxu1  ;;  %1202 = vrot.lane.b32.xlu1 %v1124_v25, %s1935_s14  ;;  %1835 = vtanh.f32 %v2269_v19 }
 0x21d   : > { %v2368_v48 = vadd.f32 %v2256_v21, %v942_v26 }
 0x21e   : > { %v1181_v27 = vpop.permute.xlu2 %1180 }
 0x21f   : > { %v1830_v6 = vpop.eup %1829  ;;  %v1030_v31 = vmul.f32 0.5, %v2368_v48 }
 0x220   : > { %v1093_v32 = vmul.f32 0.5, %v1830_v6  ;;  %v1832_v55 = vpop.eup %1831 }
 0x221   : > { %1837 = vtanh.f32 %v1030_v31  ;;  %v1834_v45 = vpop.eup %1833  ;;  %v1102_v50 = vmul.f32 0.5, %v1832_v55 }
 0x222   : > { %v1125_v37 = vadd.f32 0.5, %v1093_v32  ;;  %v967_v38 = vpop.f32.mrf.mxu3  ;;  %1839 = vtanh.f32 %v1039_v35  ;;  %v1836_v19 = vpop.eup %1835  ;;  %v1270_v49 = vmul.f32 %v1834_v45, %v1175_v41 }
 0x223   : > { %v2376_v0 = vadd.f32 %v2256_v21, %v967_v38  ;;  %1841 = vtanh.f32 %v2276_v56  ;;  %v1134_v29 = vadd.f32 0.5, %v1102_v50 }
 0x224   : > { %v944_v11 = vpop.f32.mrf.mxu1  ;;  %1204 = vrot.lane.b32.xlu2 %v1125_v37, %s1935_s14  ;;  %1843 = vtanh.f32 %v2285_v52 }
 0x225   : > { %v2379_v5 = vadd.f32 %v2256_v21, %v944_v11  ;;  %v1040_v15 = vmul.f32 0.5, %v2376_v0 }
 0x226   : > { %v1177_v9 = vpop.permute.xlu0 %1176 }
 0x227   : > { %v1838_v7 = vpop.eup %1837  ;;  %v1031_v18 = vmul.f32 0.5, %v2379_v5  ;;  %v1271_v54 = vmul.f32 %v1836_v19, %v1177_v9 }
 0x228   : > { %v1094_v57 = vmul.f32 0.5, %v1838_v7  ;;  %v1840_v62 = vpop.eup %1839 }
 0x229   : > { %1845 = vtanh.f32 %v1031_v18  ;;  %v1302_v20 = vpack.c.bf16 %v1271_v54, %v1270_v49  ;;  %v1842_v56 = vpop.eup %1841  ;;  %v1103_v3 = vmul.f32 0.5, %v1840_v62 }
 0x22a   : > { %v1126_v34 = vadd.f32 0.5, %v1094_v57  ;;  %v969_v1 = vpop.f32.mrf.mxu3  ;;  %1847 = vtanh.f32 %v1040_v15  ;;  %v1844_v43 = vpop.eup %1843 }
 0x22b   : > { %1629 = vmatmul.msk.bf16.vlgmr.msra.gmra.mxu2 %vm351_vm0, %v1302_v20  ;;  %v2389_v52 = vadd.f32 %v2256_v21, %v969_v1  ;;  %v1273_v8 = vmul.f32 %v1844_v43, %v1181_v27  ;;  %v1135_v22 = vadd.f32 0.5, %v1103_v3 }
 0x22c   : > { %v947_v2 = vpop.f32.mrf.mxu1  ;;  %1206 = vrot.lane.b32.xlu0 %v1126_v34, %s1935_s14  ;;  %1222 = vrot.lane.b32.xlu2 %v1134_v29, %s1935_s14 }
 0x22d   : > { %v2392_v4 = vadd.f32 %v2256_v21, %v947_v2  ;;  %v1041_v13 = vmul.f32 0.5, %v2389_v52 }
 0x22e   : > { %v1179_v47 = vpop.permute.xlu1 %1178 }
 0x22f   : > { %v1846_v46 = vpop.eup %1845  ;;  %v1032_v12 = vmul.f32 0.5, %v2392_v4  ;;  %v1272_v10 = vmul.f32 %v1842_v56, %v1179_v47 }
 0x230   : > { %v1095_v44 = vmul.f32 0.5, %v1846_v46  ;;  %v1848_v33 = vpop.eup %1847 }
 0x231   : > { %1849 = vtanh.f32 %v1032_v12  ;;  %v1303_v59 = vpack.c.bf16 %v1273_v8, %v1272_v10  ;;  %v1104_v6 = vmul.f32 0.5, %v1848_v33 }
 0x232   : > { %v1127_v17 = vadd.f32 0.5, %v1095_v44  ;;  %v972_v39 = vpop.f32.mrf.mxu3  ;;  %1851 = vtanh.f32 %v1041_v13 }
 0x233   : > { %v2399_v25 = vadd.f32 %v2256_v21, %v972_v39  ;;  %v1136_v38 = vadd.f32 0.5, %v1104_v6 }
 0x234   : > { %v949_v24 = vpop.f32.mrf.mxu1  ;;  %1208 = vrot.lane.b32.xlu1 %v1127_v17, %s1935_s14  ;;  %1224 = vrot.lane.b32.xlu0 %v1135_v22, %s1935_s14 }
 0x235   : > { %v2402_v26 = vadd.f32 %v2256_v21, %v949_v24  ;;  %v1042_v37 = vmul.f32 0.5, %v2399_v25 }
 0x237   : > { %v1850_v31 = vpop.eup %1849  ;;  %v1033_v32 = vmul.f32 0.5, %v2402_v26 }
 0x238   : > { %v1096_v35 = vmul.f32 0.5, %v1850_v31  ;;  %v1852_v41 = vpop.eup %1851 }
 0x239   : > { %1853 = vtanh.f32 %v1033_v32  ;;  %v1105_v50 = vmul.f32 0.5, %v1852_v41  ;;  %v1187_v41 = vpop.permute.xlu2 %1186 }
 0x23a   : > { %v1128_v55 = vadd.f32 0.5, %v1096_v35  ;;  %v974_v11 = vpop.f32.mrf.mxu3  ;;  %1855 = vtanh.f32 %v1042_v37 }
 0x23b   : > { %1630 = vmatmul.msk.bf16.gmra.mxu2 %vm351_vm0, %v1303_v59  ;;  %v2410_v19 = vadd.f32 %v2256_v21, %v974_v11  ;;  %1857 = vtanh.f32 %v2290_v60  ;;  %v1137_v57 = vadd.f32 0.5, %v1105_v50 }
 0x23c   : > { %v952_v45 = vpop.f32.mrf.mxu1  ;;  %1210 = vrot.lane.b32.xlu1 %v1128_v55, %s1935_s14  ;;  %1226 = vrot.lane.b32.xlu0 %v1136_v38, %s1935_s14  ;;  %1859 = vtanh.f32 %v2299_v51 }
 0x23d   : > { %v2413_v9 = vadd.f32 %v2256_v21, %v952_v45  ;;  %v1043_v54 = vmul.f32 0.5, %v2410_v19 }
 0x23e   : > { %v1183_v29 = vpop.permute.xlu0 %1182 }
 0x23f   : > { %v1854_v7 = vpop.eup %1853  ;;  %v1034_v49 = vmul.f32 0.5, %v2413_v9 }
 0x240   : > { %v1097_v18 = vmul.f32 0.5, %v1854_v7  ;;  %v1856_v20 = vpop.eup %1855 }
 0x241   : > { %1861 = vtanh.f32 %v1034_v49  ;;  %v1858_v1 = vpop.eup %1857  ;;  %v1106_v56 = vmul.f32 0.5, %v1856_v20 }
 0x242   : > { %v1129_v15 = vadd.f32 0.5, %v1097_v18  ;;  %v977_v34 = vpop.f32.mrf.mxu3  ;;  %1863 = vtanh.f32 %v1043_v54  ;;  %v1860_v27 = vpop.eup %1859  ;;  %v1274_v47 = vmul.f32 %v1858_v1, %v1183_v29 }
 0x243   : > { %v2422_v60 = vadd.f32 %v2256_v21, %v977_v34  ;;  %v1138_v44 = vadd.f32 0.5, %v1106_v56 }
 0x244   : > { %v954_v62 = vpop.f32.mrf.mxu1  ;;  %1228 = vrot.lane.b32.xlu1 %v1137_v57, %s1935_s14  ;;  %1212 = vrot.lane.b32.xlu2 %v1129_v15, %s1935_s14 }
 0x245   : > { %v2425_v51 = vadd.f32 %v2256_v21, %v954_v62  ;;  %v1044_v12 = vmul.f32 0.5, %v2422_v60 }
 0x246   : > { %v1185_v2 = vpop.permute.xlu1 %1184 }
 0x247   : > { %v1862_v43 = vpop.eup %1861  ;;  %v1035_v3 = vmul.f32 0.5, %v2425_v51  ;;  %v1275_v46 = vmul.f32 %v1860_v27, %v1185_v2 }
 0x248   : > { %v1098_v8 = vmul.f32 0.5, %v1862_v43  ;;  %v1864_v59 = vpop.eup %1863 }
 0x249   : > { %1865 = vtanh.f32 %v1035_v3  ;;  %v1304_v10 = vpack.c.bf16 %v1275_v46, %v1274_v47  ;;  %v1107_v24 = vmul.f32 0.5, %v1864_v59 }
 0x24a   : > { %v1130_v13 = vadd.f32 0.5, %v1098_v8  ;;  %v979_v17 = vpop.f32.mrf.mxu3  ;;  %1867 = vtanh.f32 %v1044_v12 }
 0x24b   : > { %1631 = vmatmul.msk.bf16.gmra.mxu2 %vm351_vm0, %v1304_v10  ;;  %v2433_v33 = vadd.f32 %v2256_v21, %v979_v17  ;;  %1869 = vtanh.f32 %v2304_v61  ;;  %v1139_v55 = vadd.f32 0.5, %v1107_v24 }
 0x24c   : > { %v957_v22 = vpop.f32.mrf.mxu1  ;;  %1230 = vrot.lane.b32.xlu1 %v1138_v44, %s1935_s14  ;;  %1214 = vrot.lane.b32.xlu2 %v1130_v13, %s1935_s14  ;;  %1871 = vtanh.f32 %v2310_v23 }
 0x24d   : > { %v2436_v39 = vadd.f32 %v2256_v21, %v957_v22  ;;  %v1045_v35 = vmul.f32 0.5, %v2433_v33 }
 0x24f   : > { %v1866_v6 = vpop.eup %1865  ;;  %v1036_v31 = vmul.f32 0.5, %v2436_v39 }
 0x250   : > { %v1099_v32 = vmul.f32 0.5, %v1866_v6  ;;  %v1868_v38 = vpop.eup %1867 }
 0x251   : > { %1873 = vtanh.f32 %v1036_v31  ;;  %v1870_v45 = vpop.eup %1869  ;;  %v1108_v7 = vmul.f32 0.5, %v1868_v38 }
 0x252   : > { %v1131_v37 = vadd.f32 0.5, %v1099_v32  ;;  %1875 = vtanh.f32 %v1045_v35  ;;  %v1872_v50 = vpop.eup %1871  ;;  %v1276_v18 = vmul.f32 %v1870_v45, %v1187_v41 }
 0x253   : > { %1877 = vtanh.f32 %v2315_v63  ;;  %v1140_v29 = vadd.f32 0.5, %v1108_v7 }
 0x254   : > { %v959_v11 = vpop.f32.mrf.mxu1  ;;  %1216 = vrot.lane.b32.xlu0 %v1131_v37, %s1935_s14  ;;  %1232 = vrot.lane.b32.xlu2 %v1139_v55, %s1935_s14  ;;  %1879 = vtanh.f32 %v2320_v36 }
 0x255   : > { %v2445_v61 = vadd.f32 %v2256_v21, %v959_v11  ;;  %v1193_v21 = vpop.permute.xlu2 %1192 }
 0x256   : > { %v1189_v23 = vpop.permute.xlu0 %1188 }
 0x257   : > { %v1874_v49 = vpop.eup %1873  ;;  %v1037_v54 = vmul.f32 0.5, %v2445_v61  ;;  %v1277_v57 = vmul.f32 %v1872_v50, %v1189_v23 }
 0x258   : > { %v1100_v15 = vmul.f32 0.5, %v1874_v49  ;;  %v1876_v62 = vpop.eup %1875 }
 0x259   : > { %1881 = vtanh.f32 %v1037_v54  ;;  %v1305_v20 = vpack.c.bf16 %v1277_v57, %v1276_v18  ;;  %v1878_v63 = vpop.eup %1877  ;;  %v1109_v2 = vmul.f32 0.5, %v1876_v62 }
 0x25a   : > { %v1132_v34 = vadd.f32 0.5, %v1100_v15  ;;  %v1880_v1 = vpop.eup %1879  ;;  %1883 = vtanh.f32 %v2325_v42 }
 0x25b   : > { %1632 = vmatmul.msk.bf16.gmra.mxu2 %vm351_vm0, %v1305_v20  ;;  %v1279_v43 = vmul.f32 %v1880_v1, %v1193_v21  ;;  %v1141_v8 = vadd.f32 0.5, %v1109_v2  ;;  %1885 = vtanh.f32 %v2330_v53 }
 0x25c   : > { %1218 = vrot.lane.b32.xlu0 %v1132_v34, %s1935_s14  ;;  %1234 = vrot.lane.b32.xlu2 %v1140_v29, %s1935_s14  ;;  %1887 = vtanh.f32 %v2335_v58 }
 0x25d   : > { %1889 = vtanh.f32 %v2343_v30 }
 0x25e   : > { %v1191_v27 = vpop.permute.xlu1 %1190  ;;  %1891 = vtanh.f32 %v2351_v40 }
 0x25f   : > { %v1882_v56 = vpop.eup %1881  ;;  %v1278_v36 = vmul.f32 %v1878_v63, %v1191_v27  ;;  %1893 = vtanh.f32 %v2359_v16 }
 0x260   : > { %v1101_v47 = vmul.f32 0.5, %v1882_v56  ;;  %v1884_v10 = vpop.eup %1883  ;;  %1895 = vtanh.f32 %v2356_v14 }
 0x261   : > { %v1306_v3 = vpack.c.bf16 %v1279_v43, %v1278_v36  ;;  %v1886_v44 = vpop.eup %1885  ;;  %1897 = vtanh.f32 %v2365_v28 }
 0x262   : > { %v1133_v46 = vadd.f32 0.5, %v1101_v47  ;;  %v1888_v6 = vpop.eup %1887  ;;  %1899 = vtanh.f32 %v2368_v48 }
 0x263   : > { %v1890_v31 = vpop.eup %1889  ;;  %1901 = vtanh.f32 %v2379_v5 }
 0x264   : > { %1220 = vrot.lane.b32.xlu1 %v1133_v46, %s1935_s14  ;;  %1236 = vrot.lane.b32.xlu0 %v1141_v8, %s1935_s14  ;;  %v1892_v55 = vpop.eup %1891  ;;  %1903 = vtanh.f32 %v2392_v4  ;;  %v2476_v4 = vld [vmem:[%s2606_s6] ss:$0 sm:$0xff] }
 0x265   : > { %v1894_v38 = vpop.eup %1893  ;;  %1905 = vtanh.f32 %v2402_v26 }
 0x266   : > { %v1199_v24 = vpop.permute.xlu2 %1198  ;;  %v1896_v45 = vpop.eup %1895  ;;  %1907 = vtanh.f32 %v2376_v0 }
 0x267   : > { %v1282_v42 = vmul.f32 %v1888_v6, %v1199_v24  ;;  %v1898_v50 = vpop.eup %1897  ;;  %1909 = vtanh.f32 %v2389_v52 }
 0x268   : > { %v1900_v23 = vpop.eup %1899  ;;  %1911 = vtanh.f32 %v2399_v25 }
 0x269   : > { %v1902_v7 = vpop.eup %1901  ;;  %1913 = vtanh.f32 %v2410_v19 }
 0x26a   : > { %v1904_v5 = vpop.eup %1903  ;;  %1915 = vtanh.f32 %v2413_v9 }
 0x26b   : > { %1633 = vmatmul.msk.bf16.gmra.mxu2 %vm351_vm0, %v1306_v3  ;;  %v1906_v34 = vpop.eup %1905  ;;  %1917 = vtanh.f32 %v2425_v51 }
 0x26c   : > { %v1908_v2 = vpop.eup %1907  ;;  %1919 = vtanh.f32 %v2422_v60 }
 0x26d   : > { %v1910_v56 = vpop.eup %1909  ;;  %1921 = vtanh.f32 %v2433_v33 }
 0x26e   : > { %v1195_v12 = vpop.permute.xlu0 %1194  ;;  %1923 = vtanh.f32 %v2436_v39 }
 0x26f   : > { %v1280_v59 = vmul.f32 %v1884_v10, %v1195_v12  ;;  %v1912_v12 = vpop.eup %1911  ;;  %1925 = vtanh.f32 %v2445_v61 }
 0x270   : > { %v1914_v10 = vpop.eup %1913 }
 0x276   : > { %v1197_v13 = vpop.permute.xlu1 %1196 }
 0x277   : > { %v1281_v17 = vmul.f32 %v1886_v44, %v1197_v13 }
 0x279   : > { %v1307_v22 = vpack.c.bf16 %v1281_v17, %v1280_v59 }
 0x27b   : > { %1634 = vmatmul.msk.bf16.gmra.mxu2 %vm351_vm0, %v1307_v22  ;;  %v1916_v22 = vpop.eup %1915 }
 0x27c   : > { %v1918_v24 = vpop.eup %1917 }
 0x27e   : > { %v1205_v37 = vpop.permute.xlu2 %1204 }
 0x27f   : > { %v1285_v58 = vmul.f32 %v1894_v38, %v1205_v37 }
 0x286   : > { %v1201_v32 = vpop.permute.xlu0 %1200  ;;  %v1223_v16 = vpop.permute.xlu2 %1222 }
 0x287   : > { %v1283_v53 = vmul.f32 %v1890_v31, %v1201_v32  ;;  %v1294_v54 = vmul.f32 %v1896_v45, %v1223_v16 }
 0x289   : > { %v1308_v35 = vpack.c.bf16 %v1283_v53, %v1282_v42 }
 0x28b   : > { %1635 = vmatmul.msk.bf16.gmra.mxu2 %vm351_vm0, %v1308_v35 }
 0x28e   : > { %v1203_v41 = vpop.permute.xlu1 %1202 }
 0x28f   : > { %v1284_v11 = vmul.f32 %v1892_v55, %v1203_v41  ;;  %v1920_v55 = vpop.eup %1919 }
 0x290   : > { %v1922_v38 = vpop.eup %1921 }
 0x291   : > { %v1309_v30 = vpack.c.bf16 %v1285_v58, %v1284_v11  ;;  %v1924_v58 = vpop.eup %1923 }
 0x292   : > { %v1926_v11 = vpop.eup %1925 }
 0x29b   : > { %1636 = vmatmul.msk.bf16.gmra.mxu2 %vm351_vm0, %v1309_v30 }
 0x29e   : > { %v1207_v40 = vpop.permute.xlu0 %1206  ;;  %v1213_v28 = vpop.permute.xlu2 %1212 }
 0x29f   : > { %v1286_v57 = vmul.f32 %v1900_v23, %v1207_v40  ;;  %v1289_v62 = vmul.f32 %v1906_v34, %v1213_v28 }
 0x2a6   : > { %v1209_v49 = vpop.permute.xlu1 %1208  ;;  %v1225_v18 = vpop.permute.xlu0 %1224 }
 0x2a7   : > { %v1287_v14 = vmul.f32 %v1902_v7, %v1209_v49  ;;  %v1295_v15 = vmul.f32 %v1898_v50, %v1225_v18  ;;  %v1215_v27 = vpop.permute.xlu2 %1214 }
 0x2a8   : > { %v1290_v31 = vmul.f32 %v1916_v22, %v1215_v27 }
 0x2a9   : > { %v1310_v48 = vpack.c.bf16 %v1287_v14, %v1286_v57  ;;  %v1314_v20 = vpack.c.bf16 %v1295_v15, %v1294_v54 }
 0x2ab   : > { %1637 = vmatmul.msk.bf16.gmra.mxu2 %vm351_vm0, %v1310_v48  ;;  %1641 = vmatmul.msk.bf16.vlgmr.msra.gmra.mxu3 %vm351_vm0, %v1314_v20 }
 0x2ae   : > { %v1211_v29 = vpop.permute.xlu1 %1210  ;;  %v1395_v26 = vpop.f32.mrf.mxu2 }
 0x2af   : > { %v1288_v21 = vmul.f32 %v1904_v5, %v1211_v29  ;;  %v1396_v63 = vadd.f32 %v2476_v4, %v1395_v26  ;;  %v1227_v0 = vpop.permute.xlu0 %1226  ;;  %v1233_v8 = vpop.permute.xlu2 %1232 }
 0x2b0   : > { %v1296_v36 = vmul.f32 %v1908_v2, %v1227_v0  ;;  %v1299_v25 = vmul.f32 %v1914_v10, %v1233_v8 }
 0x2b1   : > { %v1311_v1 = vpack.c.bf16 %v1289_v62, %v1288_v21  ;;  %1476 = vst.msk [vmem:[%s2484_s9] sm:$0xff] %vm1475_vm1, %v1396_v63 }
 0x2b6   : > { %v1229_v43 = vpop.permute.xlu1 %1228  ;;  %v1397_v3 = vpop.f32.mrf.mxu2 }
 0x2b7   : > { %v1297_v47 = vmul.f32 %v1910_v56, %v1229_v43  ;;  %v1398_v52 = vadd.f32 %v2476_v4, %v1397_v3  ;;  %v1235_v41 = vpop.permute.xlu2 %1234 }
 0x2b8   : > { %v1300_v33 = vmul.f32 %v1920_v55, %v1235_v41 }
 0x2b9   : > { %v1315_v46 = vpack.c.bf16 %v1297_v47, %v1296_v36  ;;  %1477 = vst.msk [vmem:[%s2484_s9 + $0x8] sm:$0xff] %vm1475_vm1, %v1398_v52 }
 0x2bb   : > { %1638 = vmatmul.msk.bf16.gmra.mxu2 %vm351_vm0, %v1311_v1  ;;  %1642 = vmatmul.msk.bf16.gmra.mxu3 %vm351_vm0, %v1315_v46 }
 0x2be   : > { %v1231_v44 = vpop.permute.xlu1 %1230  ;;  %v1400_v19 = vpop.f32.mrf.mxu2 }
 0x2bf   : > { %v1298_v13 = vmul.f32 %v1912_v12, %v1231_v44  ;;  %v1401_v59 = vadd.f32 %v2476_v4, %v1400_v19 }
 0x2c1   : > { %v1316_v17 = vpack.c.bf16 %v1299_v25, %v1298_v13  ;;  %1478 = vst.msk [vmem:[%s2484_s9 + $0x10] sm:$0xff] %vm1475_vm1, %v1401_v59 }
 0x2c6   : > { %v1217_v6 = vpop.permute.xlu0 %1216  ;;  %v1402_v42 = vpop.f32.mrf.mxu2 }
 0x2c7   : > { %v1291_v32 = vmul.f32 %v1918_v24, %v1217_v6  ;;  %v1403_v9 = vadd.f32 %v2476_v4, %v1402_v42 }
 0x2c9   : > { %v1312_v53 = vpack.c.bf16 %v1291_v32, %v1290_v31  ;;  %1479 = vst.msk [vmem:[%s2484_s9 + $0x18] sm:$0xff] %vm1475_vm1, %v1403_v9 }
 0x2cb   : > { %1639 = vmatmul.msk.bf16.gmra.mxu2 %vm351_vm0, %v1312_v53  ;;  %1643 = vmatmul.msk.bf16.gmra.mxu3 %vm351_vm0, %v1316_v17 }
 0x2ce   : > { %v1219_v51 = vpop.permute.xlu0 %1218  ;;  %v1405_v35 = vpop.f32.mrf.mxu2 }
 0x2cf   : > { %v1406_v37 = vadd.f32 %v2476_v4, %v1405_v35  ;;  %v1292_v40 = vmul.f32 %v1924_v58, %v1219_v51 }
 0x2d1   : > { %1480 = vst.msk [vmem:[%s2484_s9 + $0x20] sm:$0xff] %vm1475_vm1, %v1406_v37 }
 0x2d6   : > { %v1221_v60 = vpop.permute.xlu1 %1220  ;;  %v1237_v30 = vpop.permute.xlu0 %1236 }
 0x2d7   : > { %v1293_v39 = vmul.f32 %v1926_v11, %v1221_v60  ;;  %v1301_v16 = vmul.f32 %v1922_v38, %v1237_v30  ;;  %v1407_v61 = vpop.f32.mrf.mxu2 }
 0x2d8   : > { %v1408_v45 = vadd.f32 %v2476_v4, %v1407_v61 }
 0x2d9   : > { %v1313_v50 = vpack.c.bf16 %v1293_v39, %v1292_v40  ;;  %v1317_v23 = vpack.c.bf16 %v1301_v16, %v1300_v33 }
 0x2da   : > { %1481 = vst.msk [vmem:[%s2484_s9 + $0x28] sm:$0xff] %vm1475_vm1, %v1408_v45 }
 0x2db   : > { %1640 = vmatmul.msk.bf16.gmra.mxu2 %vm351_vm0, %v1313_v50  ;;  %1644 = vmatmul.msk.bf16.gmra.mxu3 %vm351_vm0, %v1317_v23 }
 0x2df   : > { %v1410_v7 = vpop.f32.mrf.mxu2 }
 0x2e0   : > { %v1411_v49 = vadd.f32 %v2476_v4, %v1410_v7 }
 0x2e2   : > { %1482 = vst.msk [vmem:[%s2484_s9 + $0x30] sm:$0xff] %vm1475_vm1, %v1411_v49 }
 0x2e7   : > { %v1412_v18 = vpop.f32.mrf.mxu2 }
 0x2e8   : > { %v1413_v54 = vadd.f32 %v2476_v4, %v1412_v18 }
 0x2ea   : > { %1483 = vst.msk [vmem:[%s2484_s9 + $0x38] sm:$0xff] %vm1475_vm1, %v1413_v54 }
 0x2ef   : > { %v1415_v57 = vpop.f32.mrf.mxu2 }
 0x2f0   : > { %v1416_v14 = vadd.f32 %v2476_v4, %v1415_v57 }
 0x2f2   : > { %1484 = vst.msk [vmem:[%s2484_s9 + $0x40] sm:$0xff] %vm1475_vm1, %v1416_v14 }
 0x2f7   : > { %v1417_v15 = vpop.f32.mrf.mxu2 }
 0x2f8   : > { %v1418_v28 = vadd.f32 %v2476_v4, %v1417_v15 }
 0x2fa   : > { %1485 = vst.msk [vmem:[%s2484_s9 + $0x48] sm:$0xff] %vm1475_vm1, %v1418_v28 }
 0x2ff   : > { %v1420_v48 = vpop.f32.mrf.mxu2 }
 0x300   : > { %v1421_v20 = vadd.f32 %v2476_v4, %v1420_v48 }
 0x302   : > { %1486 = vst.msk [vmem:[%s2484_s9 + $0x50] sm:$0xff] %vm1475_vm1, %v1421_v20 }
 0x307   : > { %v1422_v5 = vpop.f32.mrf.mxu2 }
 0x308   : > { %v1423_v34 = vadd.f32 %v2476_v4, %v1422_v5 }
 0x30a   : > { %1487 = vst.msk [vmem:[%s2484_s9 + $0x58] sm:$0xff] %vm1475_vm1, %v1423_v34 }
 0x30f   : > { %v1425_v29 = vpop.f32.mrf.mxu2 }
 0x310   : > { %v1426_v62 = vadd.f32 %v2476_v4, %v1425_v29 }
 0x312   : > { %1488 = vst.msk [vmem:[%s2484_s9 + $0x60] sm:$0xff] %vm1475_vm1, %v1426_v62 }
 0x317   : > { %v1427_v21 = vpop.f32.mrf.mxu2 }
 0x318   : > { %v1428_v26 = vadd.f32 %v2476_v4, %v1427_v21 }
 0x31a   : > { %1489 = vst.msk [vmem:[%s2484_s9 + $0x68] sm:$0xff] %vm1475_vm1, %v1428_v26 }
 0x31f   : > { %v1430_v63 = vpop.f32.mrf.mxu2 }
 0x320   : > { %v1431_v1 = vadd.f32 %v2476_v4, %v1430_v63 }
 0x322   : > { %1490 = vst.msk [vmem:[%s2484_s9 + $0x70] sm:$0xff] %vm1475_vm1, %v1431_v1 }
 0x327   : > { %v1432_v27 = vpop.f32.mrf.mxu2 }
 0x328   : > { %v1433_v0 = vadd.f32 %v2476_v4, %v1432_v27 }
 0x32a   : > { %1491 = vst.msk [vmem:[%s2484_s9 + $0x78] sm:$0xff] %vm1475_vm1, %v1433_v0 }
 0x32e   : > { %v1455_v2 = vpop.f32.mrf.mxu3 }
 0x32f   : > { %v1435_v56 = vpop.f32.mrf.mxu2  ;;  %v1456_v43 = vadd.f32 %v2476_v4, %v1455_v2 }
 0x330   : > { %v1436_v36 = vadd.f32 %v2476_v4, %v1435_v56 }
 0x331   : > { %1500 = vst.msk [vmem:[%s2484_s9 + $0xc0] sm:$0xff] %vm1475_vm1, %v1456_v43 }
 0x332   : > { %1492 = vst.msk [vmem:[%s2484_s9 + $0x80] sm:$0xff] %vm1475_vm1, %v1436_v36 }
 0x336   : > { %v1457_v47 = vpop.f32.mrf.mxu3 }
 0x337   : > { %v1437_v3 = vpop.f32.mrf.mxu2  ;;  %v1458_v52 = vadd.f32 %v2476_v4, %v1457_v47 }
 0x338   : > { %v1438_v46 = vadd.f32 %v2476_v4, %v1437_v3 }
 0x339   : > { %1501 = vst.msk [vmem:[%s2484_s9 + $0xc8] sm:$0xff] %vm1475_vm1, %v1458_v52 }
 0x33a   : > { %1493 = vst.msk [vmem:[%s2484_s9 + $0x88] sm:$0xff] %vm1475_vm1, %v1438_v46 }
 0x33e   : > { %v1460_v8 = vpop.f32.mrf.mxu3 }
 0x33f   : > { %v1440_v12 = vpop.f32.mrf.mxu2  ;;  %v1461_v10 = vadd.f32 %v2476_v4, %v1460_v8 }
 0x340   : > { %v1441_v44 = vadd.f32 %v2476_v4, %v1440_v12 }
 0x341   : > { %1502 = vst.msk [vmem:[%s2484_s9 + $0xd0] sm:$0xff] %vm1475_vm1, %v1461_v10 }
 0x342   : > { %1494 = vst.msk [vmem:[%s2484_s9 + $0x90] sm:$0xff] %vm1475_vm1, %v1441_v44 }
 0x346   : > { %v1462_v25 = vpop.f32.mrf.mxu3 }
 0x347   : > { %v1442_v13 = vpop.f32.mrf.mxu2  ;;  %v1463_v19 = vadd.f32 %v2476_v4, %v1462_v25 }
 0x348   : > { %v1443_v59 = vadd.f32 %v2476_v4, %v1442_v13 }
 0x349   : > { %1503 = vst.msk [vmem:[%s2484_s9 + $0xd8] sm:$0xff] %vm1475_vm1, %v1463_v19 }
 0x34a   : > { %1495 = vst.msk [vmem:[%s2484_s9 + $0x98] sm:$0xff] %vm1475_vm1, %v1443_v59 }
 0x34e   : > { %v1465_v17 = vpop.f32.mrf.mxu3 }
 0x34f   : > { %v1445_v22 = vpop.f32.mrf.mxu2  ;;  %v1466_v24 = vadd.f32 %v2476_v4, %v1465_v17 }
 0x350   : > { %v1446_v6 = vadd.f32 %v2476_v4, %v1445_v22 }
 0x351   : > { %1504 = vst.msk [vmem:[%s2484_s9 + $0xe0] sm:$0xff] %vm1475_vm1, %v1466_v24 }
 0x352   : > { %1496 = vst.msk [vmem:[%s2484_s9 + $0xa0] sm:$0xff] %vm1475_vm1, %v1446_v6 }
 0x356   : > { %v1467_v31 = vpop.f32.mrf.mxu3 }
 0x357   : > { %v1447_v32 = vpop.f32.mrf.mxu2  ;;  %v1468_v42 = vadd.f32 %v2476_v4, %v1467_v31 }
 0x358   : > { %v1448_v9 = vadd.f32 %v2476_v4, %v1447_v32 }
 0x359   : > { %1505 = vst.msk [vmem:[%s2484_s9 + $0xe8] sm:$0xff] %vm1475_vm1, %v1468_v42 }
 0x35a   : > { %1497 = vst.msk [vmem:[%s2484_s9 + $0xa8] sm:$0xff] %vm1475_vm1, %v1448_v9 }
 0x35e   : > { %v1470_v53 = vpop.f32.mrf.mxu3 }
 0x35f   : > { %v1450_v51 = vpop.f32.mrf.mxu2  ;;  %v1471_v35 = vadd.f32 %v2476_v4, %v1470_v53 }
 0x360   : > { %v1451_v37 = vadd.f32 %v2476_v4, %v1450_v51 }
 0x361   : > { %1506 = vst.msk [vmem:[%s2484_s9 + $0xf0] sm:$0xff] %vm1475_vm1, %v1471_v35 }
 0x362   : > { %1498 = vst.msk [vmem:[%s2484_s9 + $0xb0] sm:$0xff] %vm1475_vm1, %v1451_v37 }
 0x366   : > { %v1472_v55 = vpop.f32.mrf.mxu3 }
 0x367   : > { %v1452_v38 = vpop.f32.mrf.mxu2  ;;  %v1473_v41 = vadd.f32 %v2476_v4, %v1472_v55 }
 0x368   : > { %v1453_v58 = vadd.f32 %v2476_v4, %v1452_v38 }
 0x369   : > { %1507 = vst.msk [vmem:[%s2484_s9 + $0xf8] sm:$0xff] %vm1475_vm1, %v1473_v41 }
 0x36a   : > { %1499 = vst.msk [vmem:[%s2484_s9 + $0xb8] sm:$0xff] %vm1475_vm1, %v1453_v58 }
 0x36b PF: > { %s17_s24 = sadd.s32 1, %s1933_s24  }
 0x36c   : > { %p14_p4 = scmp.ge.s32.totalorder %s17_s24, 4  }
 0x36e   :  { %16 = sbr.rel (!%p14_p4) target bundleno = 1 (0x1), region = 78 }

// kernel: _lambda_.6
= control target key start
LH: loop header
LB: loop body
LE: loop exit
PB: predicated region body
PF: predicated region fallthrough
CT: control target
= control target key end

     0   :  { %s5378_s0 = inlined_call_operand.vmem [shape: bf16[512,160], index: 0, kind: input, shape index: {}]   ;;  %s5379_s1 = inlined_call_operand.vmem [shape: f32[512,32], index: 1, kind: input, shape index: {}]   ;;  %s5380_s2 = inlined_call_operand.vmem [shape: f32[1,32], index: 2, kind: input, shape index: {}]   ;;  %s5381_s3 = inlined_call_operand.vmem [shape: f32[1,32], index: 3, kind: input, shape index: {}]   ;;  %s5382_s4 = inlined_call_operand.vmem [shape: bf16[160,128], index: 4, kind: input, shape index: {}]   ;;  %s5383_s5 = inlined_call_operand.vmem [shape: f32[1,128], index: 5, kind: input, shape index: {}]   ;;  %s5384_s6 = inlined_call_operand.vmem [shape: bf16[64,64], index: 6, kind: input, shape index: {}]   ;;  %s5385_s7 = inlined_call_operand.vmem [shape: f32[1,64], index: 7, kind: input, shape index: {}]   ;;  %s5386_s8 = inlined_call_operand.vmem [shape: bf16[32,32], index: 8, kind: input, shape index: {}]   ;;  %s5387_s9 = inlined_call_operand.vmem [shape: f32[1,32], index: 9, kind: input, shape index: {}]   ;;  %s5388_s10 = inlined_call_operand.hbm [shape: f32[512,32], index: 10, kind: output, shape index: {0}]   ;;  %s5389_s11 = inlined_call_operand.vmem [shape: f32[512,32], index: 11, kind: output, shape index: {1}]   ;;  %s5390_s12 = inlined_call_operand.hbm [shape: f32[16,32], index: 12, kind: output, shape index: {2}]   ;;  %s5391_s13 = inlined_call_operand.hbm [shape: f32[16,32], index: 13, kind: output, shape index: {3}]   ;;  %s5392_s14 = inlined_call_operand.vmem [shape: f32[16,32], index: 14, kind: output, shape index: {4}]   ;;  %s5393_s15 = inlined_call_operand.vmem [shape: f32[16,32], index: 15, kind: output, shape index: {5}]  }
   0x1   :  { %5408 = sst [smem:[#allocation18_spill]] %s5378_s0 }
   0x2   :  { %5409 = sst [smem:[#allocation19_spill]] %s5379_s1 }
   0x3   :  { %5410 = sst [smem:[#allocation20_spill]] %s5382_s4 }
   0x4   :  { %5411 = sst [smem:[#allocation21_spill]] %s5383_s5 }
   0x5   :  { %5412 = sst [smem:[#allocation22_spill]] %s5384_s6 }
   0x6   :  { %5413 = sst [smem:[#allocation23_spill]] %s5385_s7 }
   0x7   :  { %21 = vsyncpa [#allocation3], 0 }
   0x8   :  { %23 = vsyncpa [#allocation3 + $0x1], 0 }
   0x9   :  { %24 = vsyncpa [#allocation5], 0 }
   0xa   :  { %26 = vsyncpa [#allocation5 + $0x1], 0  ;;  %s3946_s18 = smov 0   ;;  %s3948_s19 = smov 0  }
   0xb   :  { %s3950_s20 = smov 0   ;;  %s3952_s21 = smov 0  }
   0xc LB: > { %5414 = sst [smem:[#allocation9_spill]] %s3848_s18  ;;  %s3967_s22 = sadd.s32 4294967295, %s3860_s21   ;;  %s3860_s21 = sphi %s3952_s21, %s5438_s21   ;;  %s3856_s20 = sphi %s3950_s20, %s5440_s20   ;;  %s3852_s19 = sphi %s3948_s19, %s5442_s19   ;;  %s3848_s18 = sphi %s3946_s18, %s5441_s18  }
   0xd   : > { %5415 = sst [smem:[#allocation10_spill]] %s3856_s20  ;;  %s5394_s23 = sadd.s32 4294967294, %s3860_s21  }
   0xe   : > { %s3971_s24 = sadd.s32 1, %s3860_s21   ;;  %s259_s25 = sadd.s32 1, %s3856_s20 }
   0xf   : > { %5416 = sst [smem:[#allocation11_spill]] %s3971_s24  ;;  %s256_s26 = ssub.s32 %s3860_s21, %s3971_s24 }
  0x10   : > { %p269_p0 = scmp.ne.s32.totalorder %s3856_s20, %s3852_s19  ;;  %p257_p1 = scmp.eq.s32.totalorder %s256_s26, 0 }
  0x11   : > { %p270_p2 = scmp.eq.s32.totalorder %s3967_s22, 1  ;;  %p275_p3 = scmp.ne.s32.totalorder %s3852_s19, %s3848_s18 }
  0x12   : > { %p276_p4 = scmp.eq.s32.totalorder %s5394_s23, 1  ;;  %p3105_p7 = scmp.ge.s32.totalorder %s3860_s21, 1 }
  0x13   : > { %s3984_s27 = scalar_select %p257_p1, %s3856_s20, %s259_s25  }
  0x14   : > { %p3986_p5 = por %p270_p2, %p269_p0  ;;  %p3990_p6 = por %p276_p4, %p275_p3 }
  0x15   : > { %5417 = sst [smem:[#allocation12_spill]] %s3984_s27  ;;  %p467_p8 = scmp.lt.s32.totalorder %s3860_s21, 3 }
  0x16   : > { %s5419_s29 = scalar_select %p3990_p6, 1, 0 }
  0x17   : > { %p468_p9 = pnand %p3105_p7, %p467_p8 }
  0x18   : > { %5420 = sst [smem:[#allocation13_spill]] %s5419_s29 }
  0x19   : > { %471 = sbr.rel (%p468_p9) target bundleno = 1406 (0x57e), region = 60 }
  0x1e   : > { %s5421_s4 = sld [smem:[#allocation20_spill]]  ;;  %s3109_s17 = sshll.u32 %s3967_s22, 5  ;;  %vm833_vm0 = vcmask 261120   ;;  %vm1112_vm1 = vcmask 523264  }
  0x1f   : > { %p545_p10 = scmp.lt.s32.totalorder %s3109_s17, 63  ;;  %s5422_s0 = sld [smem:[#allocation18_spill]] }
  0x20   : > { %s5423_s6 = sld [smem:[#allocation22_spill]]  ;;  %s3862_s29 = smov 64  }
  0x21   : > { %s5444_s17 = smov (!%p545_p10, %s3109_s17), 63  ;;  %s5424_s5 = sld [smem:[#allocation21_spill]] }
  0x22   : > { %s4009_s30 = sshll.u32 %s5444_s17, 3  ;;  %s5425_s7 = sld [smem:[#allocation23_spill]] }
  0x23   : > { %s3863_s17 = smov 96   ;;  %s5430_s1 = sld [smem:[#allocation19_spill]] }
  0x24   : > { %v3407_v0 = vld [vmem:[%s5421_s4 + $0x38] sm:$0xff]  ;;  %v3409_v1 = vld [vmem:[%s5421_s4 + $0x48] sm:$0xff]  ;;  %v3406_v2 = vld [vmem:[%s5421_s4 + $0x30] sm:$0xff]  ;;  %s4784_s25 = sand.u32 1, %s3852_s19  }
  0x25   : > { %882 = vmatpush.bf16.msra.mxu0 %v3407_v0  ;;  %977 = vmatpush.bf16.msra.mxu1 %v3409_v1  ;;  %v3408_v3 = vld [vmem:[%s5421_s4 + $0x40] sm:$0xff]  ;;  %v3405_v4 = vld [vmem:[%s5421_s4 + $0x28] sm:$0xff]  ;;  %s4018_s18 = scalar_lea.vmem %s5422_s0, %s4009_s30  ;;  %v3403_v9 = vld [vmem:[%s5421_s4 + $0x18] sm:$0xff]  ;;  %s3106_s26 = sshll.u32 %s4784_s25, 8 }
  0x26   : > { %v3368_v5 = vld [vmem:[%s4018_s18 + $0x4] sm:$0xf]  ;;  %v3122_v6 = vld [vmem:[%s4018_s18 + $0x8] sm:$0xf0]  ;;  %v3402_v10 = vld [vmem:[%s5421_s4 + $0x10] sm:$0xff]  ;;  %s4804_s20 = scalar_lea.vmem [#allocation2], %s3106_s26 }
  0x27   : > { %v3125_v7 = vor.u32 %v3368_v5, %v3122_v6  ;;  %v3404_v8 = vld [vmem:[%s5421_s4 + $0x20] sm:$0xff]  ;;  %v3370_v11 = vld [vmem:[%s4018_s18 + $0x14] sm:$0xf]  ;;  %v3130_v12 = vld [vmem:[%s4018_s18 + $0x18] sm:$0xf0]  ;;  %s2851_s16 = sshll.u32 %s4804_s20, 4  ;;  %s5248_s16 = int_to_ptr.vmem [resolvable:$true] %s2851_s16 }
  0x28   : > { %v3401_v13 = vld [vmem:[%s5421_s4 + $0x8] sm:$0xff]  ;;  %v3133_v14 = vor.u32 %v3370_v11, %v3130_v12  ;;  %v3400_v15 = vld [vmem:[%s5421_s4] sm:$0xff]  ;;  %v3128_v22 = vld [vmem:[%s4018_s18 + $0x10] sm:$0xf]  ;;  %s2816_s23 = scalar_lea.sflag [#allocation3], %s4784_s25  ;;  %s3758_s0 = scalar_lea.hbm %s5388_s10, 512 }
  0x29   : > { %883 = vmatpush.bf16.msra.mxu0 %v3406_v2  ;;  %978 = vmatpush.bf16.msra.mxu1 %v3408_v3  ;;  %v3120_v16 = vld [vmem:[%s4018_s18] sm:$0xf]  ;;  %v3369_v17 = vld [vmem:[%s4018_s18 + $0x4] sm:$0xf0]  ;;  %v3372_v19 = vld [vmem:[%s4018_s18 + $0x24] sm:$0xf]  ;;  %s4493_s24 = scalar_lea.vmem %s5430_s1, %s4009_s30 }
  0x2a   : > { %v3121_v18 = vor.u32 %v3369_v17, %v3120_v16  ;;  %v3138_v20 = vld [vmem:[%s4018_s18 + $0x28] sm:$0xf0]  ;;  %v3371_v23 = vld [vmem:[%s4018_s18 + $0x14] sm:$0xf0]  ;;  %v3374_v25 = vld [vmem:[%s4018_s18 + $0x34] sm:$0xf] }
  0x2b   : > { %v3141_v21 = vor.u32 %v3372_v19, %v3138_v20  ;;  %v3129_v24 = vor.u32 %v3371_v23, %v3128_v22  ;;  %v3146_v26 = vld [vmem:[%s4018_s18 + $0x38] sm:$0xf0]  ;;  %v3136_v28 = vld [vmem:[%s4018_s18 + $0x20] sm:$0xf]  ;;  %v3373_v29 = vld [vmem:[%s4018_s18 + $0x24] sm:$0xf0] }
  0x2c   : > { %3286 = vmatmul.msk.bf16.vlgmr.msra.gmra.mxu1 %vm833_vm0, %v3125_v7  ;;  %v3149_v27 = vor.u32 %v3374_v25, %v3146_v26  ;;  %v3137_v30 = vor.u32 %v3373_v29, %v3136_v28  ;;  %v3376_v31 = vld [vmem:[%s4018_s18 + $0x44] sm:$0xf]  ;;  %v3154_v32 = vld [vmem:[%s4018_s18 + $0x48] sm:$0xf0]  ;;  %v3144_v34 = vld [vmem:[%s4018_s18 + $0x30] sm:$0xf] }
  0x2d   : > { %884 = vmatpush.bf16.msra.mxu0 %v3405_v4  ;;  %v3157_v33 = vor.u32 %v3376_v31, %v3154_v32  ;;  %v3375_v35 = vld [vmem:[%s4018_s18 + $0x34] sm:$0xf0]  ;;  %v3152_v37 = vld [vmem:[%s4018_s18 + $0x40] sm:$0xf]  ;;  %v3377_v38 = vld [vmem:[%s4018_s18 + $0x44] sm:$0xf0] }
  0x2e   : > { %v3145_v36 = vor.u32 %v3375_v35, %v3144_v34  ;;  %v3153_v39 = vor.u32 %v3377_v38, %v3152_v37  ;;  %v3413_v40 = vld [vmem:[%s5423_s6 + $0x18] sm:$0xff]  ;;  %v3412_v41 = vld [vmem:[%s5423_s6 + $0x10] sm:$0xff]  ;;  %v3411_v42 = vld [vmem:[%s5423_s6 + $0x8] sm:$0xff] }
  0x2f   : > { %1165 = vmatpush.bf16.msra.mxu2 %v3413_v40  ;;  %v3410_v43 = vld [vmem:[%s5423_s6] sm:$0xff]  ;;  %v3160_v45 = vld [vmem:[%s4018_s18 + $0x50] sm:$0xf]  ;;  %v3379_v46 = vld [vmem:[%s4018_s18 + $0x54] sm:$0xf0] }
  0x30   : > { %v3161_v47 = vor.u32 %v3379_v46, %v3160_v45  ;;  %v3378_v48 = vld [vmem:[%s4018_s18 + $0x54] sm:$0xf]  ;;  %v3162_v49 = vld [vmem:[%s4018_s18 + $0x58] sm:$0xf0]  ;;  %v3168_v53 = vld [vmem:[%s4018_s18 + $0x60] sm:$0xf] }
  0x31   : > { %885 = vmatpush.bf16.msra.mxu0 %v3404_v8  ;;  %v3165_v50 = vor.u32 %v3378_v48, %v3162_v49  ;;  %v3381_v54 = vld [vmem:[%s4018_s18 + $0x64] sm:$0xf0]  ;;  %v4082_v55 = vld [vmem:[%s5424_s5] ss:$0 sm:$0xff]  ;;  %v3380_v57 = vld [vmem:[%s4018_s18 + $0x64] sm:$0xf] }
  0x32   : > { %v3169_v56 = vor.u32 %v3381_v54, %v3168_v53  ;;  %v3170_v58 = vld [vmem:[%s4018_s18 + $0x68] sm:$0xf0]  ;;  %v3176_v5 = vld [vmem:[%s4018_s18 + $0x70] sm:$0xf]  ;;  %v3383_v6 = vld [vmem:[%s4018_s18 + $0x74] sm:$0xf0] }
  0x33   : > { %1166 = vmatpush.bf16.msra.mxu2 %v3412_v41  ;;  %v3173_v60 = vor.u32 %v3380_v57, %v3170_v58  ;;  %v3177_v7 = vor.u32 %v3383_v6, %v3176_v5  ;;  %v3382_v8 = vld [vmem:[%s4018_s18 + $0x74] sm:$0xf]  ;;  %v3385_v28 = vld [vmem:[%s4018_s18 + $0x84] sm:$0xf0]  ;;  %v3384_v29 = vld [vmem:[%s4018_s18 + $0x84] sm:$0xf] }
  0x34   : > { %v3186_v32 = vld [vmem:[%s4018_s18 + $0x88] sm:$0xf0]  ;;  %v3192_v53 = vld [vmem:[%s4018_s18 + $0x90] sm:$0xf]  ;;  %v3387_v54 = vld [vmem:[%s4018_s18 + $0x94] sm:$0xf0] }
  0x35   : > { %886 = vmatpush.bf16.msra.mxu0 %v3403_v9  ;;  %v3178_v9 = vld [vmem:[%s4018_s18 + $0x78] sm:$0xf0]  ;;  %v3193_v57 = vor.u32 %v3387_v54, %v3192_v53 }
  0x37   : > { %1167 = vmatpush.bf16.msra.mxu2 %v3411_v42 }
  0x39   : > { %887 = vmatpush.bf16.msra.mxu0 %v3402_v10  ;;  %v3181_v10 = vor.u32 %v3382_v8, %v3178_v9  ;;  %v3389_v8 = vld [vmem:[%s4018_s18 + $0xa4] sm:$0xf0] }
  0x3b   : > { %1168 = vmatpush.bf16.msra.mxu2 %v3410_v43 }
  0x3c   : > { %3287 = vmatmul.msk.bf16.gmra.mxu1 %vm833_vm0, %v3133_v14 }
  0x3d   : > { %888 = vmatpush.bf16.msra.mxu0 %v3401_v13 }
  0x41   : > { %889 = vmatpush.bf16.msra.mxu0 %v3400_v15 }
  0x44   : > { %890 = vmatmul.bf16.vlgmr.msra.gmra.mxu0 %v3121_v18 }
  0x4c   : > { %3288 = vmatmul.msk.bf16.gmra.mxu1 %vm833_vm0, %v3141_v21 }
  0x54   : > { %895 = vmatmul.bf16.gmra.mxu0 %v3129_v24 }
  0x5c   : > { %3289 = vmatmul.msk.bf16.gmra.mxu1 %vm833_vm0, %v3149_v27  ;;  %v3184_v27 = vld [vmem:[%s4018_s18 + $0x80] sm:$0xf] }
  0x5d   : > { %v3185_v31 = vor.u32 %v3385_v28, %v3184_v27 }
  0x64   : > { %900 = vmatmul.bf16.gmra.mxu0 %v3137_v30 }
  0x6c   : > { %3290 = vmatmul.msk.bf16.gmra.mxu1 %vm833_vm0, %v3157_v33  ;;  %v3189_v33 = vor.u32 %v3384_v29, %v3186_v32 }
  0x74   : > { %905 = vmatmul.bf16.gmra.mxu0 %v3145_v36 }
  0x7c   : > { %3291 = vmatmul.msk.bf16.gmra.mxu1 %vm833_vm0, %v3165_v50 }
  0x84   : > { %910 = vmatmul.bf16.gmra.mxu0 %v3153_v39 }
  0x8c   : > { %3292 = vmatmul.msk.bf16.gmra.mxu1 %vm833_vm0, %v3173_v60 }
  0x94   : > { %915 = vmatmul.bf16.gmra.mxu0 %v3161_v47 }
  0x9c   : > { %3293 = vmatmul.msk.bf16.gmra.mxu1 %vm833_vm0, %v3181_v10 }
  0xa4   : > { %920 = vmatmul.bf16.gmra.mxu0 %v3169_v56 }
  0xa9   : > { %v980_v44 = vpop.f32.mrf.mxu1 }
  0xac   : > { %3294 = vmatmul.msk.bf16.gmra.mxu1 %vm833_vm0, %v3189_v33 }
  0xb1   : > { %v982_v51 = vpop.f32.mrf.mxu1 }
  0xb4   : > { %925 = vmatmul.bf16.gmra.mxu0 %v3177_v7  ;;  %v3200_v7 = vld [vmem:[%s4018_s18 + $0xa0] sm:$0xf] }
  0xb5   : > { %v3201_v10 = vor.u32 %v3389_v8, %v3200_v7 }
  0xb9   : > { %v985_v59 = vpop.f32.mrf.mxu1 }
  0xc1   : > { %v891_v52 = vpop.f32.mrf.mxu0  ;;  %v987_v3 = vpop.f32.mrf.mxu1 }
  0xc2   : > { %v892_v61 = vadd.f32 %v4082_v55, %v891_v52 }
  0xc4   : > { %v4089_v0 = vadd.f32 %v980_v44, %v892_v61  ;;  %930 = vmatmul.bf16.gmra.mxu0 %v3185_v31  ;;  %v3386_v61 = vld [vmem:[%s4018_s18 + $0x94] sm:$0xf] }
  0xc9   : > { %v893_v62 = vpop.f32.mrf.mxu0  ;;  %v990_v11 = vpop.f32.mrf.mxu1 }
  0xca   : > { %v894_v63 = vadd.f32 %v4082_v55, %v893_v62  ;;  %v3194_v62 = vld [vmem:[%s4018_s18 + $0x98] sm:$0xf0] }
  0xcc   : > { %v4091_v1 = vadd.f32 %v982_v51, %v894_v63  ;;  %v3197_v63 = vor.u32 %v3386_v61, %v3194_v62 }
  0xce   : > { %v1060_v2 = vpack.c.bf16 %v4091_v1, %v4089_v0  ;;  %3295 = vmatmul.msk.bf16.gmra.mxu1 %vm833_vm0, %v3197_v63 }
  0xd0   : > { %3318 = vmatmul.msk.bf16.vlgmr.msra.gmra.mxu2 %vm1112_vm1, %v1060_v2 }
  0xd1   : > { %v896_v4 = vpop.f32.mrf.mxu0  ;;  %v992_v19 = vpop.f32.mrf.mxu1 }
  0xd2   : > { %v897_v12 = vadd.f32 %v4082_v55, %v896_v4 }
  0xd4   : > { %v4103_v15 = vadd.f32 %v985_v59, %v897_v12  ;;  %935 = vmatmul.bf16.gmra.mxu0 %v3193_v57 }
  0xd9   : > { %v898_v13 = vpop.f32.mrf.mxu0  ;;  %v995_v24 = vpop.f32.mrf.mxu1 }
  0xda   : > { %v899_v14 = vadd.f32 %v4082_v55, %v898_v13 }
  0xdc   : > { %v4105_v16 = vadd.f32 %v987_v3, %v899_v14  ;;  %v3388_v14 = vld [vmem:[%s4018_s18 + $0xa4] sm:$0xf] }
  0xde   : > { %v1061_v17 = vpack.c.bf16 %v4105_v16, %v4103_v15 }
  0xe0   : > { %3319 = vmatmul.msk.bf16.gmra.mxu2 %vm1112_vm1, %v1061_v17  ;;  %v3202_v17 = vld [vmem:[%s4018_s18 + $0xa8] sm:$0xf0] }
  0xe1   : > { %v901_v18 = vpop.f32.mrf.mxu0  ;;  %v997_v34 = vpop.f32.mrf.mxu1 }
  0xe2   : > { %v902_v20 = vadd.f32 %v4082_v55, %v901_v18  ;;  %v3205_v18 = vor.u32 %v3388_v14, %v3202_v17 }
  0xe4   : > { %v4111_v22 = vadd.f32 %v990_v11, %v902_v20  ;;  %940 = vmatmul.bf16.gmra.mxu0 %v3201_v10  ;;  %3296 = vmatmul.msk.bf16.gmra.mxu1 %vm833_vm0, %v3205_v18  ;;  %v4170_v20 = vld [vmem:[%s5425_s7] ss:$0 sm:$0xff]  ;;  %v3392_v18 = vld [vmem:[%s4018_s18 + $0xc4] sm:$0xf] }
  0xe9   : > { %v903_v21 = vpop.f32.mrf.mxu0  ;;  %v1000_v41 = vpop.f32.mrf.mxu1 }
  0xea   : > { %v904_v23 = vadd.f32 %v4082_v55, %v903_v21 }
  0xec   : > { %v4114_v25 = vadd.f32 %v992_v19, %v904_v23 }
  0xee   : > { %v1062_v26 = vpack.c.bf16 %v4114_v25, %v4111_v22 }
  0xf0   : > { %3320 = vmatmul.msk.bf16.gmra.mxu2 %vm1112_vm1, %v1062_v26 }
  0xf1   : > { %v906_v30 = vpop.f32.mrf.mxu0  ;;  %v1002_v45 = vpop.f32.mrf.mxu1 }
  0xf2   : > { %v907_v35 = vadd.f32 %v4082_v55, %v906_v30 }
  0xf4   : > { %v4125_v37 = vadd.f32 %v995_v24, %v907_v35 }
  0xf9   : > { %v908_v36 = vpop.f32.mrf.mxu0  ;;  %v1005_v51 = vpop.f32.mrf.mxu1 }
  0xfa   : > { %v909_v38 = vadd.f32 %v4082_v55, %v908_v36 }
  0xfc   : > { %v4128_v39 = vadd.f32 %v997_v34, %v909_v38 }
  0xfe   : > { %v1063_v40 = vpack.c.bf16 %v4128_v39, %v4125_v37 }
 0x100   : > { %3321 = vmatmul.msk.bf16.gmra.mxu2 %vm1112_vm1, %v1063_v40 }
 0x101   : > { %v911_v42 = vpop.f32.mrf.mxu0  ;;  %v1007_v60 = vpop.f32.mrf.mxu1 }
 0x102   : > { %v912_v43 = vadd.f32 %v4082_v55, %v911_v42 }
 0x104   : > { %v4134_v46 = vadd.f32 %v1000_v41, %v912_v43 }
 0x109   : > { %v913_v44 = vpop.f32.mrf.mxu0  ;;  %v1010_v5 = vpop.f32.mrf.mxu1 }
 0x10a   : > { %v914_v47 = vadd.f32 %v4082_v55, %v913_v44 }
 0x10c   : > { %v4137_v48 = vadd.f32 %v1002_v45, %v914_v47  ;;  %v3208_v45 = vld [vmem:[%s4018_s18 + $0xb0] sm:$0xf]  ;;  %v3391_v47 = vld [vmem:[%s4018_s18 + $0xb4] sm:$0xf0] }
 0x10e   : > { %v1064_v49 = vpack.c.bf16 %v4137_v48, %v4134_v46 }
 0x110   : > { %3322 = vmatmul.msk.bf16.gmra.mxu2 %vm1112_vm1, %v1064_v49  ;;  %v3390_v49 = vld [vmem:[%s4018_s18 + $0xb4] sm:$0xf] }
 0x111   : > { %v916_v50 = vpop.f32.mrf.mxu0  ;;  %v1012_v13 = vpop.f32.mrf.mxu1 }
 0x112   : > { %v917_v52 = vadd.f32 %v4082_v55, %v916_v50  ;;  %v3209_v50 = vor.u32 %v3391_v47, %v3208_v45 }
 0x114   : > { %v4145_v58 = vadd.f32 %v1005_v51, %v917_v52  ;;  %v3210_v51 = vld [vmem:[%s4018_s18 + $0xb8] sm:$0xf0]  ;;  %945 = vmatmul.bf16.gmra.mxu0 %v3209_v50 }
 0x115   : > { %v3213_v52 = vor.u32 %v3390_v49, %v3210_v51 }
 0x117   : > { %3297 = vmatmul.msk.bf16.gmra.mxu1 %vm833_vm0, %v3213_v52 }
 0x119   : > { %v918_v56 = vpop.f32.mrf.mxu0  ;;  %v1015_v27 = vpop.f32.mrf.mxu1 }
 0x11a   : > { %v919_v59 = vadd.f32 %v4082_v55, %v918_v56 }
 0x11c   : > { %v4150_v2 = vadd.f32 %v1007_v60, %v919_v59 }
 0x11e   : > { %v1065_v3 = vpack.c.bf16 %v4150_v2, %v4145_v58 }
 0x120   : > { %3323 = vmatmul.msk.bf16.gmra.mxu2 %vm1112_vm1, %v1065_v3 }
 0x121   : > { %v921_v4 = vpop.f32.mrf.mxu0  ;;  %v1017_v34 = vpop.f32.mrf.mxu1 }
 0x122   : > { %v922_v6 = vadd.f32 %v4082_v55, %v921_v4 }
 0x124   : > { %v4159_v11 = vadd.f32 %v1010_v5, %v922_v6 }
 0x129   : > { %v923_v9 = vpop.f32.mrf.mxu0  ;;  %v1020_v3 = vpop.f32.mrf.mxu1 }
 0x12a   : > { %v924_v12 = vadd.f32 %v4082_v55, %v923_v9 }
 0x12c   : > { %v4164_v19 = vadd.f32 %v1012_v13, %v924_v12  ;;  %v3216_v12 = vld [vmem:[%s4018_s18 + $0xc0] sm:$0xf]  ;;  %v3393_v13 = vld [vmem:[%s4018_s18 + $0xc4] sm:$0xf0] }
 0x12d   : > { %v3217_v17 = vor.u32 %v3393_v13, %v3216_v12 }
 0x12e   : > { %v1066_v21 = vpack.c.bf16 %v4164_v19, %v4159_v11 }
 0x12f   : > { %950 = vmatmul.bf16.gmra.mxu0 %v3217_v17  ;;  %v3397_v17 = vld [vmem:[%s4018_s18 + $0xe4] sm:$0xf0] }
 0x130   : > { %3324 = vmatmul.msk.bf16.gmra.mxu2 %vm1112_vm1, %v1066_v21  ;;  %v3218_v21 = vld [vmem:[%s4018_s18 + $0xc8] sm:$0xf0] }
 0x131   : > { %v926_v24 = vpop.f32.mrf.mxu0  ;;  %v1022_v8 = vpop.f32.mrf.mxu1 }
 0x132   : > { %v927_v28 = vadd.f32 %v4082_v55, %v926_v24  ;;  %v3221_v24 = vor.u32 %v3392_v18, %v3218_v21 }
 0x134   : > { %v4179_v32 = vadd.f32 %v1015_v27, %v927_v28  ;;  %3298 = vmatmul.msk.bf16.gmra.mxu1 %vm833_vm0, %v3221_v24 }
 0x139   : > { %v928_v30 = vpop.f32.mrf.mxu0 }
 0x13a   : > { %v929_v33 = vadd.f32 %v4082_v55, %v928_v30 }
 0x13c   : > { %v4183_v35 = vadd.f32 %v1017_v34, %v929_v33 }
 0x13e   : > { %v1067_v36 = vpack.c.bf16 %v4183_v35, %v4179_v32 }
 0x140   : > { %3325 = vmatmul.msk.bf16.gmra.mxu2 %vm1112_vm1, %v1067_v36 }
 0x141   : > { %v931_v63 = vpop.f32.mrf.mxu0 }
 0x142   : > { %v932_v4 = vadd.f32 %v4082_v55, %v931_v63 }
 0x144   : > { %v4208_v6 = vadd.f32 %v1020_v3, %v932_v4 }
 0x149   : > { %v933_v5 = vpop.f32.mrf.mxu0 }
 0x14a   : > { %v934_v7 = vadd.f32 %v4082_v55, %v933_v5 }
 0x14c   : > { %v4211_v9 = vadd.f32 %v1022_v8, %v934_v7 }
 0x14e   : > { %5426 = vst [vmem:[#allocation14_spill] sm:$0xff] %v4211_v9  ;;  %v1068_v10 = vpack.c.bf16 %v4211_v9, %v4208_v6 }
 0x150   : > { %3326 = vmatmul.msk.bf16.gmra.mxu2 %vm1112_vm1, %v1068_v10 }
 0x151   : > { %v936_v14 = vpop.f32.mrf.mxu0 }
 0x153   : > { %v1170_v23 = vpop.f32.mrf.mxu2 }
 0x154   : > { %v1171_v26 = vadd.f32 %v4170_v20, %v1170_v23  ;;  %v1025_v23 = vpop.f32.mrf.mxu1 }
 0x156   : > { %1602 = vrot.lane.b32.xlu0 %v1171_v26, %s3862_s29  ;;  %v937_v26 = vadd.f32 %v4082_v55, %v936_v14  ;;  %v3232_v14 = vld [vmem:[%s4018_s18 + $0xe0] sm:$0xf] }
 0x157   : > { %v3233_v21 = vor.u32 %v3397_v17, %v3232_v14 }
 0x158   : > { %v4222_v28 = vadd.f32 %v1025_v23, %v937_v26  ;;  %v3396_v26 = vld [vmem:[%s4018_s18 + $0xe4] sm:$0xf] }
 0x159   : > { %v938_v27 = vpop.f32.mrf.mxu0 }
 0x15b   : > { %v1172_v29 = vpop.f32.mrf.mxu2 }
 0x15c   : > { %v1173_v31 = vadd.f32 %v4170_v20, %v1172_v29  ;;  %v939_v29 = vadd.f32 %v4082_v55, %v938_v27  ;;  %v1027_v30 = vpop.f32.mrf.mxu1  ;;  %v3234_v27 = vld [vmem:[%s4018_s18 + $0xe8] sm:$0xf0] }
 0x15e   : > { %1604 = vrot.lane.b32.xlu0 %v1173_v31, %s3862_s29  ;;  %v4225_v31 = vadd.f32 %v1027_v30, %v939_v29 }
 0x160   : > { %v1069_v34 = vpack.c.bf16 %v4225_v31, %v4222_v28 }
 0x161   : > { %v941_v45 = vpop.f32.mrf.mxu0 }
 0x162   : > { %3327 = vmatmul.msk.bf16.gmra.mxu2 %vm1112_vm1, %v1069_v34 }
 0x163   : > { %v1175_v38 = vpop.f32.mrf.mxu2 }
 0x164   : > { %v1176_v40 = vadd.f32 %v4170_v20, %v1175_v38  ;;  %v3224_v38 = vld [vmem:[%s4018_s18 + $0xd0] sm:$0xf]  ;;  %v1030_v50 = vpop.f32.mrf.mxu1 }
 0x166   : > { %1606 = vrot.lane.b32.xlu1 %v1176_v40, %s3862_s29  ;;  %v3395_v40 = vld [vmem:[%s4018_s18 + $0xd4] sm:$0xf0] }
 0x16b   : > { %v1177_v41 = vpop.f32.mrf.mxu2 }
 0x16c   : > { %v1178_v42 = vadd.f32 %v4170_v20, %v1177_v41  ;;  %v3394_v41 = vld [vmem:[%s4018_s18 + $0xd4] sm:$0xf]  ;;  %v1032_v63 = vpop.f32.mrf.mxu1 }
 0x16e   : > { %1608 = vrot.lane.b32.xlu1 %v1178_v42, %s3862_s29  ;;  %v3225_v42 = vor.u32 %v3395_v40, %v3224_v38 }
 0x170   : > { %955 = vmatmul.bf16.gmra.mxu0 %v3225_v42 }
 0x173   : > { %v1180_v43 = vpop.f32.mrf.mxu2 }
 0x174   : > { %v1181_v44 = vadd.f32 %v4170_v20, %v1180_v43  ;;  %v3226_v43 = vld [vmem:[%s4018_s18 + $0xd8] sm:$0xf0] }
 0x175   : > { %v3229_v47 = vor.u32 %v3394_v41, %v3226_v43 }
 0x176   : > { %1610 = vrot.lane.b32.xlu2 %v1181_v44, %s3862_s29 }
 0x177   : > { %3299 = vmatmul.msk.bf16.gmra.mxu1 %vm833_vm0, %v3229_v47 }
 0x17b   : > { %v1182_v53 = vpop.f32.mrf.mxu2 }
 0x17c   : > { %v1183_v54 = vadd.f32 %v4170_v20, %v1182_v53  ;;  %v942_v53 = vadd.f32 %v4082_v55, %v941_v45 }
 0x17e   : > { %1612 = vrot.lane.b32.xlu2 %v1183_v54, %s3862_s29 }
 0x180   : > { %960 = vmatmul.bf16.gmra.mxu0 %v3233_v21 }
 0x183   : > { %v1185_v56 = vpop.f32.mrf.mxu2 }
 0x184   : > { %v1186_v57 = vadd.f32 %v4170_v20, %v1185_v56 }
 0x186   : > { %1614 = vrot.lane.b32.xlu0 %v1186_v57, %s3862_s29 }
 0x18b   : > { %v1187_v59 = vpop.f32.mrf.mxu2 }
 0x18c   : > { %v1188_v60 = vadd.f32 %v4170_v20, %v1187_v59  ;;  %v943_v59 = vpop.f32.mrf.mxu0 }
 0x18e   : > { %1616 = vrot.lane.b32.xlu1 %v1188_v60, %s3862_s29 }
 0x193   : > { %v1190_v61 = vpop.f32.mrf.mxu2 }
 0x194   : > { %v1191_v62 = vadd.f32 %v4170_v20, %v1190_v61  ;;  %v4244_v61 = vadd.f32 %v1030_v50, %v942_v53 }
 0x196   : > { %1618 = vrot.lane.b32.xlu1 %v1191_v62, %s3862_s29  ;;  %5427 = vst [vmem:[#allocation15_spill] sm:$0xff] %v4244_v61  ;;  %v944_v62 = vadd.f32 %v4082_v55, %v943_v59 }
 0x198   : > { %v4247_v4 = vadd.f32 %v1032_v63, %v944_v62 }
 0x19a   : > { %v1070_v10 = vpack.c.bf16 %v4247_v4, %v4244_v61 }
 0x19b   : > { %v1192_v49 = vpop.f32.mrf.mxu2 }
 0x19c   : > { %3328 = vmatmul.msk.bf16.gmra.mxu2 %vm1112_vm1, %v1070_v10  ;;  %v1193_v24 = vadd.f32 %v4170_v20, %v1192_v49 }
 0x1a3   : > { %v1195_v5 = vpop.f32.mrf.mxu2 }
 0x1a4   : > { %v1196_v45 = vadd.f32 %v4170_v20, %v1195_v5 }
 0x1ab   : > { %v1197_v42 = vpop.f32.mrf.mxu2 }
 0x1ac   : > { %v1198_v59 = vadd.f32 %v4170_v20, %v1197_v42 }
 0x1c8   : > { %v1603_v33 = vpop.permute.xlu0 %1602 }
 0x1c9   : > { %v4230_v36 = vadd.f32 %v1603_v33, %v4089_v0  ;;  %v3237_v33 = vor.u32 %v3396_v26, %v3234_v27 }
 0x1cb   : > { %v1762_v44 = vmul.f32 0.5, %v4230_v36  ;;  %3300 = vmatmul.msk.bf16.gmra.mxu1 %vm833_vm0, %v3237_v33 }
 0x1cd   : > { %3475 = vtanh.f32 %v1762_v44 }
 0x1d0   : > { %v1611_v51 = vpop.permute.xlu2 %1610  ;;  %v1605_v52 = vpop.permute.xlu0 %1604 }
 0x1d1   : > { %v4241_v54 = vadd.f32 %v1605_v52, %v4091_v1  ;;  %v4269_v40 = vadd.f32 %v1611_v51, %v4111_v22 }
 0x1d3   : > { %v3476_v56 = vpop.eup %3475  ;;  %v1763_v57 = vmul.f32 0.5, %v4241_v54  ;;  %v1766_v47 = vmul.f32 0.5, %v4269_v40 }
 0x1d4   : > { %v1826_v60 = vmul.f32 0.5, %v3476_v56  ;;  %v1200_v56 = vpop.f32.mrf.mxu2 }
 0x1d5   : > { %3477 = vtanh.f32 %v1763_v57  ;;  %v1201_v5 = vadd.f32 %v4170_v20, %v1200_v56 }
 0x1d6   : > { %v1858_v3 = vadd.f32 0.5, %v1826_v60 }
 0x1d8   : > { %v1613_v7 = vpop.permute.xlu2 %1612  ;;  %v1607_v8 = vpop.permute.xlu1 %1606  ;;  %1922 = vrot.lane.b32.xlu2 %v1858_v3, %s3863_s17 }
 0x1d9   : > { %v4253_v12 = vadd.f32 %v1613_v7, %v4114_v25  ;;  %v4256_v13 = vadd.f32 %v1607_v8, %v4103_v15 }
 0x1db   : > { %v1764_v18 = vmul.f32 0.5, %v4256_v13  ;;  %v3478_v23 = vpop.eup %3477  ;;  %v1767_v29 = vmul.f32 0.5, %v4253_v12 }
 0x1dc   : > { %v1827_v30 = vmul.f32 0.5, %v3478_v23  ;;  %v1202_v7 = vpop.f32.mrf.mxu2 }
 0x1dd   : > { %3479 = vtanh.f32 %v1764_v18  ;;  %v1203_v18 = vadd.f32 %v4170_v20, %v1202_v7 }
 0x1de   : > { %v1859_v34 = vadd.f32 0.5, %v1827_v30  ;;  %3481 = vtanh.f32 %v1767_v29 }
 0x1e0   : > { %v1609_v38 = vpop.permute.xlu1 %1608  ;;  %1620 = vrot.lane.b32.xlu2 %v1193_v24, %s3862_s29  ;;  %1924 = vrot.lane.b32.xlu0 %v1859_v34, %s3863_s17 }
 0x1e1   : > { %v4272_v41 = vadd.f32 %v1609_v38, %v4105_v16 }
 0x1e3   : > { %v1765_v43 = vmul.f32 0.5, %v4272_v41  ;;  %v3480_v44 = vpop.eup %3479 }
 0x1e4   : > { %v1828_v49 = vmul.f32 0.5, %v3480_v44  ;;  %v3482_v50 = vpop.eup %3481  ;;  %v4292_v21 = vpop.f32.mrf.mxu2 }
 0x1e5   : > { %3483 = vtanh.f32 %v1765_v43  ;;  %v1831_v51 = vmul.f32 0.5, %v3482_v50  ;;  %v946_v44 = vpop.f32.mrf.mxu0  ;;  %v3399_v50 = vld [vmem:[%s4018_s18 + $0xf4] sm:$0xf0] }
 0x1e6   : > { %v1860_v52 = vadd.f32 0.5, %v1828_v49  ;;  %3485 = vtanh.f32 %v1766_v47  ;;  %v947_v47 = vadd.f32 %v4082_v55, %v946_v44  ;;  %v3240_v49 = vld [vmem:[%s4018_s18 + $0xf0] sm:$0xf] }
 0x1e7   : > { %v1863_v62 = vadd.f32 0.5, %v1831_v51  ;;  %v3241_v51 = vor.u32 %v3399_v50, %v3240_v49 }
 0x1e8   : > { %1622 = vrot.lane.b32.xlu2 %v1196_v45, %s3862_s29  ;;  %1926 = vrot.lane.b32.xlu0 %v1860_v52, %s3863_s17  ;;  %v1035_v45 = vpop.f32.mrf.mxu1 }
 0x1e9   : > { %965 = vmatmul.bf16.gmra.mxu0 %v3241_v51 }
 0x1eb   : > { %v3484_v53 = vpop.eup %3483 }
 0x1ec   : > { %v1829_v57 = vmul.f32 0.5, %v3484_v53  ;;  %v3486_v63 = vpop.eup %3485  ;;  %v1207_v33 = vpop.f32.mrf.mxu2  ;;  %v4306_v53 = vadd.f32 %v1035_v45, %v947_v47 }
 0x1ed   : > { %v1830_v3 = vmul.f32 0.5, %v3486_v63  ;;  %v1208_v38 = vadd.f32 %v4170_v20, %v1207_v33  ;;  %v948_v52 = vpop.f32.mrf.mxu0 }
 0x1ee   : > { %v1861_v60 = vadd.f32 0.5, %v1829_v57  ;;  %v949_v56 = vadd.f32 %v4082_v55, %v948_v52  ;;  %v3398_v57 = vld [vmem:[%s4018_s18 + $0xf4] sm:$0xf] }
 0x1ef   : > { %v1862_v8 = vadd.f32 0.5, %v1830_v3 }
 0x1f0   : > { %1928 = vrot.lane.b32.xlu1 %v1861_v60, %s3863_s17  ;;  %1932 = vrot.lane.b32.xlu2 %v1863_v62, %s3863_s17  ;;  %v1037_v60 = vpop.f32.mrf.mxu1 }
 0x1f1   : > { %1624 = vrot.lane.b32.xlu0 %v1198_v59, %s3862_s29  ;;  %v3242_v59 = vld [vmem:[%s4018_s18 + $0xf8] sm:$0xf0]  ;;  %v4311_v63 = vadd.f32 %v1037_v60, %v949_v56  ;;  %s4525_s18 = scalar_lea.vmem %s5389_s11, %s4009_s30 }
 0x1f2   : > { %v3245_v62 = vor.u32 %v3398_v57, %v3242_v59 }
 0x1f3   : > { %5428 = vst [vmem:[#allocation16_spill] sm:$0xff] %v4311_v63  ;;  %v1071_v3 = vpack.c.bf16 %v4311_v63, %v4306_v53 }
 0x1f4   : > { %3301 = vmatmul.msk.bf16.gmra.mxu1 %vm833_vm0, %v3245_v62  ;;  %v4333_v47 = vpop.f32.mrf.mxu2 }
 0x1f5   : > { %3329 = vmatmul.msk.bf16.gmra.mxu2 %vm1112_vm1, %v1071_v3 }
 0x1f8   : > { %1930 = vrot.lane.b32.xlu1 %v1862_v8, %s3863_s17  ;;  %v1615_v10 = vpop.permute.xlu0 %1614  ;;  %v951_v8 = vpop.f32.mrf.mxu0 }
 0x1f9   : > { %1626 = vrot.lane.b32.xlu0 %v1201_v5, %s3862_s29  ;;  %v4288_v14 = vadd.f32 %v1615_v10, %v4125_v37 }
 0x1fb   : > { %v1768_v17 = vmul.f32 0.5, %v4288_v14 }
 0x1fd   : > { %3487 = vtanh.f32 %v1768_v17  ;;  %v1040_v17 = vpop.f32.mrf.mxu1 }
 0x200   : > { %1628 = vrot.lane.b32.xlu1 %v1203_v18, %s3862_s29  ;;  %v1617_v23 = vpop.permute.xlu1 %1616 }
 0x201   : > { %v4296_v24 = vadd.f32 %v1617_v23, %v4128_v39  ;;  %v952_v23 = vadd.f32 %v4082_v55, %v951_v8 }
 0x203   : > { %v3488_v26 = vpop.eup %3487  ;;  %v1769_v27 = vmul.f32 0.5, %v4296_v24 }
 0x204   : > { %v1832_v29 = vmul.f32 0.5, %v3488_v26  ;;  %v953_v26 = vpop.f32.mrf.mxu0 }
 0x205   : > { %3489 = vtanh.f32 %v1769_v27  ;;  %v4322_v27 = vadd.f32 %v1040_v17, %v952_v23 }
 0x206   : > { %v1864_v30 = vadd.f32 0.5, %v1832_v29  ;;  %v954_v29 = vadd.f32 %v4082_v55, %v953_v26 }
 0x208   : > { %1934 = vrot.lane.b32.xlu0 %v1864_v30, %s3863_s17  ;;  %v1042_v30 = vpop.f32.mrf.mxu1  ;;  %v1619_v49 = vpop.permute.xlu1 %1618 }
 0x209   : > { %v4337_v52 = vadd.f32 %v1619_v49, %v4134_v46 }
 0x20b   : > { %v3490_v34 = vpop.eup %3489 }
 0x20c   : > { %v1833_v42 = vmul.f32 0.5, %v3490_v34  ;;  %v4325_v34 = vadd.f32 %v1042_v30, %v954_v29  ;;  %v956_v44 = vpop.f32.mrf.mxu0 }
 0x20d   : > { %v957_v50 = vadd.f32 %v4082_v55, %v956_v44 }
 0x20e   : > { %v1865_v43 = vadd.f32 0.5, %v1833_v42  ;;  %v1072_v42 = vpack.c.bf16 %v4325_v34, %v4322_v27 }
 0x210   : > { %1936 = vrot.lane.b32.xlu1 %v1865_v43, %s3863_s17  ;;  %1632 = vrot.lane.b32.xlu0 %v1208_v38, %s3862_s29  ;;  %v1045_v45 = vpop.f32.mrf.mxu1 }
 0x211   : > { %3330 = vmatmul.msk.bf16.gmra.mxu2 %vm1112_vm1, %v1072_v42  ;;  %v4339_v60 = vadd.f32 %v1045_v45, %v957_v50 }
 0x213   : > { %5429 = vst [vmem:[#allocation17_spill] sm:$0xff] %v4339_v60 }
 0x214   : > { %v958_v56 = vpop.f32.mrf.mxu0 }
 0x215   : > { %v959_v62 = vadd.f32 %v4082_v55, %v958_v56 }
 0x21c   : > { %v961_v26 = vpop.f32.mrf.mxu0 }
 0x21d   : > { %v962_v42 = vadd.f32 %v4082_v55, %v961_v26 }
 0x224   : > { %v963_v50 = vpop.f32.mrf.mxu0 }
 0x232   : > { %v1923_v5 = vpop.permute.xlu2 %1922 }
 0x23a   : > { %v1621_v7 = vpop.permute.xlu2 %1620 }
 0x23b   : > { %v4318_v10 = vadd.f32 %v1621_v7, %v4137_v48  ;;  %v1047_v7 = vpop.f32.mrf.mxu1 }
 0x23c   : > { %v4343_v8 = vadd.f32 %v1047_v7, %v959_v62 }
 0x23d   : > { %v1771_v18 = vmul.f32 0.5, %v4318_v10 }
 0x23e   : > { %v1073_v23 = vpack.c.bf16 %v4343_v8, %v4339_v60 }
 0x23f   : > { %3491 = vtanh.f32 %v1771_v18  ;;  %v1212_v18 = vpop.f32.mrf.mxu2 }
 0x240   : > { %3493 = vtanh.f32 %v4230_v36  ;;  %3331 = vmatmul.msk.bf16.gmra.mxu2 %vm1112_vm1, %v1073_v23 }
 0x241   : > { %3495 = vtanh.f32 %v4241_v54  ;;  %v1770_v54 = vmul.f32 0.5, %v4337_v52 }
 0x242   : > { %v1623_v30 = vpop.permute.xlu2 %1622 }
 0x243   : > { %3497 = vtanh.f32 %v1770_v54 }
 0x244   : > { %3499 = vtanh.f32 %v4256_v13 }
 0x245   : > { %v3492_v33 = vpop.eup %3491  ;;  %3501 = vtanh.f32 %v4272_v41 }
 0x246   : > { %v1835_v38 = vmul.f32 0.5, %v3492_v33  ;;  %v3494_v51 = vpop.eup %3493  ;;  %v1206_v33 = vadd.f32 %v4170_v20, %v4292_v21  ;;  %3503 = vtanh.f32 %v4269_v40 }
 0x247   : > { %v3496_v57 = vpop.eup %3495  ;;  %v2018_v36 = vmul.f32 %v3494_v51, %v1923_v5  ;;  %v1215_v45 = vpop.f32.mrf.mxu2  ;;  %3505 = vtanh.f32 %v4253_v12 }
 0x248   : > { %v1867_v43 = vadd.f32 0.5, %v1835_v38  ;;  %v1050_v29 = vpop.f32.mrf.mxu1 }
 0x249   : > { %v3498_v38 = vpop.eup %3497  ;;  %v4359_v21 = vadd.f32 %v1050_v29, %v962_v42 }
 0x24a   : > { %1940 = vrot.lane.b32.xlu0 %v1867_v43, %s3863_s17  ;;  %v4355_v43 = vadd.f32 %v1623_v30, %v4145_v58  ;;  %v3500_v44 = vpop.eup %3499  ;;  %v1834_v41 = vmul.f32 0.5, %v3498_v38  ;;  %v1933_v12 = vpop.permute.xlu2 %1932 }
 0x24b   : > { %v3502_v49 = vpop.eup %3501 }
 0x24c   : > { %v1772_v62 = vmul.f32 0.5, %v4355_v43  ;;  %v3504_v26 = vpop.eup %3503 }
 0x24e   : > { %3507 = vtanh.f32 %v1772_v62 }
 0x252   : > { %v1925_v59 = vpop.permute.xlu0 %1924 }
 0x253   : > { %v2019_v3 = vmul.f32 %v3496_v57, %v1925_v59  ;;  %v964_v59 = vadd.f32 %v4082_v55, %v963_v50  ;;  %v1213_v50 = vadd.f32 %v4170_v20, %v1212_v18 }
 0x255   : > { %v2154_v17 = vpack.c.bf16 %v2019_v3, %v2018_v36  ;;  %v1052_v3 = vpop.f32.mrf.mxu1 }
 0x256   : > { %v4367_v40 = vadd.f32 %v1052_v3, %v964_v59  ;;  %v1216_v3 = vadd.f32 %v4170_v20, %v1215_v45 }
 0x257   : > { %2194 = vrot.lane.b32.xlu2 %v2154_v17, %s3862_s29  ;;  %v1866_v17 = vadd.f32 0.5, %v1834_v41 }
 0x258   : > { %v1074_v23 = vpack.c.bf16 %v4367_v40, %v4359_v21 }
 0x25a   : > { %v1927_v5 = vpop.permute.xlu0 %1926  ;;  %3332 = vmatmul.msk.bf16.gmra.mxu2 %vm1112_vm1, %v1074_v23 }
 0x25b   : > { %v2020_v51 = vmul.f32 %v3500_v44, %v1927_v5  ;;  %v3506_v5 = vpop.eup %3505  ;;  %v1217_v44 = vpop.f32.mrf.mxu2 }
 0x25c   : > { %v2023_v30 = vmul.f32 %v3506_v5, %v1933_v12  ;;  %v3508_v41 = vpop.eup %3507 }
 0x25f   : > { %1630 = vrot.lane.b32.xlu2 %v1206_v33, %s3862_s29 }
 0x262   : > { %v1929_v13 = vpop.permute.xlu1 %1928 }
 0x263   : > { %v2021_v56 = vmul.f32 %v3502_v49, %v1929_v13  ;;  %v1625_v57 = vpop.permute.xlu0 %1624  ;;  %v1211_v49 = vadd.f32 %v4170_v20, %v4333_v47  ;;  %v3415_v47 = vld [vmem:[%s5386_s8 + $0x8] sm:$0xff]  ;;  %v1220_v12 = vpop.f32.mrf.mxu2 }
 0x264   : > { %v4365_v36 = vadd.f32 %v1625_v57, %v4150_v2  ;;  %v1836_v57 = vmul.f32 0.5, %v3508_v41  ;;  %2292 = vmatpush.bf16.msra.mxu3 %v3415_v47  ;;  %v1221_v47 = vadd.f32 %v4170_v20, %v1220_v12 }
 0x265   : > { %v2155_v7 = vpack.c.bf16 %v2021_v56, %v2020_v51 }
 0x266   : > { %v1773_v54 = vmul.f32 0.5, %v4365_v36 }
 0x267   : > { %2196 = vrot.lane.b32.xlu1 %v2155_v7, %s3862_s29  ;;  %1938 = vrot.lane.b32.xlu2 %v1866_v17, %s3863_s17  ;;  %v3414_v7 = vld [vmem:[%s5386_s8] sm:$0xff]  ;;  %v1868_v17 = vadd.f32 0.5, %v1836_v57 }
 0x268   : > { %3509 = vtanh.f32 %v1773_v54  ;;  %2293 = vmatpush.bf16.msra.mxu3 %v3414_v7 }
 0x26a   : > { %v1931_v29 = vpop.permute.xlu1 %1930 }
 0x26b   : > { %v2022_v33 = vmul.f32 %v3504_v26, %v1931_v29  ;;  %v1627_v38 = vpop.permute.xlu0 %1626  ;;  %v1218_v29 = vadd.f32 %v4170_v20, %v1217_v44 }
 0x26c   : > { %v4376_v42 = vadd.f32 %v1627_v38, %v4159_v11  ;;  %v1222_v38 = vpop.f32.mrf.mxu2 }
 0x26d   : > { %v2156_v13 = vpack.c.bf16 %v2023_v30, %v2022_v33  ;;  %v1223_v44 = vadd.f32 %v4170_v20, %v1222_v38 }
 0x26e   : > { %v1774_v51 = vmul.f32 0.5, %v4376_v42  ;;  %v3510_v56 = vpop.eup %3509 }
 0x26f   : > { %2198 = vrot.lane.b32.xlu0 %v2156_v13, %s3862_s29  ;;  %1634 = vrot.lane.b32.xlu1 %v1211_v49, %s3862_s29  ;;  %v1837_v62 = vmul.f32 0.5, %v3510_v56 }
 0x270   : > { %3511 = vtanh.f32 %v1774_v51  ;;  %1636 = vrot.lane.b32.xlu2 %v1213_v50, %s3862_s29 }
 0x271   : > { %v1869_v26 = vadd.f32 0.5, %v1837_v62 }
 0x272   : > { %v1629_v59 = vpop.permute.xlu1 %1628 }
 0x273   : > { %v4390_v18 = vadd.f32 %v1629_v59, %v4164_v19 }
 0x275   : > { %v1775_v54 = vmul.f32 0.5, %v4390_v18 }
 0x276   : > { %v3512_v23 = vpop.eup %3511 }
 0x277   : > { %1638 = vrot.lane.b32.xlu0 %v1216_v3, %s3862_s29  ;;  %1942 = vrot.lane.b32.xlu1 %v1868_v17, %s3863_s17  ;;  %3513 = vtanh.f32 %v1775_v54  ;;  %v1838_v45 = vmul.f32 0.5, %v3512_v23  ;;  %v966_v17 = vpop.f32.mrf.mxu0  ;;  %v1055_v23 = vpop.f32.mrf.mxu1 }
 0x278   : > { %1944 = vrot.lane.b32.xlu2 %v1869_v26, %s3863_s17  ;;  %3515 = vtanh.f32 %v4288_v14  ;;  %v967_v26 = vadd.f32 %v4082_v55, %v966_v17 }
 0x279   : > { %3517 = vtanh.f32 %v4296_v24  ;;  %v1870_v30 = vadd.f32 0.5, %v1838_v45 }
 0x27a   : > { %v1935_v5 = vpop.permute.xlu0 %1934 }
 0x27d   : > { %v3514_v33 = vpop.eup %3513 }
 0x27e   : > { %v3516_v49 = vpop.eup %3515  ;;  %v1839_v13 = vmul.f32 0.5, %v3514_v33 }
 0x27f   : > { %1640 = vrot.lane.b32.xlu1 %v1218_v29, %s3862_s29  ;;  %1946 = vrot.lane.b32.xlu0 %v1870_v30, %s3863_s17  ;;  %v3518_v41 = vpop.eup %3517  ;;  %v2024_v56 = vmul.f32 %v3516_v49, %v1935_v5  ;;  %v968_v45 = vpop.f32.mrf.mxu0  ;;  %v4416_v5 = vadd.f32 %v1055_v23, %v967_v26 }
 0x280   : > { %v1871_v62 = vadd.f32 0.5, %v1839_v13  ;;  %v969_v29 = vadd.f32 %v4082_v55, %v968_v45  ;;  %v1057_v30 = vpop.f32.mrf.mxu1 }
 0x282   : > { %v1937_v50 = vpop.permute.xlu1 %1936  ;;  %v1633_v51 = vpop.permute.xlu0 %1632  ;;  %v4419_v33 = vadd.f32 %v1057_v30, %v969_v29 }
 0x283   : > { %v2025_v57 = vmul.f32 %v3518_v41, %v1937_v50  ;;  %v4405_v14 = vadd.f32 %v1633_v51, %v4183_v35  ;;  %v1225_v51 = vpop.f32.mrf.mxu2 }
 0x284   : > { %v1075_v12 = vpack.c.bf16 %v4419_v33, %v4416_v5 }
 0x285   : > { %v2157_v24 = vpack.c.bf16 %v2025_v57, %v2024_v56  ;;  %v1777_v59 = vmul.f32 0.5, %v4405_v14 }
 0x286   : > { %3333 = vmatmul.msk.bf16.gmra.mxu2 %vm1112_vm1, %v1075_v12 }
 0x287   : > { %3519 = vtanh.f32 %v1777_v59  ;;  %1948 = vrot.lane.b32.xlu1 %v1871_v62, %s3863_s17  ;;  %1644 = vrot.lane.b32.xlu0 %v1223_v44, %s3862_s29 }
 0x288   : > { %2200 = vrot.lane.b32.xlu2 %v2157_v24, %s3862_s29  ;;  %3521 = vtanh.f32 %v4337_v52 }
 0x289   : > { %3523 = vtanh.f32 %v4318_v10  ;;  %v1226_v10 = vadd.f32 %v4170_v20, %v1225_v51 }
 0x28d   : > { %v3520_v3 = vpop.eup %3519 }
 0x28e   : > { %v1841_v7 = vmul.f32 0.5, %v3520_v3  ;;  %v3522_v50 = vpop.eup %3521 }
 0x28f   : > { %v3524_v56 = vpop.eup %3523 }
 0x290   : > { %1642 = vrot.lane.b32.xlu2 %v1221_v47, %s3862_s29  ;;  %v1873_v54 = vadd.f32 0.5, %v1841_v7 }
 0x292   : > { %1952 = vrot.lane.b32.xlu0 %v1873_v54, %s3863_s17  ;;  %v1227_v54 = vpop.f32.mrf.mxu2 }
 0x293   : > { %v1228_v23 = vadd.f32 %v4170_v20, %v1227_v54 }
 0x29a   : > { %v1230_v12 = vpop.f32.mrf.mxu2 }
 0x2a2   : > { %v1232_v51 = vpop.f32.mrf.mxu2 }
 0x2b1   : > { %v2195_v38 = vpop.permute.xlu2 %2194 }
 0x2b2   : > { %3342 = vmatmul.msk.bf16.vlgmr.msra.gmra.mxu3 %vm833_vm0, %v2195_v38 }
 0x2b9   : > { %v1631_v49 = vpop.permute.xlu2 %1630 }
 0x2ba   : > { %v4427_v13 = vadd.f32 %v1631_v49, %v4179_v32 }
 0x2bc   : > { %v1776_v55 = vmul.f32 0.5, %v4427_v13  ;;  %v1941_v41 = vpop.permute.xlu0 %1940 }
 0x2bd   : > { %v2027_v44 = vmul.f32 %v3524_v56, %v1941_v41 }
 0x2be   : > { %3525 = vtanh.f32 %v1776_v55 }
 0x2c1   : > { %v1939_v57 = vpop.permute.xlu2 %1938 }
 0x2c2   : > { %v2026_v24 = vmul.f32 %v3522_v50, %v1939_v57 }
 0x2c4   : > { %v3526_v59 = vpop.eup %3525  ;;  %v2158_v62 = vpack.c.bf16 %v2027_v44, %v2026_v24 }
 0x2c5   : > { %v1840_v47 = vmul.f32 0.5, %v3526_v59 }
 0x2c6   : > { %2202 = vrot.lane.b32.xlu1 %v2158_v62, %s3862_s29 }
 0x2c7   : > { %v1872_v52 = vadd.f32 0.5, %v1840_v47 }
 0x2c9   : > { %1950 = vrot.lane.b32.xlu2 %v1872_v52, %s3863_s17 }
 0x2ca   : > { %v1637_v3 = vpop.permute.xlu2 %1636 }
 0x2cb   : > { %v4435_v7 = vadd.f32 %v1637_v3, %v4211_v9 }
 0x2cd   : > { %v1779_v17 = vmul.f32 0.5, %v4435_v7 }
 0x2ce   : > { %1646 = vrot.lane.b32.xlu1 %v1226_v10, %s3862_s29 }
 0x2cf   : > { %3527 = vtanh.f32 %v1779_v17  ;;  %v1235_v17 = vpop.f32.mrf.mxu2 }
 0x2d0   : > { %3529 = vtanh.f32 %v4355_v43 }
 0x2d1   : > { %1648 = vrot.lane.b32.xlu2 %v1228_v23, %s3862_s29  ;;  %3531 = vtanh.f32 %v4365_v36 }
 0x2d2   : > { %v1945_v38 = vpop.permute.xlu2 %1944 }
 0x2d5   : > { %v3528_v26 = vpop.eup %3527 }
 0x2d6   : > { %v1843_v45 = vmul.f32 0.5, %v3528_v26  ;;  %v3530_v56 = vpop.eup %3529 }
 0x2d7   : > { %v3532_v44 = vpop.eup %3531 }
 0x2d8   : > { %v1875_v29 = vadd.f32 0.5, %v1843_v45  ;;  %v2029_v62 = vmul.f32 %v3532_v44, %v1945_v38  ;;  %v1231_v45 = vadd.f32 %v4170_v20, %v1230_v12 }
 0x2d9   : > { %v2197_v30 = vpop.permute.xlu1 %2196 }
 0x2da   : > { %1956 = vrot.lane.b32.xlu2 %v1875_v29, %s3863_s17  ;;  %3343 = vmatmul.msk.bf16.gmra.mxu3 %vm833_vm0, %v2197_v30 }
 0x2e1   : > { %v1635_v49 = vpop.permute.xlu1 %1634  ;;  %v2199_v55 = vpop.permute.xlu0 %2198 }
 0x2e2   : > { %v4445_v41 = vadd.f32 %v1635_v49, %v4208_v6  ;;  %v2201_v57 = vpop.permute.xlu2 %2200 }
 0x2e4   : > { %v1778_v50 = vmul.f32 0.5, %v4445_v41 }
 0x2e6   : > { %3533 = vtanh.f32 %v1778_v50 }
 0x2e9   : > { %v1943_v24 = vpop.permute.xlu1 %1942  ;;  %v1639_v59 = vpop.permute.xlu0 %1638 }
 0x2ea   : > { %v2028_v47 = vmul.f32 %v3530_v56, %v1943_v24  ;;  %v4450_v52 = vadd.f32 %v1639_v59, %v4222_v28  ;;  %3344 = vmatmul.msk.bf16.gmra.mxu3 %vm833_vm0, %v2199_v55  ;;  %v1643_v30 = vpop.permute.xlu2 %1642  ;;  %v1233_v55 = vadd.f32 %v4170_v20, %v1232_v51  ;;  %v1237_v51 = vpop.f32.mrf.mxu2 }
 0x2eb   : > { %v4465_v50 = vadd.f32 %v1643_v30, %v4244_v61 }
 0x2ec   : > { %v3534_v43 = vpop.eup %3533  ;;  %v2159_v3 = vpack.c.bf16 %v2029_v62, %v2028_v47  ;;  %v1780_v36 = vmul.f32 0.5, %v4450_v52 }
 0x2ed   : > { %v1842_v10 = vmul.f32 0.5, %v3534_v43 }
 0x2ee   : > { %2204 = vrot.lane.b32.xlu0 %v2159_v3, %s3862_s29  ;;  %3535 = vtanh.f32 %v1780_v36 }
 0x2ef   : > { %v1874_v54 = vadd.f32 0.5, %v1842_v10  ;;  %3537 = vtanh.f32 %v4376_v42 }
 0x2f0   : > { %3539 = vtanh.f32 %v4390_v18  ;;  %v1782_v18 = vmul.f32 0.5, %v4465_v50 }
 0x2f1   : > { %v1641_v23 = vpop.permute.xlu1 %1640  ;;  %1954 = vrot.lane.b32.xlu1 %v1874_v54, %s3863_s17  ;;  %v1947_v26 = vpop.permute.xlu0 %1946 }
 0x2f2   : > { %v4459_v29 = vadd.f32 %v1641_v23, %v4225_v31 }
 0x2f4   : > { %v1781_v38 = vmul.f32 0.5, %v4459_v29  ;;  %v3536_v49 = vpop.eup %3535 }
 0x2f5   : > { %v3538_v42 = vpop.eup %3537  ;;  %v1844_v56 = vmul.f32 0.5, %v3536_v49 }
 0x2f6   : > { %3541 = vtanh.f32 %v1781_v38  ;;  %1650 = vrot.lane.b32.xlu0 %v1231_v45, %s3862_s29  ;;  %v3540_v12 = vpop.eup %3539  ;;  %v2030_v59 = vmul.f32 %v3538_v42, %v1947_v26  ;;  %v1236_v26 = vadd.f32 %v4170_v20, %v1235_v17  ;;  %v1240_v38 = vpop.f32.mrf.mxu2 }
 0x2f7   : > { %v1876_v10 = vadd.f32 0.5, %v1844_v56  ;;  %3543 = vtanh.f32 %v1782_v18 }
 0x2f9   : > { %v1949_v44 = vpop.permute.xlu1 %1948  ;;  %1652 = vrot.lane.b32.xlu1 %v1233_v55, %s3862_s29  ;;  %v1645_v24 = vpop.permute.xlu0 %1644 }
 0x2fa   : > { %v2031_v62 = vmul.f32 %v3540_v12, %v1949_v44  ;;  %v4471_v47 = vadd.f32 %v1645_v24, %v4247_v4  ;;  %3345 = vmatmul.msk.bf16.gmra.mxu3 %vm833_vm0, %v2201_v57  ;;  %v1238_v57 = vadd.f32 %v4170_v20, %v1237_v51 }
 0x2fc   : > { %v3542_v43 = vpop.eup %3541  ;;  %v2160_v3 = vpack.c.bf16 %v2031_v62, %v2030_v59  ;;  %v1783_v36 = vmul.f32 0.5, %v4471_v47 }
 0x2fd   : > { %v1845_v54 = vmul.f32 0.5, %v3542_v43  ;;  %v3544_v45 = vpop.eup %3543 }
 0x2fe   : > { %1958 = vrot.lane.b32.xlu0 %v1876_v10, %s3863_s17  ;;  %2206 = vrot.lane.b32.xlu2 %v2160_v3, %s3862_s29  ;;  %3545 = vtanh.f32 %v1783_v36  ;;  %v1846_v49 = vmul.f32 0.5, %v3544_v45  ;;  %v1242_v12 = vpop.f32.mrf.mxu2  ;;  %v4502_v36 = vld [vmem:[%s5380_s2] ss:$0 sm:$0xff] }
 0x2ff   : > { %v1877_v23 = vadd.f32 0.5, %v1845_v54  ;;  %v1243_v17 = vadd.f32 %v4170_v20, %v1242_v12  ;;  %3547 = vtanh.f32 %v4405_v14  ;;  %v1241_v14 = vadd.f32 %v4170_v20, %v1240_v38  ;;  %v2050_v10 = vld [vmem:[%s4493_s24] sm:$0xff] }
 0x300   : > { %v1878_v42 = vadd.f32 0.5, %v1846_v49  ;;  %3549 = vtanh.f32 %v4427_v13  ;;  %v4511_v20 = vld [vmem:[%s5381_s3] ss:$0 sm:$0xff] }
 0x301   : > { %1960 = vrot.lane.b32.xlu1 %v1877_v23, %s3863_s17  ;;  %v2086_v23 = vmul.f32 %v4502_v36, %v2050_v10 }
 0x304   : > { %v3546_v30 = vpop.eup %3545  ;;  %v1953_v44 = vpop.permute.xlu0 %1952 }
 0x305   : > { %v1847_v55 = vmul.f32 0.5, %v3546_v30  ;;  %v3548_v24 = vpop.eup %3547  ;;  %v2051_v30 = vld [vmem:[%s4493_s24 + $0x8] sm:$0xff] }
 0x306   : > { %1656 = vrot.lane.b32.xlu0 %v1238_v57, %s3862_s29  ;;  %1654 = vrot.lane.b32.xlu2 %v1236_v26, %s3862_s29  ;;  %v3550_v18 = vpop.eup %3549  ;;  %v2033_v62 = vmul.f32 %v3548_v24, %v1953_v44  ;;  %v4516_v26 = vld [vmem:[%s5387_s9] ss:$0 sm:$0xff]  ;;  %v2122_v57 = vadd.f32 %v4511_v20, %v2086_v23  ;;  %v2087_v12 = vmul.f32 %v4502_v36, %v2051_v30 }
 0x307   : > { %v1879_v56 = vadd.f32 0.5, %v1847_v55 }
 0x308   : > { %v2123_v44 = vadd.f32 %v4511_v20, %v2087_v12 }
 0x30e   : > { %1962 = vrot.lane.b32.xlu2 %v1878_v42, %s3863_s17  ;;  %1964 = vrot.lane.b32.xlu0 %v1879_v56, %s3863_s17 }
 0x316   : > { %1660 = vrot.lane.b32.xlu2 %v1243_v17, %s3862_s29 }
 0x323   : > { %v1951_v59 = vpop.permute.xlu2 %1950 }
 0x324   : > { %v2032_v51 = vmul.f32 %v3550_v18, %v1951_v59 }
 0x326   : > { %v2161_v43 = vpack.c.bf16 %v2033_v62, %v2032_v51 }
 0x328   : > { %2208 = vrot.lane.b32.xlu1 %v2161_v43, %s3862_s29 }
 0x32b   : > { %v1649_v3 = vpop.permute.xlu2 %1648 }
 0x32c   : > { %v4497_v13 = vadd.f32 %v1649_v3, %v4311_v63 }
 0x32e   : > { %v1785_v54 = vmul.f32 0.5, %v4497_v13 }
 0x330   : > { %3551 = vtanh.f32 %v1785_v54  ;;  %1658 = vrot.lane.b32.xlu1 %v1241_v14, %s3862_s29 }
 0x335   : > { %v2295_v45 = vpop.f32.mrf.mxu3 }
 0x336   : > { %v3552_v38 = vpop.eup %3551  ;;  %v2296_v49 = vadd.f32 %v4516_v26, %v2295_v45 }
 0x337   : > { %v1849_v55 = vmul.f32 0.5, %v3552_v38  ;;  %v4544_v38 = vpop.f32.mrf.mxu2 }
 0x338   : > { %v2375_v42 = vadd.f32 %v2296_v49, %v2122_v57  ;;  %v2203_v56 = vpop.permute.xlu1 %2202 }
 0x339   : > { %3346 = vmatmul.msk.bf16.gmra.mxu3 %vm833_vm0, %v2203_v56  ;;  %v1881_v17 = vadd.f32 0.5, %v1849_v55  ;;  %v1957_v56 = vpop.permute.xlu2 %1956 }
 0x33a   : > { %2439 = vst.msk [vmem:[%s4525_s18] sm:$0xff] %vm833_vm0, %v2375_v42  ;;  %v2713_v59 = vmul.f32 %v2375_v42, %v2375_v42  ;;  %v2643_v3 = vsel %vm833_vm0, %v2375_v42, 0.0 }
 0x33b   : > { %1968 = vrot.lane.b32.xlu2 %v1881_v17, %s3863_s17  ;;  %v3731_v17 = vld [vmem:[%s5425_s7] ss:$0 sm:$0xff] }
 0x33c   : > { %v2745_v57 = vsel %vm833_vm0, %v2713_v59, 0.0 }
 0x33d   : > { %v2297_v24 = vpop.f32.mrf.mxu3 }
 0x33e   : > { %v2298_v18 = vadd.f32 %v4516_v26, %v2297_v24  ;;  %v2052_v24 = vld [vmem:[%s4493_s24 + $0x10] sm:$0xff] }
 0x33f   : > { %v1247_v12 = vpop.f32.mrf.mxu2  ;;  %v2088_v59 = vmul.f32 %v4502_v36, %v2052_v24 }
 0x340   : > { %v2376_v62 = vadd.f32 %v2298_v18, %v2123_v44  ;;  %v1647_v51 = vpop.permute.xlu1 %1646  ;;  %v1248_v44 = vadd.f32 %v3731_v17, %v1247_v12 }
 0x341   : > { %v4535_v43 = vadd.f32 %v1647_v51, %v4306_v53 }
 0x342   : > { %2440 = vst.msk [vmem:[%s4525_s18 + $0x8] sm:$0xff] %vm833_vm0, %v2376_v62  ;;  %v2644_v14 = vsel %vm833_vm0, %v2376_v62, 0.0  ;;  %v2714_v10 = vmul.f32 %v2376_v62, %v2376_v62  ;;  %v2124_v62 = vadd.f32 %v4511_v20, %v2088_v59 }
 0x343   : > { %v2645_v54 = vadd.f32 %v2644_v14, %v2643_v3  ;;  %v1784_v23 = vmul.f32 0.5, %v4535_v43  ;;  %v2053_v3 = vld [vmem:[%s4493_s24 + $0x18] sm:$0xff] }
 0x344   : > { %v2746_v45 = vsel %vm833_vm0, %v2714_v10, 0.0 }
 0x345   : > { %v2747_v30 = vadd.f32 %v2746_v45, %v2745_v57  ;;  %3553 = vtanh.f32 %v1784_v23  ;;  %v2089_v57 = vmul.f32 %v4502_v36, %v2053_v3 }
 0x346   : > { %3555 = vtanh.f32 %v4435_v7 }
 0x347   : > { %3557 = vtanh.f32 %v4445_v41 }
 0x348   : > { %3559 = vtanh.f32 %v4450_v52 }
 0x349   : > { %3561 = vtanh.f32 %v4459_v29 }
 0x34b   : > { %v3554_v49 = vpop.eup %3553 }
 0x34c   : > { %v1848_v55 = vmul.f32 0.5, %v3554_v49  ;;  %v3556_v45 = vpop.eup %3555 }
 0x34e   : > { %v1880_v42 = vadd.f32 0.5, %v1848_v55 }
 0x350   : > { %1966 = vrot.lane.b32.xlu1 %v1880_v42, %s3863_s17  ;;  %v3558_v42 = vpop.eup %3557 }
 0x358   : > { %v4551_v18 = vpop.permute.xlu2 %2206  ;;  %1664 = vrot.lane.b32.xlu1 %v1248_v44, %s3862_s29  ;;  %v2035_v44 = vmul.f32 %v3556_v45, %v1957_v56 }
 0x35d   : > { %v2300_v51 = vpop.f32.mrf.mxu3 }
 0x35e   : > { %v2301_v14 = vadd.f32 %v4516_v26, %v2300_v51 }
 0x360   : > { %v2377_v10 = vadd.f32 %v2301_v14, %v2124_v62  ;;  %v2205_v23 = vpop.permute.xlu0 %2204  ;;  %v1655_v55 = vpop.permute.xlu2 %1654  ;;  %v2125_v62 = vadd.f32 %v4511_v20, %v2089_v57  ;;  %v2054_v14 = vld [vmem:[%s4493_s24 + $0x20] sm:$0xff] }
 0x361   : > { %3347 = vmatmul.msk.bf16.gmra.mxu3 %vm833_vm0, %v2205_v23  ;;  %v4572_v56 = vadd.f32 %v1655_v55, %v4339_v60 }
 0x362   : > { %2441 = vst.msk [vmem:[%s4525_s18 + $0x10] sm:$0xff] %vm833_vm0, %v2377_v10  ;;  %v2646_v7 = vsel %vm833_vm0, %v2377_v10, 0.0  ;;  %v2715_v49 = vmul.f32 %v2377_v10, %v2377_v10 }
 0x363   : > { %v2647_v41 = vadd.f32 %v2646_v7, %v2645_v54  ;;  %v1955_v12 = vpop.permute.xlu1 %1954  ;;  %v2090_v54 = vmul.f32 %v4502_v36, %v2054_v14 }
 0x364   : > { %v2748_v24 = vsel %vm833_vm0, %v2715_v49, 0.0  ;;  %v2034_v59 = vmul.f32 %v3558_v42, %v1955_v12 }
 0x365   : > { %v2749_v51 = vadd.f32 %v2748_v24, %v2747_v30  ;;  %v2302_v3 = vpop.f32.mrf.mxu3  ;;  %v2055_v24 = vld [vmem:[%s4493_s24 + $0x28] sm:$0xff] }
 0x366   : > { %v2162_v23 = vpack.c.bf16 %v2035_v44, %v2034_v59  ;;  %v2303_v63 = vadd.f32 %v4516_v26, %v2302_v3  ;;  %v2126_v44 = vadd.f32 %v4511_v20, %v2090_v54  ;;  %v1246_v59 = vadd.f32 %v3731_v17, %v4544_v38 }
 0x367   : > { %v2091_v3 = vmul.f32 %v4502_v36, %v2055_v24 }
 0x368   : > { %v2378_v61 = vadd.f32 %v2303_v63, %v2125_v62  ;;  %2210 = vrot.lane.b32.xlu0 %v2162_v23, %s3862_s29  ;;  %v1651_v10 = vpop.permute.xlu0 %1650  ;;  %v4584_v55 = vpop.permute.xlu2 %1962 }
 0x369   : > { %v4575_v45 = vadd.f32 %v1651_v10, %v4322_v27  ;;  %v3560_v10 = vpop.eup %3559 }
 0x36a   : > { %2442 = vst.msk [vmem:[%s4525_s18 + $0x18] sm:$0xff] %vm833_vm0, %v2378_v61  ;;  %v2648_v30 = vsel %vm833_vm0, %v2378_v61, 0.0  ;;  %v2716_v57 = vmul.f32 %v2378_v61, %v2378_v61  ;;  %v1788_v61 = vmul.f32 0.5, %v4572_v56 }
 0x36b   : > { %v2649_v63 = vadd.f32 %v2648_v30, %v2647_v41  ;;  %v1786_v7 = vmul.f32 0.5, %v4575_v45  ;;  %v1653_v49 = vpop.permute.xlu1 %1652 }
 0x36c   : > { %v2750_v42 = vsel %vm833_vm0, %v2716_v57, 0.0  ;;  %v4587_v12 = vadd.f32 %v1653_v49, %v4325_v34 }
 0x36d   : > { %v2751_v52 = vadd.f32 %v2750_v42, %v2749_v51  ;;  %3563 = vtanh.f32 %v1786_v7  ;;  %v2305_v41 = vpop.f32.mrf.mxu3  ;;  %v3562_v51 = vpop.eup %3561  ;;  %v2127_v7 = vadd.f32 %v4511_v20, %v2091_v3 }
 0x36e   : > { %v1787_v29 = vmul.f32 0.5, %v4587_v12  ;;  %v2306_v62 = vadd.f32 %v4516_v26, %v2305_v41 }
 0x370   : > { %3565 = vtanh.f32 %v1787_v29  ;;  %v2379_v14 = vadd.f32 %v2306_v62, %v2126_v44  ;;  %1662 = vrot.lane.b32.xlu0 %v1246_v59, %s3862_s29  ;;  %v1959_v23 = vpop.permute.xlu0 %1958  ;;  %v2056_v59 = vld [vmem:[%s4493_s24 + $0x30] sm:$0xff]  ;;  %v1661_v29 = vpop.permute.xlu2 %1660 }
 0x371   : > { %3567 = vtanh.f32 %v1788_v61  ;;  %3348 = vmatmul.msk.bf16.gmra.mxu3 %vm833_vm0, %v4551_v18  ;;  %v2036_v42 = vmul.f32 %v3560_v10, %v1959_v23  ;;  %v2092_v23 = vmul.f32 %v4502_v36, %v2056_v59 }
 0x372   : > { %2443 = vst.msk [vmem:[%s4525_s18 + $0x20] sm:$0xff] %vm833_vm0, %v2379_v14  ;;  %v2650_v38 = vsel %vm833_vm0, %v2379_v14, 0.0  ;;  %v2717_v17 = vmul.f32 %v2379_v14, %v2379_v14  ;;  %3569 = vtanh.f32 %v4465_v50 }
 0x373   : > { %v3564_v54 = vpop.eup %3563  ;;  %v2651_v30 = vadd.f32 %v2650_v38, %v2649_v63  ;;  %v1961_v57 = vpop.permute.xlu1 %1960  ;;  %3571 = vtanh.f32 %v4471_v47 }
 0x374   : > { %v2752_v49 = vsel %vm833_vm0, %v2717_v17, 0.0  ;;  %v2037_v44 = vmul.f32 %v3562_v51, %v1961_v57  ;;  %v1850_v24 = vmul.f32 0.5, %v3564_v54 }
 0x375   : > { %v2753_v61 = vadd.f32 %v2752_v49, %v2751_v52  ;;  %v2307_v41 = vpop.f32.mrf.mxu3  ;;  %v4611_v52 = vadd.f32 %v1661_v29, %v4367_v40  ;;  %v2128_v49 = vadd.f32 %v4511_v20, %v2092_v23 }
 0x376   : > { %v3566_v18 = vpop.eup %3565  ;;  %v2163_v62 = vpack.c.bf16 %v2037_v44, %v2036_v42  ;;  %v2308_v60 = vadd.f32 %v4516_v26, %v2307_v41  ;;  %v1882_v14 = vadd.f32 0.5, %v1850_v24  ;;  %v2057_v24 = vld [vmem:[%s4493_s24 + $0x38] sm:$0xff] }
 0x377   : > { %v3568_v9 = vpop.eup %3567  ;;  %v1851_v63 = vmul.f32 0.5, %v3566_v18  ;;  %v1791_v42 = vmul.f32 0.5, %v4611_v52 }
 0x378   : > { %v2380_v38 = vadd.f32 %v2308_v60, %v2127_v7  ;;  %1970 = vrot.lane.b32.xlu0 %v1882_v14, %s3863_s17  ;;  %2212 = vrot.lane.b32.xlu2 %v2163_v62, %s3862_s29  ;;  %v1657_v3 = vpop.permute.xlu0 %1656  ;;  %v1852_v54 = vmul.f32 0.5, %v3568_v9  ;;  %v3570_v9 = vpop.eup %3569  ;;  %v2093_v62 = vmul.f32 %v4502_v36, %v2057_v24 }
 0x379   : > { %v4614_v10 = vadd.f32 %v1657_v3, %v4343_v8  ;;  %v1883_v51 = vadd.f32 0.5, %v1851_v63  ;;  %v2038_v14 = vmul.f32 %v3570_v9, %v4584_v55 }
 0x37a   : > { %2444 = vst.msk [vmem:[%s4525_s18 + $0x28] sm:$0xff] %vm833_vm0, %v2380_v38  ;;  %v2652_v60 = vsel %vm833_vm0, %v2380_v38, 0.0  ;;  %v2718_v17 = vmul.f32 %v2380_v38, %v2380_v38  ;;  %v1884_v59 = vadd.f32 0.5, %v1852_v54 }
 0x37b   : > { %v2653_v57 = vadd.f32 %v2652_v60, %v2651_v30  ;;  %v1789_v7 = vmul.f32 0.5, %v4614_v10  ;;  %1972 = vrot.lane.b32.xlu1 %v1883_v51, %s3863_s17  ;;  %v3572_v30 = vpop.eup %3571 }
 0x37c   : > { %v2754_v50 = vsel %vm833_vm0, %v2718_v17, 0.0  ;;  %v2129_v17 = vadd.f32 %v4511_v20, %v2093_v62 }
 0x37d   : > { %v2755_v44 = vadd.f32 %v2754_v50, %v2753_v61  ;;  %3573 = vtanh.f32 %v1789_v7  ;;  %v2310_v47 = vpop.f32.mrf.mxu3 }
 0x37e   : > { %v2311_v41 = vadd.f32 %v4516_v26, %v2310_v47  ;;  %3575 = vtanh.f32 %v1791_v42 }
 0x380   : > { %v2381_v18 = vadd.f32 %v2311_v41, %v2128_v49  ;;  %1974 = vrot.lane.b32.xlu0 %v1884_v59, %s3863_s17  ;;  %v1965_v29 = vpop.permute.xlu0 %1964 }
 0x381   : > { %v2039_v63 = vmul.f32 %v3572_v30, %v1965_v29 }
 0x382   : > { %2445 = vst.msk [vmem:[%s4525_s18 + $0x30] sm:$0xff] %vm833_vm0, %v2381_v18  ;;  %v2654_v61 = vsel %vm833_vm0, %v2381_v18, 0.0  ;;  %v2719_v38 = vmul.f32 %v2381_v18, %v2381_v18 }
 0x383   : > { %v3574_v3 = vpop.eup %3573  ;;  %v2655_v23 = vadd.f32 %v2654_v61, %v2653_v57  ;;  %v2164_v51 = vpack.c.bf16 %v2039_v63, %v2038_v14 }
 0x384   : > { %v2756_v60 = vsel %vm833_vm0, %v2719_v38, 0.0  ;;  %v1853_v54 = vmul.f32 0.5, %v3574_v3  ;;  %v3576_v42 = vpop.eup %3575  ;;  %v2058_v3 = vld [vmem:[%s4493_s24 + $0x40] sm:$0xff] }
 0x385   : > { %v2757_v7 = vadd.f32 %v2756_v60, %v2755_v44  ;;  %v2312_v50 = vpop.f32.mrf.mxu3  ;;  %2214 = vrot.lane.b32.xlu2 %v2164_v51, %s3862_s29  ;;  %v1855_v41 = vmul.f32 0.5, %v3576_v42 }
 0x386   : > { %v2313_v55 = vadd.f32 %v4516_v26, %v2312_v50  ;;  %v1885_v49 = vadd.f32 0.5, %v1853_v54 }
 0x387   : > { %v1887_v30 = vadd.f32 0.5, %v1855_v41 }
 0x388   : > { %v2382_v47 = vadd.f32 %v2313_v55, %v2129_v17  ;;  %1976 = vrot.lane.b32.xlu1 %v1885_v49, %s3863_s17  ;;  %v2059_v17 = vld [vmem:[%s4493_s24 + $0x48] sm:$0xff] }
 0x389   : > { %v2095_v50 = vmul.f32 %v4502_v36, %v2059_v17 }
 0x38a   : > { %2446 = vst.msk [vmem:[%s4525_s18 + $0x38] sm:$0xff] %vm833_vm0, %v2382_v47  ;;  %v2656_v57 = vsel %vm833_vm0, %v2382_v47, 0.0  ;;  %v2720_v24 = vmul.f32 %v2382_v47, %v2382_v47 }
 0x38b   : > { %v2657_v59 = vadd.f32 %v2656_v57, %v2655_v23  ;;  %v2094_v23 = vmul.f32 %v4502_v36, %v2058_v3 }
 0x38c   : > { %v2758_v44 = vsel %vm833_vm0, %v2720_v24, 0.0 }
 0x38d   : > { %v2759_v9 = vadd.f32 %v2758_v44, %v2757_v7  ;;  %v2130_v51 = vadd.f32 %v4511_v20, %v2094_v23 }
 0x390   : > { %1980 = vrot.lane.b32.xlu1 %v1887_v30, %s3863_s17  ;;  %v2131_v30 = vadd.f32 %v4511_v20, %v2095_v50 }
 0x395   : > { %v1969_v55 = vpop.permute.xlu2 %1968 }
 0x39a   : > { %v2209_v18 = vpop.permute.xlu1 %2208 }
 0x39b   : > { %3349 = vmatmul.msk.bf16.gmra.mxu3 %vm833_vm0, %v2209_v18 }
 0x3a2   : > { %v1659_v29 = vpop.permute.xlu1 %1658 }
 0x3a3   : > { %v4645_v62 = vadd.f32 %v1659_v29, %v4359_v21 }
 0x3a5   : > { %v1790_v14 = vmul.f32 0.5, %v4645_v62 }
 0x3a7   : > { %3577 = vtanh.f32 %v1790_v14 }
 0x3a8   : > { %3579 = vtanh.f32 %v4497_v13 }
 0x3a9   : > { %3581 = vtanh.f32 %v4535_v43 }
 0x3ad   : > { %v3578_v63 = vpop.eup %3577 }
 0x3ae   : > { %v1854_v61 = vmul.f32 0.5, %v3578_v63  ;;  %v3580_v49 = vpop.eup %3579 }
 0x3af   : > { %v3582_v13 = vpop.eup %3581  ;;  %v2041_v41 = vmul.f32 %v3580_v49, %v1969_v55  ;;  %v2060_v49 = vld [vmem:[%s4493_s24 + $0x50] sm:$0xff] }
 0x3b0   : > { %v1886_v38 = vadd.f32 0.5, %v1854_v61 }
 0x3b2   : > { %1978 = vrot.lane.b32.xlu0 %v1886_v38, %s3863_s17 }
 0x3bc   : > { %v2315_v60 = vpop.f32.mrf.mxu3 }
 0x3bd   : > { %v2316_v54 = vadd.f32 %v4516_v26, %v2315_v60 }
 0x3bf   : > { %v2383_v7 = vadd.f32 %v2316_v54, %v2130_v51 }
 0x3c1   : > { %2447 = vst.msk [vmem:[%s4525_s18 + $0x40] sm:$0xff] %vm833_vm0, %v2383_v7  ;;  %v2658_v42 = vsel %vm833_vm0, %v2383_v7, 0.0  ;;  %v2721_v47 = vmul.f32 %v2383_v7, %v2383_v7 }
 0x3c2   : > { %v2659_v57 = vadd.f32 %v2658_v42, %v2657_v59  ;;  %v1967_v24 = vpop.permute.xlu1 %1966  ;;  %v2096_v42 = vmul.f32 %v4502_v36, %v2060_v49 }
 0x3c3   : > { %v2760_v43 = vsel %vm833_vm0, %v2721_v47, 0.0  ;;  %v2040_v44 = vmul.f32 %v3582_v13, %v1967_v24 }
 0x3c4   : > { %v2761_v18 = vadd.f32 %v2760_v43, %v2759_v9  ;;  %v2317_v29 = vpop.f32.mrf.mxu3 }
 0x3c5   : > { %v2165_v14 = vpack.c.bf16 %v2041_v41, %v2040_v44  ;;  %v2318_v63 = vadd.f32 %v4516_v26, %v2317_v29  ;;  %v2061_v41 = vld [vmem:[%s4493_s24 + $0x58] sm:$0xff] }
 0x3c7   : > { %v2384_v61 = vadd.f32 %v2318_v63, %v2131_v30  ;;  %2216 = vrot.lane.b32.xlu2 %v2165_v14, %s3862_s29 }
 0x3c9   : > { %2448 = vst.msk [vmem:[%s4525_s18 + $0x48] sm:$0xff] %vm833_vm0, %v2384_v61  ;;  %v2660_v59 = vsel %vm833_vm0, %v2384_v61, 0.0  ;;  %v2722_v38 = vmul.f32 %v2384_v61, %v2384_v61 }
 0x3ca   : > { %v2661_v3 = vadd.f32 %v2660_v59, %v2659_v57  ;;  %v1665_v23 = vpop.permute.xlu1 %1664  ;;  %v2132_v57 = vadd.f32 %v4511_v20, %v2096_v42 }
 0x3cb   : > { %v2762_v51 = vsel %vm833_vm0, %v2722_v38, 0.0  ;;  %v4669_v60 = vadd.f32 %v1665_v23, %v4419_v33 }
 0x3cc   : > { %v2763_v9 = vadd.f32 %v2762_v51, %v2761_v18  ;;  %v2097_v18 = vmul.f32 %v4502_v36, %v2061_v41 }
 0x3cd   : > { %v1793_v17 = vmul.f32 0.5, %v4669_v60 }
 0x3cf   : > { %3583 = vtanh.f32 %v1793_v17 }
 0x3d0   : > { %3585 = vtanh.f32 %v4575_v45 }
 0x3d1   : > { %3587 = vtanh.f32 %v4587_v12  ;;  %v2133_v12 = vadd.f32 %v4511_v20, %v2097_v18 }
 0x3d2   : > { %v2213_v63 = vpop.permute.xlu2 %2212 }
 0x3d5   : > { %v3584_v54 = vpop.eup %3583 }
 0x3d6   : > { %v1857_v7 = vmul.f32 0.5, %v3584_v54  ;;  %v3586_v59 = vpop.eup %3585  ;;  %v2062_v54 = vld [vmem:[%s4493_s24 + $0x60] sm:$0xff] }
 0x3d7   : > { %v3588_v23 = vpop.eup %3587 }
 0x3d8   : > { %v1889_v50 = vadd.f32 0.5, %v1857_v7 }
 0x3da   : > { %v2211_v55 = vpop.permute.xlu0 %2210  ;;  %1984 = vrot.lane.b32.xlu1 %v1889_v50, %s3863_s17 }
 0x3db   : > { %3350 = vmatmul.msk.bf16.gmra.mxu3 %vm833_vm0, %v2211_v55 }
 0x3e2   : > { %v1663_v47 = vpop.permute.xlu0 %1662 }
 0x3e3   : > { %v4677_v13 = vadd.f32 %v1663_v47, %v4416_v5 }
 0x3e4   : > { %v2320_v24 = vpop.f32.mrf.mxu3 }
 0x3e5   : > { %v1792_v43 = vmul.f32 0.5, %v4677_v13  ;;  %v2321_v44 = vadd.f32 %v4516_v26, %v2320_v24 }
 0x3e7   : > { %3589 = vtanh.f32 %v1792_v43  ;;  %v2385_v30 = vadd.f32 %v2321_v44, %v2132_v57  ;;  %v2098_v57 = vmul.f32 %v4502_v36, %v2062_v54 }
 0x3e8   : > { %3591 = vtanh.f32 %v4572_v56 }
 0x3e9   : > { %2449 = vst.msk [vmem:[%s4525_s18 + $0x50] sm:$0xff] %vm833_vm0, %v2385_v30  ;;  %v2662_v29 = vsel %vm833_vm0, %v2385_v30, 0.0  ;;  %v2723_v14 = vmul.f32 %v2385_v30, %v2385_v30  ;;  %v2134_v18 = vadd.f32 %v4511_v20, %v2098_v57  ;;  %3593 = vtanh.f32 %v4614_v10  ;;  %v2215_v10 = vpop.permute.xlu2 %2214 }
 0x3ea   : > { %v2663_v61 = vadd.f32 %v2662_v29, %v2661_v3  ;;  %v1971_v38 = vpop.permute.xlu0 %1970  ;;  %v1285_v57 = vmul.f32 0.5, %v4105_v16 }
 0x3eb   : > { %v2764_v45 = vsel %vm833_vm0, %v2723_v14, 0.0  ;;  %3351 = vmatmul.msk.bf16.gmra.mxu3 %vm833_vm0, %v2213_v63  ;;  %v2042_v49 = vmul.f32 %v3586_v59, %v1971_v38  ;;  %v2063_v63 = vld [vmem:[%s4493_s24 + $0x68] sm:$0xff]  ;;  %v1282_v59 = vmul.f32 0.5, %v4089_v0 }
 0x3ec   : > { %v2765_v51 = vadd.f32 %v2764_v45, %v2763_v9  ;;  %v2322_v17 = vpop.f32.mrf.mxu3  ;;  %v2099_v38 = vmul.f32 %v4502_v36, %v2063_v63 }
 0x3ed   : > { %v3590_v7 = vpop.eup %3589  ;;  %v2323_v50 = vadd.f32 %v4516_v26, %v2322_v17  ;;  %v1973_v55 = vpop.permute.xlu1 %1972  ;;  %3595 = vtanh.f32 %v1282_v59  ;;  %v1288_v59 = vmul.f32 0.5, %v4125_v37 }
 0x3ee   : > { %v2043_v42 = vmul.f32 %v3588_v23, %v1973_v55  ;;  %v1856_v3 = vmul.f32 0.5, %v3590_v7  ;;  %v3592_v23 = vpop.eup %3591  ;;  %3597 = vtanh.f32 %v1285_v57 }
 0x3ef   : > { %v2386_v47 = vadd.f32 %v2323_v50, %v2133_v12  ;;  %v3594_v54 = vpop.eup %3593  ;;  %3599 = vtanh.f32 %v1288_v59 }
 0x3f0   : > { %v2166_v24 = vpack.c.bf16 %v2043_v42, %v2042_v49  ;;  %v1888_v41 = vadd.f32 0.5, %v1856_v3  ;;  %v2135_v42 = vadd.f32 %v4511_v20, %v2099_v38 }
 0x3f1   : > { %2450 = vst.msk [vmem:[%s4525_s18 + $0x58] sm:$0xff] %vm833_vm0, %v2386_v47  ;;  %v2664_v43 = vsel %vm833_vm0, %v2386_v47, 0.0  ;;  %v2724_v9 = vmul.f32 %v2386_v47, %v2386_v47 }
 0x3f2   : > { %v2665_v44 = vadd.f32 %v2664_v43, %v2663_v61  ;;  %1982 = vrot.lane.b32.xlu0 %v1888_v41, %s3863_s17  ;;  %2218 = vrot.lane.b32.xlu2 %v2166_v24, %s3862_s29  ;;  %v1975_v12 = vpop.permute.xlu0 %1974 }
 0x3f3   : > { %v2766_v30 = vsel %vm833_vm0, %v2724_v9, 0.0  ;;  %v2044_v50 = vmul.f32 %v3592_v23, %v1975_v12  ;;  %v3596_v43 = vpop.eup %3595  ;;  %v1291_v12 = vmul.f32 0.5, %v4137_v48 }
 0x3f4   : > { %v2767_v29 = vadd.f32 %v2766_v30, %v2765_v51  ;;  %v2325_v14 = vpop.f32.mrf.mxu3 }
 0x3f5   : > { %v2326_v61 = vadd.f32 %v4516_v26, %v2325_v14  ;;  %3601 = vtanh.f32 %v1291_v12 }
 0x3f7   : > { %v2387_v45 = vadd.f32 %v2326_v61, %v2134_v18  ;;  %v1346_v18 = vmul.f32 0.5, %v3596_v43 }
 0x3f9   : > { %2451 = vst.msk [vmem:[%s4525_s18 + $0x60] sm:$0xff] %vm833_vm0, %v2387_v45  ;;  %v2666_v56 = vsel %vm833_vm0, %v2387_v45, 0.0  ;;  %v2725_v17 = vmul.f32 %v2387_v45, %v2387_v45  ;;  %v1378_v61 = vadd.f32 0.5, %v1346_v18  ;;  %v3598_v45 = vpop.eup %3597 }
 0x3fa   : > { %v2667_v51 = vadd.f32 %v2666_v56, %v2665_v44  ;;  %v1977_v7 = vpop.permute.xlu1 %1976  ;;  %v1349_v38 = vmul.f32 0.5, %v3598_v45  ;;  %v3600_v56 = vpop.eup %3599 }
 0x3fb   : > { %v2768_v55 = vsel %vm833_vm0, %v2725_v17, 0.0  ;;  %v2045_v49 = vmul.f32 %v3594_v54, %v1977_v7  ;;  %3352 = vmatmul.msk.bf16.gmra.mxu3 %vm833_vm0, %v2215_v10  ;;  %v1352_v17 = vmul.f32 0.5, %v3600_v56  ;;  %v1294_v54 = vmul.f32 0.5, %v4159_v11  ;;  %v2064_v7 = vld [vmem:[%s4493_s24 + $0x70] sm:$0xff] }
 0x3fc   : > { %v2769_v3 = vadd.f32 %v2768_v55, %v2767_v29  ;;  %v2327_v47 = vpop.f32.mrf.mxu3  ;;  %v1381_v23 = vadd.f32 0.5, %v1349_v38  ;;  %v2100_v55 = vmul.f32 %v4502_v36, %v2064_v7 }
 0x3fd   : > { %v2167_v24 = vpack.c.bf16 %v2045_v49, %v2044_v50  ;;  %v2328_v41 = vadd.f32 %v4516_v26, %v2327_v47  ;;  %v1384_v10 = vadd.f32 0.5, %v1352_v17  ;;  %3603 = vtanh.f32 %v1294_v54 }
 0x3fe   : > { %v1297_v49 = vmul.f32 0.5, %v4183_v35  ;;  %3605 = vtanh.f32 %v4611_v52  ;;  %v2136_v47 = vadd.f32 %v4511_v20, %v2100_v55  ;;  %v1286_v55 = vmul.f32 0.5, %v4111_v22 }
 0x3ff   : > { %v2388_v9 = vadd.f32 %v2328_v41, %v2135_v42  ;;  %2220 = vrot.lane.b32.xlu2 %v2167_v24, %s3862_s29  ;;  %3607 = vtanh.f32 %v4645_v62  ;;  %v2065_v24 = vld [vmem:[%s4493_s24 + $0x78] sm:$0xff]  ;;  %v1283_v41 = vmul.f32 0.5, %v4091_v1 }
 0x400   : > { %3609 = vtanh.f32 %v1297_v49  ;;  %v2101_v18 = vmul.f32 %v4502_v36, %v2065_v24 }
 0x401   : > { %2452 = vst.msk [vmem:[%s4525_s18 + $0x68] sm:$0xff] %vm833_vm0, %v2388_v9  ;;  %v2668_v44 = vsel %vm833_vm0, %v2388_v9, 0.0  ;;  %v2726_v30 = vmul.f32 %v2388_v9, %v2388_v9  ;;  %3611 = vtanh.f32 %v1283_v41  ;;  %v1303_v41 = vmul.f32 0.5, %v4247_v4 }
 0x402   : > { %v2669_v14 = vadd.f32 %v2668_v44, %v2667_v51  ;;  %v3602_v51 = vpop.eup %3601  ;;  %v1981_v52 = vpop.permute.xlu1 %1980 }
 0x403   : > { %v2770_v29 = vsel %vm833_vm0, %v2726_v30, 0.0  ;;  %v1355_v50 = vmul.f32 0.5, %v3602_v51  ;;  %v2137_v51 = vadd.f32 %v4511_v20, %v2101_v18 }
 0x404   : > { %v2771_v63 = vadd.f32 %v2770_v29, %v2769_v3  ;;  %v3604_v3 = vpop.eup %3603 }
 0x405   : > { %v1387_v42 = vadd.f32 0.5, %v1355_v50  ;;  %v1358_v9 = vmul.f32 0.5, %v3604_v3  ;;  %v3606_v29 = vpop.eup %3605 }
 0x406   : > { %v3608_v45 = vpop.eup %3607  ;;  %v2047_v17 = vmul.f32 %v3606_v29, %v1981_v52  ;;  %v1289_v52 = vmul.f32 0.5, %v4128_v39 }
 0x407   : > { %1442 = vrot.lane.b32.xlu2 %v1378_v61, %s3863_s17  ;;  %v1300_v61 = vmul.f32 0.5, %v4222_v28  ;;  %v3610_v56 = vpop.eup %3609 }
 0x408   : > { %v1361_v3 = vmul.f32 0.5, %v3610_v56 }
 0x409   : > { %3613 = vtanh.f32 %v1300_v61 }
 0x40a   : > { %3615 = vtanh.f32 %v1286_v55  ;;  %v1295_v55 = vmul.f32 0.5, %v4164_v19 }
 0x40b   : > { %3617 = vtanh.f32 %v1303_v41 }
 0x40c   : > { %3619 = vtanh.f32 %v1289_v52 }
 0x40f   : > { %1448 = vrot.lane.b32.xlu2 %v1381_v23, %s3863_s17  ;;  %v1390_v23 = vadd.f32 0.5, %v1358_v9  ;;  %v1393_v9 = vadd.f32 0.5, %v1361_v3 }
 0x417   : > { %1454 = vrot.lane.b32.xlu2 %v1384_v10, %s3863_s17 }
 0x41e   : > { %v2330_v57 = vpop.f32.mrf.mxu3 }
 0x41f   : > { %1460 = vrot.lane.b32.xlu2 %v1387_v42, %s3863_s17  ;;  %v2331_v43 = vadd.f32 %v4516_v26, %v2330_v57 }
 0x421   : > { %v2389_v44 = vadd.f32 %v2331_v43, %v2136_v47  ;;  %v2217_v30 = vpop.permute.xlu2 %2216 }
 0x422   : > { %3353 = vmatmul.msk.bf16.gmra.mxu3 %vm833_vm0, %v2217_v30 }
 0x423   : > { %2453 = vst.msk [vmem:[%s4525_s18 + $0x70] sm:$0xff] %vm833_vm0, %v2389_v44  ;;  %v2670_v62 = vsel %vm833_vm0, %v2389_v44, 0.0  ;;  %v2727_v59 = vmul.f32 %v2389_v44, %v2389_v44 }
 0x424   : > { %v2671_v38 = vadd.f32 %v2670_v62, %v2669_v14  ;;  %v1979_v12 = vpop.permute.xlu0 %1978  ;;  %v3612_v14 = vpop.eup %3611 }
 0x425   : > { %v2772_v54 = vsel %vm833_vm0, %v2727_v59, 0.0  ;;  %v2046_v10 = vmul.f32 %v3608_v45, %v1979_v12  ;;  %v1347_v24 = vmul.f32 0.5, %v3612_v14  ;;  %v3614_v44 = vpop.eup %3613  ;;  %v1306_v45 = vmul.f32 0.5, %v4322_v27 }
 0x426   : > { %v2773_v7 = vadd.f32 %v2772_v54, %v2771_v63  ;;  %v2332_v50 = vpop.f32.mrf.mxu3  ;;  %v3616_v62 = vpop.eup %3615  ;;  %v1364_v59 = vmul.f32 0.5, %v3614_v44 }
 0x427   : > { %1466 = vrot.lane.b32.xlu2 %v1390_v23, %s3863_s17  ;;  %v2168_v49 = vpack.c.bf16 %v2047_v17, %v2046_v10  ;;  %v2333_v42 = vadd.f32 %v4516_v26, %v2332_v50  ;;  %v1379_v29 = vadd.f32 0.5, %v1347_v24  ;;  %v1350_v61 = vmul.f32 0.5, %v3616_v62  ;;  %v3618_v12 = vpop.eup %3617 }
 0x428   : > { %v1292_v23 = vmul.f32 0.5, %v4145_v58  ;;  %3621 = vtanh.f32 %v1306_v45  ;;  %v3620_v17 = vpop.eup %3619  ;;  %v1367_v54 = vmul.f32 0.5, %v3618_v12  ;;  %v1298_v24 = vmul.f32 0.5, %v4208_v6 }
 0x429   : > { %v2390_v47 = vadd.f32 %v2333_v42, %v2137_v51  ;;  %2222 = vrot.lane.b32.xlu0 %v2168_v49, %s3862_s29  ;;  %v1382_v56 = vadd.f32 0.5, %v1350_v61  ;;  %v1353_v10 = vmul.f32 0.5, %v3620_v17  ;;  %v1309_v51 = vmul.f32 0.5, %v4343_v8 }
 0x42a   : > { %3623 = vtanh.f32 %v1292_v23  ;;  %v1304_v17 = vmul.f32 0.5, %v4306_v53 }
 0x42b   : > { %2454 = vst.msk [vmem:[%s4525_s18 + $0x78] sm:$0xff] %vm833_vm0, %v2390_v47  ;;  %v2672_v57 = vsel %vm833_vm0, %v2390_v47, 0.0  ;;  %v2728_v63 = vmul.f32 %v2390_v47, %v2390_v47  ;;  %v1385_v49 = vadd.f32 0.5, %v1353_v10  ;;  %3625 = vtanh.f32 %v1309_v51 }
 0x42c   : > { %v4753_v43 = vadd.f32 %v2672_v57, %v2671_v38  ;;  %v1396_v38 = vadd.f32 0.5, %v1364_v59  ;;  %3627 = vtanh.f32 %v1295_v55  ;;  %v1312_v47 = vmul.f32 0.5, %v4416_v5 }
 0x42d   : > { %v2774_v30 = vsel %vm833_vm0, %v2728_v63, 0.0  ;;  %v1301_v59 = vmul.f32 0.5, %v4225_v31 }
 0x42e   : > { %v4756_v18 = vadd.f32 %v2774_v30, %v2773_v7  ;;  %v1399_v7 = vadd.f32 0.5, %v1367_v54  ;;  %v3622_v50 = vpop.eup %3621  ;;  %3629 = vtanh.f32 %v1312_v47 }
 0x42f   : > { %1472 = vrot.lane.b32.xlu2 %v1393_v9, %s3863_s17  ;;  %v1370_v14 = vmul.f32 0.5, %v3622_v50  ;;  %3631 = vtanh.f32 %v1298_v24 }
 0x430   : > { %v3624_v42 = vpop.eup %3623  ;;  %3633 = vtanh.f32 %v1301_v59 }
 0x431   : > { %1444 = vrot.lane.b32.xlu0 %v1379_v29, %s3863_s17  ;;  %v1356_v3 = vmul.f32 0.5, %v3624_v42  ;;  %v1402_v57 = vadd.f32 0.5, %v1370_v14  ;;  %v3626_v63 = vpop.eup %3625  ;;  %3635 = vtanh.f32 %v4089_v0  ;;  %v2067_v14 = vld [vmem:[%s4493_s24 + $0x88] sm:$0xff] }
 0x432   : > { %v3628_v9 = vpop.eup %3627  ;;  %v1373_v44 = vmul.f32 0.5, %v3626_v63  ;;  %3637 = vtanh.f32 %v1304_v17 }
 0x433   : > { %v1388_v41 = vadd.f32 0.5, %v1356_v3  ;;  %v1359_v52 = vmul.f32 0.5, %v3628_v9  ;;  %3639 = vtanh.f32 %v4669_v60  ;;  %v1307_v3 = vmul.f32 0.5, %v4325_v34 }
 0x434   : > { %v1405_v29 = vadd.f32 0.5, %v1373_v44  ;;  %v3630_v62 = vpop.eup %3629  ;;  %3641 = vtanh.f32 %v4677_v13 }
 0x435   : > { %v1391_v61 = vadd.f32 0.5, %v1359_v52  ;;  %v3632_v45 = vpop.eup %3631 }
 0x436   : > { %v1362_v12 = vmul.f32 0.5, %v3632_v45  ;;  %v3634_v10 = vpop.eup %3633 }
 0x437   : > { %1478 = vrot.lane.b32.xlu2 %v1396_v38, %s3863_s17  ;;  %v1376_v38 = vmul.f32 0.5, %v3630_v62  ;;  %v1365_v50 = vmul.f32 0.5, %v3634_v10  ;;  %v3636_v47 = vpop.eup %3635 }
 0x438   : > { %v1394_v54 = vadd.f32 0.5, %v1362_v12  ;;  %v3638_v63 = vpop.eup %3637 }
 0x439   : > { %1450 = vrot.lane.b32.xlu0 %v1382_v56, %s3863_s17  ;;  %v1408_v23 = vadd.f32 0.5, %v1376_v38  ;;  %v2066_v56 = vld [vmem:[%s4493_s24 + $0x80] sm:$0xff]  ;;  %v3640_v13 = vpop.eup %3639  ;;  %v1368_v62 = vmul.f32 0.5, %v3638_v63 }
 0x43a   : > { %v3642_v52 = vpop.eup %3641 }
 0x43f   : > { %1484 = vrot.lane.b32.xlu2 %v1399_v7, %s3863_s17  ;;  %v2102_v7 = vmul.f32 %v4502_v36, %v2066_v56 }
 0x441   : > { %1456 = vrot.lane.b32.xlu0 %v1385_v49, %s3863_s17  ;;  %v2138_v55 = vadd.f32 %v4511_v20, %v2102_v7  ;;  %v1284_v49 = vmul.f32 0.5, %v4103_v15 }
 0x443   : > { %3643 = vtanh.f32 %v1284_v49  ;;  %v4825_v49 = vld [vmem:[%s5380_s2] ss:$0 sm:$0xff] }
 0x444   : > { %3645 = vtanh.f32 %v4105_v16  ;;  %v1287_v16 = vmul.f32 0.5, %v4114_v25 }
 0x445   : > { %3647 = vtanh.f32 %v1307_v3 }
 0x446   : > { %3649 = vtanh.f32 %v1287_v16 }
 0x447   : > { %1490 = vrot.lane.b32.xlu2 %v1402_v57, %s3863_s17  ;;  %v1397_v57 = vadd.f32 0.5, %v1365_v50  ;;  %v1400_v50 = vadd.f32 0.5, %v1368_v62  ;;  %3651 = vtanh.f32 %v4125_v37 }
 0x449   : > { %1462 = vrot.lane.b32.xlu0 %v1388_v41, %s3863_s17  ;;  %v2103_v41 = vmul.f32 %v4502_v36, %v2067_v14  ;;  %v3644_v56 = vpop.eup %3643 }
 0x44a   : > { %v3646_v7 = vpop.eup %3645 }
 0x44b   : > { %v2139_v38 = vadd.f32 %v4511_v20, %v2103_v41 }
 0x44c   : > { %v2219_v30 = vpop.permute.xlu2 %2218  ;;  %v1985_v9 = vpop.permute.xlu1 %1984 }
 0x44d   : > { %3354 = vmatmul.msk.bf16.gmra.mxu3 %vm833_vm0, %v2219_v30  ;;  %v2049_v59 = vmul.f32 %v3640_v13, %v1985_v9  ;;  %v2069_v13 = vld [vmem:[%s4493_s24 + $0x98] sm:$0xff] }
 0x44f   : > { %1496 = vrot.lane.b32.xlu2 %v1405_v29, %s3863_s17 }
 0x451   : > { %1468 = vrot.lane.b32.xlu0 %v1391_v61, %s3863_s17 }
 0x457   : > { %1502 = vrot.lane.b32.xlu2 %v1408_v23, %s3863_s17 }
 0x459   : > { %v2221_v51 = vpop.permute.xlu2 %2220  ;;  %1474 = vrot.lane.b32.xlu0 %v1394_v54, %s3863_s17  ;;  %v4817_v54 = vld [vmem:[%s5387_s9] ss:$0 sm:$0xff] }
 0x45d   : > { %3355 = vmatmul.msk.bf16.gmra.mxu3 %vm833_vm0, %v2221_v51  ;;  %v1310_v51 = vmul.f32 0.5, %v4359_v21 }
 0x45e   : > { %v2335_v42 = vpop.f32.mrf.mxu3 }
 0x45f   : > { %v2336_v0 = vadd.f32 %v4516_v26, %v2335_v42  ;;  %3653 = vtanh.f32 %v1310_v51 }
 0x460   : > { %3655 = vtanh.f32 %v4137_v48 }
 0x461   : > { %v2391_v60 = vadd.f32 %v2336_v0, %v2138_v55  ;;  %v1443_v24 = vpop.permute.xlu2 %1442  ;;  %1480 = vrot.lane.b32.xlu0 %v1397_v57, %s3863_s17  ;;  %v3648_v55 = vpop.eup %3647 }
 0x462   : > { %v4796_v44 = vmul.f32 %v3636_v47, %v1443_v24  ;;  %v1348_v47 = vmul.f32 0.5, %v3644_v56  ;;  %v1371_v63 = vmul.f32 0.5, %v3648_v55  ;;  %v4842_v24 = vld [vmem:[%s5381_s3] ss:$0 sm:$0xff] }
 0x463   : > { %2455 = vst.msk [vmem:[%s4525_s18 + $0x80] sm:$0xff] %vm833_vm0, %v2391_v60  ;;  %v2674_v26 = vsel %vm833_vm0, %v2391_v60, 0.0  ;;  %v2729_v30 = vmul.f32 %v2391_v60, %v2391_v60  ;;  %v2070_v55 = vld [vmem:[%s4493_s24 + $0xa0] sm:$0xff] }
 0x464   : > { %v2675_v29 = vadd.f32 %v2674_v26, %v4753_v43  ;;  %2407 = vst.msk [vmem:[%s4804_s20] sm:$0xff] %vm833_vm0, %v4796_v44  ;;  %v1983_v36 = vpop.permute.xlu0 %1982  ;;  %v2068_v43 = vld [vmem:[%s4493_s24 + $0x90] sm:$0xff]  ;;  %v1290_v26 = vmul.f32 0.5, %v4134_v46  ;;  %v1403_v16 = vadd.f32 0.5, %v1371_v63 }
 0x465   : > { %v2776_v61 = vsel %vm833_vm0, %v2729_v30, 0.0  ;;  %v2048_v45 = vmul.f32 %v3642_v52, %v1983_v36  ;;  %v2104_v42 = vmul.f32 %v4825_v49, %v2068_v43  ;;  %v3650_v30 = vpop.eup %3649  ;;  %v1313_v36 = vmul.f32 0.5, %v4419_v33 }
 0x466   : > { %v2777_v12 = vadd.f32 %v2776_v61, %v4756_v18  ;;  %v2337_v23 = vpop.f32.mrf.mxu3  ;;  %v3652_v62 = vpop.eup %3651  ;;  %3657 = vtanh.f32 %v1290_v26  ;;  %v1351_v56 = vmul.f32 0.5, %v3650_v30 }
 0x467   : > { %v2169_v17 = vpack.c.bf16 %v2049_v59, %v2048_v45  ;;  %v2338_v10 = vadd.f32 %v4817_v54, %v2337_v23  ;;  %v2140_v37 = vadd.f32 %v4842_v24, %v2104_v42  ;;  %v3654_v59 = vpop.eup %3653  ;;  %3659 = vtanh.f32 %v1313_v36 }
 0x469   : > { %v2392_v20 = vadd.f32 %v2338_v10, %v2139_v38  ;;  %v1449_v18 = vpop.permute.xlu2 %1448  ;;  %2224 = vrot.lane.b32.xlu1 %v2169_v17, %s3862_s29  ;;  %1486 = vrot.lane.b32.xlu0 %v1400_v50, %s3863_s17  ;;  %v2105_v38 = vmul.f32 %v4825_v49, %v2069_v13  ;;  %v1374_v10 = vmul.f32 0.5, %v3654_v59  ;;  %v2071_v59 = vld [vmem:[%s4493_s24 + $0xa8] sm:$0xff] }
 0x46a   : > { %v4828_v14 = vmul.f32 %v3646_v7, %v1449_v18  ;;  %v3656_v18 = vpop.eup %3655 }
 0x46b   : > { %2456 = vst.msk [vmem:[%s4525_s18 + $0x88] sm:$0xff] %vm833_vm0, %v2392_v20  ;;  %v2676_v0 = vsel %vm833_vm0, %v2392_v20, 0.0  ;;  %v2730_v3 = vmul.f32 %v2392_v20, %v2392_v20  ;;  %v2141_v51 = vadd.f32 %v4842_v24, %v2105_v38  ;;  %v1293_v20 = vmul.f32 0.5, %v4150_v2 }
 0x46c   : > { %v2677_v57 = vadd.f32 %v2676_v0, %v2675_v29  ;;  %2410 = vst.msk [vmem:[%s4804_s20 + $0x18] sm:$0xff] %vm833_vm0, %v4828_v14  ;;  %v1380_v29 = vadd.f32 0.5, %v1348_v47  ;;  %v1383_v0 = vadd.f32 0.5, %v1351_v56  ;;  %v1406_v47 = vadd.f32 0.5, %v1374_v10 }
 0x46d   : > { %v2778_v60 = vsel %vm833_vm0, %v2730_v3, 0.0  ;;  %v3658_v3 = vpop.eup %3657  ;;  %3661 = vtanh.f32 %v1293_v20  ;;  %v2107_v10 = vmul.f32 %v4825_v49, %v2071_v59 }
 0x46e   : > { %v2779_v41 = vadd.f32 %v2778_v60, %v2777_v12  ;;  %v2340_v9 = vpop.f32.mrf.mxu3  ;;  %3663 = vtanh.f32 %v4159_v11  ;;  %v1354_v26 = vmul.f32 0.5, %v3658_v3  ;;  %v5431_v3 = vld [vmem:[#allocation14_spill] sm:$0xff] }
 0x46f   : > { %v2341_v52 = vadd.f32 %v4817_v54, %v2340_v9 }
 0x470   : > { %v1386_v38 = vadd.f32 0.5, %v1354_v26 }
 0x471   : > { %v2393_v61 = vadd.f32 %v2341_v52, %v2140_v37  ;;  %v1455_v45 = vpop.permute.xlu2 %1454  ;;  %1446 = vrot.lane.b32.xlu1 %v1380_v29, %s3863_s17  ;;  %1492 = vrot.lane.b32.xlu0 %v1403_v16, %s3863_s17  ;;  %v2106_v37 = vmul.f32 %v4825_v49, %v2070_v55 }
 0x472   : > { %v4852_v12 = vmul.f32 %v3652_v62, %v1455_v45 }
 0x473   : > { %2457 = vst.msk [vmem:[%s4525_s18 + $0x90] sm:$0xff] %vm833_vm0, %v2393_v61  ;;  %v2678_v23 = vsel %vm833_vm0, %v2393_v61, 0.0  ;;  %v2731_v43 = vmul.f32 %v2393_v61, %v2393_v61  ;;  %v2142_v36 = vadd.f32 %v4842_v24, %v2106_v37  ;;  %v1296_v61 = vmul.f32 0.5, %v4179_v32 }
 0x474   : > { %v2679_v17 = vadd.f32 %v2678_v23, %v2677_v57  ;;  %2413 = vst.msk [vmem:[%s4804_s20 + $0x30] sm:$0xff] %vm833_vm0, %v4852_v12  ;;  %v3660_v57 = vpop.eup %3659 }
 0x475   : > { %v2780_v48 = vsel %vm833_vm0, %v2731_v43, 0.0  ;;  %v1377_v52 = vmul.f32 0.5, %v3660_v57  ;;  %v3662_v11 = vpop.eup %3661  ;;  %3665 = vtanh.f32 %v1296_v61 }
 0x476   : > { %v2781_v7 = vadd.f32 %v2780_v48, %v2779_v41  ;;  %v2342_v50 = vpop.f32.mrf.mxu3  ;;  %v3664_v43 = vpop.eup %3663  ;;  %3667 = vtanh.f32 %v4183_v35 }
 0x477   : > { %v2343_v42 = vadd.f32 %v4817_v54, %v2342_v50  ;;  %v1409_v23 = vadd.f32 0.5, %v1377_v52  ;;  %v1357_v50 = vmul.f32 0.5, %v3662_v11 }
 0x479   : > { %v2394_v63 = vadd.f32 %v2343_v42, %v2141_v51  ;;  %v1461_v60 = vpop.permute.xlu2 %1460  ;;  %1452 = vrot.lane.b32.xlu1 %v1383_v0, %s3863_s17  ;;  %1498 = vrot.lane.b32.xlu0 %v1406_v47, %s3863_s17  ;;  %v1299_v47 = vmul.f32 0.5, %v5431_v3 }
 0x47a   : > { %v4868_v41 = vmul.f32 %v3656_v18, %v1461_v60  ;;  %v2143_v18 = vadd.f32 %v4842_v24, %v2107_v10 }
 0x47b   : > { %2458 = vst.msk [vmem:[%s4525_s18 + $0x98] sm:$0xff] %vm833_vm0, %v2394_v63  ;;  %v2680_v9 = vsel %vm833_vm0, %v2394_v63, 0.0  ;;  %v2732_v13 = vmul.f32 %v2394_v63, %v2394_v63  ;;  %v1389_v63 = vadd.f32 0.5, %v1357_v50  ;;  %v3666_v60 = vpop.eup %3665  ;;  %3669 = vtanh.f32 %v1299_v47 }
 0x47c   : > { %v2681_v30 = vadd.f32 %v2680_v9, %v2679_v17  ;;  %2416 = vst.msk [vmem:[%s4804_s20 + $0x48] sm:$0xff] %vm833_vm0, %v4868_v41  ;;  %v3668_v35 = vpop.eup %3667  ;;  %3671 = vtanh.f32 %v4222_v28  ;;  %v1360_v52 = vmul.f32 0.5, %v3666_v60 }
 0x47d   : > { %v2782_v29 = vsel %vm833_vm0, %v2732_v13, 0.0 }
 0x47e   : > { %v2783_v62 = vadd.f32 %v2782_v29, %v2781_v7  ;;  %v2345_v16 = vpop.f32.mrf.mxu3  ;;  %v1392_v61 = vadd.f32 0.5, %v1360_v52 }
 0x47f   : > { %v2346_v45 = vadd.f32 %v4817_v54, %v2345_v16  ;;  %v5432_v16 = vld [vmem:[#allocation15_spill] sm:$0xff] }
 0x480   : > { %v1302_v59 = vmul.f32 0.5, %v5432_v16 }
 0x481   : > { %v2395_v56 = vadd.f32 %v2346_v45, %v2142_v36  ;;  %v1467_v17 = vpop.permute.xlu2 %1466  ;;  %1458 = vrot.lane.b32.xlu1 %v1386_v38, %s3863_s17  ;;  %1504 = vrot.lane.b32.xlu0 %v1409_v23, %s3863_s17  ;;  %v3670_v45 = vpop.eup %3669 }
 0x482   : > { %v4885_v48 = vmul.f32 %v3664_v43, %v1467_v17  ;;  %v3672_v38 = vpop.eup %3671  ;;  %3673 = vtanh.f32 %v1302_v59  ;;  %v1363_v23 = vmul.f32 0.5, %v3670_v45  ;;  %v5433_v43 = vld [vmem:[#allocation16_spill] sm:$0xff]  ;;  %v2073_v59 = vld [vmem:[%s4493_s24 + $0xb8] sm:$0xff] }
 0x483   : > { %2459 = vst.msk [vmem:[%s4525_s18 + $0xa0] sm:$0xff] %vm833_vm0, %v2395_v56  ;;  %v2682_v51 = vsel %vm833_vm0, %v2395_v56, 0.0  ;;  %v2733_v7 = vmul.f32 %v2395_v56, %v2395_v56  ;;  %3675 = vtanh.f32 %v4247_v4  ;;  %v1305_v56 = vmul.f32 0.5, %v5433_v43 }
 0x484   : > { %v2683_v55 = vadd.f32 %v2682_v51, %v2681_v30  ;;  %2419 = vst.msk [vmem:[%s4804_s20 + $0x60] sm:$0xff] %vm833_vm0, %v4885_v48  ;;  %v1395_v17 = vadd.f32 0.5, %v1363_v23 }
 0x485   : > { %v2784_v20 = vsel %vm833_vm0, %v2733_v7, 0.0  ;;  %3677 = vtanh.f32 %v1305_v56 }
 0x486   : > { %v2785_v42 = vadd.f32 %v2784_v20, %v2783_v62  ;;  %v2347_v0 = vpop.f32.mrf.mxu3  ;;  %3679 = vtanh.f32 %v4322_v27  ;;  %v2072_v20 = vld [vmem:[%s4493_s24 + $0xb0] sm:$0xff] }
 0x487   : > { %v2348_v57 = vadd.f32 %v4817_v54, %v2347_v0  ;;  %3681 = vtanh.f32 %v4091_v1  ;;  %v2108_v27 = vmul.f32 %v4825_v49, %v2072_v20 }
 0x488   : > { %v3674_v10 = vpop.eup %3673 }
 0x489   : > { %v2396_v37 = vadd.f32 %v2348_v57, %v2143_v18  ;;  %v1473_v9 = vpop.permute.xlu2 %1472  ;;  %1464 = vrot.lane.b32.xlu1 %v1389_v63, %s3863_s17  ;;  %v3676_v51 = vpop.eup %3675  ;;  %v5434_v18 = vld [vmem:[#allocation17_spill] sm:$0xff] }
 0x48a   : > { %v4900_v13 = vmul.f32 %v3668_v35, %v1473_v9  ;;  %v2541_v9 = vmul.f32 %v4796_v44, %v4796_v44 }
 0x48b   : > { %2460 = vst.msk [vmem:[%s4525_s18 + $0xa8] sm:$0xff] %vm833_vm0, %v2396_v37  ;;  %v2684_v26 = vsel %vm833_vm0, %v2396_v37, 0.0  ;;  %v2734_v30 = vmul.f32 %v2396_v37, %v2396_v37  ;;  %v3678_v0 = vpop.eup %3677 }
 0x48c   : > { %v4906_v29 = vadd.f32 %v2684_v26, %v2683_v55  ;;  %2422 = vst.msk [vmem:[%s4804_s20 + $0x78] sm:$0xff] %vm833_vm0, %v4900_v13  ;;  %v1366_v55 = vmul.f32 0.5, %v3674_v10  ;;  %v3680_v57 = vpop.eup %3679  ;;  %v1369_v35 = vmul.f32 0.5, %v3678_v0 }
 0x48d   : > { %v2786_v36 = vsel %vm833_vm0, %v2734_v30, 0.0  ;;  %v3682_v1 = vpop.eup %3681  ;;  %v2144_v30 = vadd.f32 %v4842_v24, %v2108_v27 }
 0x48e   : > { %v4912_v62 = vadd.f32 %v2786_v36, %v2785_v42  ;;  %v1308_v42 = vmul.f32 0.5, %v5434_v18  ;;  %v1398_v47 = vadd.f32 0.5, %v1366_v55  ;;  %v1401_v36 = vadd.f32 0.5, %v1369_v35 }
 0x490   : > { %3683 = vtanh.f32 %v1308_v42 }
 0x491   : > { %v1479_v11 = vpop.permute.xlu2 %1478  ;;  %1470 = vrot.lane.b32.xlu1 %v1392_v61, %s3863_s17  ;;  %3685 = vtanh.f32 %v4343_v8  ;;  %v1311_v61 = vmul.f32 0.5, %v4367_v40  ;;  %v2471_v8 = vsel %vm833_vm0, %v4796_v44, 0.0  ;;  %v2109_v44 = vmul.f32 %v4825_v49, %v2073_v59 }
 0x492   : > { %v4916_v28 = vmul.f32 %v3672_v38, %v1479_v11  ;;  %3687 = vtanh.f32 %v4111_v22  ;;  %v2573_v22 = vsel %vm833_vm0, %v2541_v9, 0.0 }
 0x493   : > { %3689 = vtanh.f32 %v1311_v61 }
 0x494   : > { %2425 = vst.msk [vmem:[%s4804_s20 + $0x90] sm:$0xff] %vm833_vm0, %v4916_v28  ;;  %3691 = vtanh.f32 %v4416_v5 }
 0x495   : > { %3693 = vtanh.f32 %v4128_v39 }
 0x496   : > { %v3684_v23 = vpop.eup %3683  ;;  %3695 = vtanh.f32 %v4145_v58 }
 0x497   : > { %v1372_v0 = vmul.f32 0.5, %v3684_v23  ;;  %3697 = vtanh.f32 %v4164_v19 }
 0x498   : > { %3699 = vtanh.f32 %v4208_v6 }
 0x499   : > { %v1485_v7 = vpop.permute.xlu2 %1484  ;;  %1476 = vrot.lane.b32.xlu1 %v1395_v17, %s3863_s17  ;;  %v3686_v17 = vpop.eup %3685  ;;  %3701 = vtanh.f32 %v4225_v31 }
 0x49a   : > { %v4924_v50 = vmul.f32 %v3676_v51, %v1485_v7  ;;  %3703 = vtanh.f32 %v4306_v53 }
 0x49b   : > { %v2223_v4 = vpop.permute.xlu0 %2222  ;;  %3705 = vtanh.f32 %v4103_v15 }
 0x49c   : > { %2428 = vst.msk [vmem:[%s4804_s20 + $0xa8] sm:$0xff] %vm833_vm0, %v4924_v50  ;;  %3356 = vmatmul.msk.bf16.gmra.mxu3 %vm833_vm0, %v2223_v4  ;;  %3707 = vtanh.f32 %v4325_v34 }
 0x49d   : > { %3709 = vtanh.f32 %v4114_v25 }
 0x49e   : > { %3711 = vtanh.f32 %v4359_v21  ;;  %v2476_v21 = vsel %vm833_vm0, %v4828_v14, 0.0 }
 0x49f   : > { %3713 = vtanh.f32 %v4134_v46 }
 0x4a0   : > { %3715 = vtanh.f32 %v4419_v33 }
 0x4a1   : > { %v1491_v63 = vpop.permute.xlu2 %1490  ;;  %1482 = vrot.lane.b32.xlu1 %v1398_v47, %s3863_s17  ;;  %v3688_v47 = vpop.eup %3687  ;;  %3717 = vtanh.f32 %v4150_v2 }
 0x4a2   : > { %v4936_v60 = vmul.f32 %v3680_v57, %v1491_v63  ;;  %3719 = vtanh.f32 %v4179_v32 }
 0x4a3   : > { %v1445_v37 = vpop.permute.xlu0 %1444 }
 0x4a4   : > { %2431 = vst.msk [vmem:[%s4804_s20 + $0xc0] sm:$0xff] %vm833_vm0, %v4936_v60  ;;  %v1539_v26 = vmul.f32 %v3682_v1, %v1445_v37  ;;  %v2145_v1 = vadd.f32 %v4842_v24, %v2109_v44 }
 0x4a5   : > { %v2350_v52 = vpop.f32.mrf.mxu3 }
 0x4a6   : > { %2408 = vst.msk [vmem:[%s4804_s20 + $0x8] sm:$0xff] %vm833_vm0, %v1539_v26  ;;  %v2472_v45 = vsel %vm833_vm0, %v1539_v26, 0.0  ;;  %v2542_v38 = vmul.f32 %v1539_v26, %v1539_v26  ;;  %v2351_v11 = vadd.f32 %v4817_v54, %v2350_v52  ;;  %v3690_v26 = vpop.eup %3689  ;;  %3721 = vtanh.f32 %v5431_v3 }
 0x4a7   : > { %v4954_v56 = vadd.f32 %v2472_v45, %v2471_v8  ;;  %v1375_v61 = vmul.f32 0.5, %v3690_v26 }
 0x4a8   : > { %v2574_v10 = vsel %vm833_vm0, %v2542_v38, 0.0  ;;  %v2397_v51 = vadd.f32 %v2351_v11, %v2144_v30  ;;  %v3692_v30 = vpop.eup %3691  ;;  %3723 = vtanh.f32 %v5432_v16 }
 0x4a9   : > { %v1497_v7 = vpop.permute.xlu2 %1496  ;;  %1488 = vrot.lane.b32.xlu1 %v1401_v36, %s3863_s17  ;;  %v4960_v55 = vadd.f32 %v2574_v10, %v2573_v22  ;;  %v3694_v8 = vpop.eup %3693  ;;  %v1407_v22 = vadd.f32 0.5, %v1375_v61  ;;  %3725 = vtanh.f32 %v5433_v43 }
 0x4aa   : > { %v4962_v4 = vmul.f32 %v3686_v17, %v1497_v7  ;;  %2461 = vst.msk [vmem:[%s4525_s18 + $0xb0] sm:$0xff] %vm833_vm0, %v2397_v51  ;;  %v2686_v20 = vsel %vm833_vm0, %v2397_v51, 0.0  ;;  %v2735_v42 = vmul.f32 %v2397_v51, %v2397_v51  ;;  %v3696_v10 = vpop.eup %3695  ;;  %3727 = vtanh.f32 %v5434_v18 }
 0x4ab   : > { %v2687_v57 = vadd.f32 %v2686_v20, %v4906_v29  ;;  %v1451_v63 = vpop.permute.xlu0 %1450  ;;  %v1404_v29 = vadd.f32 0.5, %v1372_v0  ;;  %v3698_v44 = vpop.eup %3697  ;;  %3729 = vtanh.f32 %v4367_v40 }
 0x4ac   : > { %2434 = vst.msk [vmem:[%s4804_s20 + $0xd8] sm:$0xff] %vm833_vm0, %v4962_v4  ;;  %v2788_v27 = vsel %vm833_vm0, %v2735_v42, 0.0  ;;  %v4973_v35 = vmul.f32 %v3688_v47, %v1451_v63  ;;  %v2074_v42 = vld [vmem:[%s4493_s24 + $0xc0] sm:$0xff]  ;;  %v3700_v47 = vpop.eup %3699 }
 0x4ad   : > { %v2789_v37 = vadd.f32 %v2788_v27, %v4912_v62  ;;  %v2352_v9 = vpop.f32.mrf.mxu3  ;;  %v2110_v0 = vmul.f32 %v4825_v49, %v2074_v42  ;;  %v2075_v27 = vld [vmem:[%s4493_s24 + $0xc8] sm:$0xff] }
 0x4ae   : > { %2411 = vst.msk [vmem:[%s4804_s20 + $0x20] sm:$0xff] %vm833_vm0, %v4973_v35  ;;  %v2353_v5 = vadd.f32 %v4817_v54, %v2352_v9  ;;  %v2111_v9 = vmul.f32 %v4825_v49, %v2075_v27 }
 0x4af   : > { %v2146_v63 = vadd.f32 %v4842_v24, %v2110_v0 }
 0x4b0   : > { %v2398_v52 = vadd.f32 %v2353_v5, %v2145_v1  ;;  %v3702_v5 = vpop.eup %3701 }
 0x4b1   : > { %v1503_v36 = vpop.permute.xlu2 %1502  ;;  %1494 = vrot.lane.b32.xlu1 %v1404_v29, %s3863_s17 }
 0x4b2   : > { %v4983_v59 = vmul.f32 %v3692_v30, %v1503_v36  ;;  %2462 = vst.msk [vmem:[%s4525_s18 + $0xb8] sm:$0xff] %vm833_vm0, %v2398_v52  ;;  %v2688_v39 = vsel %vm833_vm0, %v2398_v52, 0.0  ;;  %v2736_v62 = vmul.f32 %v2398_v52, %v2398_v52 }
 0x4b3   : > { %v2689_v45 = vadd.f32 %v2688_v39, %v2687_v57  ;;  %v1457_v38 = vpop.permute.xlu0 %1456  ;;  %v2147_v39 = vadd.f32 %v4842_v24, %v2111_v9 }
 0x4b4   : > { %2437 = vst.msk [vmem:[%s4804_s20 + $0xf0] sm:$0xff] %vm833_vm0, %v4983_v59  ;;  %v2790_v11 = vsel %vm833_vm0, %v2736_v62, 0.0  ;;  %v4992_v23 = vmul.f32 %v3694_v8, %v1457_v38  ;;  %v2076_v8 = vld [vmem:[%s4493_s24 + $0xd0] sm:$0xff] }
 0x4b5   : > { %v2791_v17 = vadd.f32 %v2790_v11, %v2789_v37 }
 0x4b6   : > { %2414 = vst.msk [vmem:[%s4804_s20 + $0x38] sm:$0xff] %vm833_vm0, %v4992_v23 }
 0x4b9   : > { %1500 = vrot.lane.b32.xlu1 %v1407_v22, %s3863_s17  ;;  %s3416_s17 = sshll.u32 %s3967_s22, 8 }
 0x4ba   : > { %s2850_s30 = scalar_lea.hbm %s5388_s10, %s3416_s17 }
 0x4bb   : > { %v1463_v51 = vpop.permute.xlu0 %1462  ;;  %s2853_s29 = sshll.u32 %s2850_s30, 4  ;;  %s5250_s29 = int_to_ptr.hbm [resolvable:$true] %s2853_s29 }
 0x4bc   : > { %v4999_v7 = vmul.f32 %v3696_v10, %v1463_v51  ;;  %v2112_v10 = vmul.f32 %v4825_v49, %v2076_v8  ;;  %s3752_s27 = sshra.s32 %s5250_s29, 4  ;;  %s3753_s27 = int_to_ptr.hbm [resolvable:$true] %s3752_s27 }
 0x4bd   : > { %s3754_s30 = scalar_lea.hbm %s3753_s27, 256  ;;  %p3759_p0 = scmp.lt.s32.totalorder %s3753_s27, %s5388_s10 }
 0x4be   : > { %2417 = vst.msk [vmem:[%s4804_s20 + $0x50] sm:$0xff] %vm833_vm0, %v4999_v7  ;;  %v2148_v0 = vadd.f32 %v4842_v24, %v2112_v10  ;;  %p3755_p11 = scmp.ne.s32.totalorder %s3753_s27, %s3754_s30  ;;  %p3760_p1 = scmp.lt.s32.totalorder %s3758_s0, %s3754_s30 }
 0x4c0   : > { %p3756_p12 = pnand %p3755_p11, %p3986_p5  ;;  %p3761_p2 = por %p3760_p1, %p3759_p0 }
 0x4c2   : > { %p3757_p13 = pneg %p3756_p12 }
 0x4c3   : > { %v1469_v20 = vpop.permute.xlu0 %1468 }
 0x4c4   : > { %v5005_v58 = vmul.f32 %v3698_v44, %v1469_v20  ;;  %p3762_p3 = pnand %p3761_p2, %p3757_p13 }
 0x4c6   : > { %2420 = vst.msk [vmem:[%s4804_s20 + $0x68] sm:$0xff] %vm833_vm0, %v5005_v58 }
 0x4cb   : > { %v1475_v57 = vpop.permute.xlu0 %1474 }
 0x4cc   : > { %v5013_v19 = vmul.f32 %v3700_v47, %v1475_v57 }
 0x4ce   : > { %2423 = vst.msk [vmem:[%s4804_s20 + $0x80] sm:$0xff] %vm833_vm0, %v5013_v19 }
 0x4d0   : > { %v2355_v6 = vpop.f32.mrf.mxu3 }
 0x4d1   : > { %v2356_v1 = vadd.f32 %v4817_v54, %v2355_v6 }
 0x4d3   : > { %v2399_v37 = vadd.f32 %v2356_v1, %v2146_v63  ;;  %v1481_v29 = vpop.permute.xlu0 %1480  ;;  %v2077_v63 = vld [vmem:[%s4493_s24 + $0xd8] sm:$0xff] }
 0x4d4   : > { %v5026_v30 = vmul.f32 %v3702_v5, %v1481_v29 }
 0x4d5   : > { %2463 = vst.msk [vmem:[%s4525_s18 + $0xc0] sm:$0xff] %vm833_vm0, %v2399_v37  ;;  %v2690_v31 = vsel %vm833_vm0, %v2399_v37, 0.0  ;;  %v2737_v26 = vmul.f32 %v2399_v37, %v2399_v37  ;;  %v2113_v37 = vmul.f32 %v4825_v49, %v2077_v63 }
 0x4d6   : > { %v2691_v52 = vadd.f32 %v2690_v31, %v2689_v45  ;;  %2426 = vst.msk [vmem:[%s4804_s20 + $0x98] sm:$0xff] %vm833_vm0, %v5026_v30  ;;  %v3704_v45 = vpop.eup %3703 }
 0x4d7   : > { %v2792_v36 = vsel %vm833_vm0, %v2737_v26, 0.0  ;;  %v3706_v27 = vpop.eup %3705  ;;  %v2149_v8 = vadd.f32 %v4842_v24, %v2113_v37  ;;  %v2547_v37 = vmul.f32 %v4852_v12, %v4852_v12 }
 0x4d8   : > { %v2793_v62 = vadd.f32 %v2792_v36, %v2791_v17  ;;  %v2357_v61 = vpop.f32.mrf.mxu3  ;;  %v3708_v34 = vpop.eup %3707 }
 0x4d9   : > { %v2358_v38 = vadd.f32 %v4817_v54, %v2357_v61 }
 0x4db   : > { %v2400_v11 = vadd.f32 %v2358_v38, %v2147_v39  ;;  %v2225_v22 = vpop.permute.xlu1 %2224  ;;  %v1487_v53 = vpop.permute.xlu0 %1486  ;;  %v2545_v38 = vmul.f32 %v4973_v35, %v4973_v35 }
 0x4dc   : > { %3357 = vmatmul.msk.bf16.gmra.mxu3 %vm833_vm0, %v2225_v22  ;;  %v5041_v17 = vmul.f32 %v3704_v45, %v1487_v53 }
 0x4dd   : > { %2464 = vst.msk [vmem:[%s4525_s18 + $0xc8] sm:$0xff] %vm833_vm0, %v2400_v11  ;;  %v2692_v51 = vsel %vm833_vm0, %v2400_v11, 0.0  ;;  %v2738_v44 = vmul.f32 %v2400_v11, %v2400_v11  ;;  %v2580_v63 = vsel %vm833_vm0, %v2545_v38, 0.0 }
 0x4de   : > { %v2693_v20 = vadd.f32 %v2692_v51, %v2691_v52  ;;  %2429 = vst.msk [vmem:[%s4804_s20 + $0xb0] sm:$0xff] %vm833_vm0, %v5041_v17  ;;  %v2544_v52 = vmul.f32 %v4828_v14, %v4828_v14  ;;  %v3710_v51 = vpop.eup %3709 }
 0x4df   : > { %v2794_v42 = vsel %vm833_vm0, %v2738_v44, 0.0  ;;  %v3712_v14 = vpop.eup %3711 }
 0x4e0   : > { %v2795_v47 = vadd.f32 %v2794_v42, %v2793_v62  ;;  %v2360_v57 = vpop.f32.mrf.mxu3  ;;  %v2578_v44 = vsel %vm833_vm0, %v2544_v52, 0.0 }
 0x4e1   : > { %v2361_v6 = vadd.f32 %v4817_v54, %v2360_v57 }
 0x4e3   : > { %v2401_v1 = vadd.f32 %v2361_v6, %v2148_v0  ;;  %v1447_v15 = vpop.permute.xlu1 %1446  ;;  %v1493_v5 = vpop.permute.xlu0 %1492 }
 0x4e4   : > { %v1540_v9 = vmul.f32 %v3706_v27, %v1447_v15  ;;  %v5057_v26 = vmul.f32 %v3708_v34, %v1493_v5 }
 0x4e5   : > { %2465 = vst.msk [vmem:[%s4525_s18 + $0xd0] sm:$0xff] %vm833_vm0, %v2401_v1  ;;  %v2694_v29 = vsel %vm833_vm0, %v2401_v1, 0.0  ;;  %v2739_v31 = vmul.f32 %v2401_v1, %v2401_v1 }
 0x4e6   : > { %v2695_v36 = vadd.f32 %v2694_v29, %v2693_v20  ;;  %2409 = vst.msk [vmem:[%s4804_s20 + $0x10] sm:$0xff] %vm833_vm0, %v1540_v9  ;;  %v2474_v39 = vsel %vm833_vm0, %v1540_v9, 0.0  ;;  %v2543_v62 = vmul.f32 %v1540_v9, %v1540_v9  ;;  %v2478_v20 = vsel %vm833_vm0, %v4973_v35, 0.0 }
 0x4e7   : > { %v2796_v25 = vsel %vm833_vm0, %v2739_v31, 0.0  ;;  %v2475_v61 = vadd.f32 %v2474_v39, %v4954_v56  ;;  %2432 = vst.msk [vmem:[%s4804_s20 + $0xc8] sm:$0xff] %vm833_vm0, %v5057_v26  ;;  %v2482_v29 = vsel %vm833_vm0, %v4852_v12, 0.0  ;;  %v2548_v31 = vmul.f32 %v4992_v23, %v4992_v23  ;;  %v3714_v39 = vpop.eup %3713 }
 0x4e8   : > { %v2797_v11 = vadd.f32 %v2796_v25, %v2795_v47  ;;  %v2576_v22 = vsel %vm833_vm0, %v2543_v62, 0.0  ;;  %v2362_v10 = vpop.f32.mrf.mxu3 }
 0x4e9   : > { %v2477_v45 = vadd.f32 %v2476_v21, %v2475_v61  ;;  %v2577_v53 = vadd.f32 %v2576_v22, %v4960_v55  ;;  %v2363_v56 = vadd.f32 %v4817_v54, %v2362_v10  ;;  %v3716_v61 = vpop.eup %3715  ;;  %v2484_v21 = vsel %vm833_vm0, %v4992_v23, 0.0 }
 0x4ea   : > { %v2586_v10 = vsel %vm833_vm0, %v2548_v31, 0.0 }
 0x4eb   : > { %v2579_v42 = vadd.f32 %v2578_v44, %v2577_v53  ;;  %v2402_v0 = vadd.f32 %v2363_v56, %v2149_v8  ;;  %v1453_v47 = vpop.permute.xlu1 %1452  ;;  %v2479_v57 = vadd.f32 %v2478_v20, %v2477_v45  ;;  %v1499_v6 = vpop.permute.xlu0 %1498  ;;  %v2584_v8 = vsel %vm833_vm0, %v2547_v37, 0.0 }
 0x4ec   : > { %v1543_v55 = vmul.f32 %v3710_v51, %v1453_v47  ;;  %v5087_v15 = vmul.f32 %v3712_v14, %v1499_v6  ;;  %v2550_v51 = vmul.f32 %v4868_v41, %v4868_v41  ;;  %v2488_v14 = vsel %vm833_vm0, %v4868_v41, 0.0 }
 0x4ed   : > { %2466 = vst.msk [vmem:[%s4525_s18 + $0xd8] sm:$0xff] %vm833_vm0, %v2402_v0  ;;  %v2696_v27 = vsel %vm833_vm0, %v2402_v0, 0.0  ;;  %v2740_v35 = vmul.f32 %v2402_v0, %v2402_v0  ;;  %v2581_v1 = vadd.f32 %v2580_v63, %v2579_v42  ;;  %v2551_v42 = vmul.f32 %v4999_v7, %v4999_v7 }
 0x4ee   : > { %v5091_v34 = vadd.f32 %v2696_v27, %v2695_v36  ;;  %2412 = vst.msk [vmem:[%s4804_s20 + $0x28] sm:$0xff] %vm833_vm0, %v1543_v55  ;;  %v2480_v46 = vsel %vm833_vm0, %v1543_v55, 0.0  ;;  %v2546_v9 = vmul.f32 %v1543_v55, %v1543_v55  ;;  %v2490_v63 = vsel %vm833_vm0, %v4999_v7, 0.0  ;;  %v3718_v55 = vpop.eup %3717 }
 0x4ef   : > { %v2798_v33 = vsel %vm833_vm0, %v2740_v35, 0.0  ;;  %v2481_v5 = vadd.f32 %v2480_v46, %v2479_v57  ;;  %2435 = vst.msk [vmem:[%s4804_s20 + $0xe0] sm:$0xff] %vm833_vm0, %v5087_v15  ;;  %v2590_v57 = vsel %vm833_vm0, %v2550_v51, 0.0  ;;  %v2553_v46 = vmul.f32 %v4885_v48, %v4885_v48 }
 0x4f0   : > { %v5104_v52 = vadd.f32 %v2798_v33, %v2797_v11  ;;  %v2582_v36 = vsel %vm833_vm0, %v2546_v9, 0.0  ;;  %v2494_v7 = vsel %vm833_vm0, %v4885_v48, 0.0 }
 0x4f1   : > { %v2483_v62 = vadd.f32 %v2482_v29, %v2481_v5  ;;  %v2583_v25 = vadd.f32 %v2582_v36, %v2581_v1  ;;  %v2592_v1 = vsel %vm833_vm0, %v2551_v42, 0.0  ;;  %v2554_v29 = vmul.f32 %v5005_v58, %v5005_v58 }
 0x4f3   : > { %v2585_v38 = vadd.f32 %v2584_v8, %v2583_v25  ;;  %v1459_v12 = vpop.permute.xlu1 %1458  ;;  %v2485_v22 = vadd.f32 %v2484_v21, %v2483_v62  ;;  %v1505_v45 = vpop.permute.xlu0 %1504  ;;  %v2496_v62 = vsel %vm833_vm0, %v5005_v58, 0.0  ;;  %v2500_v58 = vsel %vm833_vm0, %v4900_v13, 0.0 }
 0x4f4   : > { %v1546_v11 = vmul.f32 %v3714_v39, %v1459_v12  ;;  %v5111_v56 = vmul.f32 %v3716_v61, %v1505_v45  ;;  %v2596_v39 = vsel %vm833_vm0, %v2553_v46, 0.0  ;;  %v3720_v25 = vpop.eup %3719  ;;  %v2508_v46 = vsel %vm833_vm0, %v5026_v30, 0.0 }
 0x4f5   : > { %v2587_v53 = vadd.f32 %v2586_v10, %v2585_v38  ;;  %v2598_v38 = vsel %vm833_vm0, %v2554_v29, 0.0 }
 0x4f6   : > { %2415 = vst.msk [vmem:[%s4804_s20 + $0x40] sm:$0xff] %vm833_vm0, %v1546_v11  ;;  %v2486_v44 = vsel %vm833_vm0, %v1546_v11, 0.0  ;;  %v2549_v23 = vmul.f32 %v1546_v11, %v1546_v11 }
 0x4f7   : > { %v2487_v20 = vadd.f32 %v2486_v44, %v2485_v22  ;;  %2438 = vst.msk [vmem:[%s4804_s20 + $0xf8] sm:$0xff] %vm833_vm0, %v5111_v56  ;;  %v2556_v22 = vmul.f32 %v4900_v13, %v4900_v13 }
 0x4f8   : > { %v2588_v2 = vsel %vm833_vm0, %v2549_v23, 0.0 }
 0x4f9   : > { %v2489_v0 = vadd.f32 %v2488_v14, %v2487_v20  ;;  %v2589_v47 = vadd.f32 %v2588_v2, %v2587_v53  ;;  %v2557_v53 = vmul.f32 %v5013_v19, %v5013_v19  ;;  %v2602_v23 = vsel %vm833_vm0, %v2556_v22, 0.0  ;;  %v3722_v14 = vpop.eup %3721 }
 0x4fa   : > { %v2502_v20 = vsel %vm833_vm0, %v5013_v19, 0.0  ;;  %v2506_v19 = vsel %vm833_vm0, %v4916_v28, 0.0 }
 0x4fb   : > { %v2591_v6 = vadd.f32 %v2590_v57, %v2589_v47  ;;  %v1465_v27 = vpop.permute.xlu1 %1464  ;;  %v2491_v35 = vadd.f32 %v2490_v63, %v2489_v0  ;;  %v2604_v47 = vsel %vm833_vm0, %v2557_v53, 0.0  ;;  %v2559_v63 = vmul.f32 %v4916_v28, %v4916_v28 }
 0x4fc   : > { %v1549_v41 = vmul.f32 %v3718_v55, %v1465_v27 }
 0x4fd   : > { %v2593_v37 = vadd.f32 %v2592_v1, %v2591_v6 }
 0x4fe   : > { %2418 = vst.msk [vmem:[%s4804_s20 + $0x58] sm:$0xff] %vm833_vm0, %v1549_v41  ;;  %v2492_v9 = vsel %vm833_vm0, %v1549_v41, 0.0  ;;  %v2552_v33 = vmul.f32 %v1549_v41, %v1549_v41 }
 0x4ff   : > { %v2493_v5 = vadd.f32 %v2492_v9, %v2491_v35  ;;  %v2560_v35 = vmul.f32 %v5026_v30, %v5026_v30  ;;  %v3724_v9 = vpop.eup %3723 }
 0x500   : > { %v2594_v31 = vsel %vm833_vm0, %v2552_v33, 0.0 }
 0x501   : > { %v2495_v36 = vadd.f32 %v2494_v7, %v2493_v5  ;;  %v2595_v32 = vadd.f32 %v2594_v31, %v2593_v37  ;;  %v2608_v37 = vsel %vm833_vm0, %v2559_v63, 0.0  ;;  %v2610_v28 = vsel %vm833_vm0, %v2560_v35, 0.0 }
 0x502   : > { %v2520_v63 = vsel %vm833_vm0, %v5057_v26, 0.0 }
 0x503   : > { %v2597_v61 = vadd.f32 %v2596_v39, %v2595_v32  ;;  %v1471_v8 = vpop.permute.xlu1 %1470  ;;  %v2497_v21 = vadd.f32 %v2496_v62, %v2495_v36  ;;  %v2562_v36 = vmul.f32 %v4924_v50, %v4924_v50  ;;  %v2512_v62 = vsel %vm833_vm0, %v4924_v50, 0.0 }
 0x504   : > { %v1552_v48 = vmul.f32 %v3720_v25, %v1471_v8  ;;  %v2563_v25 = vmul.f32 %v5041_v17, %v5041_v17  ;;  %v2078_v8 = vld [vmem:[%s4493_s24 + $0xe0] sm:$0xff] }
 0x505   : > { %v2599_v12 = vadd.f32 %v2598_v38, %v2597_v61  ;;  %v2614_v38 = vsel %vm833_vm0, %v2562_v36, 0.0  ;;  %v2114_v50 = vmul.f32 %v4825_v49, %v2078_v8 }
 0x506   : > { %2421 = vst.msk [vmem:[%s4804_s20 + $0x70] sm:$0xff] %vm833_vm0, %v1552_v48  ;;  %v2498_v10 = vsel %vm833_vm0, %v1552_v48, 0.0  ;;  %v2555_v11 = vmul.f32 %v1552_v48, %v1552_v48  ;;  %v2514_v48 = vsel %vm833_vm0, %v5041_v17, 0.0 }
 0x507   : > { %v2499_v45 = vadd.f32 %v2498_v10, %v2497_v21 }
 0x508   : > { %v2600_v51 = vsel %vm833_vm0, %v2555_v11, 0.0 }
 0x509   : > { %v2501_v44 = vadd.f32 %v2500_v58, %v2499_v45  ;;  %v2601_v3 = vadd.f32 %v2600_v51, %v2599_v12  ;;  %v3726_v12 = vpop.eup %3725  ;;  %v2616_v45 = vsel %vm833_vm0, %v2563_v25, 0.0  ;;  %v2565_v51 = vmul.f32 %v4936_v60, %v4936_v60 }
 0x50b   : > { %v2603_v42 = vadd.f32 %v2602_v23, %v2601_v3  ;;  %v1477_v2 = vpop.permute.xlu1 %1476  ;;  %v2503_v0 = vadd.f32 %v2502_v20, %v2501_v44  ;;  %v2150_v23 = vadd.f32 %v4842_v24, %v2114_v50  ;;  %v2518_v20 = vsel %vm833_vm0, %v4936_v60, 0.0 }
 0x50c   : > { %v1555_v13 = vmul.f32 %v3722_v14, %v1477_v2  ;;  %v2566_v14 = vmul.f32 %v5057_v26, %v5057_v26  ;;  %v2079_v2 = vld [vmem:[%s4493_s24 + $0xe8] sm:$0xff]  ;;  %v2568_v26 = vmul.f32 %v4962_v4, %v4962_v4 }
 0x50d   : > { %v2605_v57 = vadd.f32 %v2604_v47, %v2603_v42  ;;  %v2115_v35 = vmul.f32 %v4825_v49, %v2079_v2 }
 0x50e   : > { %2424 = vst.msk [vmem:[%s4804_s20 + $0x88] sm:$0xff] %vm833_vm0, %v1555_v13  ;;  %v2504_v55 = vsel %vm833_vm0, %v1555_v13, 0.0  ;;  %v2558_v6 = vmul.f32 %v1555_v13, %v1555_v13 }
 0x50f   : > { %v2505_v27 = vadd.f32 %v2504_v55, %v2503_v0  ;;  %v3728_v55 = vpop.eup %3727  ;;  %v2151_v40 = vadd.f32 %v4842_v24, %v2115_v35 }
 0x510   : > { %v2606_v1 = vsel %vm833_vm0, %v2558_v6, 0.0 }
 0x511   : > { %v2507_v41 = vadd.f32 %v2506_v19, %v2505_v27  ;;  %v2607_v16 = vadd.f32 %v2606_v1, %v2605_v57  ;;  %v2620_v57 = vsel %vm833_vm0, %v2565_v51, 0.0  ;;  %v2622_v1 = vsel %vm833_vm0, %v2566_v14, 0.0 }
 0x513   : > { %v2609_v33 = vadd.f32 %v2608_v37, %v2607_v16  ;;  %v1483_v5 = vpop.permute.xlu1 %1482  ;;  %v2509_v7 = vadd.f32 %v2508_v46, %v2507_v41 }
 0x514   : > { %v1558_v29 = vmul.f32 %v3724_v9, %v1483_v5 }
 0x515   : > { %v2611_v31 = vadd.f32 %v2610_v28, %v2609_v33 }
 0x516   : > { %2427 = vst.msk [vmem:[%s4804_s20 + $0xa0] sm:$0xff] %vm833_vm0, %v1558_v29  ;;  %v2510_v32 = vsel %vm833_vm0, %v1558_v29, 0.0  ;;  %v2561_v39 = vmul.f32 %v1558_v29, %v1558_v29 }
 0x517   : > { %v2511_v30 = vadd.f32 %v2510_v32, %v2509_v7  ;;  %v2524_v7 = vsel %vm833_vm0, %v4962_v4, 0.0  ;;  %v5240_v32 = vld [vmem:[%s5387_s9] ss:$0 sm:$0xff]  ;;  %v2626_v4 = vsel %vm833_vm0, %v2568_v26, 0.0 }
 0x518   : > { %v2612_v61 = vsel %vm833_vm0, %v2561_v39, 0.0  ;;  %v3730_v39 = vpop.eup %3729 }
 0x519   : > { %v2513_v43 = vadd.f32 %v2512_v62, %v2511_v30  ;;  %v2613_v21 = vadd.f32 %v2612_v61, %v2611_v31  ;;  %v2526_v61 = vsel %vm833_vm0, %v5087_v15, 0.0 }
 0x51b   : > { %v2615_v22 = vadd.f32 %v2614_v38, %v2613_v21  ;;  %v1489_v10 = vpop.permute.xlu1 %1488  ;;  %v2515_v11 = vadd.f32 %v2514_v48, %v2513_v43  ;;  %v2571_v21 = vmul.f32 %v4983_v59, %v4983_v59 }
 0x51c   : > { %v1561_v58 = vmul.f32 %v3726_v12, %v1489_v10 }
 0x51d   : > { %v2617_v53 = vadd.f32 %v2616_v45, %v2615_v22 }
 0x51e   : > { %2430 = vst.msk [vmem:[%s4804_s20 + $0xb8] sm:$0xff] %vm833_vm0, %v1561_v58  ;;  %v2516_v17 = vsel %vm833_vm0, %v1561_v58, 0.0  ;;  %v2564_v44 = vmul.f32 %v1561_v58, %v1561_v58 }
 0x51f   : > { %v2517_v3 = vadd.f32 %v2516_v17, %v2515_v11  ;;  %v2365_v42 = vpop.f32.mrf.mxu3 }
 0x520   : > { %v2618_v18 = vsel %vm833_vm0, %v2564_v44, 0.0  ;;  %v2366_v13 = vadd.f32 %v4817_v54, %v2365_v42 }
 0x521   : > { %v2519_v0 = vadd.f32 %v2518_v20, %v2517_v3  ;;  %v2619_v47 = vadd.f32 %v2618_v18, %v2617_v53 }
 0x522   : > { %v2403_v6 = vadd.f32 %v2366_v13, %v2150_v23 }
 0x523   : > { %v2621_v60 = vadd.f32 %v2620_v57, %v2619_v47  ;;  %v1495_v27 = vpop.permute.xlu1 %1494  ;;  %v2521_v19 = vadd.f32 %v2520_v63, %v2519_v0 }
 0x524   : > { %v1564_v41 = vmul.f32 %v3728_v55, %v1495_v27  ;;  %2467 = vst.msk [vmem:[%s4525_s18 + $0xe0] sm:$0xff] %vm833_vm0, %v2403_v6  ;;  %v2698_v54 = vsel %vm833_vm0, %v2403_v6, 0.0  ;;  %v2741_v16 = vmul.f32 %v2403_v6, %v2403_v6 }
 0x525   : > { %v2623_v37 = vadd.f32 %v2622_v1, %v2621_v60  ;;  %v5223_v49 = vadd.f32 %v2698_v54, %v5091_v34 }
 0x526   : > { %2433 = vst.msk [vmem:[%s4804_s20 + $0xd0] sm:$0xff] %vm833_vm0, %v1564_v41  ;;  %v2522_v46 = vsel %vm833_vm0, %v1564_v41, 0.0  ;;  %v2567_v9 = vmul.f32 %v1564_v41, %v1564_v41  ;;  %v2800_v33 = vsel %vm833_vm0, %v2741_v16, 0.0 }
 0x527   : > { %v2523_v5 = vadd.f32 %v2522_v46, %v2521_v19  ;;  %v5233_v28 = vadd.f32 %v2800_v33, %v5104_v52  ;;  %v2367_v34 = vpop.f32.mrf.mxu3  ;;  %v2569_v52 = vmul.f32 %v5087_v15, %v5087_v15 }
 0x528   : > { %v2624_v29 = vsel %vm833_vm0, %v2567_v9, 0.0  ;;  %v2368_v24 = vadd.f32 %v5240_v32, %v2367_v34 }
 0x529   : > { %v2525_v31 = vadd.f32 %v2524_v7, %v2523_v5  ;;  %v2625_v36 = vadd.f32 %v2624_v29, %v2623_v37  ;;  %v2628_v38 = vsel %vm833_vm0, %v2569_v52, 0.0 }
 0x52a   : > { %v5246_v62 = vadd.f32 %v2368_v24, %v2151_v40 }
 0x52b   : > { %v2627_v30 = vadd.f32 %v2626_v4, %v2625_v36  ;;  %v1501_v25 = vpop.permute.xlu1 %1500  ;;  %v2527_v43 = vadd.f32 %v2526_v61, %v2525_v31 }
 0x52c   : > { %v1567_v8 = vmul.f32 %v3730_v39, %v1501_v25  ;;  %2468 = vst.msk [vmem:[%s4525_s18 + $0xe8] sm:$0xff] %vm833_vm0, %v5246_v62 }
 0x52d   : > { %v2629_v10 = vadd.f32 %v2628_v38, %v2627_v30 }
 0x52e   : > { %2436 = vst.msk [vmem:[%s4804_s20 + $0xe8] sm:$0xff] %vm833_vm0, %v1567_v8  ;;  %v2528_v48 = vsel %vm833_vm0, %v1567_v8, 0.0  ;;  %v2570_v12 = vmul.f32 %v1567_v8, %v1567_v8 }
 0x52f   : > { %v2529_v22 = vadd.f32 %v2528_v48, %v2527_v43 }
 0x530   : > { %3765 = shalt.err (!%p3762_p3)
}
 0x531   : > { %s3864_s20 = smov 128   ;;  %s3865_s5 = smov 8   ;;  %v2530_v15 = vsel %vm833_vm0, %v4983_v59, 0.0  ;;  %v2572_v11 = vmul.f32 %v5111_v56, %v5111_v56  ;;  %v2630_v50 = vsel %vm833_vm0, %v2570_v12, 0.0  ;;  %v2632_v53 = vsel %vm833_vm0, %v2571_v21, 0.0 }
 0x532   : > { %3417 = dma.vmem_to_hbm [thread:$0]  (%p3986_p5), %s5248_s16, 4096, %s5250_s29, %s2816_s23, %s3864_s20, %s3864_s20, %s3865_s5   ;;  %v2531_v45 = vadd.f32 %v2530_v15, %v2529_v22  ;;  %v2631_v58 = vadd.f32 %v2630_v50, %v2629_v10  ;;  %v2532_v51 = vsel %vm833_vm0, %v5111_v56, 0.0 }
 0x533   : > { %v2634_v3 = vsel %vm833_vm0, %v2572_v11, 0.0  ;;  %s3363_s0 = sshll.u32 %s3967_s22, 3  ;;  %s3107_s1 = sshll.u32 %s4784_s25, 3 }
 0x534   : > { %v2533_v17 = vadd.f32 %v2532_v51, %v2531_v45  ;;  %v2633_v44 = vadd.f32 %v2632_v53, %v2631_v58  ;;  %s2870_s16 = scalar_lea.hbm %s5390_s12, %s3363_s0  ;;  %s2825_s29 = sand.u32 1, %s3967_s22  }
 0x535   : > { %s2884_s30 = scalar_lea.hbm %s5391_s13, %s3363_s0  ;;  %s524_s26 = scalar_lea.vmem [#allocation4], %s3107_s1 }
 0x536   : > { %v2534_v23 = vrot.slane %v2533_v17, 4  ;;  %v2635_v20 = vadd.f32 %v2634_v3, %v2633_v44  ;;  %s2872_s17 = sshll.u32 %s524_s26, 4  ;;  %s2874_s20 = sshll.u32 %s2870_s16, 4  ;;  %s2873_s17 = int_to_ptr.vmem [resolvable:$true] %s2872_s17  ;;  %s2875_s20 = int_to_ptr.hbm [resolvable:$true] %s2874_s20 }
 0x537   : > { %s531_s6 = scalar_lea.vmem [#allocation6], %s3107_s1  ;;  %s2888_s7 = sshll.u32 %s2884_s30, 4  ;;  %s5298_s7 = int_to_ptr.hbm [resolvable:$true] %s2888_s7 }
 0x538   : > { %v2636_v59 = vrot.slane %v2635_v20, 4  ;;  %v2535_v14 = vadd.f32 %v2534_v23, %v2533_v17  ;;  %s2886_s25 = sshll.u32 %s531_s6, 4  ;;  %s2826_s0 = scalar_lea.sflag [#allocation5], %s2825_s29  ;;  %s5296_s25 = int_to_ptr.vmem [resolvable:$true] %s2886_s25 }
 0x539   : > { %s3780_s4 = sshra.s32 %s2875_s20, 4  ;;  %s3786_s23 = scalar_lea.hbm %s5390_s12, 16  ;;  %s3781_s4 = int_to_ptr.hbm [resolvable:$true] %s3780_s4 }
 0x53a   : > { %v2637_v18 = vadd.f32 %v2636_v59, %v2635_v20  ;;  %v2536_v42 = vrot.slane %v2535_v14, 2  ;;  %s3782_s5 = scalar_lea.hbm %s3781_s4, 8  ;;  %p3787_p9 = scmp.lt.s32.totalorder %s3781_s4, %s5390_s12 }
 0x53b   : > { %p3783_p4 = scmp.ne.s32.totalorder %s3781_s4, %s3782_s5  ;;  %p3788_p10 = scmp.lt.s32.totalorder %s3786_s23, %s3782_s5 }
 0x53c   : > { %v2537_v2 = vadd.f32 %v2536_v42, %v2535_v14  ;;  %v2638_v56 = vrot.slane %v2637_v18, 2 }
 0x53d   : > { %p3784_p7 = pnand %p3783_p4, %p3986_p5  ;;  %p3789_p11 = por %p3788_p10, %p3787_p9 }
 0x53e   : > { %v2538_v0 = vrot.slane %v2537_v2, 1  ;;  %v2639_v47 = vadd.f32 %v2638_v56, %v2637_v18 }
 0x53f   : > { %p3785_p8 = pneg %p3784_p7 }
 0x540   : > { %v2539_v13 = vadd.f32 %v2538_v0, %v2537_v2  ;;  %v2640_v57 = vrot.slane %v2639_v47, 1 }
 0x541   : > { %p3790_p12 = pnand %p3789_p11, %p3785_p8 }
 0x542   : > { %2540 = vst.msk [vmem:[%s524_s26] sm:$0xff] %vm833_vm0, %v2539_v13  ;;  %v2641_v63 = vadd.f32 %v2640_v57, %v2639_v47 }
 0x543   : > { %3793 = shalt.err (!%p3790_p12)
}
 0x544   : > { %3418 = dma.vmem_to_hbm [thread:$0]  (%p3986_p5), %s2873_s17, 128, %s2875_s20, %s2826_s0   ;;  %2642 = vst.msk [vmem:[%s531_s6] sm:$0xff] %vm833_vm0, %v2641_v63 }
 0x545   : > { %s3808_s29 = sshra.s32 %s5298_s7, 4  ;;  %s3814_s5 = scalar_lea.hbm %s5391_s13, 16  ;;  %s3809_s29 = int_to_ptr.hbm [resolvable:$true] %s3808_s29 }
 0x546   : > { %s3810_s26 = scalar_lea.hbm %s3809_s29, 8  ;;  %p3815_p2 = scmp.lt.s32.totalorder %s3809_s29, %s5391_s13 }
 0x547   : > { %p3811_p13 = scmp.ne.s32.totalorder %s3809_s29, %s3810_s26  ;;  %p3816_p3 = scmp.lt.s32.totalorder %s3814_s5, %s3810_s26 }
 0x549   : > { %p3812_p0 = pnand %p3811_p13, %p3986_p5  ;;  %p3817_p4 = por %p3816_p3, %p3815_p2 }
 0x54b   : > { %p3813_p1 = pneg %p3812_p0 }
 0x54d   : > { %p3818_p7 = pnand %p3817_p4, %p3813_p1 }
 0x54f   : > { %3821 = shalt.err (!%p3818_p7)
}
 0x550   : > { %3419 = dma.vmem_to_hbm [thread:$0]  (%p3986_p5), %s5296_s25, 128, %s5298_s7, %s2826_s0   ;;  %v2080_v55 = vld [vmem:[%s4493_s24 + $0xf0] sm:$0xff]  ;;  %v3736_v60 = vld [vmem:[%s5380_s2] ss:$0 sm:$0xff]  ;;  %v2081_v1 = vld [vmem:[%s4493_s24 + $0xf8] sm:$0xff]  ;;  %v2742_v37 = vmul.f32 %v5246_v62, %v5246_v62  ;;  %v2700_v26 = vsel %vm833_vm0, %v5246_v62, 0.0 }
 0x551   : > { %v2116_v6 = vmul.f32 %v3736_v60, %v2080_v55  ;;  %v3737_v27 = vld [vmem:[%s5381_s3] ss:$0 sm:$0xff]  ;;  %v2117_v16 = vmul.f32 %v3736_v60, %v2081_v1  ;;  %v2701_v29 = vadd.f32 %v2700_v26, %v5223_v49  ;;  %p564_p5 = scmp.lt.s32.totalorder %s3967_s22, 1 }
 0x552   : > { %v2802_v5 = vsel %vm833_vm0, %v2742_v37, 0.0 }
 0x553   : > { %v2152_v19 = vadd.f32 %v3737_v27, %v2116_v6  ;;  %v2153_v9 = vadd.f32 %v3737_v27, %v2117_v16  ;;  %v2803_v36 = vadd.f32 %v2802_v5, %v5233_v28  ;;  %s5446_s22 = smov (!%p564_p5, %s3967_s22), 1 }
 0x554   : > { %s3116_s7 = sshll.u32 %s5446_s22, 3 }
 0x555   : > { %s571_s30 = scalar_lea.vmem %s5393_s15, %s3116_s7 }
 0x55f   : > { %v2370_v35 = vpop.f32.mrf.mxu3 }
 0x560   : > { %v2371_v41 = vadd.f32 %v5240_v32, %v2370_v35 }
 0x562   : > { %v2405_v54 = vadd.f32 %v2371_v41, %v2152_v19 }
 0x564   : > { %2469 = vst.msk [vmem:[%s4525_s18 + $0xf0] sm:$0xff] %vm833_vm0, %v2405_v54  ;;  %v2743_v46 = vmul.f32 %v2405_v54, %v2405_v54  ;;  %v2702_v40 = vsel %vm833_vm0, %v2405_v54, 0.0 }
 0x565   : > { %v2703_v24 = vadd.f32 %v2702_v40, %v2701_v29 }
 0x566   : > { %v2804_v34 = vsel %vm833_vm0, %v2743_v46, 0.0 }
 0x567   : > { %v2372_v33 = vpop.f32.mrf.mxu3  ;;  %v2805_v39 = vadd.f32 %v2804_v34, %v2803_v36 }
 0x568   : > { %v2373_v7 = vadd.f32 %v5240_v32, %v2372_v33 }
 0x56a   : > { %v2406_v31 = vadd.f32 %v2373_v7, %v2153_v9 }
 0x56c   : > { %2470 = vst.msk [vmem:[%s4525_s18 + $0xf8] sm:$0xff] %vm833_vm0, %v2406_v31  ;;  %v2704_v4 = vsel %vm833_vm0, %v2406_v31, 0.0  ;;  %v2744_v52 = vmul.f32 %v2406_v31, %v2406_v31  ;;  %s567_s18 = scalar_lea.vmem %s5392_s14, %s3116_s7 }
 0x56d   : > { %v2705_v30 = vadd.f32 %v2704_v4, %v2703_v24 }
 0x56e   : > { %v2806_v62 = vsel %vm833_vm0, %v2744_v52, 0.0 }
 0x56f   : > { %v2706_v25 = vrot.slane %v2705_v30, 4  ;;  %v2807_v32 = vadd.f32 %v2806_v62, %v2805_v39 }
 0x571   : > { %v2707_v49 = vadd.f32 %v2706_v25, %v2705_v30  ;;  %v2808_v61 = vrot.slane %v2807_v32, 4 }
 0x573   : > { %v2708_v8 = vrot.slane %v2707_v49, 2  ;;  %v2809_v43 = vadd.f32 %v2808_v61, %v2807_v32 }
 0x575   : > { %v2709_v28 = vadd.f32 %v2708_v8, %v2707_v49  ;;  %v2810_v21 = vrot.slane %v2809_v43, 2 }
 0x577   : > { %v2710_v38 = vrot.slane %v2709_v28, 1  ;;  %v2811_v48 = vadd.f32 %v2810_v21, %v2809_v43 }
 0x579   : > { %v2711_v12 = vadd.f32 %v2710_v38, %v2709_v28  ;;  %v2812_v22 = vrot.slane %v2811_v48, 1 }
 0x57b   : > { %2712 = vst.msk [vmem:[%s567_s18] sm:$0xff] %vm833_vm0, %v2711_v12  ;;  %v2813_v10 = vadd.f32 %v2812_v22, %v2811_v48 }
 0x57d   : > { %2814 = vst.msk [vmem:[%s571_s30] sm:$0xff] %vm833_vm0, %v2813_v10 }
 0x57e PF: > { %s5435_s22 = sld [smem:[#allocation9_spill]]  ;;  %p3433_p8 = scmp.ge.s32.totalorder %s3860_s21, 2 }
 0x580   : > { %p3424_p9 = pnand %p3433_p8, %p3990_p6 }
 0x582   : > { %p3425_p10 = pneg %p3424_p9 }
 0x584   : > { %s2906_s26 = sand.u32 1, %s5435_s22  }
 0x585   : > { %s2907_s1 = scalar_lea.sflag [#allocation3], %s2906_s26 }
 0x586   : > { %3839 = dma.done.wait (%p3425_p10), %s2907_s1, 4096  }
 0x587   : > { %3841 = vsyncadd (%p3425_p10), %s2907_s1, 4294963200  ;;  %s5437_s4 = sadd.s32 4294967294, %s3860_s21  }
 0x588   : > { %s2924_s5 = sand.u32 1, %s5437_s4  }
 0x589   : > { %s2925_s16 = scalar_lea.sflag [#allocation5], %s2924_s5 }
 0x58a   : > { %3843 = dma.done.wait (%p3425_p10), %s2925_s16, 256  }
 0x58b   : > { %3845 = vsyncadd (%p3425_p10), %s2925_s16, 4294967040  ;;  %s5438_s21 = sld [smem:[#allocation11_spill]]  ;;  %s5441_s18 = smov %s3852_s19 }
 0x58c   : > { %s5439_s23 = sld [smem:[#allocation10_spill]] }
 0x58d   : > { %s5440_s20 = sld [smem:[#allocation12_spill]] }
 0x591   : > { %p29_p11 = scmp.ge.s32.totalorder %s5438_s21, 4  }
 0x592   : > { %s5442_s19 = smov %s5439_s23 }
 0x593   :  { %31 = sbr.rel (!%p29_p11) target bundleno = 12 (0xc), region = 166 }
 0x598   :  { %2955 = vsyncpa [#allocation3], 1 }
 0x599   :  { %2957 = vsyncpa [#allocation3 + $0x1], 1 }
 0x59a   :  { %2958 = vsyncpa [#allocation5], 1 }
 0x59b   :  { %2960 = vsyncpa [#allocation5 + $0x1], 1 }

</bundles_post_ra>
